<compile_context>
chip_gen: v6e
topology: v6e:2x2x1
jax: 0.10.0
libtpu: 0.0.40
codegen_flags: <defaults>
</compile_context>

<pallas_src>
import functools

import numpy as np
import jax
import jax.numpy as jnp
from jax.experimental import pallas as pl
from jax.experimental.pallas import tpu as pltpu

EPS = 1e-5
CP = 128   # lane-padded channel width; real channels live in lanes [0, Cout)


# ---------------------------------------------------------------------------
# Fused Pallas kernel
# ---------------------------------------------------------------------------
def _fused_kernel(xim_ref, w1_ref, w2_ref, w3_ref,
                  bm1_ref, bm2_ref, bm3_ref,
                  w5_ref, b5_ref, w6_ref, b6_ref,
                  o_ref,
                  f1_ref, f23_ref, p2_ref, p3_ref, *, geom):
    (N, Cout,
     Hp1, Wp1, Hp2, Wp2, Hp3, Wp3,
     H1, W1, H2, W2, H3, W3,
     rv1, rv23, HWf) = geom

    def conv_taps(src_ref, w3d_ref, Wp, rv, cin):
        # 3x3 conv over the flat padded [rows, CP] layout: 9 plane-indexed dots,
        # f32-accumulated (single-accumulator pattern; maps to MRB accumulation on v7x).
        acc = None
        for kh in range(3):
            for kw in range(3):
                off = kh * Wp + kw                                  # static row offset
                lhs = src_ref[off:off + rv, 0:cin]                  # [rv, cin]
                term = jnp.dot(lhs, w3d_ref[kh * 3 + kw],           # [cin, CP]
                               preferred_element_type=jnp.float32)
                acc = term if acc is None else acc + term
        return acc

    def scatter_rows(f_ref, dst_ref, bm_ref, *, Wp_src, img_src, Hout, Wout,
                     stride, Wn, img_dst, pad_off, relu):
        # Select the stride-s conv-output rows out of the "all corners" result and
        # write them (+ the positional BN-fold bias map) into the destination layout.
        # Replaces the old dense 0/1 selection matmuls with strided row copies.
        for n in range(N):
            for ho in range(Hout):
                src_base = n * img_src + stride * ho * Wp_src       # static
                loc = (ho + pad_off) * Wn + pad_off                 # within-image dst row
                if stride == 1:
                    src = f_ref[pl.ds(src_base, Wout), :]
                else:
                    src = f_ref[pl.ds(src_base, Wout, stride=stride), :]
                val = src + bm_ref[pl.ds(loc, Wout), :]
                if relu:
                    val = jnp.maximum(val, 0.0)
                dst_ref[pl.ds(n * img_dst + loc, Wout), :] = val

    # ---- conv1 (BN1 folded): one im2col matmul, K = 9*Cin ----
    f1_ref[...] = jnp.dot(xim_ref[...], w1_ref[...],
                          preferred_element_type=jnp.float32)       # [rv1, CP]
    p2_ref[...] = jnp.zeros_like(p2_ref)                            # zero padding ring
    scatter_rows(f1_ref, p2_ref, bm1_ref, Wp_src=Wp1, img_src=Hp1 * Wp1,
                 Hout=H1, Wout=W1, stride=2, Wn=Wp2, img_dst=Hp2 * Wp2,
                 pad_off=1, relu=True)

    # ---- conv2 (BN2 folded) ----
    f23_ref[...] = conv_taps(p2_ref, w2_ref, Wp2, rv23, Cout)
    p3_ref[...] = jnp.zeros_like(p3_ref)
    scatter_rows(f23_ref, p3_ref, bm2_ref, Wp_src=Wp2, img_src=Hp2 * Wp2,
                 Hout=H2, Wout=W2, stride=1, Wn=Wp3, img_dst=Hp3 * Wp3,
                 pad_off=1, relu=True)

    # ---- conv3 (BN3 folded, no relu): x_left written straight into the output ----
    f23_ref[...] = conv_taps(p3_ref, w3_ref, Wp3, rv23, Cout)
    scatter_rows(f23_ref, o_ref, bm3_ref, Wp_src=Wp3, img_src=Hp3 * Wp3,
                 Hout=H3, Wout=W3, stride=2, Wn=W3, img_dst=HWf,
                 pad_off=0, relu=False)

    # ---- SE gate: global avg pool -> linear5+relu -> linear6+sigmoid -> scale ----
    for n in range(N):
        rows = pl.ds(n * HWf, HWf)
        x_n = o_ref[rows, :]                                         # [HWf, CP]
        pooled = jnp.mean(x_n, axis=0, keepdims=True)                # [1, CP]
        h = jnp.maximum(
            jnp.dot(pooled[:, 0:Cout], w5_ref[...],
                    preferred_element_type=jnp.float32) + b5_ref[...], 0.0)
        gate = jax.nn.sigmoid(
            jnp.dot(h[:, 0:Cout], w6_ref[...],
                    preferred_element_type=jnp.float32) + b6_ref[...])   # [1, CP]
        # out = x_left * (gate + 1); padded lanes of x_n are 0, so they stay 0.
        o_ref[rows, :] = x_n * (gate + 1.0)


# ---------------------------------------------------------------------------
# One-time parameter preprocessing (hoisted out of the per-call path)
# ---------------------------------------------------------------------------
def _fold_bn_conv(w, b, bn, hin, win, stride, spatial_pad):
    # Exact inference-BN fold: per-channel scale into the conv weights; per-channel
    # shift into a *positional* bias map (conv of the shift over the un-padded extent,
    # exact at zero-padded borders), plus the conv bias.
    gamma, beta, mean, var = bn
    a = gamma / jnp.sqrt(var + EPS)
    c = beta - mean * a
    cout, cin = w.shape[0], w.shape[1]

    wmat = jnp.transpose(w * a[None, :, None, None], (2, 3, 1, 0)).reshape(9 * cin, cout)
    wmat = jnp.pad(wmat, ((0, 0), (0, CP - cout)))                   # [(kh,kw,cin), CP]

    c_img = jnp.broadcast_to(c[None, :, None, None], (1, cin, hin, win))
    bm = jax.lax.conv_general_dilated(
        c_img, w, (stride, stride), ((1, 1), (1, 1)),
        dimension_numbers=("NCHW", "OIHW", "NCHW"))[0] + b[:, None, None]
    bm = jnp.transpose(bm, (1, 2, 0))                                # [Hout, Wout, cout]
    if spatial_pad:
        bm = jnp.pad(bm, ((1, 1), (1, 1), (0, 0)))                   # zeros at next pad ring
    bm = jnp.pad(bm.reshape(-1, cout), ((0, 0), (0, CP - cout)))     # per-image [rows, CP]
    return wmat, bm


def prepare_constants(params, in_channels, out_channels, input_shape):
    H, W = input_shape
    H1, W1 = (H - 1) // 2 + 1, (W - 1) // 2 + 1
    H2, W2 = H1, W1

    w1, bm1 = _fold_bn_conv(params["conv1_w"], params["conv1_b"], params["bn1"], H, W, 2, True)
    w2, bm2 = _fold_bn_conv(params["conv2_w"], params["conv2_b"], params["bn2"], H1, W1, 1, True)
    w3, bm3 = _fold_bn_conv(params["conv3_w"], params["conv3_b"], params["bn3"], H2, W2, 2, False)
    # conv2/conv3 weights as [9, Cout, CP]: clean per-tap plane indexing in the kernel.
    w2 = w2.reshape(9, out_channels, CP)
    w3 = w3.reshape(9, out_channels, CP)

    pad_c = ((0, 0), (0, CP - out_channels))
    w5 = jnp.pad(params["w5"].T, pad_c)
    b5 = jnp.pad(params["b5"][None, :], pad_c)
    w6 = jnp.pad(params["w6"].T, pad_c)
    b6 = jnp.pad(params["b6"][None, :], pad_c)
    return (w1, w2, w3, bm1, bm2, bm3, w5, b5, w6, b6)


# ---------------------------------------------------------------------------
# Forward builder (one pallas_call, no grid at these shapes)
# ---------------------------------------------------------------------------
def build_forward(batch, in_channels, out_channels, input_shape):
    N, Cin, Cout = batch, in_channels, out_channels
    H, W = input_shape
    H1, W1 = (H - 1) // 2 + 1, (W - 1) // 2 + 1
    H2, W2 = H1, W1
    H3, W3 = (H2 - 1) // 2 + 1, (W2 - 1) // 2 + 1
    Hp1, Wp1 = H + 2, W + 2
    Hp2, Wp2 = H1 + 2, W1 + 2
    Hp3, Wp3 = H2 + 2, W2 + 2
    rv1 = N * Hp1 * Wp1 - 2 * Wp1 - 2        # "all corners" row counts
    rv23 = N * Hp2 * Wp2 - 2 * Wp2 - 2
    HWf = H3 * W3

    geom = (N, Cout, Hp1, Wp1, Hp2, Wp2, Hp3, Wp3,
            H1, W1, H2, W2, H3, W3, rv1, rv23, HWf)
    kernel = functools.partial(_fused_kernel, geom=geom)
    flops = 2 * rv1 * (9 * Cin) * CP + 2 * (2 * rv23 * (9 * Cout) * CP)
    vmem = pl.BlockSpec(memory_space=pltpu.MemorySpace.VMEM)

    @jax.jit
    def forward(x_nchw, consts):
        # channels-minor, zero-padded, flattened input; conv1's im2col slab is built
        # here (it is an input, so XLA fuses this into one copy).
        x_flat = jnp.pad(jnp.transpose(x_nchw, (0, 2, 3, 1)),
                         ((0, 0), (1, 1), (1, 1), (0, 0))).reshape(N * Hp1 * Wp1, Cin)
        x_im = jnp.concatenate(
            [x_flat[kh * Wp1 + kw: kh * Wp1 + kw + rv1]
             for kh in range(3) for kw in range(3)], axis=1)          # [rv1, 9*Cin]

        args = (x_im,) + tuple(consts)
        bytes_accessed = sum(int(np.prod(a.shape)) * 4 for a in args) + N * HWf * CP * 4
        out_flat = pl.pallas_call(
            kernel,
            out_shape=jax.ShapeDtypeStruct((N * HWf, CP), jnp.float32),
            in_specs=[vmem] * len(args),
            out_specs=vmem,
            scratch_shapes=[pltpu.VMEM((rv1, CP), jnp.float32),          # f1 (all corners)
                            pltpu.VMEM((rv23, CP), jnp.float32),         # f2 / f3 (reused)
                            pltpu.VMEM((N * Hp2 * Wp2, CP), jnp.float32),  # padded conv2 input
                            pltpu.VMEM((N * Hp3 * Wp3, CP), jnp.float32)], # padded conv3 input
            cost_estimate=pl.CostEstimate(flops=flops,
                                          transcendentals=N * Cout,
                                          bytes_accessed=bytes_accessed),
        )(*args)
        # lane-padded flattened NHWC -> NCHW
        return jnp.transpose(out_flat[:, :Cout].reshape(N, H3, W3, Cout), (0, 3, 1, 2))

    return forward


# ---------------------------------------------------------------------------
# Pure-JAX reference (correctness check)
# ---------------------------------------------------------------------------
def reference_forward(x, p):
    def bn(x, gamma, beta, mean, var):
        c = lambda v: v[None, :, None, None]
        return (x - c(mean)) / jnp.sqrt(c(var) + EPS) * c(gamma) + c(beta)

    def conv(x, w, b, stride):
        y = jax.lax.conv_general_dilated(
            x, w, (stride, stride), ((1, 1), (1, 1)),
            dimension_numbers=("NCHW", "OIHW", "NCHW"))
        return y + b[None, :, None, None]

    x = jax.nn.relu(conv(bn(x, *p["bn1"]), p["conv1_w"], p["conv1_b"], 2))
    x = jax.nn.relu(conv(bn(x, *p["bn2"]), p["conv2_w"], p["conv2_b"], 1))
    x = conv(bn(x, *p["bn3"]), p["conv3_w"], p["conv3_b"], 2)
    x_left = x
    pooled = jnp.mean(x, axis=(2, 3))
    h = jax.nn.relu(pooled @ p["w5"].T + p["b5"])
    g = jax.nn.sigmoid(h @ p["w6"].T + p["b6"])
    return x_left * (g[:, :, None, None] + 1.0)


# ---------------------------------------------------------------------------
# Deterministic parameter init (synthetic; shapes from the module __init__)
# ---------------------------------------------------------------------------
def init_params(key, in_channels, out_channels):
    ks = jax.random.split(key, 20)
    nrm = lambda k, s, scale=0.1: scale * jax.random.normal(k, s, dtype=jnp.float32)
    uni = lambda k, s: jax.random.uniform(k, s, dtype=jnp.float32, minval=0.5, maxval=1.5)
    return {
        "bn1": (1.0 + nrm(ks[0], (in_channels,)), nrm(ks[1], (in_channels,)),
                nrm(ks[2], (in_channels,)), uni(ks[3], (in_channels,))),
        "conv1_w": nrm(ks[4], (out_channels, in_channels, 3, 3), 0.2),
        "conv1_b": nrm(ks[5], (out_channels,)),
        "bn2": (1.0 + nrm(ks[6], (out_channels,)), nrm(ks[7], (out_channels,)),
                nrm(ks[8], (out_channels,)), uni(ks[9], (out_channels,))),
        "conv2_w": nrm(ks[10], (out_channels, out_channels, 3, 3), 0.2),
        "conv2_b": nrm(ks[11], (out_channels,)),
        "bn3": (1.0 + nrm(ks[12], (out_channels,)), nrm(ks[13], (out_channels,)),
                nrm(ks[14], (out_channels,)), uni(ks[15], (out_channels,))),
        "conv3_w": nrm(ks[16], (out_channels, out_channels, 3, 3), 0.2),
        "conv3_b": nrm(ks[17], (out_channels,)),
        "w5": nrm(ks[18], (out_channels, out_channels), 0.3),
        "b5": nrm(ks[19], (out_channels,)),
        "w6": nrm(ks[18], (out_channels, out_channels), 0.25),
        "b6": nrm(ks[19], (out_channels,), 0.05),
    }


if __name__ == "__main__":
    in_channels, out_channels = 4, 8
    N, H, W = 2, 16, 16                                   # input_shape = (16, 16)

    key = jax.random.PRNGKey(0)
    k_x, k_p = jax.random.split(key)
    x = jax.random.normal(k_x, (N, in_channels, H, W), dtype=jnp.float32)
    params = init_params(k_p, in_channels, out_channels)

    # one-time prep (BN fold, bias maps, lane-padded weights) -- NOT in the call path
    consts = prepare_constants(params, in_channels, out_channels, (H, W))
    forward = build_forward(N, in_channels, out_channels, (H, W))

    out = jax.block_until_ready(forward(x, consts))
    ref = jax.block_until_ready(reference_forward(x, params))

    assert out.shape == (N, out_channels, 4, 4), out.shape
    np.testing.assert_allclose(np.asarray(out), np.asarray(ref), rtol=1e-3, atol=1e-3)
    print("KERNEL_OK")
</pallas_src>

<mosaic_0001>
module attributes {stable_mosaic.version = 11 : i64} {
  func.func @_fused_kernel(%arg0: memref<610x36xf32, #tpu.memory_space<vmem>>, %arg1: memref<36x128xf32, #tpu.memory_space<vmem>>, %arg2: memref<9x8x128xf32, #tpu.memory_space<vmem>>, %arg3: memref<9x8x128xf32, #tpu.memory_space<vmem>>, %arg4: memref<100x128xf32, #tpu.memory_space<vmem>>, %arg5: memref<100x128xf32, #tpu.memory_space<vmem>>, %arg6: memref<16x128xf32, #tpu.memory_space<vmem>>, %arg7: memref<8x128xf32, #tpu.memory_space<vmem>>, %arg8: memref<1x128xf32, #tpu.memory_space<vmem>>, %arg9: memref<8x128xf32, #tpu.memory_space<vmem>>, %arg10: memref<1x128xf32, #tpu.memory_space<vmem>>, %arg11: memref<32x128xf32, #tpu.memory_space<vmem>>, %arg12: memref<610x128xf32, #tpu.memory_space<vmem>>, %arg13: memref<178x128xf32, #tpu.memory_space<vmem>>, %arg14: memref<200x128xf32, #tpu.memory_space<vmem>>, %arg15: memref<200x128xf32, #tpu.memory_space<vmem>>) attributes {dimension_semantics = [], scalar_prefetch = 0 : i64, scratch_operands = 4 : i64, tpu.core_type = #tpu.core_type<tc>} {
    %c0 = arith.constant 0 : index
    %c0_0 = arith.constant 0 : index
    %0 = vector.load %arg0[%c0, %c0_0] : memref<610x36xf32, #tpu.memory_space<vmem>>, vector<610x36xf32>
    %c0_1 = arith.constant 0 : index
    %c0_2 = arith.constant 0 : index
    %1 = vector.load %arg1[%c0_1, %c0_2] : memref<36x128xf32, #tpu.memory_space<vmem>>, vector<36x128xf32>
    %cst = arith.constant dense<0.000000e+00> : vector<610x128xf32>
    %2 = tpu.matmul %0, %1, %cst {dimension_numbers = #tpu.dot_dimension_numbers<[1], [0], [0], [1], [0, 0, 1, 1], [], []>} : vector<610x36xf32>, vector<36x128xf32>, vector<610x128xf32> -> vector<610x128xf32>
    %c0_3 = arith.constant 0 : index
    %c0_4 = arith.constant 0 : index
    %3 = vector.load %arg12[%c0_3, %c0_4] : memref<610x128xf32, #tpu.memory_space<vmem>>, vector<610x128xf32>
    tpu.vector_store %arg12[%c0_3, %c0_4], %2 {strides = array<i32>} : memref<610x128xf32, #tpu.memory_space<vmem>>, vector<610x128xf32>,
    %cst_5 = arith.constant 0.000000e+00 : f32
    %4 = vector.broadcast %cst_5 : f32 to vector<200x128xf32>
    %c0_6 = arith.constant 0 : index
    %c0_7 = arith.constant 0 : index
    %5 = vector.load %arg14[%c0_6, %c0_7] : memref<200x128xf32, #tpu.memory_space<vmem>>, vector<200x128xf32>
    tpu.vector_store %arg14[%c0_6, %c0_7], %4 {strides = array<i32>} : memref<200x128xf32, #tpu.memory_space<vmem>>, vector<200x128xf32>,
    %c0_8 = arith.constant 0 : index
    %c0_9 = arith.constant 0 : index
    %6 = tpu.strided_load %arg12[%c0_8, %c0_9] {strides = array<i32: 2, 1>} : memref<610x128xf32, #tpu.memory_space<vmem>>, vector<8x128xf32>
    %c11 = arith.constant 11 : index
    %c0_10 = arith.constant 0 : index
    %7 = vector.load %arg4[%c11, %c0_10] : memref<100x128xf32, #tpu.memory_space<vmem>>, vector<8x128xf32>
    %8 = arith.addf %6, %7 : vector<8x128xf32>
    %cst_11 = arith.constant 0.000000e+00 : f32
    %9 = vector.broadcast %cst_11 : f32 to vector<8x128xf32>
    %10 = arith.maximumf %8, %9 : vector<8x128xf32>
    %c11_12 = arith.constant 11 : index
    %c0_13 = arith.constant 0 : index
    %11 = vector.load %arg14[%c11_12, %c0_13] : memref<200x128xf32, #tpu.memory_space<vmem>>, vector<8x128xf32>
    tpu.vector_store %arg14[%c11_12, %c0_13], %10 {strides = array<i32>} : memref<200x128xf32, #tpu.memory_space<vmem>>, vector<8x128xf32>,
    %c36 = arith.constant 36 : index
    %c0_14 = arith.constant 0 : index
    %12 = tpu.strided_load %arg12[%c36, %c0_14] {strides = array<i32: 2, 1>} : memref<610x128xf32, #tpu.memory_space<vmem>>, vector<8x128xf32>
    %c21 = arith.constant 21 : index
    %c0_15 = arith.constant 0 : index
    %13 = vector.load %arg4[%c21, %c0_15] : memref<100x128xf32, #tpu.memory_space<vmem>>, vector<8x128xf32>
    %14 = arith.addf %12, %13 : vector<8x128xf32>
    %cst_16 = arith.constant 0.000000e+00 : f32
    %15 = vector.broadcast %cst_16 : f32 to vector<8x128xf32>
    %16 = arith.maximumf %14, %15 : vector<8x128xf32>
    %c21_17 = arith.constant 21 : index
    %c0_18 = arith.constant 0 : index
    %17 = vector.load %arg14[%c21_17, %c0_18] : memref<200x128xf32, #tpu.memory_space<vmem>>, vector<8x128xf32>
    tpu.vector_store %arg14[%c21_17, %c0_18], %16 {strides = array<i32>} : memref<200x128xf32, #tpu.memory_space<vmem>>, vector<8x128xf32>,
    %c72 = arith.constant 72 : index
    %c0_19 = arith.constant 0 : index
    %18 = tpu.strided_load %arg12[%c72, %c0_19] {strides = array<i32: 2, 1>} : memref<610x128xf32, #tpu.memory_space<vmem>>, vector<8x128xf32>
    %c31 = arith.constant 31 : index
    %c0_20 = arith.constant 0 : index
    %19 = vector.load %arg4[%c31, %c0_20] : memref<100x128xf32, #tpu.memory_space<vmem>>, vector<8x128xf32>
    %20 = arith.addf %18, %19 : vector<8x128xf32>
    %cst_21 = arith.constant 0.000000e+00 : f32
    %21 = vector.broadcast %cst_21 : f32 to vector<8x128xf32>
    %22 = arith.maximumf %20, %21 : vector<8x128xf32>
    %c31_22 = arith.constant 31 : index
    %c0_23 = arith.constant 0 : index
    %23 = vector.load %arg14[%c31_22, %c0_23] : memref<200x128xf32, #tpu.memory_space<vmem>>, vector<8x128xf32>
    tpu.vector_store %arg14[%c31_22, %c0_23], %22 {strides = array<i32>} : memref<200x128xf32, #tpu.memory_space<vmem>>, vector<8x128xf32>,
    %c108 = arith.constant 108 : index
    %c0_24 = arith.constant 0 : index
    %24 = tpu.strided_load %arg12[%c108, %c0_24] {strides = array<i32: 2, 1>} : memref<610x128xf32, #tpu.memory_space<vmem>>, vector<8x128xf32>
    %c41 = arith.constant 41 : index
    %c0_25 = arith.constant 0 : index
    %25 = vector.load %arg4[%c41, %c0_25] : memref<100x128xf32, #tpu.memory_space<vmem>>, vector<8x128xf32>
    %26 = arith.addf %24, %25 : vector<8x128xf32>
    %cst_26 = arith.constant 0.000000e+00 : f32
    %27 = vector.broadcast %cst_26 : f32 to vector<8x128xf32>
    %28 = arith.maximumf %26, %27 : vector<8x128xf32>
    %c41_27 = arith.constant 41 : index
    %c0_28 = arith.constant 0 : index
    %29 = vector.load %arg14[%c41_27, %c0_28] : memref<200x128xf32, #tpu.memory_space<vmem>>, vector<8x128xf32>
    tpu.vector_store %arg14[%c41_27, %c0_28], %28 {strides = array<i32>} : memref<200x128xf32, #tpu.memory_space<vmem>>, vector<8x128xf32>,
    %c144 = arith.constant 144 : index
    %c0_29 = arith.constant 0 : index
    %30 = tpu.strided_load %arg12[%c144, %c0_29] {strides = array<i32: 2, 1>} : memref<610x128xf32, #tpu.memory_space<vmem>>, vector<8x128xf32>
    %c51 = arith.constant 51 : index
    %c0_30 = arith.constant 0 : index
    %31 = vector.load %arg4[%c51, %c0_30] : memref<100x128xf32, #tpu.memory_space<vmem>>, vector<8x128xf32>
    %32 = arith.addf %30, %31 : vector<8x128xf32>
    %cst_31 = arith.constant 0.000000e+00 : f32
    %33 = vector.broadcast %cst_31 : f32 to vector<8x128xf32>
    %34 = arith.maximumf %32, %33 : vector<8x128xf32>
    %c51_32 = arith.constant 51 : index
    %c0_33 = arith.constant 0 : index
    %35 = vector.load %arg14[%c51_32, %c0_33] : memref<200x128xf32, #tpu.memory_space<vmem>>, vector<8x128xf32>
    tpu.vector_store %arg14[%c51_32, %c0_33], %34 {strides = array<i32>} : memref<200x128xf32, #tpu.memory_space<vmem>>, vector<8x128xf32>,
    %c180 = arith.constant 180 : index
    %c0_34 = arith.constant 0 : index
    %36 = tpu.strided_load %arg12[%c180, %c0_34] {strides = array<i32: 2, 1>} : memref<610x128xf32, #tpu.memory_space<vmem>>, vector<8x128xf32>
    %c61 = arith.constant 61 : index
    %c0_35 = arith.constant 0 : index
    %37 = vector.load %arg4[%c61, %c0_35] : memref<100x128xf32, #tpu.memory_space<vmem>>, vector<8x128xf32>
    %38 = arith.addf %36, %37 : vector<8x128xf32>
    %cst_36 = arith.constant 0.000000e+00 : f32
    %39 = vector.broadcast %cst_36 : f32 to vector<8x128xf32>
    %40 = arith.maximumf %38, %39 : vector<8x128xf32>
    %c61_37 = arith.constant 61 : index
    %c0_38 = arith.constant 0 : index
    %41 = vector.load %arg14[%c61_37, %c0_38] : memref<200x128xf32, #tpu.memory_space<vmem>>, vector<8x128xf32>
    tpu.vector_store %arg14[%c61_37, %c0_38], %40 {strides = array<i32>} : memref<200x128xf32, #tpu.memory_space<vmem>>, vector<8x128xf32>,
    %c216 = arith.constant 216 : index
    %c0_39 = arith.constant 0 : index
    %42 = tpu.strided_load %arg12[%c216, %c0_39] {strides = array<i32: 2, 1>} : memref<610x128xf32, #tpu.memory_space<vmem>>, vector<8x128xf32>
    %c71 = arith.constant 71 : index
    %c0_40 = arith.constant 0 : index
    %43 = vector.load %arg4[%c71, %c0_40] : memref<100x128xf32, #tpu.memory_space<vmem>>, vector<8x128xf32>
    %44 = arith.addf %42, %43 : vector<8x128xf32>
    %cst_41 = arith.constant 0.000000e+00 : f32
    %45 = vector.broadcast %cst_41 : f32 to vector<8x128xf32>
    %46 = arith.maximumf %44, %45 : vector<8x128xf32>
    %c71_42 = arith.constant 71 : index
    %c0_43 = arith.constant 0 : index
    %47 = vector.load %arg14[%c71_42, %c0_43] : memref<200x128xf32, #tpu.memory_space<vmem>>, vector<8x128xf32>
    tpu.vector_store %arg14[%c71_42, %c0_43], %46 {strides = array<i32>} : memref<200x128xf32, #tpu.memory_space<vmem>>, vector<8x128xf32>,
    %c252 = arith.constant 252 : index
    %c0_44 = arith.constant 0 : index
    %48 = tpu.strided_load %arg12[%c252, %c0_44] {strides = array<i32: 2, 1>} : memref<610x128xf32, #tpu.memory_space<vmem>>, vector<8x128xf32>
    %c81 = arith.constant 81 : index
    %c0_45 = arith.constant 0 : index
    %49 = vector.load %arg4[%c81, %c0_45] : memref<100x128xf32, #tpu.memory_space<vmem>>, vector<8x128xf32>
    %50 = arith.addf %48, %49 : vector<8x128xf32>
    %cst_46 = arith.constant 0.000000e+00 : f32
    %51 = vector.broadcast %cst_46 : f32 to vector<8x128xf32>
    %52 = arith.maximumf %50, %51 : vector<8x128xf32>
    %c81_47 = arith.constant 81 : index
    %c0_48 = arith.constant 0 : index
    %53 = vector.load %arg14[%c81_47, %c0_48] : memref<200x128xf32, #tpu.memory_space<vmem>>, vector<8x128xf32>
    tpu.vector_store %arg14[%c81_47, %c0_48], %52 {strides = array<i32>} : memref<200x128xf32, #tpu.memory_space<vmem>>, vector<8x128xf32>,
    %c324 = arith.constant 324 : index
    %c0_49 = arith.constant 0 : index
    %54 = tpu.strided_load %arg12[%c324, %c0_49] {strides = array<i32: 2, 1>} : memref<610x128xf32, #tpu.memory_space<vmem>>, vector<8x128xf32>
    %c11_50 = arith.constant 11 : index
    %c0_51 = arith.constant 0 : index
    %55 = vector.load %arg4[%c11_50, %c0_51] : memref<100x128xf32, #tpu.memory_space<vmem>>, vector<8x128xf32>
    %56 = arith.addf %54, %55 : vector<8x128xf32>
    %cst_52 = arith.constant 0.000000e+00 : f32
    %57 = vector.broadcast %cst_52 : f32 to vector<8x128xf32>
    %58 = arith.maximumf %56, %57 : vector<8x128xf32>
    %c111 = arith.constant 111 : index
    %c0_53 = arith.constant 0 : index
    %59 = vector.load %arg14[%c111, %c0_53] : memref<200x128xf32, #tpu.memory_space<vmem>>, vector<8x128xf32>
    tpu.vector_store %arg14[%c111, %c0_53], %58 {strides = array<i32>} : memref<200x128xf32, #tpu.memory_space<vmem>>, vector<8x128xf32>,
    %c360 = arith.constant 360 : index
    %c0_54 = arith.constant 0 : index
    %60 = tpu.strided_load %arg12[%c360, %c0_54] {strides = array<i32: 2, 1>} : memref<610x128xf32, #tpu.memory_space<vmem>>, vector<8x128xf32>
    %c21_55 = arith.constant 21 : index
    %c0_56 = arith.constant 0 : index
    %61 = vector.load %arg4[%c21_55, %c0_56] : memref<100x128xf32, #tpu.memory_space<vmem>>, vector<8x128xf32>
    %62 = arith.addf %60, %61 : vector<8x128xf32>
    %cst_57 = arith.constant 0.000000e+00 : f32
    %63 = vector.broadcast %cst_57 : f32 to vector<8x128xf32>
    %64 = arith.maximumf %62, %63 : vector<8x128xf32>
    %c121 = arith.constant 121 : index
    %c0_58 = arith.constant 0 : index
    %65 = vector.load %arg14[%c121, %c0_58] : memref<200x128xf32, #tpu.memory_space<vmem>>, vector<8x128xf32>
    tpu.vector_store %arg14[%c121, %c0_58], %64 {strides = array<i32>} : memref<200x128xf32, #tpu.memory_space<vmem>>, vector<8x128xf32>,
    %c396 = arith.constant 396 : index
    %c0_59 = arith.constant 0 : index
    %66 = tpu.strided_load %arg12[%c396, %c0_59] {strides = array<i32: 2, 1>} : memref<610x128xf32, #tpu.memory_space<vmem>>, vector<8x128xf32>
    %c31_60 = arith.constant 31 : index
    %c0_61 = arith.constant 0 : index
    %67 = vector.load %arg4[%c31_60, %c0_61] : memref<100x128xf32, #tpu.memory_space<vmem>>, vector<8x128xf32>
    %68 = arith.addf %66, %67 : vector<8x128xf32>
    %cst_62 = arith.constant 0.000000e+00 : f32
    %69 = vector.broadcast %cst_62 : f32 to vector<8x128xf32>
    %70 = arith.maximumf %68, %69 : vector<8x128xf32>
    %c131 = arith.constant 131 : index
    %c0_63 = arith.constant 0 : index
    %71 = vector.load %arg14[%c131, %c0_63] : memref<200x128xf32, #tpu.memory_space<vmem>>, vector<8x128xf32>
    tpu.vector_store %arg14[%c131, %c0_63], %70 {strides = array<i32>} : memref<200x128xf32, #tpu.memory_space<vmem>>, vector<8x128xf32>,
    %c432 = arith.constant 432 : index
    %c0_64 = arith.constant 0 : index
    %72 = tpu.strided_load %arg12[%c432, %c0_64] {strides = array<i32: 2, 1>} : memref<610x128xf32, #tpu.memory_space<vmem>>, vector<8x128xf32>
    %c41_65 = arith.constant 41 : index
    %c0_66 = arith.constant 0 : index
    %73 = vector.load %arg4[%c41_65, %c0_66] : memref<100x128xf32, #tpu.memory_space<vmem>>, vector<8x128xf32>
    %74 = arith.addf %72, %73 : vector<8x128xf32>
    %cst_67 = arith.constant 0.000000e+00 : f32
    %75 = vector.broadcast %cst_67 : f32 to vector<8x128xf32>
    %76 = arith.maximumf %74, %75 : vector<8x128xf32>
    %c141 = arith.constant 141 : index
    %c0_68 = arith.constant 0 : index
    %77 = vector.load %arg14[%c141, %c0_68] : memref<200x128xf32, #tpu.memory_space<vmem>>, vector<8x128xf32>
    tpu.vector_store %arg14[%c141, %c0_68], %76 {strides = array<i32>} : memref<200x128xf32, #tpu.memory_space<vmem>>, vector<8x128xf32>,
    %c468 = arith.constant 468 : index
    %c0_69 = arith.constant 0 : index
    %78 = tpu.strided_load %arg12[%c468, %c0_69] {strides = array<i32: 2, 1>} : memref<610x128xf32, #tpu.memory_space<vmem>>, vector<8x128xf32>
    %c51_70 = arith.constant 51 : index
    %c0_71 = arith.constant 0 : index
    %79 = vector.load %arg4[%c51_70, %c0_71] : memref<100x128xf32, #tpu.memory_space<vmem>>, vector<8x128xf32>
    %80 = arith.addf %78, %79 : vector<8x128xf32>
    %cst_72 = arith.constant 0.000000e+00 : f32
    %81 = vector.broadcast %cst_72 : f32 to vector<8x128xf32>
    %82 = arith.maximumf %80, %81 : vector<8x128xf32>
    %c151 = arith.constant 151 : index
    %c0_73 = arith.constant 0 : index
    %83 = vector.load %arg14[%c151, %c0_73] : memref<200x128xf32, #tpu.memory_space<vmem>>, vector<8x128xf32>
    tpu.vector_store %arg14[%c151, %c0_73], %82 {strides = array<i32>} : memref<200x128xf32, #tpu.memory_space<vmem>>, vector<8x128xf32>,
    %c504 = arith.constant 504 : index
    %c0_74 = arith.constant 0 : index
    %84 = tpu.strided_load %arg12[%c504, %c0_74] {strides = array<i32: 2, 1>} : memref<610x128xf32, #tpu.memory_space<vmem>>, vector<8x128xf32>
    %c61_75 = arith.constant 61 : index
    %c0_76 = arith.constant 0 : index
    %85 = vector.load %arg4[%c61_75, %c0_76] : memref<100x128xf32, #tpu.memory_space<vmem>>, vector<8x128xf32>
    %86 = arith.addf %84, %85 : vector<8x128xf32>
    %cst_77 = arith.constant 0.000000e+00 : f32
    %87 = vector.broadcast %cst_77 : f32 to vector<8x128xf32>
    %88 = arith.maximumf %86, %87 : vector<8x128xf32>
    %c161 = arith.constant 161 : index
    %c0_78 = arith.constant 0 : index
    %89 = vector.load %arg14[%c161, %c0_78] : memref<200x128xf32, #tpu.memory_space<vmem>>, vector<8x128xf32>
    tpu.vector_store %arg14[%c161, %c0_78], %88 {strides = array<i32>} : memref<200x128xf32, #tpu.memory_space<vmem>>, vector<8x128xf32>,
    %c540 = arith.constant 540 : index
    %c0_79 = arith.constant 0 : index
    %90 = tpu.strided_load %arg12[%c540, %c0_79] {strides = array<i32: 2, 1>} : memref<610x128xf32, #tpu.memory_space<vmem>>, vector<8x128xf32>
    %c71_80 = arith.constant 71 : index
    %c0_81 = arith.constant 0 : index
    %91 = vector.load %arg4[%c71_80, %c0_81] : memref<100x128xf32, #tpu.memory_space<vmem>>, vector<8x128xf32>
    %92 = arith.addf %90, %91 : vector<8x128xf32>
    %cst_82 = arith.constant 0.000000e+00 : f32
    %93 = vector.broadcast %cst_82 : f32 to vector<8x128xf32>
    %94 = arith.maximumf %92, %93 : vector<8x128xf32>
    %c171 = arith.constant 171 : index
    %c0_83 = arith.constant 0 : index
    %95 = vector.load %arg14[%c171, %c0_83] : memref<200x128xf32, #tpu.memory_space<vmem>>, vector<8x128xf32>
    tpu.vector_store %arg14[%c171, %c0_83], %94 {strides = array<i32>} : memref<200x128xf32, #tpu.memory_space<vmem>>, vector<8x128xf32>,
    %c576 = arith.constant 576 : index
    %c0_84 = arith.constant 0 : index
    %96 = tpu.strided_load %arg12[%c576, %c0_84] {strides = array<i32: 2, 1>} : memref<610x128xf32, #tpu.memory_space<vmem>>, vector<8x128xf32>
    %c81_85 = arith.constant 81 : index
    %c0_86 = arith.constant 0 : index
    %97 = vector.load %arg4[%c81_85, %c0_86] : memref<100x128xf32, #tpu.memory_space<vmem>>, vector<8x128xf32>
    %98 = arith.addf %96, %97 : vector<8x128xf32>
    %cst_87 = arith.constant 0.000000e+00 : f32
    %99 = vector.broadcast %cst_87 : f32 to vector<8x128xf32>
    %100 = arith.maximumf %98, %99 : vector<8x128xf32>
    %c181 = arith.constant 181 : index
    %c0_88 = arith.constant 0 : index
    %101 = vector.load %arg14[%c181, %c0_88] : memref<200x128xf32, #tpu.memory_space<vmem>>, vector<8x128xf32>
    tpu.vector_store %arg14[%c181, %c0_88], %100 {strides = array<i32>} : memref<200x128xf32, #tpu.memory_space<vmem>>, vector<8x128xf32>,
    %c0_89 = arith.constant 0 : index
    %c0_90 = arith.constant 0 : index
    %102 = vector.load %arg14[%c0_89, %c0_90] : memref<200x128xf32, #tpu.memory_space<vmem>>, vector<178x8xf32>
    %c0_91 = arith.constant 0 : index
    %c0_92 = arith.constant 0 : index
    %c0_93 = arith.constant 0 : index
    %103 = vector.load %arg2[%c0_91, %c0_92, %c0_93] : memref<9x8x128xf32, #tpu.memory_space<vmem>>, vector<1x8x128xf32>
    %104 = vector.shape_cast %103 : vector<1x8x128xf32> to vector<8x128xf32>
    %cst_94 = arith.constant dense<0.000000e+00> : vector<178x128xf32>
    %105 = tpu.matmul %102, %104, %cst_94 {dimension_numbers = #tpu.dot_dimension_numbers<[1], [0], [0], [1], [0, 0, 1, 1], [], []>} : vector<178x8xf32>, vector<8x128xf32>, vector<178x128xf32> -> vector<178x128xf32>
    %c1 = arith.constant 1 : index
    %c0_95 = arith.constant 0 : index
    %106 = vector.load %arg14[%c1, %c0_95] : memref<200x128xf32, #tpu.memory_space<vmem>>, vector<178x8xf32>
    %c1_96 = arith.constant 1 : index
    %c0_97 = arith.constant 0 : index
    %c0_98 = arith.constant 0 : index
    %107 = vector.load %arg2[%c1_96, %c0_97, %c0_98] : memref<9x8x128xf32, #tpu.memory_space<vmem>>, vector<1x8x128xf32>
    %108 = vector.shape_cast %107 : vector<1x8x128xf32> to vector<8x128xf32>
    %cst_99 = arith.constant dense<0.000000e+00> : vector<178x128xf32>
    %109 = tpu.matmul %106, %108, %cst_99 {dimension_numbers = #tpu.dot_dimension_numbers<[1], [0], [0], [1], [0, 0, 1, 1], [], []>} : vector<178x8xf32>, vector<8x128xf32>, vector<178x128xf32> -> vector<178x128xf32>
    %110 = arith.addf %105, %109 : vector<178x128xf32>
    %c2 = arith.constant 2 : index
    %c0_100 = arith.constant 0 : index
    %111 = vector.load %arg14[%c2, %c0_100] : memref<200x128xf32, #tpu.memory_space<vmem>>, vector<178x8xf32>
    %c2_101 = arith.constant 2 : index
    %c0_102 = arith.constant 0 : index
    %c0_103 = arith.constant 0 : index
    %112 = vector.load %arg2[%c2_101, %c0_102, %c0_103] : memref<9x8x128xf32, #tpu.memory_space<vmem>>, vector<1x8x128xf32>
    %113 = vector.shape_cast %112 : vector<1x8x128xf32> to vector<8x128xf32>
    %cst_104 = arith.constant dense<0.000000e+00> : vector<178x128xf32>
    %114 = tpu.matmul %111, %113, %cst_104 {dimension_numbers = #tpu.dot_dimension_numbers<[1], [0], [0], [1], [0, 0, 1, 1], [], []>} : vector<178x8xf32>, vector<8x128xf32>, vector<178x128xf32> -> vector<178x128xf32>
    %115 = arith.addf %110, %114 : vector<178x128xf32>
    %c10 = arith.constant 10 : index
    %c0_105 = arith.constant 0 : index
    %116 = vector.load %arg14[%c10, %c0_105] : memref<200x128xf32, #tpu.memory_space<vmem>>, vector<178x8xf32>
    %c3 = arith.constant 3 : index
    %c0_106 = arith.constant 0 : index
    %c0_107 = arith.constant 0 : index
    %117 = vector.load %arg2[%c3, %c0_106, %c0_107] : memref<9x8x128xf32, #tpu.memory_space<vmem>>, vector<1x8x128xf32>
    %118 = vector.shape_cast %117 : vector<1x8x128xf32> to vector<8x128xf32>
    %cst_108 = arith.constant dense<0.000000e+00> : vector<178x128xf32>
    %119 = tpu.matmul %116, %118, %cst_108 {dimension_numbers = #tpu.dot_dimension_numbers<[1], [0], [0], [1], [0, 0, 1, 1], [], []>} : vector<178x8xf32>, vector<8x128xf32>, vector<178x128xf32> -> vector<178x128xf32>
    %120 = arith.addf %115, %119 : vector<178x128xf32>
    %c11_109 = arith.constant 11 : index
    %c0_110 = arith.constant 0 : index
    %121 = vector.load %arg14[%c11_109, %c0_110] : memref<200x128xf32, #tpu.memory_space<vmem>>, vector<178x8xf32>
    %c4 = arith.constant 4 : index
    %c0_111 = arith.constant 0 : index
    %c0_112 = arith.constant 0 : index
    %122 = vector.load %arg2[%c4, %c0_111, %c0_112] : memref<9x8x128xf32, #tpu.memory_space<vmem>>, vector<1x8x128xf32>
    %123 = vector.shape_cast %122 : vector<1x8x128xf32> to vector<8x128xf32>
    %cst_113 = arith.constant dense<0.000000e+00> : vector<178x128xf32>
    %124 = tpu.matmul %121, %123, %cst_113 {dimension_numbers = #tpu.dot_dimension_numbers<[1], [0], [0], [1], [0, 0, 1, 1], [], []>} : vector<178x8xf32>, vector<8x128xf32>, vector<178x128xf32> -> vector<178x128xf32>
    %125 = arith.addf %120, %124 : vector<178x128xf32>
    %c12 = arith.constant 12 : index
    %c0_114 = arith.constant 0 : index
    %126 = vector.load %arg14[%c12, %c0_114] : memref<200x128xf32, #tpu.memory_space<vmem>>, vector<178x8xf32>
    %c5 = arith.constant 5 : index
    %c0_115 = arith.constant 0 : index
    %c0_116 = arith.constant 0 : index
    %127 = vector.load %arg2[%c5, %c0_115, %c0_116] : memref<9x8x128xf32, #tpu.memory_space<vmem>>, vector<1x8x128xf32>
    %128 = vector.shape_cast %127 : vector<1x8x128xf32> to vector<8x128xf32>
    %cst_117 = arith.constant dense<0.000000e+00> : vector<178x128xf32>
    %129 = tpu.matmul %126, %128, %cst_117 {dimension_numbers = #tpu.dot_dimension_numbers<[1], [0], [0], [1], [0, 0, 1, 1], [], []>} : vector<178x8xf32>, vector<8x128xf32>, vector<178x128xf32> -> vector<178x128xf32>
    %130 = arith.addf %125, %129 : vector<178x128xf32>
    %c20 = arith.constant 20 : index
    %c0_118 = arith.constant 0 : index
    %131 = vector.load %arg14[%c20, %c0_118] : memref<200x128xf32, #tpu.memory_space<vmem>>, vector<178x8xf32>
    %c6 = arith.constant 6 : index
    %c0_119 = arith.constant 0 : index
    %c0_120 = arith.constant 0 : index
    %132 = vector.load %arg2[%c6, %c0_119, %c0_120] : memref<9x8x128xf32, #tpu.memory_space<vmem>>, vector<1x8x128xf32>
    %133 = vector.shape_cast %132 : vector<1x8x128xf32> to vector<8x128xf32>
    %cst_121 = arith.constant dense<0.000000e+00> : vector<178x128xf32>
    %134 = tpu.matmul %131, %133, %cst_121 {dimension_numbers = #tpu.dot_dimension_numbers<[1], [0], [0], [1], [0, 0, 1, 1], [], []>} : vector<178x8xf32>, vector<8x128xf32>, vector<178x128xf32> -> vector<178x128xf32>
    %135 = arith.addf %130, %134 : vector<178x128xf32>
    %c21_122 = arith.constant 21 : index
    %c0_123 = arith.constant 0 : index
    %136 = vector.load %arg14[%c21_122, %c0_123] : memref<200x128xf32, #tpu.memory_space<vmem>>, vector<178x8xf32>
    %c7 = arith.constant 7 : index
    %c0_124 = arith.constant 0 : index
    %c0_125 = arith.constant 0 : index
    %137 = vector.load %arg2[%c7, %c0_124, %c0_125] : memref<9x8x128xf32, #tpu.memory_space<vmem>>, vector<1x8x128xf32>
    %138 = vector.shape_cast %137 : vector<1x8x128xf32> to vector<8x128xf32>
    %cst_126 = arith.constant dense<0.000000e+00> : vector<178x128xf32>
    %139 = tpu.matmul %136, %138, %cst_126 {dimension_numbers = #tpu.dot_dimension_numbers<[1], [0], [0], [1], [0, 0, 1, 1], [], []>} : vector<178x8xf32>, vector<8x128xf32>, vector<178x128xf32> -> vector<178x128xf32>
    %140 = arith.addf %135, %139 : vector<178x128xf32>
    %c22 = arith.constant 22 : index
    %c0_127 = arith.constant 0 : index
    %141 = vector.load %arg14[%c22, %c0_127] : memref<200x128xf32, #tpu.memory_space<vmem>>, vector<178x8xf32>
    %c8 = arith.constant 8 : index
    %c0_128 = arith.constant 0 : index
    %c0_129 = arith.constant 0 : index
    %142 = vector.load %arg2[%c8, %c0_128, %c0_129] : memref<9x8x128xf32, #tpu.memory_space<vmem>>, vector<1x8x128xf32>
    %143 = vector.shape_cast %142 : vector<1x8x128xf32> to vector<8x128xf32>
    %cst_130 = arith.constant dense<0.000000e+00> : vector<178x128xf32>
    %144 = tpu.matmul %141, %143, %cst_130 {dimension_numbers = #tpu.dot_dimension_numbers<[1], [0], [0], [1], [0, 0, 1, 1], [], []>} : vector<178x8xf32>, vector<8x128xf32>, vector<178x128xf32> -> vector<178x128xf32>
    %145 = arith.addf %140, %144 : vector<178x128xf32>
    %c0_131 = arith.constant 0 : index
    %c0_132 = arith.constant 0 : index
    %146 = vector.load %arg13[%c0_131, %c0_132] : memref<178x128xf32, #tpu.memory_space<vmem>>, vector<178x128xf32>
    tpu.vector_store %arg13[%c0_131, %c0_132], %145 {strides = array<i32>} : memref<178x128xf32, #tpu.memory_space<vmem>>, vector<178x128xf32>,
    %cst_133 = arith.constant 0.000000e+00 : f32
    %147 = vector.broadcast %cst_133 : f32 to vector<200x128xf32>
    %c0_134 = arith.constant 0 : index
    %c0_135 = arith.constant 0 : index
    %148 = vector.load %arg15[%c0_134, %c0_135] : memref<200x128xf32, #tpu.memory_space<vmem>>, vector<200x128xf32>
    tpu.vector_store %arg15[%c0_134, %c0_135], %147 {strides = array<i32>} : memref<200x128xf32, #tpu.memory_space<vmem>>, vector<200x128xf32>,
    %c0_136 = arith.constant 0 : index
    %c0_137 = arith.constant 0 : index
    %149 = vector.load %arg13[%c0_136, %c0_137] : memref<178x128xf32, #tpu.memory_space<vmem>>, vector<8x128xf32>
    %c11_138 = arith.constant 11 : index
    %c0_139 = arith.constant 0 : index
    %150 = vector.load %arg5[%c11_138, %c0_139] : memref<100x128xf32, #tpu.memory_space<vmem>>, vector<8x128xf32>
    %151 = arith.addf %149, %150 : vector<8x128xf32>
    %cst_140 = arith.constant 0.000000e+00 : f32
    %152 = vector.broadcast %cst_140 : f32 to vector<8x128xf32>
    %153 = arith.maximumf %151, %152 : vector<8x128xf32>
    %c11_141 = arith.constant 11 : index
    %c0_142 = arith.constant 0 : index
    %154 = vector.load %arg15[%c11_141, %c0_142] : memref<200x128xf32, #tpu.memory_space<vmem>>, vector<8x128xf32>
    tpu.vector_store %arg15[%c11_141, %c0_142], %153 {strides = array<i32>} : memref<200x128xf32, #tpu.memory_space<vmem>>, vector<8x128xf32>,
    %c10_143 = arith.constant 10 : index
    %c0_144 = arith.constant 0 : index
    %155 = vector.load %arg13[%c10_143, %c0_144] : memref<178x128xf32, #tpu.memory_space<vmem>>, vector<8x128xf32>
    %c21_145 = arith.constant 21 : index
    %c0_146 = arith.constant 0 : index
    %156 = vector.load %arg5[%c21_145, %c0_146] : memref<100x128xf32, #tpu.memory_space<vmem>>, vector<8x128xf32>
    %157 = arith.addf %155, %156 : vector<8x128xf32>
    %cst_147 = arith.constant 0.000000e+00 : f32
    %158 = vector.broadcast %cst_147 : f32 to vector<8x128xf32>
    %159 = arith.maximumf %157, %158 : vector<8x128xf32>
    %c21_148 = arith.constant 21 : index
    %c0_149 = arith.constant 0 : index
    %160 = vector.load %arg15[%c21_148, %c0_149] : memref<200x128xf32, #tpu.memory_space<vmem>>, vector<8x128xf32>
    tpu.vector_store %arg15[%c21_148, %c0_149], %159 {strides = array<i32>} : memref<200x128xf32, #tpu.memory_space<vmem>>, vector<8x128xf32>,
    %c20_150 = arith.constant 20 : index
    %c0_151 = arith.constant 0 : index
    %161 = vector.load %arg13[%c20_150, %c0_151] : memref<178x128xf32, #tpu.memory_space<vmem>>, vector<8x128xf32>
    %c31_152 = arith.constant 31 : index
    %c0_153 = arith.constant 0 : index
    %162 = vector.load %arg5[%c31_152, %c0_153] : memref<100x128xf32, #tpu.memory_space<vmem>>, vector<8x128xf32>
    %163 = arith.addf %161, %162 : vector<8x128xf32>
    %cst_154 = arith.constant 0.000000e+00 : f32
    %164 = vector.broadcast %cst_154 : f32 to vector<8x128xf32>
    %165 = arith.maximumf %163, %164 : vector<8x128xf32>
    %c31_155 = arith.constant 31 : index
    %c0_156 = arith.constant 0 : index
    %166 = vector.load %arg15[%c31_155, %c0_156] : memref<200x128xf32, #tpu.memory_space<vmem>>, vector<8x128xf32>
    tpu.vector_store %arg15[%c31_155, %c0_156], %165 {strides = array<i32>} : memref<200x128xf32, #tpu.memory_space<vmem>>, vector<8x128xf32>,
    %c30 = arith.constant 30 : index
    %c0_157 = arith.constant 0 : index
    %167 = vector.load %arg13[%c30, %c0_157] : memref<178x128xf32, #tpu.memory_space<vmem>>, vector<8x128xf32>
    %c41_158 = arith.constant 41 : index
    %c0_159 = arith.constant 0 : index
    %168 = vector.load %arg5[%c41_158, %c0_159] : memref<100x128xf32, #tpu.memory_space<vmem>>, vector<8x128xf32>
    %169 = arith.addf %167, %168 : vector<8x128xf32>
    %cst_160 = arith.constant 0.000000e+00 : f32
    %170 = vector.broadcast %cst_160 : f32 to vector<8x128xf32>
    %171 = arith.maximumf %169, %170 : vector<8x128xf32>
    %c41_161 = arith.constant 41 : index
    %c0_162 = arith.constant 0 : index
    %172 = vector.load %arg15[%c41_161, %c0_162] : memref<200x128xf32, #tpu.memory_space<vmem>>, vector<8x128xf32>
    tpu.vector_store %arg15[%c41_161, %c0_162], %171 {strides = array<i32>} : memref<200x128xf32, #tpu.memory_space<vmem>>, vector<8x128xf32>,
    %c40 = arith.constant 40 : index
    %c0_163 = arith.constant 0 : index
    %173 = vector.load %arg13[%c40, %c0_163] : memref<178x128xf32, #tpu.memory_space<vmem>>, vector<8x128xf32>
    %c51_164 = arith.constant 51 : index
    %c0_165 = arith.constant 0 : index
    %174 = vector.load %arg5[%c51_164, %c0_165] : memref<100x128xf32, #tpu.memory_space<vmem>>, vector<8x128xf32>
    %175 = arith.addf %173, %174 : vector<8x128xf32>
    %cst_166 = arith.constant 0.000000e+00 : f32
    %176 = vector.broadcast %cst_166 : f32 to vector<8x128xf32>
    %177 = arith.maximumf %175, %176 : vector<8x128xf32>
    %c51_167 = arith.constant 51 : index
    %c0_168 = arith.constant 0 : index
    %178 = vector.load %arg15[%c51_167, %c0_168] : memref<200x128xf32, #tpu.memory_space<vmem>>, vector<8x128xf32>
    tpu.vector_store %arg15[%c51_167, %c0_168], %177 {strides = array<i32>} : memref<200x128xf32, #tpu.memory_space<vmem>>, vector<8x128xf32>,
    %c50 = arith.constant 50 : index
    %c0_169 = arith.constant 0 : index
    %179 = vector.load %arg13[%c50, %c0_169] : memref<178x128xf32, #tpu.memory_space<vmem>>, vector<8x128xf32>
    %c61_170 = arith.constant 61 : index
    %c0_171 = arith.constant 0 : index
    %180 = vector.load %arg5[%c61_170, %c0_171] : memref<100x128xf32, #tpu.memory_space<vmem>>, vector<8x128xf32>
    %181 = arith.addf %179, %180 : vector<8x128xf32>
    %cst_172 = arith.constant 0.000000e+00 : f32
    %182 = vector.broadcast %cst_172 : f32 to vector<8x128xf32>
    %183 = arith.maximumf %181, %182 : vector<8x128xf32>
    %c61_173 = arith.constant 61 : index
    %c0_174 = arith.constant 0 : index
    %184 = vector.load %arg15[%c61_173, %c0_174] : memref<200x128xf32, #tpu.memory_space<vmem>>, vector<8x128xf32>
    tpu.vector_store %arg15[%c61_173, %c0_174], %183 {strides = array<i32>} : memref<200x128xf32, #tpu.memory_space<vmem>>, vector<8x128xf32>,
    %c60 = arith.constant 60 : index
    %c0_175 = arith.constant 0 : index
    %185 = vector.load %arg13[%c60, %c0_175] : memref<178x128xf32, #tpu.memory_space<vmem>>, vector<8x128xf32>
    %c71_176 = arith.constant 71 : index
    %c0_177 = arith.constant 0 : index
    %186 = vector.load %arg5[%c71_176, %c0_177] : memref<100x128xf32, #tpu.memory_space<vmem>>, vector<8x128xf32>
    %187 = arith.addf %185, %186 : vector<8x128xf32>
    %cst_178 = arith.constant 0.000000e+00 : f32
    %188 = vector.broadcast %cst_178 : f32 to vector<8x128xf32>
    %189 = arith.maximumf %187, %188 : vector<8x128xf32>
    %c71_179 = arith.constant 71 : index
    %c0_180 = arith.constant 0 : index
    %190 = vector.load %arg15[%c71_179, %c0_180] : memref<200x128xf32, #tpu.memory_space<vmem>>, vector<8x128xf32>
    tpu.vector_store %arg15[%c71_179, %c0_180], %189 {strides = array<i32>} : memref<200x128xf32, #tpu.memory_space<vmem>>, vector<8x128xf32>,
    %c70 = arith.constant 70 : index
    %c0_181 = arith.constant 0 : index
    %191 = vector.load %arg13[%c70, %c0_181] : memref<178x128xf32, #tpu.memory_space<vmem>>, vector<8x128xf32>
    %c81_182 = arith.constant 81 : index
    %c0_183 = arith.constant 0 : index
    %192 = vector.load %arg5[%c81_182, %c0_183] : memref<100x128xf32, #tpu.memory_space<vmem>>, vector<8x128xf32>
    %193 = arith.addf %191, %192 : vector<8x128xf32>
    %cst_184 = arith.constant 0.000000e+00 : f32
    %194 = vector.broadcast %cst_184 : f32 to vector<8x128xf32>
    %195 = arith.maximumf %193, %194 : vector<8x128xf32>
    %c81_185 = arith.constant 81 : index
    %c0_186 = arith.constant 0 : index
    %196 = vector.load %arg15[%c81_185, %c0_186] : memref<200x128xf32, #tpu.memory_space<vmem>>, vector<8x128xf32>
    tpu.vector_store %arg15[%c81_185, %c0_186], %195 {strides = array<i32>} : memref<200x128xf32, #tpu.memory_space<vmem>>, vector<8x128xf32>,
    %c100 = arith.constant 100 : index
    %c0_187 = arith.constant 0 : index
    %197 = vector.load %arg13[%c100, %c0_187] : memref<178x128xf32, #tpu.memory_space<vmem>>, vector<8x128xf32>
    %c11_188 = arith.constant 11 : index
    %c0_189 = arith.constant 0 : index
    %198 = vector.load %arg5[%c11_188, %c0_189] : memref<100x128xf32, #tpu.memory_space<vmem>>, vector<8x128xf32>
    %199 = arith.addf %197, %198 : vector<8x128xf32>
    %cst_190 = arith.constant 0.000000e+00 : f32
    %200 = vector.broadcast %cst_190 : f32 to vector<8x128xf32>
    %201 = arith.maximumf %199, %200 : vector<8x128xf32>
    %c111_191 = arith.constant 111 : index
    %c0_192 = arith.constant 0 : index
    %202 = vector.load %arg15[%c111_191, %c0_192] : memref<200x128xf32, #tpu.memory_space<vmem>>, vector<8x128xf32>
    tpu.vector_store %arg15[%c111_191, %c0_192], %201 {strides = array<i32>} : memref<200x128xf32, #tpu.memory_space<vmem>>, vector<8x128xf32>,
    %c110 = arith.constant 110 : index
    %c0_193 = arith.constant 0 : index
    %203 = vector.load %arg13[%c110, %c0_193] : memref<178x128xf32, #tpu.memory_space<vmem>>, vector<8x128xf32>
    %c21_194 = arith.constant 21 : index
    %c0_195 = arith.constant 0 : index
    %204 = vector.load %arg5[%c21_194, %c0_195] : memref<100x128xf32, #tpu.memory_space<vmem>>, vector<8x128xf32>
    %205 = arith.addf %203, %204 : vector<8x128xf32>
    %cst_196 = arith.constant 0.000000e+00 : f32
    %206 = vector.broadcast %cst_196 : f32 to vector<8x128xf32>
    %207 = arith.maximumf %205, %206 : vector<8x128xf32>
    %c121_197 = arith.constant 121 : index
    %c0_198 = arith.constant 0 : index
    %208 = vector.load %arg15[%c121_197, %c0_198] : memref<200x128xf32, #tpu.memory_space<vmem>>, vector<8x128xf32>
    tpu.vector_store %arg15[%c121_197, %c0_198], %207 {strides = array<i32>} : memref<200x128xf32, #tpu.memory_space<vmem>>, vector<8x128xf32>,
    %c120 = arith.constant 120 : index
    %c0_199 = arith.constant 0 : index
    %209 = vector.load %arg13[%c120, %c0_199] : memref<178x128xf32, #tpu.memory_space<vmem>>, vector<8x128xf32>
    %c31_200 = arith.constant 31 : index
    %c0_201 = arith.constant 0 : index
    %210 = vector.load %arg5[%c31_200, %c0_201] : memref<100x128xf32, #tpu.memory_space<vmem>>, vector<8x128xf32>
    %211 = arith.addf %209, %210 : vector<8x128xf32>
    %cst_202 = arith.constant 0.000000e+00 : f32
    %212 = vector.broadcast %cst_202 : f32 to vector<8x128xf32>
    %213 = arith.maximumf %211, %212 : vector<8x128xf32>
    %c131_203 = arith.constant 131 : index
    %c0_204 = arith.constant 0 : index
    %214 = vector.load %arg15[%c131_203, %c0_204] : memref<200x128xf32, #tpu.memory_space<vmem>>, vector<8x128xf32>
    tpu.vector_store %arg15[%c131_203, %c0_204], %213 {strides = array<i32>} : memref<200x128xf32, #tpu.memory_space<vmem>>, vector<8x128xf32>,
    %c130 = arith.constant 130 : index
    %c0_205 = arith.constant 0 : index
    %215 = vector.load %arg13[%c130, %c0_205] : memref<178x128xf32, #tpu.memory_space<vmem>>, vector<8x128xf32>
    %c41_206 = arith.constant 41 : index
    %c0_207 = arith.constant 0 : index
    %216 = vector.load %arg5[%c41_206, %c0_207] : memref<100x128xf32, #tpu.memory_space<vmem>>, vector<8x128xf32>
    %217 = arith.addf %215, %216 : vector<8x128xf32>
    %cst_208 = arith.constant 0.000000e+00 : f32
    %218 = vector.broadcast %cst_208 : f32 to vector<8x128xf32>
    %219 = arith.maximumf %217, %218 : vector<8x128xf32>
    %c141_209 = arith.constant 141 : index
    %c0_210 = arith.constant 0 : index
    %220 = vector.load %arg15[%c141_209, %c0_210] : memref<200x128xf32, #tpu.memory_space<vmem>>, vector<8x128xf32>
    tpu.vector_store %arg15[%c141_209, %c0_210], %219 {strides = array<i32>} : memref<200x128xf32, #tpu.memory_space<vmem>>, vector<8x128xf32>,
    %c140 = arith.constant 140 : index
    %c0_211 = arith.constant 0 : index
    %221 = vector.load %arg13[%c140, %c0_211] : memref<178x128xf32, #tpu.memory_space<vmem>>, vector<8x128xf32>
    %c51_212 = arith.constant 51 : index
    %c0_213 = arith.constant 0 : index
    %222 = vector.load %arg5[%c51_212, %c0_213] : memref<100x128xf32, #tpu.memory_space<vmem>>, vector<8x128xf32>
    %223 = arith.addf %221, %222 : vector<8x128xf32>
    %cst_214 = arith.constant 0.000000e+00 : f32
    %224 = vector.broadcast %cst_214 : f32 to vector<8x128xf32>
    %225 = arith.maximumf %223, %224 : vector<8x128xf32>
    %c151_215 = arith.constant 151 : index
    %c0_216 = arith.constant 0 : index
    %226 = vector.load %arg15[%c151_215, %c0_216] : memref<200x128xf32, #tpu.memory_space<vmem>>, vector<8x128xf32>
    tpu.vector_store %arg15[%c151_215, %c0_216], %225 {strides = array<i32>} : memref<200x128xf32, #tpu.memory_space<vmem>>, vector<8x128xf32>,
    %c150 = arith.constant 150 : index
    %c0_217 = arith.constant 0 : index
    %227 = vector.load %arg13[%c150, %c0_217] : memref<178x128xf32, #tpu.memory_space<vmem>>, vector<8x128xf32>
    %c61_218 = arith.constant 61 : index
    %c0_219 = arith.constant 0 : index
    %228 = vector.load %arg5[%c61_218, %c0_219] : memref<100x128xf32, #tpu.memory_space<vmem>>, vector<8x128xf32>
    %229 = arith.addf %227, %228 : vector<8x128xf32>
    %cst_220 = arith.constant 0.000000e+00 : f32
    %230 = vector.broadcast %cst_220 : f32 to vector<8x128xf32>
    %231 = arith.maximumf %229, %230 : vector<8x128xf32>
    %c161_221 = arith.constant 161 : index
    %c0_222 = arith.constant 0 : index
    %232 = vector.load %arg15[%c161_221, %c0_222] : memref<200x128xf32, #tpu.memory_space<vmem>>, vector<8x128xf32>
    tpu.vector_store %arg15[%c161_221, %c0_222], %231 {strides = array<i32>} : memref<200x128xf32, #tpu.memory_space<vmem>>, vector<8x128xf32>,
    %c160 = arith.constant 160 : index
    %c0_223 = arith.constant 0 : index
    %233 = vector.load %arg13[%c160, %c0_223] : memref<178x128xf32, #tpu.memory_space<vmem>>, vector<8x128xf32>
    %c71_224 = arith.constant 71 : index
    %c0_225 = arith.constant 0 : index
    %234 = vector.load %arg5[%c71_224, %c0_225] : memref<100x128xf32, #tpu.memory_space<vmem>>, vector<8x128xf32>
    %235 = arith.addf %233, %234 : vector<8x128xf32>
    %cst_226 = arith.constant 0.000000e+00 : f32
    %236 = vector.broadcast %cst_226 : f32 to vector<8x128xf32>
    %237 = arith.maximumf %235, %236 : vector<8x128xf32>
    %c171_227 = arith.constant 171 : index
    %c0_228 = arith.constant 0 : index
    %238 = vector.load %arg15[%c171_227, %c0_228] : memref<200x128xf32, #tpu.memory_space<vmem>>, vector<8x128xf32>
    tpu.vector_store %arg15[%c171_227, %c0_228], %237 {strides = array<i32>} : memref<200x128xf32, #tpu.memory_space<vmem>>, vector<8x128xf32>,
    %c170 = arith.constant 170 : index
    %c0_229 = arith.constant 0 : index
    %239 = vector.load %arg13[%c170, %c0_229] : memref<178x128xf32, #tpu.memory_space<vmem>>, vector<8x128xf32>
    %c81_230 = arith.constant 81 : index
    %c0_231 = arith.constant 0 : index
    %240 = vector.load %arg5[%c81_230, %c0_231] : memref<100x128xf32, #tpu.memory_space<vmem>>, vector<8x128xf32>
    %241 = arith.addf %239, %240 : vector<8x128xf32>
    %cst_232 = arith.constant 0.000000e+00 : f32
    %242 = vector.broadcast %cst_232 : f32 to vector<8x128xf32>
    %243 = arith.maximumf %241, %242 : vector<8x128xf32>
    %c181_233 = arith.constant 181 : index
    %c0_234 = arith.constant 0 : index
    %244 = vector.load %arg15[%c181_233, %c0_234] : memref<200x128xf32, #tpu.memory_space<vmem>>, vector<8x128xf32>
    tpu.vector_store %arg15[%c181_233, %c0_234], %243 {strides = array<i32>} : memref<200x128xf32, #tpu.memory_space<vmem>>, vector<8x128xf32>,
    %c0_235 = arith.constant 0 : index
    %c0_236 = arith.constant 0 : index
    %245 = vector.load %arg15[%c0_235, %c0_236] : memref<200x128xf32, #tpu.memory_space<vmem>>, vector<178x8xf32>
    %c0_237 = arith.constant 0 : index
    %c0_238 = arith.constant 0 : index
    %c0_239 = arith.constant 0 : index
    %246 = vector.load %arg3[%c0_237, %c0_238, %c0_239] : memref<9x8x128xf32, #tpu.memory_space<vmem>>, vector<1x8x128xf32>
    %247 = vector.shape_cast %246 : vector<1x8x128xf32> to vector<8x128xf32>
    %cst_240 = arith.constant dense<0.000000e+00> : vector<178x128xf32>
    %248 = tpu.matmul %245, %247, %cst_240 {dimension_numbers = #tpu.dot_dimension_numbers<[1], [0], [0], [1], [0, 0, 1, 1], [], []>} : vector<178x8xf32>, vector<8x128xf32>, vector<178x128xf32> -> vector<178x128xf32>
    %c1_241 = arith.constant 1 : index
    %c0_242 = arith.constant 0 : index
    %249 = vector.load %arg15[%c1_241, %c0_242] : memref<200x128xf32, #tpu.memory_space<vmem>>, vector<178x8xf32>
    %c1_243 = arith.constant 1 : index
    %c0_244 = arith.constant 0 : index
    %c0_245 = arith.constant 0 : index
    %250 = vector.load %arg3[%c1_243, %c0_244, %c0_245] : memref<9x8x128xf32, #tpu.memory_space<vmem>>, vector<1x8x128xf32>
    %251 = vector.shape_cast %250 : vector<1x8x128xf32> to vector<8x128xf32>
    %cst_246 = arith.constant dense<0.000000e+00> : vector<178x128xf32>
    %252 = tpu.matmul %249, %251, %cst_246 {dimension_numbers = #tpu.dot_dimension_numbers<[1], [0], [0], [1], [0, 0, 1, 1], [], []>} : vector<178x8xf32>, vector<8x128xf32>, vector<178x128xf32> -> vector<178x128xf32>
    %253 = arith.addf %248, %252 : vector<178x128xf32>
    %c2_247 = arith.constant 2 : index
    %c0_248 = arith.constant 0 : index
    %254 = vector.load %arg15[%c2_247, %c0_248] : memref<200x128xf32, #tpu.memory_space<vmem>>, vector<178x8xf32>
    %c2_249 = arith.constant 2 : index
    %c0_250 = arith.constant 0 : index
    %c0_251 = arith.constant 0 : index
    %255 = vector.load %arg3[%c2_249, %c0_250, %c0_251] : memref<9x8x128xf32, #tpu.memory_space<vmem>>, vector<1x8x128xf32>
    %256 = vector.shape_cast %255 : vector<1x8x128xf32> to vector<8x128xf32>
    %cst_252 = arith.constant dense<0.000000e+00> : vector<178x128xf32>
    %257 = tpu.matmul %254, %256, %cst_252 {dimension_numbers = #tpu.dot_dimension_numbers<[1], [0], [0], [1], [0, 0, 1, 1], [], []>} : vector<178x8xf32>, vector<8x128xf32>, vector<178x128xf32> -> vector<178x128xf32>
    %258 = arith.addf %253, %257 : vector<178x128xf32>
    %c10_253 = arith.constant 10 : index
    %c0_254 = arith.constant 0 : index
    %259 = vector.load %arg15[%c10_253, %c0_254] : memref<200x128xf32, #tpu.memory_space<vmem>>, vector<178x8xf32>
    %c3_255 = arith.constant 3 : index
    %c0_256 = arith.constant 0 : index
    %c0_257 = arith.constant 0 : index
    %260 = vector.load %arg3[%c3_255, %c0_256, %c0_257] : memref<9x8x128xf32, #tpu.memory_space<vmem>>, vector<1x8x128xf32>
    %261 = vector.shape_cast %260 : vector<1x8x128xf32> to vector<8x128xf32>
    %cst_258 = arith.constant dense<0.000000e+00> : vector<178x128xf32>
    %262 = tpu.matmul %259, %261, %cst_258 {dimension_numbers = #tpu.dot_dimension_numbers<[1], [0], [0], [1], [0, 0, 1, 1], [], []>} : vector<178x8xf32>, vector<8x128xf32>, vector<178x128xf32> -> vector<178x128xf32>
    %263 = arith.addf %258, %262 : vector<178x128xf32>
    %c11_259 = arith.constant 11 : index
    %c0_260 = arith.constant 0 : index
    %264 = vector.load %arg15[%c11_259, %c0_260] : memref<200x128xf32, #tpu.memory_space<vmem>>, vector<178x8xf32>
    %c4_261 = arith.constant 4 : index
    %c0_262 = arith.constant 0 : index
    %c0_263 = arith.constant 0 : index
    %265 = vector.load %arg3[%c4_261, %c0_262, %c0_263] : memref<9x8x128xf32, #tpu.memory_space<vmem>>, vector<1x8x128xf32>
    %266 = vector.shape_cast %265 : vector<1x8x128xf32> to vector<8x128xf32>
    %cst_264 = arith.constant dense<0.000000e+00> : vector<178x128xf32>
    %267 = tpu.matmul %264, %266, %cst_264 {dimension_numbers = #tpu.dot_dimension_numbers<[1], [0], [0], [1], [0, 0, 1, 1], [], []>} : vector<178x8xf32>, vector<8x128xf32>, vector<178x128xf32> -> vector<178x128xf32>
    %268 = arith.addf %263, %267 : vector<178x128xf32>
    %c12_265 = arith.constant 12 : index
    %c0_266 = arith.constant 0 : index
    %269 = vector.load %arg15[%c12_265, %c0_266] : memref<200x128xf32, #tpu.memory_space<vmem>>, vector<178x8xf32>
    %c5_267 = arith.constant 5 : index
    %c0_268 = arith.constant 0 : index
    %c0_269 = arith.constant 0 : index
    %270 = vector.load %arg3[%c5_267, %c0_268, %c0_269] : memref<9x8x128xf32, #tpu.memory_space<vmem>>, vector<1x8x128xf32>
    %271 = vector.shape_cast %270 : vector<1x8x128xf32> to vector<8x128xf32>
    %cst_270 = arith.constant dense<0.000000e+00> : vector<178x128xf32>
    %272 = tpu.matmul %269, %271, %cst_270 {dimension_numbers = #tpu.dot_dimension_numbers<[1], [0], [0], [1], [0, 0, 1, 1], [], []>} : vector<178x8xf32>, vector<8x128xf32>, vector<178x128xf32> -> vector<178x128xf32>
    %273 = arith.addf %268, %272 : vector<178x128xf32>
    %c20_271 = arith.constant 20 : index
    %c0_272 = arith.constant 0 : index
    %274 = vector.load %arg15[%c20_271, %c0_272] : memref<200x128xf32, #tpu.memory_space<vmem>>, vector<178x8xf32>
    %c6_273 = arith.constant 6 : index
    %c0_274 = arith.constant 0 : index
    %c0_275 = arith.constant 0 : index
    %275 = vector.load %arg3[%c6_273, %c0_274, %c0_275] : memref<9x8x128xf32, #tpu.memory_space<vmem>>, vector<1x8x128xf32>
    %276 = vector.shape_cast %275 : vector<1x8x128xf32> to vector<8x128xf32>
    %cst_276 = arith.constant dense<0.000000e+00> : vector<178x128xf32>
    %277 = tpu.matmul %274, %276, %cst_276 {dimension_numbers = #tpu.dot_dimension_numbers<[1], [0], [0], [1], [0, 0, 1, 1], [], []>} : vector<178x8xf32>, vector<8x128xf32>, vector<178x128xf32> -> vector<178x128xf32>
    %278 = arith.addf %273, %277 : vector<178x128xf32>
    %c21_277 = arith.constant 21 : index
    %c0_278 = arith.constant 0 : index
    %279 = vector.load %arg15[%c21_277, %c0_278] : memref<200x128xf32, #tpu.memory_space<vmem>>, vector<178x8xf32>
    %c7_279 = arith.constant 7 : index
    %c0_280 = arith.constant 0 : index
    %c0_281 = arith.constant 0 : index
    %280 = vector.load %arg3[%c7_279, %c0_280, %c0_281] : memref<9x8x128xf32, #tpu.memory_space<vmem>>, vector<1x8x128xf32>
    %281 = vector.shape_cast %280 : vector<1x8x128xf32> to vector<8x128xf32>
    %cst_282 = arith.constant dense<0.000000e+00> : vector<178x128xf32>
    %282 = tpu.matmul %279, %281, %cst_282 {dimension_numbers = #tpu.dot_dimension_numbers<[1], [0], [0], [1], [0, 0, 1, 1], [], []>} : vector<178x8xf32>, vector<8x128xf32>, vector<178x128xf32> -> vector<178x128xf32>
    %283 = arith.addf %278, %282 : vector<178x128xf32>
    %c22_283 = arith.constant 22 : index
    %c0_284 = arith.constant 0 : index
    %284 = vector.load %arg15[%c22_283, %c0_284] : memref<200x128xf32, #tpu.memory_space<vmem>>, vector<178x8xf32>
    %c8_285 = arith.constant 8 : index
    %c0_286 = arith.constant 0 : index
    %c0_287 = arith.constant 0 : index
    %285 = vector.load %arg3[%c8_285, %c0_286, %c0_287] : memref<9x8x128xf32, #tpu.memory_space<vmem>>, vector<1x8x128xf32>
    %286 = vector.shape_cast %285 : vector<1x8x128xf32> to vector<8x128xf32>
    %cst_288 = arith.constant dense<0.000000e+00> : vector<178x128xf32>
    %287 = tpu.matmul %284, %286, %cst_288 {dimension_numbers = #tpu.dot_dimension_numbers<[1], [0], [0], [1], [0, 0, 1, 1], [], []>} : vector<178x8xf32>, vector<8x128xf32>, vector<178x128xf32> -> vector<178x128xf32>
    %288 = arith.addf %283, %287 : vector<178x128xf32>
    %c0_289 = arith.constant 0 : index
    %c0_290 = arith.constant 0 : index
    %289 = vector.load %arg13[%c0_289, %c0_290] : memref<178x128xf32, #tpu.memory_space<vmem>>, vector<178x128xf32>
    tpu.vector_store %arg13[%c0_289, %c0_290], %288 {strides = array<i32>} : memref<178x128xf32, #tpu.memory_space<vmem>>, vector<178x128xf32>,
    %c0_291 = arith.constant 0 : index
    %c0_292 = arith.constant 0 : index
    %290 = tpu.strided_load %arg13[%c0_291, %c0_292] {strides = array<i32: 2, 1>} : memref<178x128xf32, #tpu.memory_space<vmem>>, vector<4x128xf32>
    %c0_293 = arith.constant 0 : index
    %c0_294 = arith.constant 0 : index
    %291 = vector.load %arg6[%c0_293, %c0_294] : memref<16x128xf32, #tpu.memory_space<vmem>>, vector<4x128xf32>
    %292 = arith.addf %290, %291 : vector<4x128xf32>
    %c0_295 = arith.constant 0 : index
    %c0_296 = arith.constant 0 : index
    %293 = vector.load %arg11[%c0_295, %c0_296] : memref<32x128xf32, #tpu.memory_space<vmem>>, vector<4x128xf32>
    tpu.vector_store %arg11[%c0_295, %c0_296], %292 {strides = array<i32>} : memref<32x128xf32, #tpu.memory_space<vmem>>, vector<4x128xf32>,
    %c20_297 = arith.constant 20 : index
    %c0_298 = arith.constant 0 : index
    %294 = tpu.strided_load %arg13[%c20_297, %c0_298] {strides = array<i32: 2, 1>} : memref<178x128xf32, #tpu.memory_space<vmem>>, vector<4x128xf32>
    %c4_299 = arith.constant 4 : index
    %c0_300 = arith.constant 0 : index
    %295 = vector.load %arg6[%c4_299, %c0_300] : memref<16x128xf32, #tpu.memory_space<vmem>>, vector<4x128xf32>
    %296 = arith.addf %294, %295 : vector<4x128xf32>
    %c4_301 = arith.constant 4 : index
    %c0_302 = arith.constant 0 : index
    %297 = vector.load %arg11[%c4_301, %c0_302] : memref<32x128xf32, #tpu.memory_space<vmem>>, vector<4x128xf32>
    tpu.vector_store %arg11[%c4_301, %c0_302], %296 {strides = array<i32>} : memref<32x128xf32, #tpu.memory_space<vmem>>, vector<4x128xf32>,
    %c40_303 = arith.constant 40 : index
    %c0_304 = arith.constant 0 : index
    %298 = tpu.strided_load %arg13[%c40_303, %c0_304] {strides = array<i32: 2, 1>} : memref<178x128xf32, #tpu.memory_space<vmem>>, vector<4x128xf32>
    %c8_305 = arith.constant 8 : index
    %c0_306 = arith.constant 0 : index
    %299 = vector.load %arg6[%c8_305, %c0_306] : memref<16x128xf32, #tpu.memory_space<vmem>>, vector<4x128xf32>
    %300 = arith.addf %298, %299 : vector<4x128xf32>
    %c8_307 = arith.constant 8 : index
    %c0_308 = arith.constant 0 : index
    %301 = vector.load %arg11[%c8_307, %c0_308] : memref<32x128xf32, #tpu.memory_space<vmem>>, vector<4x128xf32>
    tpu.vector_store %arg11[%c8_307, %c0_308], %300 {strides = array<i32>} : memref<32x128xf32, #tpu.memory_space<vmem>>, vector<4x128xf32>,
    %c60_309 = arith.constant 60 : index
    %c0_310 = arith.constant 0 : index
    %302 = tpu.strided_load %arg13[%c60_309, %c0_310] {strides = array<i32: 2, 1>} : memref<178x128xf32, #tpu.memory_space<vmem>>, vector<4x128xf32>
    %c12_311 = arith.constant 12 : index
    %c0_312 = arith.constant 0 : index
    %303 = vector.load %arg6[%c12_311, %c0_312] : memref<16x128xf32, #tpu.memory_space<vmem>>, vector<4x128xf32>
    %304 = arith.addf %302, %303 : vector<4x128xf32>
    %c12_313 = arith.constant 12 : index
    %c0_314 = arith.constant 0 : index
    %305 = vector.load %arg11[%c12_313, %c0_314] : memref<32x128xf32, #tpu.memory_space<vmem>>, vector<4x128xf32>
    tpu.vector_store %arg11[%c12_313, %c0_314], %304 {strides = array<i32>} : memref<32x128xf32, #tpu.memory_space<vmem>>, vector<4x128xf32>,
    %c100_315 = arith.constant 100 : index
    %c0_316 = arith.constant 0 : index
    %306 = tpu.strided_load %arg13[%c100_315, %c0_316] {strides = array<i32: 2, 1>} : memref<178x128xf32, #tpu.memory_space<vmem>>, vector<4x128xf32>
    %c0_317 = arith.constant 0 : index
    %c0_318 = arith.constant 0 : index
    %307 = vector.load %arg6[%c0_317, %c0_318] : memref<16x128xf32, #tpu.memory_space<vmem>>, vector<4x128xf32>
    %308 = arith.addf %306, %307 : vector<4x128xf32>
    %c16 = arith.constant 16 : index
    %c0_319 = arith.constant 0 : index
    %309 = vector.load %arg11[%c16, %c0_319] : memref<32x128xf32, #tpu.memory_space<vmem>>, vector<4x128xf32>
    tpu.vector_store %arg11[%c16, %c0_319], %308 {strides = array<i32>} : memref<32x128xf32, #tpu.memory_space<vmem>>, vector<4x128xf32>,
    %c120_320 = arith.constant 120 : index
    %c0_321 = arith.constant 0 : index
    %310 = tpu.strided_load %arg13[%c120_320, %c0_321] {strides = array<i32: 2, 1>} : memref<178x128xf32, #tpu.memory_space<vmem>>, vector<4x128xf32>
    %c4_322 = arith.constant 4 : index
    %c0_323 = arith.constant 0 : index
    %311 = vector.load %arg6[%c4_322, %c0_323] : memref<16x128xf32, #tpu.memory_space<vmem>>, vector<4x128xf32>
    %312 = arith.addf %310, %311 : vector<4x128xf32>
    %c20_324 = arith.constant 20 : index
    %c0_325 = arith.constant 0 : index
    %313 = vector.load %arg11[%c20_324, %c0_325] : memref<32x128xf32, #tpu.memory_space<vmem>>, vector<4x128xf32>
    tpu.vector_store %arg11[%c20_324, %c0_325], %312 {strides = array<i32>} : memref<32x128xf32, #tpu.memory_space<vmem>>, vector<4x128xf32>,
    %c140_326 = arith.constant 140 : index
    %c0_327 = arith.constant 0 : index
    %314 = tpu.strided_load %arg13[%c140_326, %c0_327] {strides = array<i32: 2, 1>} : memref<178x128xf32, #tpu.memory_space<vmem>>, vector<4x128xf32>
    %c8_328 = arith.constant 8 : index
    %c0_329 = arith.constant 0 : index
    %315 = vector.load %arg6[%c8_328, %c0_329] : memref<16x128xf32, #tpu.memory_space<vmem>>, vector<4x128xf32>
    %316 = arith.addf %314, %315 : vector<4x128xf32>
    %c24 = arith.constant 24 : index
    %c0_330 = arith.constant 0 : index
    %317 = vector.load %arg11[%c24, %c0_330] : memref<32x128xf32, #tpu.memory_space<vmem>>, vector<4x128xf32>
    tpu.vector_store %arg11[%c24, %c0_330], %316 {strides = array<i32>} : memref<32x128xf32, #tpu.memory_space<vmem>>, vector<4x128xf32>,
    %c160_331 = arith.constant 160 : index
    %c0_332 = arith.constant 0 : index
    %318 = tpu.strided_load %arg13[%c160_331, %c0_332] {strides = array<i32: 2, 1>} : memref<178x128xf32, #tpu.memory_space<vmem>>, vector<4x128xf32>
    %c12_333 = arith.constant 12 : index
    %c0_334 = arith.constant 0 : index
    %319 = vector.load %arg6[%c12_333, %c0_334] : memref<16x128xf32, #tpu.memory_space<vmem>>, vector<4x128xf32>
    %320 = arith.addf %318, %319 : vector<4x128xf32>
    %c28 = arith.constant 28 : index
    %c0_335 = arith.constant 0 : index
    %321 = vector.load %arg11[%c28, %c0_335] : memref<32x128xf32, #tpu.memory_space<vmem>>, vector<4x128xf32>
    tpu.vector_store %arg11[%c28, %c0_335], %320 {strides = array<i32>} : memref<32x128xf32, #tpu.memory_space<vmem>>, vector<4x128xf32>,
    %c0_336 = arith.constant 0 : index
    %c0_337 = arith.constant 0 : index
    %322 = vector.load %arg11[%c0_336, %c0_337] : memref<32x128xf32, #tpu.memory_space<vmem>>, vector<16x128xf32>
    %cst_338 = arith.constant dense<0.000000e+00> : vector<128xf32>
    %323 = vector.multi_reduction <add>, %322, %cst_338 [0] : vector<16x128xf32> to vector<128xf32>
    %324 = vector.shape_cast %323 : vector<128xf32> to vector<1x128xf32>
    %cst_339 = arith.constant 1.600000e+01 : f32
    %325 = vector.broadcast %cst_339 : f32 to vector<1x128xf32>
    %326 = arith.divf %324, %325 : vector<1x128xf32>
    %327 = vector.extract_strided_slice %326 {offsets = [0, 0], sizes = [1, 8], strides = [1, 1]} : vector<1x128xf32> to vector<1x8xf32>
    %c0_340 = arith.constant 0 : index
    %c0_341 = arith.constant 0 : index
    %328 = vector.load %arg7[%c0_340, %c0_341] : memref<8x128xf32, #tpu.memory_space<vmem>>, vector<8x128xf32>
    %cst_342 = arith.constant dense<0.000000e+00> : vector<1x128xf32>
    %329 = tpu.matmul %327, %328, %cst_342 {dimension_numbers = #tpu.dot_dimension_numbers<[1], [0], [0], [1], [0, 0, 1, 1], [], []>} : vector<1x8xf32>, vector<8x128xf32>, vector<1x128xf32> -> vector<1x128xf32>
    %c0_343 = arith.constant 0 : index
    %c0_344 = arith.constant 0 : index
    %330 = vector.load %arg8[%c0_343, %c0_344] : memref<1x128xf32, #tpu.memory_space<vmem>>, vector<1x128xf32>
    %331 = arith.addf %329, %330 : vector<1x128xf32>
    %cst_345 = arith.constant 0.000000e+00 : f32
    %332 = vector.broadcast %cst_345 : f32 to vector<1x128xf32>
    %333 = arith.maximumf %331, %332 : vector<1x128xf32>
    %334 = vector.extract_strided_slice %333 {offsets = [0, 0], sizes = [1, 8], strides = [1, 1]} : vector<1x128xf32> to vector<1x8xf32>
    %c0_346 = arith.constant 0 : index
    %c0_347 = arith.constant 0 : index
    %335 = vector.load %arg9[%c0_346, %c0_347] : memref<8x128xf32, #tpu.memory_space<vmem>>, vector<8x128xf32>
    %cst_348 = arith.constant dense<0.000000e+00> : vector<1x128xf32>
    %336 = tpu.matmul %334, %335, %cst_348 {dimension_numbers = #tpu.dot_dimension_numbers<[1], [0], [0], [1], [0, 0, 1, 1], [], []>} : vector<1x8xf32>, vector<8x128xf32>, vector<1x128xf32> -> vector<1x128xf32>
    %c0_349 = arith.constant 0 : index
    %c0_350 = arith.constant 0 : index
    %337 = vector.load %arg10[%c0_349, %c0_350] : memref<1x128xf32, #tpu.memory_space<vmem>>, vector<1x128xf32>
    %338 = arith.addf %336, %337 : vector<1x128xf32>
    %339 = arith.negf %338 : vector<1x128xf32>
    %340 = math.exp %339 : vector<1x128xf32>
    %cst_351 = arith.constant 1.000000e+00 : f32
    %341 = vector.broadcast %cst_351 : f32 to vector<1x128xf32>
    %342 = arith.addf %341, %340 : vector<1x128xf32>
    %343 = arith.divf %341, %342 : vector<1x128xf32>
    %cst_352 = arith.constant 1.000000e+00 : f32
    %344 = vector.broadcast %cst_352 : f32 to vector<1x128xf32>
    %345 = arith.addf %343, %344 : vector<1x128xf32>
    %346 = vector.broadcast %345 : vector<1x128xf32> to vector<16x128xf32>
    %347 = arith.mulf %322, %346 : vector<16x128xf32>
    %c0_353 = arith.constant 0 : index
    %c0_354 = arith.constant 0 : index
    %348 = vector.load %arg11[%c0_353, %c0_354] : memref<32x128xf32, #tpu.memory_space<vmem>>, vector<16x128xf32>
    tpu.vector_store %arg11[%c0_353, %c0_354], %347 {strides = array<i32>} : memref<32x128xf32, #tpu.memory_space<vmem>>, vector<16x128xf32>,
    %c16_355 = arith.constant 16 : index
    %c0_356 = arith.constant 0 : index
    %349 = vector.load %arg11[%c16_355, %c0_356] : memref<32x128xf32, #tpu.memory_space<vmem>>, vector<16x128xf32>
    %cst_357 = arith.constant dense<0.000000e+00> : vector<128xf32>
    %350 = vector.multi_reduction <add>, %349, %cst_357 [0] : vector<16x128xf32> to vector<128xf32>
    %351 = vector.shape_cast %350 : vector<128xf32> to vector<1x128xf32>
    %cst_358 = arith.constant 1.600000e+01 : f32
    %352 = vector.broadcast %cst_358 : f32 to vector<1x128xf32>
    %353 = arith.divf %351, %352 : vector<1x128xf32>
    %354 = vector.extract_strided_slice %353 {offsets = [0, 0], sizes = [1, 8], strides = [1, 1]} : vector<1x128xf32> to vector<1x8xf32>
    %c0_359 = arith.constant 0 : index
    %c0_360 = arith.constant 0 : index
    %355 = vector.load %arg7[%c0_359, %c0_360] : memref<8x128xf32, #tpu.memory_space<vmem>>, vector<8x128xf32>
    %cst_361 = arith.constant dense<0.000000e+00> : vector<1x128xf32>
    %356 = tpu.matmul %354, %355, %cst_361 {dimension_numbers = #tpu.dot_dimension_numbers<[1], [0], [0], [1], [0, 0, 1, 1], [], []>} : vector<1x8xf32>, vector<8x128xf32>, vector<1x128xf32> -> vector<1x128xf32>
    %c0_362 = arith.constant 0 : index
    %c0_363 = arith.constant 0 : index
    %357 = vector.load %arg8[%c0_362, %c0_363] : memref<1x128xf32, #tpu.memory_space<vmem>>, vector<1x128xf32>
    %358 = arith.addf %356, %357 : vector<1x128xf32>
    %cst_364 = arith.constant 0.000000e+00 : f32
    %359 = vector.broadcast %cst_364 : f32 to vector<1x128xf32>
    %360 = arith.maximumf %358, %359 : vector<1x128xf32>
    %361 = vector.extract_strided_slice %360 {offsets = [0, 0], sizes = [1, 8], strides = [1, 1]} : vector<1x128xf32> to vector<1x8xf32>
    %c0_365 = arith.constant 0 : index
    %c0_366 = arith.constant 0 : index
    %362 = vector.load %arg9[%c0_365, %c0_366] : memref<8x128xf32, #tpu.memory_space<vmem>>, vector<8x128xf32>
    %cst_367 = arith.constant dense<0.000000e+00> : vector<1x128xf32>
    %363 = tpu.matmul %361, %362, %cst_367 {dimension_numbers = #tpu.dot_dimension_numbers<[1], [0], [0], [1], [0, 0, 1, 1], [], []>} : vector<1x8xf32>, vector<8x128xf32>, vector<1x128xf32> -> vector<1x128xf32>
    %c0_368 = arith.constant 0 : index
    %c0_369 = arith.constant 0 : index
    %364 = vector.load %arg10[%c0_368, %c0_369] : memref<1x128xf32, #tpu.memory_space<vmem>>, vector<1x128xf32>
    %365 = arith.addf %363, %364 : vector<1x128xf32>
    %366 = arith.negf %365 : vector<1x128xf32>
    %367 = math.exp %366 : vector<1x128xf32>
    %cst_370 = arith.constant 1.000000e+00 : f32
    %368 = vector.broadcast %cst_370 : f32 to vector<1x128xf32>
    %369 = arith.addf %368, %367 : vector<1x128xf32>
    %370 = arith.divf %368, %369 : vector<1x128xf32>
    %cst_371 = arith.constant 1.000000e+00 : f32
    %371 = vector.broadcast %cst_371 : f32 to vector<1x128xf32>
    %372 = arith.addf %370, %371 : vector<1x128xf32>
    %373 = vector.broadcast %372 : vector<1x128xf32> to vector<16x128xf32>
    %374 = arith.mulf %349, %373 : vector<16x128xf32>
    %c16_372 = arith.constant 16 : index
    %c0_373 = arith.constant 0 : index
    %375 = vector.load %arg11[%c16_372, %c0_373] : memref<32x128xf32, #tpu.memory_space<vmem>>, vector<16x128xf32>
    tpu.vector_store %arg11[%c16_372, %c0_373], %374 {strides = array<i32>} : memref<32x128xf32, #tpu.memory_space<vmem>>, vector<16x128xf32>,
    return
  }
}

</mosaic_0001>

<bundles_post_ra>
// kernel: forward.1
= control target key start
LH: loop header
LB: loop body
LE: loop exit
PB: predicated region body
PF: predicated region fallthrough
CT: control target
= control target key end

     0   :  { %vm353_vm0 = vcmask 1043456   ;;  %v9434_v1 = vmov 0.0   ;;  %vm9435_vm1 = vmmov 0   ;;  %vm121_vm2 = vcmask 293888   ;;  %s12519_s0 = inlined_call_operand.vmem [shape: f32[610,36], index: 0, kind: input, shape index: {}]   ;;  %s12520_s1 = inlined_call_operand.vmem [shape: f32[36,128], index: 1, kind: input, shape index: {}]   ;;  %s12521_s2 = inlined_call_operand.vmem [shape: f32[9,8,128], index: 2, kind: input, shape index: {}]   ;;  %s12522_s3 = inlined_call_operand.vmem [shape: f32[9,8,128], index: 3, kind: input, shape index: {}]   ;;  %s12523_s4 = inlined_call_operand.vmem [shape: f32[100,128], index: 4, kind: input, shape index: {}]   ;;  %s12524_s5 = inlined_call_operand.vmem [shape: f32[100,128], index: 5, kind: input, shape index: {}]   ;;  %s12525_s6 = inlined_call_operand.vmem [shape: f32[16,128], index: 6, kind: input, shape index: {}]   ;;  %s12526_s7 = inlined_call_operand.vmem [shape: f32[8,128], index: 7, kind: input, shape index: {}]   ;;  %s12527_s8 = inlined_call_operand.vmem [shape: f32[1,128], index: 8, kind: input, shape index: {}]   ;;  %s12528_s9 = inlined_call_operand.vmem [shape: f32[8,128], index: 9, kind: input, shape index: {}]   ;;  %s12529_s10 = inlined_call_operand.vmem [shape: f32[1,128], index: 10, kind: input, shape index: {}]   ;;  %s12530_s11 = inlined_call_operand.hbm [shape: f32[32,128], index: 11, kind: output, shape index: {}]  }
   0x1   :  { %v120_v0 = vld [vmem:[%s12520_s1 + $0x20] sm:$0xf]  ;;  %7852 = vmatprep.subr.mxu0 %v9434_v1  ;;  %884 = vst [vmem:[#allocation4] sm:$0xff] %v9434_v1  ;;  %885 = vst [vmem:[#allocation4 + $0x8] sm:$0xff] %v9434_v1  ;;  %v119_v2 = vld [vmem:[%s12520_s1 + $0x18] sm:$0xff]  ;;  %9391 = vmatprep.subr.mxu1 %v9434_v1 }
   0x2   :  { %886 = vst [vmem:[#allocation4 + $0x10] sm:$0xff] %v9434_v1  ;;  %887 = vst [vmem:[#allocation4 + $0x18] sm:$0xff] %v9434_v1  ;;  %7853 = vmatpush3.msk.msra.mxu0 %vm353_vm0, %v120_v0  ;;  %7862 = vmatprep.mubr.msk.f32.mxu0 %vm9435_vm1, %v9434_v1  ;;  %v118_v3 = vld [vmem:[%s12520_s1 + $0x10] sm:$0xff]  ;;  %v117_v4 = vld [vmem:[%s12520_s1 + $0x8] sm:$0xff] }
   0x3   :  { %888 = vst [vmem:[#allocation4 + $0x20] sm:$0xff] %v9434_v1  ;;  %889 = vst [vmem:[#allocation4 + $0x28] sm:$0xff] %v9434_v1  ;;  %7854 = vmatprep.subr.mxu0 %v9434_v1  ;;  %8107 = vmatprep.mubr.msk.f32.mxu1 %vm9435_vm1, %v9434_v1  ;;  %v116_v5 = vld [vmem:[%s12520_s1] sm:$0xff]  ;;  %v40_v7 = vld [vmem:[%s12519_s0 + $0x8] sm:$0xff] }
   0x4   :  { %890 = vst [vmem:[#allocation4 + $0x30] sm:$0xff] %v9434_v1  ;;  %891 = vst [vmem:[#allocation4 + $0x38] sm:$0xff] %v9434_v1  ;;  %7855 = vmatpush3.msra.mxu0 %v119_v2  ;;  %v39_v6 = vld [vmem:[%s12519_s0] sm:$0xff] }
   0x5   :  { %892 = vst [vmem:[#allocation4 + $0x40] sm:$0xff] %v9434_v1  ;;  %893 = vst [vmem:[#allocation4 + $0x48] sm:$0xff] %v9434_v1  ;;  %7856 = vmatprep.subr.mxu0 %v9434_v1 }
   0x6   :  { %894 = vst [vmem:[#allocation4 + $0x50] sm:$0xff] %v9434_v1  ;;  %895 = vst [vmem:[#allocation4 + $0x58] sm:$0xff] %v9434_v1  ;;  %7857 = vmatpush3.msra.mxu0 %v118_v3 }
   0x7   :  { %896 = vst [vmem:[#allocation4 + $0x60] sm:$0xff] %v9434_v1  ;;  %897 = vst [vmem:[#allocation4 + $0x68] sm:$0xff] %v9434_v1  ;;  %7858 = vmatprep.subr.mxu0 %v9434_v1 }
   0x8   :  { %898 = vst [vmem:[#allocation4 + $0x70] sm:$0xff] %v9434_v1  ;;  %899 = vst [vmem:[#allocation4 + $0x78] sm:$0xff] %v9434_v1  ;;  %7859 = vmatpush3.msra.mxu0 %v117_v4 }
   0x9   :  { %900 = vst [vmem:[#allocation4 + $0x80] sm:$0xff] %v9434_v1  ;;  %901 = vst [vmem:[#allocation4 + $0x88] sm:$0xff] %v9434_v1  ;;  %7860 = vmatprep.subr.mxu0 %v9434_v1 }
   0xa   :  { %902 = vst [vmem:[#allocation4 + $0x90] sm:$0xff] %v9434_v1  ;;  %903 = vst [vmem:[#allocation4 + $0x98] sm:$0xff] %v9434_v1  ;;  %7861 = vmatpush3.msra.mxu0 %v116_v5 }
   0xb   :  { %904 = vst [vmem:[#allocation4 + $0xa0] sm:$0xff] %v9434_v1  ;;  %905 = vst [vmem:[#allocation4 + $0xa8] sm:$0xff] %v9434_v1  ;;  %7863 = vmatmul.mubr.msk.f32.vlgmr.msra.gmra.mxu0 %vm121_vm2, %v39_v6  ;;  %8093 = vmatprep.subr.mxu0 %v9434_v1 }
   0xc   :  { %906 = vst [vmem:[#allocation4 + $0xb0] sm:$0xff] %v9434_v1  ;;  %907 = vst [vmem:[#allocation4 + $0xb8] sm:$0xff] %v9434_v1  ;;  %7865 = vmatprep.mubr.msk.f32.mxu0 %vm9435_vm1, %v9434_v1 }
   0xd   :  { %908 = vst [vmem:[#allocation4 + $0xc0] sm:$0xff] %v9434_v1  ;;  %3654 = vst [vmem:[#allocation5] sm:$0xff] %v9434_v1 }
   0xe   :  { %3655 = vst [vmem:[#allocation5 + $0x8] sm:$0xff] %v9434_v1  ;;  %3656 = vst [vmem:[#allocation5 + $0x10] sm:$0xff] %v9434_v1 }
   0xf   :  { %3657 = vst [vmem:[#allocation5 + $0x18] sm:$0xff] %v9434_v1  ;;  %3658 = vst [vmem:[#allocation5 + $0x20] sm:$0xff] %v9434_v1 }
  0x10   :  { %3659 = vst [vmem:[#allocation5 + $0x28] sm:$0xff] %v9434_v1  ;;  %3660 = vst [vmem:[#allocation5 + $0x30] sm:$0xff] %v9434_v1 }
  0x11   :  { %3661 = vst [vmem:[#allocation5 + $0x38] sm:$0xff] %v9434_v1  ;;  %3662 = vst [vmem:[#allocation5 + $0x40] sm:$0xff] %v9434_v1 }
  0x12   :  { %3663 = vst [vmem:[#allocation5 + $0x48] sm:$0xff] %v9434_v1  ;;  %3664 = vst [vmem:[#allocation5 + $0x50] sm:$0xff] %v9434_v1 }
  0x13   :  { %3665 = vst [vmem:[#allocation5 + $0x58] sm:$0xff] %v9434_v1  ;;  %3666 = vst [vmem:[#allocation5 + $0x60] sm:$0xff] %v9434_v1 }
  0x14   :  { %3667 = vst [vmem:[#allocation5 + $0x68] sm:$0xff] %v9434_v1  ;;  %3668 = vst [vmem:[#allocation5 + $0x70] sm:$0xff] %v9434_v1 }
  0x15   :  { %3669 = vst [vmem:[#allocation5 + $0x78] sm:$0xff] %v9434_v1  ;;  %3670 = vst [vmem:[#allocation5 + $0x80] sm:$0xff] %v9434_v1 }
  0x16   :  { %3671 = vst [vmem:[#allocation5 + $0x88] sm:$0xff] %v9434_v1  ;;  %3672 = vst [vmem:[#allocation5 + $0x90] sm:$0xff] %v9434_v1 }
  0x17   :  { %3673 = vst [vmem:[#allocation5 + $0x98] sm:$0xff] %v9434_v1  ;;  %3674 = vst [vmem:[#allocation5 + $0xa0] sm:$0xff] %v9434_v1 }
  0x18   :  { %3675 = vst [vmem:[#allocation5 + $0xa8] sm:$0xff] %v9434_v1  ;;  %3676 = vst [vmem:[#allocation5 + $0xb0] sm:$0xff] %v9434_v1 }
  0x19   :  { %3677 = vst [vmem:[#allocation5 + $0xb8] sm:$0xff] %v9434_v1  ;;  %3678 = vst [vmem:[#allocation5 + $0xc0] sm:$0xff] %v9434_v1 }
  0x1a   :  { %16 = vsyncpa [#allocation7], 0  ;;  %7866 = vmatmul.mubr.msk.f32.gmra.mxu0 %vm121_vm2, %v40_v7  ;;  %v41_v8 = vld [vmem:[%s12519_s0 + $0x10] sm:$0xff]  ;;  %v42_v9 = vld [vmem:[%s12519_s0 + $0x18] sm:$0xff]  ;;  %vm1053_vm3 = vcmask 64512   ;;  %s9436_s20 = smov [#allocation6]  }
  0x1b   :  { %7868 = vmatprep.mubr.msk.f32.mxu0 %vm9435_vm1, %v9434_v1  ;;  %v43_v10 = vld [vmem:[%s12519_s0 + $0x20] sm:$0xff]  ;;  %v44_v11 = vld [vmem:[%s12519_s0 + $0x28] sm:$0xff]  ;;  %v45_v12 = vld [vmem:[%s12519_s0 + $0x30] sm:$0xff] }
  0x1c   :  { %v46_v13 = vld [vmem:[%s12519_s0 + $0x38] sm:$0xff]  ;;  %v47_v14 = vld [vmem:[%s12519_s0 + $0x40] sm:$0xff]  ;;  %v48_v15 = vld [vmem:[%s12519_s0 + $0x48] sm:$0xff] }
  0x1d   :  { %v49_v16 = vld [vmem:[%s12519_s0 + $0x50] sm:$0xff]  ;;  %v50_v17 = vld [vmem:[%s12519_s0 + $0x58] sm:$0xff]  ;;  %v51_v18 = vld [vmem:[%s12519_s0 + $0x60] sm:$0xff] }
  0x1e   :  { %7869 = vmatmul.mubr.msk.f32.gmra.mxu0 %vm121_vm2, %v41_v8  ;;  %v52_v19 = vld [vmem:[%s12519_s0 + $0x68] sm:$0xff]  ;;  %v53_v20 = vld [vmem:[%s12519_s0 + $0x70] sm:$0xff]  ;;  %v54_v21 = vld [vmem:[%s12519_s0 + $0x78] sm:$0xff] }
  0x1f   :  { %7871 = vmatprep.mubr.msk.f32.mxu0 %vm9435_vm1, %v9434_v1  ;;  %v55_v22 = vld [vmem:[%s12519_s0 + $0x80] sm:$0xff]  ;;  %v56_v23 = vld [vmem:[%s12519_s0 + $0x88] sm:$0xff]  ;;  %v57_v24 = vld [vmem:[%s12519_s0 + $0x90] sm:$0xff] }
  0x20   :  { %v58_v25 = vld [vmem:[%s12519_s0 + $0x98] sm:$0xff]  ;;  %v59_v26 = vld [vmem:[%s12519_s0 + $0xa0] sm:$0xff]  ;;  %v60_v27 = vld [vmem:[%s12519_s0 + $0xa8] sm:$0xff] }
  0x21   :  { %v61_v28 = vld [vmem:[%s12519_s0 + $0xb0] sm:$0xff]  ;;  %v62_v29 = vld [vmem:[%s12519_s0 + $0xb8] sm:$0xff]  ;;  %v63_v30 = vld [vmem:[%s12519_s0 + $0xc0] sm:$0xff] }
  0x22   :  { %7872 = vmatmul.mubr.msk.f32.gmra.mxu0 %vm121_vm2, %v42_v9  ;;  %v64_v31 = vld [vmem:[%s12519_s0 + $0xc8] sm:$0xff]  ;;  %v65_v32 = vld [vmem:[%s12519_s0 + $0xd0] sm:$0xff]  ;;  %v66_v33 = vld [vmem:[%s12519_s0 + $0xd8] sm:$0xff] }
  0x23   :  { %7874 = vmatprep.mubr.msk.f32.mxu0 %vm9435_vm1, %v9434_v1  ;;  %v67_v34 = vld [vmem:[%s12519_s0 + $0xe0] sm:$0xff]  ;;  %v68_v35 = vld [vmem:[%s12519_s0 + $0xe8] sm:$0xff]  ;;  %v69_v36 = vld [vmem:[%s12519_s0 + $0xf0] sm:$0xff] }
  0x24   :  { %v70_v37 = vld [vmem:[%s12519_s0 + $0xf8] sm:$0xff]  ;;  %v6894_v38 = vld [vmem:[%s12521_s2 + $0x8] sm:$0xff]  ;;  %v71_v39 = vld [vmem:[%s12519_s0 + $0x100] sm:$0xff] }
  0x25   :  { %9392 = vmatpush3.msra.mxu1 %v6894_v38  ;;  %8094 = vmatpush3.msra.mxu0 %v6894_v38  ;;  %v72_v40 = vld [vmem:[%s12519_s0 + $0x108] sm:$0xff]  ;;  %v73_v41 = vld [vmem:[%s12519_s0 + $0x110] sm:$0xff]  ;;  %v74_v42 = vld [vmem:[%s12519_s0 + $0x118] sm:$0xff] }
  0x26   :  { %7875 = vmatmul.mubr.msk.f32.gmra.mxu0 %vm121_vm2, %v43_v10  ;;  %8377 = vmatprep.subr.mxu0 %v9434_v1  ;;  %v75_v43 = vld [vmem:[%s12519_s0 + $0x120] sm:$0xff]  ;;  %v76_v44 = vld [vmem:[%s12519_s0 + $0x128] sm:$0xff]  ;;  %v77_v45 = vld [vmem:[%s12519_s0 + $0x130] sm:$0xff] }
  0x27   :  { %7877 = vmatprep.mubr.msk.f32.mxu0 %vm9435_vm1, %v9434_v1  ;;  %8164 = vmatprep.subr.mxu1 %v9434_v1  ;;  %v78_v46 = vld [vmem:[%s12519_s0 + $0x138] sm:$0xff]  ;;  %v79_v47 = vld [vmem:[%s12519_s0 + $0x140] sm:$0xff]  ;;  %v80_v48 = vld [vmem:[%s12519_s0 + $0x148] sm:$0xff] }
  0x28   :  { %v81_v49 = vld [vmem:[%s12519_s0 + $0x150] sm:$0xff]  ;;  %v82_v50 = vld [vmem:[%s12519_s0 + $0x158] sm:$0xff]  ;;  %v83_v51 = vld [vmem:[%s12519_s0 + $0x160] sm:$0xff] }
  0x29   :  { %v84_v52 = vld [vmem:[%s12519_s0 + $0x168] sm:$0xff]  ;;  %v85_v53 = vld [vmem:[%s12519_s0 + $0x170] sm:$0xff]  ;;  %v86_v54 = vld [vmem:[%s12519_s0 + $0x178] sm:$0xff] }
  0x2a   :  { %7878 = vmatmul.mubr.msk.f32.gmra.mxu0 %vm121_vm2, %v44_v11  ;;  %v87_v55 = vld [vmem:[%s12519_s0 + $0x180] sm:$0xff]  ;;  %v88_v57 = vld [vmem:[%s12519_s0 + $0x188] sm:$0xff]  ;;  %v89_v60 = vld [vmem:[%s12519_s0 + $0x190] sm:$0xff] }
  0x2b   :  { %7880 = vmatprep.mubr.msk.f32.mxu0 %vm9435_vm1, %v9434_v1  ;;  %v90_v63 = vld [vmem:[%s12519_s0 + $0x198] sm:$0xff]  ;;  %v9893_v0 = vld [vmem:[%s12523_s4 + $0xb] sm:$0xff]  ;;  %v91_v6 = vld [vmem:[%s12519_s0 + $0x1a0] sm:$0xff] }
  0x2c   :  { %v92_v10 = vld [vmem:[%s12519_s0 + $0x1a8] sm:$0xff] }
  0x2e   :  { %7881 = vmatmul.mubr.msk.f32.gmra.mxu0 %vm121_vm2, %v45_v12 }
  0x2f   :  { %7883 = vmatprep.mubr.msk.f32.mxu0 %vm9435_vm1, %v9434_v1 }
  0x32   :  { %7884 = vmatmul.mubr.msk.f32.gmra.mxu0 %vm121_vm2, %v46_v13  ;;  %v93_v13 = vld [vmem:[%s12519_s0 + $0x1b0] sm:$0xff] }
  0x33   :  { %7886 = vmatprep.mubr.msk.f32.mxu0 %vm9435_vm1, %v9434_v1 }
  0x36   :  { %7887 = vmatmul.mubr.msk.f32.gmra.mxu0 %vm121_vm2, %v47_v14 }
  0x37   :  { %7889 = vmatprep.mubr.msk.f32.mxu0 %vm9435_vm1, %v9434_v1 }
  0x3a   :  { %7890 = vmatmul.mubr.msk.f32.gmra.mxu0 %vm121_vm2, %v48_v15 }
  0x3b   :  { %7892 = vmatprep.mubr.msk.f32.mxu0 %vm9435_vm1, %v9434_v1 }
  0x3e   :  { %7893 = vmatmul.mubr.msk.f32.gmra.mxu0 %vm121_vm2, %v49_v16  ;;  %v94_v16 = vld [vmem:[%s12519_s0 + $0x1b8] sm:$0xff] }
  0x3f   :  { %7895 = vmatprep.mubr.msk.f32.mxu0 %vm9435_vm1, %v9434_v1 }
  0x42   :  { %7896 = vmatmul.mubr.msk.f32.gmra.mxu0 %vm121_vm2, %v50_v17 }
  0x43   :  { %7898 = vmatprep.mubr.msk.f32.mxu0 %vm9435_vm1, %v9434_v1 }
  0x46   :  { %7899 = vmatmul.mubr.msk.f32.gmra.mxu0 %vm121_vm2, %v51_v18 }
  0x47   :  { %7901 = vmatprep.mubr.msk.f32.mxu0 %vm9435_vm1, %v9434_v1 }
  0x4a   :  { %7902 = vmatmul.mubr.msk.f32.gmra.mxu0 %vm121_vm2, %v52_v19  ;;  %v95_v19 = vld [vmem:[%s12519_s0 + $0x1c0] sm:$0xff] }
  0x4b   :  { %7904 = vmatprep.mubr.msk.f32.mxu0 %vm9435_vm1, %v9434_v1 }
  0x4e   :  { %7905 = vmatmul.mubr.msk.f32.gmra.mxu0 %vm121_vm2, %v53_v20  ;;  %v9934_v20 = vld [vmem:[%s12523_s4 + $0x15] sm:$0xff] }
  0x4f   :  { %7907 = vmatprep.mubr.msk.f32.mxu0 %vm9435_vm1, %v9434_v1 }
  0x52   :  { %7908 = vmatmul.mubr.msk.f32.gmra.mxu0 %vm121_vm2, %v54_v21 }
  0x53   :  { %7910 = vmatprep.mubr.msk.f32.mxu0 %vm9435_vm1, %v9434_v1 }
  0x56   :  { %7911 = vmatmul.mubr.msk.f32.gmra.mxu0 %vm121_vm2, %v55_v22 }
  0x57   :  { %7913 = vmatprep.mubr.msk.f32.mxu0 %vm9435_vm1, %v9434_v1 }
  0x5a   :  { %7914 = vmatmul.mubr.msk.f32.gmra.mxu0 %vm121_vm2, %v56_v23 }
  0x5b   :  { %7916 = vmatprep.mubr.msk.f32.mxu0 %vm9435_vm1, %v9434_v1 }
  0x5e   :  { %7917 = vmatmul.mubr.msk.f32.gmra.mxu0 %vm121_vm2, %v57_v24 }
  0x5f   :  { %7919 = vmatprep.mubr.msk.f32.mxu0 %vm9435_vm1, %v9434_v1 }
  0x62   :  { %7920 = vmatmul.mubr.msk.f32.gmra.mxu0 %vm121_vm2, %v58_v25  ;;  %v96_v25 = vld [vmem:[%s12519_s0 + $0x1c8] sm:$0xff] }
  0x63   :  { %7922 = vmatprep.mubr.msk.f32.mxu0 %vm9435_vm1, %v9434_v1 }
  0x66   :  { %7923 = vmatmul.mubr.msk.f32.gmra.mxu0 %vm121_vm2, %v59_v26 }
  0x67   :  { %7925 = vmatprep.mubr.msk.f32.mxu0 %vm9435_vm1, %v9434_v1 }
  0x6a   :  { %7926 = vmatmul.mubr.msk.f32.gmra.mxu0 %vm121_vm2, %v60_v27 }
  0x6b   :  { %7928 = vmatprep.mubr.msk.f32.mxu0 %vm9435_vm1, %v9434_v1 }
  0x6e   :  { %7929 = vmatmul.mubr.msk.f32.gmra.mxu0 %vm121_vm2, %v61_v28 }
  0x6f   :  { %7931 = vmatprep.mubr.msk.f32.mxu0 %vm9435_vm1, %v9434_v1 }
  0x72   :  { %7932 = vmatmul.mubr.msk.f32.gmra.mxu0 %vm121_vm2, %v62_v29  ;;  %v97_v29 = vld [vmem:[%s12519_s0 + $0x1d0] sm:$0xff] }
  0x73   :  { %7934 = vmatprep.mubr.msk.f32.mxu0 %vm9435_vm1, %v9434_v1 }
  0x76   :  { %7935 = vmatmul.mubr.msk.f32.gmra.mxu0 %vm121_vm2, %v63_v30 }
  0x77   :  { %7937 = vmatprep.mubr.msk.f32.mxu0 %vm9435_vm1, %v9434_v1 }
  0x7a   :  { %7938 = vmatmul.mubr.msk.f32.gmra.mxu0 %vm121_vm2, %v64_v31 }
  0x7b   :  { %7940 = vmatprep.mubr.msk.f32.mxu0 %vm9435_vm1, %v9434_v1 }
  0x7e   :  { %7941 = vmatmul.mubr.msk.f32.gmra.mxu0 %vm121_vm2, %v65_v32  ;;  %v98_v32 = vld [vmem:[%s12519_s0 + $0x1d8] sm:$0xff] }
  0x7f   :  { %7943 = vmatprep.mubr.msk.f32.mxu0 %vm9435_vm1, %v9434_v1 }
  0x82   :  { %7944 = vmatmul.mubr.msk.f32.gmra.mxu0 %vm121_vm2, %v66_v33 }
  0x83   :  { %7946 = vmatprep.mubr.msk.f32.mxu0 %vm9435_vm1, %v9434_v1 }
  0x86   :  { %7947 = vmatmul.mubr.msk.f32.gmra.mxu0 %vm121_vm2, %v67_v34 }
  0x87   :  { %7949 = vmatprep.mubr.msk.f32.mxu0 %vm9435_vm1, %v9434_v1 }
  0x8a   :  { %7950 = vmatmul.mubr.msk.f32.gmra.mxu0 %vm121_vm2, %v68_v35  ;;  %v99_v35 = vld [vmem:[%s12519_s0 + $0x1e0] sm:$0xff] }
  0x8b   :  { %7952 = vmatprep.mubr.msk.f32.mxu0 %vm9435_vm1, %v9434_v1 }
  0x8e   :  { %7953 = vmatmul.mubr.msk.f32.gmra.mxu0 %vm121_vm2, %v69_v36  ;;  %v9964_v36 = vld [vmem:[%s12523_s4 + $0x1f] sm:$0xff] }
  0x8f   :  { %7955 = vmatprep.mubr.msk.f32.mxu0 %vm9435_vm1, %v9434_v1 }
  0x92   :  { %7956 = vmatmul.mubr.msk.f32.gmra.mxu0 %vm121_vm2, %v70_v37 }
  0x93   :  { %7958 = vmatprep.mubr.msk.f32.mxu0 %vm9435_vm1, %v9434_v1 }
  0x96   :  { %7959 = vmatmul.mubr.msk.f32.gmra.mxu0 %vm121_vm2, %v71_v39 }
  0x97   :  { %7961 = vmatprep.mubr.msk.f32.mxu0 %vm9435_vm1, %v9434_v1 }
  0x9a   :  { %7962 = vmatmul.mubr.msk.f32.gmra.mxu0 %vm121_vm2, %v72_v40 }
  0x9b   :  { %7964 = vmatprep.mubr.msk.f32.mxu0 %vm9435_vm1, %v9434_v1 }
  0x9e   :  { %7965 = vmatmul.mubr.msk.f32.gmra.mxu0 %vm121_vm2, %v73_v41  ;;  %v100_v41 = vld [vmem:[%s12519_s0 + $0x1e8] sm:$0xff] }
  0x9f   :  { %7967 = vmatprep.mubr.msk.f32.mxu0 %vm9435_vm1, %v9434_v1 }
  0xa2   :  { %7968 = vmatmul.mubr.msk.f32.gmra.mxu0 %vm121_vm2, %v74_v42 }
  0xa3   :  { %7970 = vmatprep.mubr.msk.f32.mxu0 %vm9435_vm1, %v9434_v1 }
  0xa6   :  { %7971 = vmatmul.mubr.msk.f32.gmra.mxu0 %vm121_vm2, %v75_v43 }
  0xa7   :  { %7973 = vmatprep.mubr.msk.f32.mxu0 %vm9435_vm1, %v9434_v1 }
  0xaa   :  { %7974 = vmatmul.mubr.msk.f32.gmra.mxu0 %vm121_vm2, %v76_v44 }
  0xab   :  { %7976 = vmatprep.mubr.msk.f32.mxu0 %vm9435_vm1, %v9434_v1 }
  0xae   :  { %7977 = vmatmul.mubr.msk.f32.gmra.mxu0 %vm121_vm2, %v77_v45  ;;  %v101_v45 = vld [vmem:[%s12519_s0 + $0x1f0] sm:$0xff] }
  0xaf   :  { %7979 = vmatprep.mubr.msk.f32.mxu0 %vm9435_vm1, %v9434_v1 }
  0xb2   :  { %7980 = vmatmul.mubr.msk.f32.gmra.mxu0 %vm121_vm2, %v78_v46 }
  0xb3   :  { %7982 = vmatprep.mubr.msk.f32.mxu0 %vm9435_vm1, %v9434_v1 }
  0xb6   :  { %7983 = vmatmul.mubr.msk.f32.gmra.mxu0 %vm121_vm2, %v79_v47 }
  0xb7   :  { %7985 = vmatprep.mubr.msk.f32.mxu0 %vm9435_vm1, %v9434_v1 }
  0xba   :  { %7986 = vmatmul.mubr.msk.f32.gmra.mxu0 %vm121_vm2, %v80_v48  ;;  %v102_v48 = vld [vmem:[%s12519_s0 + $0x1f8] sm:$0xff] }
  0xbb   :  { %7988 = vmatprep.mubr.msk.f32.mxu0 %vm9435_vm1, %v9434_v1 }
  0xbe   :  { %7989 = vmatmul.mubr.msk.f32.gmra.mxu0 %vm121_vm2, %v81_v49 }
  0xbf   :  { %7991 = vmatprep.mubr.msk.f32.mxu0 %vm9435_vm1, %v9434_v1 }
  0xc2   :  { %7992 = vmatmul.mubr.msk.f32.gmra.mxu0 %vm121_vm2, %v82_v50 }
  0xc3   :  { %7994 = vmatprep.mubr.msk.f32.mxu0 %vm9435_vm1, %v9434_v1 }
  0xc6   :  { %7995 = vmatmul.mubr.msk.f32.gmra.mxu0 %vm121_vm2, %v83_v51 }
  0xc7   :  { %7997 = vmatprep.mubr.msk.f32.mxu0 %vm9435_vm1, %v9434_v1 }
  0xca   :  { %7998 = vmatmul.mubr.msk.f32.gmra.mxu0 %vm121_vm2, %v84_v52  ;;  %v103_v52 = vld [vmem:[%s12519_s0 + $0x200] sm:$0xff] }
  0xcb   :  { %8000 = vmatprep.mubr.msk.f32.mxu0 %vm9435_vm1, %v9434_v1  ;;  %v423_v56 = vpop.f32.mrf.mxu0 }
  0xcc   :  { %807 = vst [vmem:[#allocation2] sm:$0xff] %v423_v56  ;;  %v10003_v56 = vld [vmem:[%s12523_s4 + $0x29] sm:$0xff] }
  0xcd   :  { %v7864_v58 = vpop.f32.mrf.mxu0 }
  0xce   :  { %8001 = vmatmul.mubr.msk.f32.gmra.mxu0 %vm121_vm2, %v85_v53 }
  0xcf   :  { %8003 = vmatprep.mubr.msk.f32.mxu0 %vm9435_vm1, %v9434_v1 }
  0xd2   :  { %8004 = vmatmul.mubr.msk.f32.gmra.mxu0 %vm121_vm2, %v86_v54 }
  0xd3   :  { %8006 = vmatprep.mubr.msk.f32.mxu0 %vm9435_vm1, %v9434_v1 }
  0xd6   :  { %8007 = vmatmul.mubr.msk.f32.gmra.mxu0 %vm121_vm2, %v87_v55  ;;  %v104_v55 = vld [vmem:[%s12519_s0 + $0x208] sm:$0xff] }
  0xd7   :  { %8009 = vmatprep.mubr.msk.f32.mxu0 %vm9435_vm1, %v9434_v1 }
  0xda   :  { %v428_v59 = vpop.f32.mrf.mxu0  ;;  %8010 = vmatmul.mubr.msk.f32.gmra.mxu0 %vm121_vm2, %v88_v57 }
  0xdb   :  { %808 = vst [vmem:[#allocation2 + $0x8] sm:$0xff] %v428_v59  ;;  %8012 = vmatprep.mubr.msk.f32.mxu0 %vm9435_vm1, %v9434_v1 }
  0xdc   :  { %v7867_v61 = vpop.f32.mrf.mxu0 }
  0xdd   :  { %v105_v61 = vld [vmem:[%s12519_s0 + $0x210] sm:$0xff] }
  0xde   :  { %v433_v62 = vpop.f32.mrf.mxu0  ;;  %8013 = vmatmul.mubr.msk.f32.gmra.mxu0 %vm121_vm2, %v89_v60 }
  0xdf   :  { %8015 = vmatprep.mubr.msk.f32.mxu0 %vm9435_vm1, %v9434_v1 }
  0xe0   :  { %v7870_v2 = vpop.f32.mrf.mxu0 }
  0xe2   :  { %v909_v3 = vld [vmem:[#allocation2] ss:$2 sm:$0xff]  ;;  %v438_v4 = vpop.f32.mrf.mxu0  ;;  %8016 = vmatmul.mubr.msk.f32.gmra.mxu0 %vm121_vm2, %v90_v63 }
  0xe3   :  { %v9897_v5 = vadd.f32 %v9893_v0, %v909_v3  ;;  %8018 = vmatprep.mubr.msk.f32.mxu0 %vm9435_vm1, %v9434_v1  ;;  %v106_v3 = vld [vmem:[%s12519_s0 + $0x218] sm:$0xff] }
  0xe4   :  { %v7873_v7 = vpop.f32.mrf.mxu0 }
  0xe5   :  { %v912_v8 = vmax.f32 %v9897_v5, 0.0  ;;  %v107_v7 = vld [vmem:[%s12519_s0 + $0x220] sm:$0xff]  ;;  %v10142_v5 = vld [vmem:[%s12523_s4 + $0x51] sm:$0xff] }
  0xe6   :  { %v443_v9 = vpop.f32.mrf.mxu0  ;;  %8019 = vmatmul.mubr.msk.f32.gmra.mxu0 %vm121_vm2, %v91_v6 }
  0xe7   :  { %913 = vst [vmem:[#allocation4 + $0xb] sm:$0xff] %v912_v8  ;;  %811 = vst [vmem:[#allocation2 + $0x20] sm:$0xff] %v443_v9  ;;  %8021 = vmatprep.mubr.msk.f32.mxu0 %vm9435_vm1, %v9434_v1 }
  0xe8   :  { %v7876_v11 = vpop.f32.mrf.mxu0 }
  0xe9   :  { %v108_v11 = vld [vmem:[%s12519_s0 + $0x228] sm:$0xff] }
  0xea   :  { %v448_v12 = vpop.f32.mrf.mxu0  ;;  %8022 = vmatmul.mubr.msk.f32.gmra.mxu0 %vm121_vm2, %v92_v10 }
  0xeb   :  { %812 = vst [vmem:[#allocation2 + $0x28] sm:$0xff] %v448_v12  ;;  %8024 = vmatprep.mubr.msk.f32.mxu0 %vm9435_vm1, %v9434_v1  ;;  %v10036_v12 = vld [vmem:[%s12523_s4 + $0x33] sm:$0xff] }
  0xec   :  { %v7879_v14 = vpop.f32.mrf.mxu0 }
  0xee   :  { %v453_v15 = vpop.f32.mrf.mxu0  ;;  %8025 = vmatmul.mubr.msk.f32.gmra.mxu0 %vm121_vm2, %v93_v13 }
  0xef   :  { %813 = vst [vmem:[#allocation2 + $0x30] sm:$0xff] %v453_v15  ;;  %8027 = vmatprep.mubr.msk.f32.mxu0 %vm9435_vm1, %v9434_v1 }
  0xf0   :  { %v7882_v17 = vpop.f32.mrf.mxu0 }
  0xf1   :  { %v109_v17 = vld [vmem:[%s12519_s0 + $0x230] sm:$0xff] }
  0xf2   :  { %v458_v18 = vpop.f32.mrf.mxu0  ;;  %8028 = vmatmul.mubr.msk.f32.gmra.mxu0 %vm121_vm2, %v94_v16 }
  0xf3   :  { %8030 = vmatprep.mubr.msk.f32.mxu0 %vm9435_vm1, %v9434_v1 }
  0xf4   :  { %v7885_v21 = vpop.f32.mrf.mxu0 }
  0xf6   :  { %v915_v22 = vld [vmem:[#allocation2 + $0x24] ss:$2 sm:$0xff]  ;;  %v463_v23 = vpop.f32.mrf.mxu0  ;;  %8031 = vmatmul.mubr.msk.f32.gmra.mxu0 %vm121_vm2, %v95_v19 }
  0xf7   :  { %v917_v24 = vadd.f32 %v9934_v20, %v915_v22  ;;  %8033 = vmatprep.mubr.msk.f32.mxu0 %vm9435_vm1, %v9434_v1  ;;  %v110_v22 = vld [vmem:[%s12519_s0 + $0x238] sm:$0xff] }
  0xf8   :  { %v7888_v26 = vpop.f32.mrf.mxu0 }
  0xf9   :  { %v918_v27 = vmax.f32 %v917_v24, 0.0 }
  0xfa   :  { %v468_v28 = vpop.f32.mrf.mxu0  ;;  %8034 = vmatmul.mubr.msk.f32.gmra.mxu0 %vm121_vm2, %v96_v25  ;;  %v111_v25 = vld [vmem:[%s12519_s0 + $0x240] sm:$0xff] }
  0xfb   :  { %919 = vst [vmem:[#allocation4 + $0x15] sm:$0xff] %v918_v27  ;;  %816 = vst [vmem:[#allocation2 + $0x48] sm:$0xff] %v468_v28  ;;  %8036 = vmatprep.mubr.msk.f32.mxu0 %vm9435_vm1, %v9434_v1 }
  0xfc   :  { %v7891_v30 = vpop.f32.mrf.mxu0 }
  0xfe   :  { %v473_v31 = vpop.f32.mrf.mxu0  ;;  %8037 = vmatmul.mubr.msk.f32.gmra.mxu0 %vm121_vm2, %v97_v29  ;;  %v112_v29 = vld [vmem:[%s12519_s0 + $0x248] sm:$0xff] }
  0xff   :  { %817 = vst [vmem:[#allocation2 + $0x50] sm:$0xff] %v473_v31  ;;  %8039 = vmatprep.mubr.msk.f32.mxu0 %vm9435_vm1, %v9434_v1 }
 0x100   :  { %v7894_v33 = vpop.f32.mrf.mxu0 }
 0x101   :  { %v10080_v33 = vld [vmem:[%s12523_s4 + $0x3d] sm:$0xff] }
 0x102   :  { %v478_v34 = vpop.f32.mrf.mxu0  ;;  %8040 = vmatmul.mubr.msk.f32.gmra.mxu0 %vm121_vm2, %v98_v32  ;;  %v113_v32 = vld [vmem:[%s12519_s0 + $0x250] sm:$0xff] }
 0x103   :  { %8042 = vmatprep.mubr.msk.f32.mxu0 %vm9435_vm1, %v9434_v1 }
 0x104   :  { %v7897_v37 = vpop.f32.mrf.mxu0 }
 0x106   :  { %v921_v38 = vld [vmem:[#allocation2 + $0x48] ss:$2 sm:$0xff]  ;;  %v483_v39 = vpop.f32.mrf.mxu0  ;;  %8043 = vmatmul.mubr.msk.f32.gmra.mxu0 %vm121_vm2, %v99_v35 }
 0x107   :  { %v923_v40 = vadd.f32 %v9964_v36, %v921_v38  ;;  %8045 = vmatprep.mubr.msk.f32.mxu0 %vm9435_vm1, %v9434_v1  ;;  %v114_v39 = vld [vmem:[%s12519_s0 + $0x258] sm:$0xff] }
 0x108   :  { %v7900_v42 = vpop.f32.mrf.mxu0 }
 0x109   :  { %v924_v43 = vmax.f32 %v923_v40, 0.0  ;;  %v1027_v40 = vld [vmem:[%s12521_s2] sm:$0xff] }
 0x10a   :  { %v488_v44 = vpop.f32.mrf.mxu0  ;;  %8046 = vmatmul.mubr.msk.f32.gmra.mxu0 %vm121_vm2, %v100_v41 }
 0x10b   :  { %925 = vst [vmem:[#allocation4 + $0x1f] sm:$0xff] %v924_v43  ;;  %820 = vst [vmem:[#allocation2 + $0x68] sm:$0xff] %v488_v44  ;;  %8048 = vmatprep.mubr.msk.f32.mxu0 %vm9435_vm1, %v9434_v1  ;;  %v115_v44 = vld [vmem:[%s12519_s0 + $0x260] sm:$0x3] }
 0x10c   :  { %v7903_v46 = vpop.f32.mrf.mxu0 }
 0x10e   :  { %v493_v47 = vpop.f32.mrf.mxu0  ;;  %8049 = vmatmul.mubr.msk.f32.gmra.mxu0 %vm121_vm2, %v101_v45 }
 0x10f   :  { %821 = vst [vmem:[#allocation2 + $0x70] sm:$0xff] %v493_v47  ;;  %8051 = vmatprep.mubr.msk.f32.mxu0 %vm9435_vm1, %v9434_v1  ;;  %v1028_v47 = vld [vmem:[#allocation4 + $0x1] sm:$0xff] }
 0x110   :  { %v7906_v49 = vpop.f32.mrf.mxu0 }
 0x111   :  { %v6989_v49 = vld [vmem:[%s12521_s2 + $0x20] sm:$0xff] }
 0x112   :  { %v498_v50 = vpop.f32.mrf.mxu0  ;;  %8052 = vmatmul.mubr.msk.f32.gmra.mxu0 %vm121_vm2, %v102_v48  ;;  %v1032_v51 = vld [vmem:[#allocation4 + $0x21] sm:$0xff] }
 0x113   :  { %822 = vst [vmem:[#allocation2 + $0x78] sm:$0xff] %v498_v50  ;;  %8108 = vmatmul.mubr.msk.f32.vlgmr.msra.gmra.mxu1 %vm1053_vm3, %v1032_v51  ;;  %8054 = vmatprep.mubr.msk.f32.mxu0 %vm9435_vm1, %v9434_v1 }
 0x114   :  { %v7909_v53 = vpop.f32.mrf.mxu0  ;;  %8110 = vmatprep.mubr.msk.f32.mxu1 %vm9435_vm1, %v9434_v1  ;;  %8165 = vmatpush3.msra.mxu1 %v1027_v40 }
 0x115   :  { %8235 = vmatprep.subr.mxu1 %v9434_v1 }
 0x116   :  { %v503_v54 = vpop.f32.mrf.mxu0  ;;  %8055 = vmatmul.mubr.msk.f32.gmra.mxu0 %vm121_vm2, %v103_v52  ;;  %v10112_v52 = vld [vmem:[%s12523_s4 + $0x47] sm:$0xff] }
 0x117   :  { %8057 = vmatprep.mubr.msk.f32.mxu0 %vm9435_vm1, %v9434_v1  ;;  %v1029_v54 = vld [vmem:[#allocation4 + $0x9] sm:$0xff] }
 0x118   :  { %v7912_v57 = vpop.f32.mrf.mxu0 }
 0x11a   :  { %v927_v58 = vld [vmem:[#allocation2 + $0x6c] ss:$2 sm:$0xff]  ;;  %v508_v59 = vpop.f32.mrf.mxu0  ;;  %8058 = vmatmul.mubr.msk.f32.gmra.mxu0 %vm121_vm2, %v104_v55 }
 0x11b   :  { %v929_v60 = vadd.f32 %v10003_v56, %v927_v58  ;;  %8060 = vmatprep.mubr.msk.f32.mxu0 %vm9435_vm1, %v9434_v1 }
 0x11c   :  { %v7915_v62 = vpop.f32.mrf.mxu0 }
 0x11d   :  { %v930_v63 = vmax.f32 %v929_v60, 0.0 }
 0x11e   :  { %v513_v2 = vpop.f32.mrf.mxu0  ;;  %8061 = vmatmul.mubr.msk.f32.gmra.mxu0 %vm121_vm2, %v105_v61  ;;  %v1030_v61 = vld [vmem:[#allocation4 + $0x11] sm:$0xff] }
 0x11f   :  { %931 = vst [vmem:[#allocation4 + $0x29] sm:$0xff] %v930_v63  ;;  %825 = vst [vmem:[#allocation2 + $0x90] sm:$0xff] %v513_v2  ;;  %8063 = vmatprep.mubr.msk.f32.mxu0 %vm9435_vm1, %v9434_v1  ;;  %8111 = vmatmul.mubr.msk.f32.gmra.mxu1 %vm1053_vm3, %v930_v63  ;;  %v1031_v2 = vld [vmem:[#allocation4 + $0x19] sm:$0xff] }
 0x120   :  { %v7918_v4 = vpop.f32.mrf.mxu0  ;;  %8113 = vmatprep.mubr.msk.f32.mxu1 %vm9435_vm1, %v9434_v1 }
 0x122   :  { %v518_v6 = vpop.f32.mrf.mxu0  ;;  %8064 = vmatmul.mubr.msk.f32.gmra.mxu0 %vm121_vm2, %v106_v3 }
 0x123   :  { %826 = vst [vmem:[#allocation2 + $0x98] sm:$0xff] %v518_v6  ;;  %8066 = vmatprep.mubr.msk.f32.mxu0 %vm9435_vm1, %v9434_v1 }
 0x124   :  { %v7921_v9 = vpop.f32.mrf.mxu0 }
 0x126   :  { %v523_v10 = vpop.f32.mrf.mxu0  ;;  %8067 = vmatmul.mubr.msk.f32.gmra.mxu0 %vm121_vm2, %v107_v7 }
 0x127   :  { %8069 = vmatprep.mubr.msk.f32.mxu0 %vm9435_vm1, %v9434_v1  ;;  %v2147_v10 = vld [vmem:[#allocation4 + $0x13] sm:$0xff] }
 0x128   :  { %v7924_v13 = vpop.f32.mrf.mxu0 }
 0x12a   :  { %v933_v14 = vld [vmem:[#allocation2 + $0x90] ss:$2 sm:$0xff]  ;;  %v528_v15 = vpop.f32.mrf.mxu0  ;;  %8070 = vmatmul.mubr.msk.f32.gmra.mxu0 %vm121_vm2, %v108_v11 }
 0x12b   :  { %v10040_v16 = vadd.f32 %v10036_v12, %v933_v14  ;;  %8072 = vmatprep.mubr.msk.f32.mxu0 %vm9435_vm1, %v9434_v1  ;;  %v2148_v14 = vld [vmem:[#allocation4 + $0x1b] sm:$0xff] }
 0x12c   :  { %v7927_v18 = vpop.f32.mrf.mxu0 }
 0x12d   :  { %v936_v19 = vmax.f32 %v10040_v16, 0.0 }
 0x12e   :  { %v533_v21 = vpop.f32.mrf.mxu0  ;;  %8073 = vmatmul.mubr.msk.f32.gmra.mxu0 %vm121_vm2, %v109_v17 }
 0x12f   :  { %937 = vst [vmem:[#allocation4 + $0x33] sm:$0xff] %v936_v19  ;;  %829 = vst [vmem:[#allocation2 + $0xb0] sm:$0xff] %v533_v21  ;;  %8075 = vmatprep.mubr.msk.f32.mxu0 %vm9435_vm1, %v9434_v1 }
 0x130   :  { %v7930_v23 = vpop.f32.mrf.mxu0 }
 0x131   :  { %v2149_v23 = vld [vmem:[#allocation4 + $0x23] sm:$0xff] }
 0x132   :  { %v538_v24 = vpop.f32.mrf.mxu0  ;;  %8076 = vmatmul.mubr.msk.f32.gmra.mxu0 %vm121_vm2, %v110_v22 }
 0x133   :  { %830 = vst [vmem:[#allocation2 + $0xb8] sm:$0xff] %v538_v24  ;;  %8078 = vmatprep.mubr.msk.f32.mxu0 %vm9435_vm1, %v9434_v1 }
 0x134   :  { %v7933_v26 = vpop.f32.mrf.mxu0 }
 0x135   :  { %v1039_v26 = vld [vmem:[#allocation4 + $0x59] sm:$0xff] }
 0x136   :  { %v543_v27 = vpop.f32.mrf.mxu0  ;;  %8079 = vmatmul.mubr.msk.f32.gmra.mxu0 %vm121_vm2, %v111_v25  ;;  %v1034_v28 = vld [vmem:[#allocation4 + $0x31] sm:$0xff] }
 0x137   :  { %831 = vst [vmem:[#allocation2 + $0xc0] sm:$0xff] %v543_v27  ;;  %8114 = vmatmul.mubr.msk.f32.gmra.mxu1 %vm1053_vm3, %v1034_v28  ;;  %8081 = vmatprep.mubr.msk.f32.mxu0 %vm9435_vm1, %v9434_v1  ;;  %v2150_v27 = vld [vmem:[#allocation4 + $0x2b] sm:$0xff] }
 0x138   :  { %v7936_v30 = vpop.f32.mrf.mxu0  ;;  %8116 = vmatprep.mubr.msk.f32.mxu1 %vm9435_vm1, %v9434_v1 }
 0x139   :  { %v10160_v30 = vld [vmem:[#allocation4] sm:$0xff] }
 0x13a   :  { %v548_v31 = vpop.f32.mrf.mxu0  ;;  %8082 = vmatmul.mubr.msk.f32.gmra.mxu0 %vm121_vm2, %v112_v29 }
 0x13b   :  { %8084 = vmatprep.mubr.msk.f32.mxu0 %vm9435_vm1, %v9434_v1  ;;  %v1040_v31 = vld [vmem:[#allocation4 + $0x61] sm:$0xff] }
 0x13c   :  { %v7939_v34 = vpop.f32.mrf.mxu0 }
 0x13e   :  { %v939_v35 = vld [vmem:[#allocation2 + $0xb4] ss:$2 sm:$0xff]  ;;  %v553_v37 = vpop.f32.mrf.mxu0  ;;  %8085 = vmatmul.mubr.msk.f32.gmra.mxu0 %vm121_vm2, %v113_v32 }
 0x13f   :  { %v941_v38 = vadd.f32 %v10080_v33, %v939_v35  ;;  %8087 = vmatprep.mubr.msk.f32.mxu0 %vm9435_vm1, %v9434_v1 }
 0x140   :  { %v7942_v41 = vpop.f32.mrf.mxu0 }
 0x141   :  { %v942_v42 = vmax.f32 %v941_v38, 0.0 }
 0x142   :  { %v558_v43 = vpop.f32.mrf.mxu0  ;;  %8088 = vmatmul.mubr.msk.f32.gmra.mxu0 %vm121_vm2, %v114_v39 }
 0x143   :  { %943 = vst [vmem:[#allocation4 + $0x3d] sm:$0xff] %v942_v42  ;;  %834 = vst [vmem:[#allocation2 + $0xd8] sm:$0xff] %v558_v43  ;;  %8090 = vmatprep.mubr.msk.f32.mxu0 %vm9435_vm1, %v9434_v1 }
 0x144   :  { %v7945_v45 = vpop.f32.mrf.mxu0 }
 0x146   :  { %v563_v46 = vpop.f32.mrf.mxu0  ;;  %8091 = vmatmul.mubr.msk.f32.gmra.mxu0 %vm121_vm2, %v115_v44  ;;  %v2156_v44 = vld [vmem:[#allocation4 + $0x5b] sm:$0xff] }
 0x147   :  { %835 = vst [vmem:[#allocation2 + $0xe0] sm:$0xff] %v563_v46  ;;  %8095 = vmatprep.mubr.msk.f32.mxu0 %vm9435_vm1, %v9434_v1 }
 0x148   :  { %v7948_v48 = vpop.f32.mrf.mxu0 }
 0x14a   :  { %v568_v50 = vpop.f32.mrf.mxu0  ;;  %8096 = vmatmul.mubr.msk.f32.vlgmr.msra.gmra.mxu0 %vm1053_vm3, %v1028_v47  ;;  %v1035_v51 = vld [vmem:[#allocation4 + $0x39] sm:$0xff]  ;;  %v2157_v47 = vld [vmem:[#allocation4 + $0x63] sm:$0xff] }
 0x14b   :  { %8117 = vmatmul.mubr.msk.f32.gmra.mxu1 %vm1053_vm3, %v1035_v51  ;;  %8098 = vmatprep.mubr.msk.f32.mxu0 %vm9435_vm1, %v9434_v1  ;;  %v2152_v34 = vld [vmem:[#allocation4 + $0x3b] sm:$0xff] }
 0x14c   :  { %v7951_v53 = vpop.f32.mrf.mxu0  ;;  %8378 = vmatpush3.msra.mxu0 %v6989_v49  ;;  %8119 = vmatprep.mubr.msk.f32.mxu1 %vm9435_vm1, %v9434_v1 }
 0x14d   :  { %8519 = vmatprep.subr.mxu0 %v9434_v1 }
 0x14e   :  { %v945_v55 = vld [vmem:[#allocation2 + $0xd8] ss:$2 sm:$0xff]  ;;  %v573_v57 = vpop.f32.mrf.mxu0  ;;  %8099 = vmatmul.mubr.msk.f32.gmra.mxu0 %vm1053_vm3, %v1029_v54 }
 0x14f   :  { %v947_v58 = vadd.f32 %v10112_v52, %v945_v55  ;;  %8101 = vmatprep.mubr.msk.f32.mxu0 %vm9435_vm1, %v9434_v1 }
 0x150   :  { %v7954_v59 = vpop.f32.mrf.mxu0 }
 0x151   :  { %v948_v60 = vmax.f32 %v947_v58, 0.0 }
 0x152   :  { %v578_v62 = vpop.f32.mrf.mxu0  ;;  %8102 = vmatmul.mubr.msk.f32.gmra.mxu0 %vm1053_vm3, %v1030_v61 }
 0x153   :  { %949 = vst [vmem:[#allocation4 + $0x47] sm:$0xff] %v948_v60  ;;  %838 = vst [vmem:[#allocation2 + $0xf8] sm:$0xff] %v578_v62  ;;  %8104 = vmatprep.mubr.msk.f32.mxu0 %vm9435_vm1, %v9434_v1 }
 0x154   :  { %v7957_v63 = vpop.f32.mrf.mxu0 }
 0x156   :  { %v583_v3 = vpop.f32.mrf.mxu0  ;;  %8105 = vmatmul.mubr.msk.f32.gmra.mxu0 %vm1053_vm3, %v1031_v2 }
 0x157   :  { %839 = vst [vmem:[#allocation2 + $0x100] sm:$0xff] %v583_v3  ;;  %8379 = vmatprep.mubr.msk.f32.mxu0 %vm9435_vm1, %v9434_v1 }
 0x158   :  { %v7960_v4 = vpop.f32.mrf.mxu0 }
 0x159   :  { %v7037_v4 = vld [vmem:[%s12521_s2 + $0x30] sm:$0xff] }
 0x15a   :  { %v588_v6 = vpop.f32.mrf.mxu0  ;;  %8380 = vmatmul.mubr.msk.f32.vlgmr.msra.gmra.mxu0 %vm1053_vm3, %v912_v8  ;;  %v1036_v7 = vld [vmem:[#allocation4 + $0x41] sm:$0xff]  ;;  %v1037_v13 = vld [vmem:[#allocation4 + $0x49] sm:$0xff] }
 0x15b   :  { %840 = vst [vmem:[#allocation2 + $0x108] sm:$0xff] %v588_v6  ;;  %8120 = vmatmul.mubr.msk.f32.gmra.mxu1 %vm1053_vm3, %v1036_v7  ;;  %8382 = vmatprep.mubr.msk.f32.mxu0 %vm9435_vm1, %v9434_v1  ;;  %v2153_v16 = vld [vmem:[#allocation4 + $0x43] sm:$0xff] }
 0x15c   :  { %v7963_v9 = vpop.f32.mrf.mxu0  ;;  %8122 = vmatprep.mubr.msk.f32.mxu1 %vm9435_vm1, %v9434_v1  ;;  %8520 = vmatpush3.msra.mxu0 %v7037_v4 }
 0x15d   :  { %8661 = vmatprep.subr.mxu0 %v10160_v30 }
 0x15e   :  { %v593_v11 = vpop.f32.mrf.mxu0  ;;  %8383 = vmatmul.mubr.msk.f32.gmra.mxu0 %vm1053_vm3, %v2147_v10 }
 0x15f   :  { %8123 = vmatmul.mubr.msk.f32.gmra.mxu1 %vm1053_vm3, %v1037_v13  ;;  %8385 = vmatprep.mubr.msk.f32.mxu0 %vm9435_vm1, %v9434_v1 }
 0x160   :  { %v7966_v8 = vpop.f32.mrf.mxu0  ;;  %8125 = vmatprep.mubr.msk.f32.mxu1 %vm9435_vm1, %v9434_v1 }
 0x162   :  { %v951_v15 = vld [vmem:[#allocation2 + $0xfc] ss:$2 sm:$0xff]  ;;  %v598_v17 = vpop.f32.mrf.mxu0  ;;  %8386 = vmatmul.mubr.msk.f32.gmra.mxu0 %vm1053_vm3, %v2148_v14 }
 0x163   :  { %v953_v18 = vadd.f32 %v10142_v5, %v951_v15  ;;  %8388 = vmatprep.mubr.msk.f32.mxu0 %vm9435_vm1, %v9434_v1 }
 0x164   :  { %v7969_v21 = vpop.f32.mrf.mxu0 }
 0x165   :  { %v954_v22 = vmax.f32 %v953_v18, 0.0 }
 0x166   :  { %v603_v24 = vpop.f32.mrf.mxu0  ;;  %8389 = vmatmul.mubr.msk.f32.gmra.mxu0 %vm1053_vm3, %v2149_v23 }
 0x167   :  { %955 = vst [vmem:[#allocation4 + $0x51] sm:$0xff] %v954_v22  ;;  %8391 = vmatprep.mubr.msk.f32.mxu0 %vm9435_vm1, %v9434_v1  ;;  %8126 = vmatmul.mubr.msk.f32.gmra.mxu1 %vm1053_vm3, %v954_v22 }
 0x168   :  { %v7972_v25 = vpop.f32.mrf.mxu0  ;;  %8128 = vmatprep.mubr.msk.f32.mxu1 %vm9435_vm1, %v9434_v1 }
 0x16a   :  { %v608_v28 = vpop.f32.mrf.mxu0  ;;  %8392 = vmatmul.mubr.msk.f32.gmra.mxu0 %vm1053_vm3, %v2150_v27 }
 0x16b   :  { %8394 = vmatprep.mubr.msk.f32.mxu0 %vm9435_vm1, %v9434_v1  ;;  %8129 = vmatmul.mubr.msk.f32.gmra.mxu1 %vm1053_vm3, %v1039_v26 }
 0x16c   :  { %v7975_v29 = vpop.f32.mrf.mxu0  ;;  %8131 = vmatprep.mubr.msk.f32.mxu1 %vm9435_vm1, %v10160_v30 }
 0x16e   :  { %v613_v32 = vpop.f32.mrf.mxu0  ;;  %8395 = vmatmul.mubr.msk.f32.gmra.mxu0 %vm1053_vm3, %v936_v19  ;;  %v2154_v39 = vld [vmem:[#allocation4 + $0x4b] sm:$0xff]  ;;  %v2155_v42 = vld [vmem:[#allocation4 + $0x53] sm:$0xff] }
 0x16f   :  { %8397 = vmatprep.mubr.msk.f32.mxu0 %vm9435_vm1, %v10160_v30  ;;  %8132 = vmatmul.mubr.msk.f32.gmra.mxu1 %vm1053_vm3, %v1040_v31 }
 0x170   :  { %v7978_v1 = vpop.f32.mrf.mxu0  ;;  %8134 = vmatprep.mubr.msk.f32.mxu1 %vm9435_vm1, %v10160_v30 }
 0x172   :  { %v618_v35 = vpop.f32.mrf.mxu0  ;;  %8398 = vmatmul.mubr.msk.f32.gmra.mxu0 %vm1053_vm3, %v2152_v34 }
 0x173   :  { %8400 = vmatprep.mubr.msk.f32.mxu0 %vm9435_vm1, %v10160_v30 }
 0x174   :  { %v7981_v37 = vpop.f32.mrf.mxu0 }
 0x176   :  { %v623_v38 = vpop.f32.mrf.mxu0  ;;  %8401 = vmatmul.mubr.msk.f32.gmra.mxu0 %vm1053_vm3, %v2153_v16 }
 0x177   :  { %847 = vst [vmem:[#allocation2 + $0x140] sm:$0xff] %v623_v38  ;;  %8403 = vmatprep.mubr.msk.f32.mxu0 %vm9435_vm1, %v10160_v30 }
 0x178   :  { %v7984_v19 = vpop.f32.mrf.mxu0 }
 0x17a   :  { %v628_v40 = vpop.f32.mrf.mxu0  ;;  %8404 = vmatmul.mubr.msk.f32.gmra.mxu0 %vm1053_vm3, %v2154_v39 }
 0x17b   :  { %848 = vst [vmem:[#allocation2 + $0x148] sm:$0xff] %v628_v40  ;;  %8406 = vmatprep.mubr.msk.f32.mxu0 %vm9435_vm1, %v10160_v30 }
 0x17c   :  { %v7987_v41 = vpop.f32.mrf.mxu0 }
 0x17e   :  { %v633_v43 = vpop.f32.mrf.mxu0  ;;  %8407 = vmatmul.mubr.msk.f32.gmra.mxu0 %vm1053_vm3, %v2155_v42 }
 0x17f   :  { %849 = vst [vmem:[#allocation2 + $0x150] sm:$0xff] %v633_v43  ;;  %8409 = vmatprep.mubr.msk.f32.mxu0 %vm9435_vm1, %v10160_v30 }
 0x180   :  { %v7990_v45 = vpop.f32.mrf.mxu0 }
 0x182   :  { %v638_v46 = vpop.f32.mrf.mxu0  ;;  %8410 = vmatmul.mubr.msk.f32.gmra.mxu0 %vm1053_vm3, %v2156_v44 }
 0x183   :  { %8412 = vmatprep.mubr.msk.f32.mxu0 %vm9435_vm1, %v10160_v30 }
 0x184   :  { %v7993_v48 = vpop.f32.mrf.mxu0 }
 0x186   :  { %v957_v49 = vld [vmem:[#allocation2 + $0x144] ss:$2 sm:$0xff]  ;;  %v643_v50 = vpop.f32.mrf.mxu0  ;;  %8413 = vmatmul.mubr.msk.f32.gmra.mxu0 %vm1053_vm3, %v2157_v47 }
 0x187   :  { %v959_v51 = vadd.f32 %v957_v49, %v9893_v0  ;;  %8415 = vmatprep.mubr.msk.f32.mxu0 %vm9435_vm1, %v10160_v30 }
 0x188   :  { %v7996_v53 = vpop.f32.mrf.mxu0 }
 0x189   :  { %v960_v54 = vmax.f32 %v959_v51, 0.0 }
 0x18a   :  { %v648_v55 = vpop.f32.mrf.mxu0 }
 0x18b   :  { %961 = vst [vmem:[#allocation4 + $0x6f] sm:$0xff] %v960_v54  ;;  %852 = vst [vmem:[#allocation2 + $0x168] sm:$0xff] %v648_v55 }
 0x18c   :  { %v7999_v57 = vpop.f32.mrf.mxu0 }
 0x18e   :  { %v653_v58 = vpop.f32.mrf.mxu0 }
 0x18f   :  { %853 = vst [vmem:[#allocation2 + $0x170] sm:$0xff] %v653_v58 }
 0x190   :  { %v8002_v59 = vpop.f32.mrf.mxu0 }
 0x192   :  { %v658_v60 = vpop.f32.mrf.mxu0  ;;  %v1041_v61 = vld [vmem:[#allocation4 + $0x69] sm:$0xff]  ;;  %v1042_v3 = vld [vmem:[#allocation4 + $0x71] sm:$0xff] }
 0x193   :  { %v2158_v62 = vld [vmem:[#allocation4 + $0x6b] sm:$0xff]  ;;  %8135 = vmatmul.mubr.msk.f32.gmra.mxu1 %vm1053_vm3, %v1041_v61 }
 0x194   :  { %8416 = vmatmul.mubr.msk.f32.gmra.mxu0 %vm1053_vm3, %v2158_v62  ;;  %v8005_v0 = vpop.f32.mrf.mxu0  ;;  %8137 = vmatprep.mubr.msk.f32.mxu1 %vm9435_vm1, %v10160_v30 }
 0x195   :  { %8418 = vmatprep.mubr.msk.f32.mxu0 %vm9435_vm1, %v10160_v30 }
 0x196   :  { %v963_v63 = vld [vmem:[#allocation2 + $0x168] ss:$2 sm:$0xff]  ;;  %v663_v2 = vpop.f32.mrf.mxu0 }
 0x197   :  { %v965_v6 = vadd.f32 %v963_v63, %v9934_v20  ;;  %8138 = vmatmul.mubr.msk.f32.gmra.mxu1 %vm1053_vm3, %v1042_v3 }
 0x198   :  { %v8008_v7 = vpop.f32.mrf.mxu0  ;;  %8140 = vmatprep.mubr.msk.f32.mxu1 %vm9435_vm1, %v10160_v30 }
 0x199   :  { %v966_v9 = vmax.f32 %v965_v6, 0.0 }
 0x19a   :  { %v668_v10 = vpop.f32.mrf.mxu0 }
 0x19b   :  { %967 = vst [vmem:[#allocation4 + $0x79] sm:$0xff] %v966_v9  ;;  %856 = vst [vmem:[#allocation2 + $0x188] sm:$0xff] %v668_v10  ;;  %8141 = vmatmul.mubr.msk.f32.gmra.mxu1 %vm1053_vm3, %v966_v9 }
 0x19c   :  { %v8011_v11 = vpop.f32.mrf.mxu0  ;;  %8143 = vmatprep.mubr.msk.f32.mxu1 %vm9435_vm1, %v10160_v30 }
 0x19e   :  { %v673_v20 = vpop.f32.mrf.mxu0 }
 0x19f   :  { %857 = vst [vmem:[#allocation2 + $0x190] sm:$0xff] %v673_v20 }
 0x1a0   :  { %v8014_v13 = vpop.f32.mrf.mxu0 }
 0x1a2   :  { %v678_v8 = vpop.f32.mrf.mxu0  ;;  %v2159_v14 = vld [vmem:[#allocation4 + $0x73] sm:$0xff]  ;;  %v2160_v18 = vld [vmem:[#allocation4 + $0x7b] sm:$0xff] }
 0x1a3   :  { %858 = vst [vmem:[#allocation2 + $0x198] sm:$0xff] %v678_v8  ;;  %8419 = vmatmul.mubr.msk.f32.gmra.mxu0 %vm1053_vm3, %v2159_v14 }
 0x1a4   :  { %v8017_v15 = vpop.f32.mrf.mxu0  ;;  %8421 = vmatprep.mubr.msk.f32.mxu0 %vm9435_vm1, %v10160_v30 }
 0x1a6   :  { %v683_v17 = vpop.f32.mrf.mxu0 }
 0x1a7   :  { %8422 = vmatmul.mubr.msk.f32.gmra.mxu0 %vm1053_vm3, %v2160_v18 }
 0x1a8   :  { %v8020_v21 = vpop.f32.mrf.mxu0  ;;  %8424 = vmatprep.mubr.msk.f32.mxu0 %vm9435_vm1, %v10160_v30 }
 0x1aa   :  { %v969_v22 = vld [vmem:[#allocation2 + $0x18c] ss:$2 sm:$0xff]  ;;  %v688_v23 = vpop.f32.mrf.mxu0 }
 0x1ab   :  { %v971_v24 = vadd.f32 %v969_v22, %v9964_v36 }
 0x1ac   :  { %v8023_v25 = vpop.f32.mrf.mxu0 }
 0x1ad   :  { %v972_v26 = vmax.f32 %v971_v24, 0.0 }
 0x1ae   :  { %v693_v27 = vpop.f32.mrf.mxu0 }
 0x1af   :  { %973 = vst [vmem:[#allocation4 + $0x83] sm:$0xff] %v972_v26  ;;  %861 = vst [vmem:[#allocation2 + $0x1b0] sm:$0xff] %v693_v27  ;;  %8425 = vmatmul.mubr.msk.f32.gmra.mxu0 %vm1053_vm3, %v972_v26 }
 0x1b0   :  { %v8026_v28 = vpop.f32.mrf.mxu0  ;;  %8427 = vmatprep.mubr.msk.f32.mxu0 %vm9435_vm1, %v10160_v30 }
 0x1b2   :  { %v698_v29 = vpop.f32.mrf.mxu0 }
 0x1b3   :  { %862 = vst [vmem:[#allocation2 + $0x1b8] sm:$0xff] %v698_v29 }
 0x1b4   :  { %v8029_v31 = vpop.f32.mrf.mxu0 }
 0x1b6   :  { %v703_v32 = vpop.f32.mrf.mxu0  ;;  %v1044_v1 = vld [vmem:[#allocation4 + $0x81] sm:$0xff] }
 0x1b7   :  { %8144 = vmatmul.mubr.msk.f32.gmra.mxu1 %vm1053_vm3, %v1044_v1 }
 0x1b8   :  { %v8032_v34 = vpop.f32.mrf.mxu0  ;;  %8146 = vmatprep.mubr.msk.f32.mxu1 %vm9435_vm1, %v10160_v30 }
 0x1ba   :  { %v975_v36 = vld [vmem:[#allocation2 + $0x1b0] ss:$2 sm:$0xff]  ;;  %v708_v35 = vpop.f32.mrf.mxu0 }
 0x1bb   :  { %v977_v37 = vadd.f32 %v975_v36, %v10003_v56 }
 0x1bc   :  { %v8035_v16 = vpop.f32.mrf.mxu0 }
 0x1bd   :  { %v978_v38 = vmax.f32 %v977_v37, 0.0 }
 0x1be   :  { %v713_v19 = vpop.f32.mrf.mxu0 }
 0x1bf   :  { %979 = vst [vmem:[#allocation4 + $0x8d] sm:$0xff] %v978_v38  ;;  %865 = vst [vmem:[#allocation2 + $0x1d0] sm:$0xff] %v713_v19 }
 0x1c0   :  { %v8038_v39 = vpop.f32.mrf.mxu0 }
 0x1c1   :  { %v6941_v39 = vld [vmem:[%s12521_s2 + $0x10] sm:$0xff] }
 0x1c2   :  { %v718_v40 = vpop.f32.mrf.mxu0 }
 0x1c3   :  { %866 = vst [vmem:[#allocation2 + $0x1d8] sm:$0xff] %v718_v40 }
 0x1c4   :  { %v8041_v41 = vpop.f32.mrf.mxu0 }
 0x1c6   :  { %v723_v42 = vpop.f32.mrf.mxu0  ;;  %v1045_v43 = vld [vmem:[#allocation4 + $0x89] sm:$0xff] }
 0x1c7   :  { %v2162_v44 = vld [vmem:[#allocation4 + $0x8b] sm:$0xff]  ;;  %867 = vst [vmem:[#allocation2 + $0x1e0] sm:$0xff] %v723_v42  ;;  %8147 = vmatmul.mubr.msk.f32.gmra.mxu1 %vm1053_vm3, %v1045_v43 }
 0x1c8   :  { %8428 = vmatmul.mubr.msk.f32.gmra.mxu0 %vm1053_vm3, %v2162_v44  ;;  %v8044_v45 = vpop.f32.mrf.mxu0  ;;  %8149 = vmatprep.mubr.msk.f32.mxu1 %vm9435_vm1, %v10160_v30  ;;  %v1005_v42 = vld [vmem:[#allocation4 + $0x8] sm:$0xff] }
 0x1c9   :  { %8430 = vmatprep.mubr.msk.f32.mxu0 %vm9435_vm1, %v10160_v30 }
 0x1ca   :  { %v728_v56 = vpop.f32.mrf.mxu0 }
 0x1cc   :  { %v8047_v46 = vpop.f32.mrf.mxu0 }
 0x1cd   :  { %v1006_v46 = vld [vmem:[#allocation4 + $0x10] sm:$0xff] }
 0x1ce   :  { %v981_v47 = vld [vmem:[#allocation2 + $0x1d4] ss:$2 sm:$0xff]  ;;  %v733_v48 = vpop.f32.mrf.mxu0 }
 0x1cf   :  { %v983_v49 = vadd.f32 %v981_v47, %v10036_v12 }
 0x1d0   :  { %v8050_v50 = vpop.f32.mrf.mxu0 }
 0x1d1   :  { %v984_v51 = vmax.f32 %v983_v49, 0.0 }
 0x1d2   :  { %v738_v53 = vpop.f32.mrf.mxu0 }
 0x1d3   :  { %985 = vst [vmem:[#allocation4 + $0x97] sm:$0xff] %v984_v51  ;;  %870 = vst [vmem:[#allocation2 + $0x1f8] sm:$0xff] %v738_v53  ;;  %v10229_v54 = vpop.f32.mrf.mxu1  ;;  %v1007_v51 = vld [vmem:[#allocation4 + $0x18] sm:$0xff] }
 0x1d4   :  { %v8053_v55 = vpop.f32.mrf.mxu0 }
 0x1d5   :  { %v8109_v57 = vpop.f32.mrf.mxu1 }
 0x1d6   :  { %v743_v58 = vpop.f32.mrf.mxu0  ;;  %v1008_v57 = vld [vmem:[#allocation4 + $0x20] sm:$0xff] }
 0x1d7   :  { %871 = vst [vmem:[#allocation2 + $0x200] sm:$0xff] %v743_v58  ;;  %v2740_v58 = vld [vmem:[#allocation4 + $0x14] sm:$0xff] }
 0x1d8   :  { %v8056_v59 = vpop.f32.mrf.mxu0 }
 0x1d9   :  { %v7085_v59 = vld [vmem:[%s12521_s2 + $0x40] sm:$0xff] }
 0x1da   :  { %v748_v60 = vpop.f32.mrf.mxu0  ;;  %v1046_v61 = vld [vmem:[#allocation4 + $0x91] sm:$0xff]  ;;  %v1047_v2 = vld [vmem:[#allocation4 + $0x99] sm:$0xff] }
 0x1db   :  { %v2163_v62 = vld [vmem:[#allocation4 + $0x93] sm:$0xff]  ;;  %8150 = vmatmul.mubr.msk.f32.gmra.mxu1 %vm1053_vm3, %v1046_v61 }
 0x1dc   :  { %8431 = vmatmul.mubr.msk.f32.gmra.mxu0 %vm1053_vm3, %v2163_v62  ;;  %v8059_v12 = vpop.f32.mrf.mxu0  ;;  %8152 = vmatprep.mubr.msk.f32.mxu1 %vm9435_vm1, %v10160_v30  ;;  %v1009_v62 = vld [vmem:[#allocation4 + $0x28] sm:$0xff] }
 0x1dd   :  { %8433 = vmatprep.mubr.msk.f32.mxu0 %vm9435_vm1, %v10160_v30  ;;  %v2741_v12 = vld [vmem:[#allocation4 + $0x1c] sm:$0xff] }
 0x1de   :  { %v987_v0 = vld [vmem:[#allocation2 + $0x1f8] ss:$2 sm:$0xff]  ;;  %v753_v63 = vpop.f32.mrf.mxu0 }
 0x1df   :  { %v989_v3 = vadd.f32 %v987_v0, %v10080_v33  ;;  %8153 = vmatmul.mubr.msk.f32.gmra.mxu1 %vm1053_vm3, %v1047_v2  ;;  %v10239_v4 = vpop.f32.mrf.mxu1 }
 0x1e0   :  { %v8062_v6 = vpop.f32.mrf.mxu0  ;;  %8155 = vmatprep.mubr.msk.f32.mxu1 %vm9435_vm1, %v10160_v30 }
 0x1e1   :  { %v990_v7 = vmax.f32 %v989_v3, 0.0  ;;  %v8112_v9 = vpop.f32.mrf.mxu1  ;;  %v1010_v6 = vld [vmem:[#allocation4 + $0x30] sm:$0xff] }
 0x1e2   :  { %v758_v10 = vpop.f32.mrf.mxu0 }
 0x1e3   :  { %991 = vst [vmem:[#allocation4 + $0xa1] sm:$0xff] %v990_v7  ;;  %874 = vst [vmem:[#allocation2 + $0x218] sm:$0xff] %v758_v10  ;;  %8156 = vmatmul.mubr.msk.f32.gmra.mxu1 %vm1053_vm3, %v990_v7  ;;  %v2742_v7 = vld [vmem:[#allocation4 + $0x24] sm:$0xff] }
 0x1e4   :  { %v8065_v11 = vpop.f32.mrf.mxu0  ;;  %8158 = vmatprep.mubr.msk.f32.mxu1 %vm9435_vm1, %v10160_v30 }
 0x1e6   :  { %v763_v33 = vpop.f32.mrf.mxu0 }
 0x1e7   :  { %875 = vst [vmem:[#allocation2 + $0x220] sm:$0xff] %v763_v33 }
 0x1e8   :  { %v8068_v20 = vpop.f32.mrf.mxu0 }
 0x1e9   :  { %v1011_v20 = vld [vmem:[#allocation4 + $0x38] sm:$0xff] }
 0x1ea   :  { %v768_v13 = vpop.f32.mrf.mxu0  ;;  %v2164_v8 = vld [vmem:[#allocation4 + $0x9b] sm:$0xff]  ;;  %v2165_v17 = vld [vmem:[#allocation4 + $0xa3] sm:$0xff] }
 0x1eb   :  { %876 = vst [vmem:[#allocation2 + $0x228] sm:$0xff] %v768_v13  ;;  %8434 = vmatmul.mubr.msk.f32.gmra.mxu0 %vm1053_vm3, %v2164_v8  ;;  %v2743_v13 = vld [vmem:[#allocation4 + $0x2c] sm:$0xff] }
 0x1ec   :  { %v8071_v14 = vpop.f32.mrf.mxu0  ;;  %8436 = vmatprep.mubr.msk.f32.mxu0 %vm9435_vm1, %v10160_v30 }
 0x1ee   :  { %v773_v15 = vpop.f32.mrf.mxu0 }
 0x1ef   :  { %8437 = vmatmul.mubr.msk.f32.gmra.mxu0 %vm1053_vm3, %v2165_v17  ;;  %v1012_v15 = vld [vmem:[#allocation4 + $0x40] sm:$0xff]  ;;  %v2744_v17 = vld [vmem:[#allocation4 + $0x34] sm:$0xff] }
 0x1f0   :  { %v8074_v18 = vpop.f32.mrf.mxu0  ;;  %8439 = vmatprep.mubr.msk.f32.mxu0 %vm9435_vm1, %v10160_v30 }
 0x1f2   :  { %v993_v21 = vld [vmem:[#allocation2 + $0x21c] ss:$2 sm:$0xff]  ;;  %v778_v22 = vpop.f32.mrf.mxu0 }
 0x1f3   :  { %v995_v23 = vadd.f32 %v993_v21, %v10112_v52 }
 0x1f4   :  { %v8077_v24 = vpop.f32.mrf.mxu0 }
 0x1f5   :  { %v996_v25 = vmax.f32 %v995_v23, 0.0  ;;  %v1013_v24 = vld [vmem:[#allocation4 + $0x48] sm:$0xff] }
 0x1f6   :  { %v783_v26 = vpop.f32.mrf.mxu0 }
 0x1f7   :  { %997 = vst [vmem:[#allocation4 + $0xab] sm:$0xff] %v996_v25  ;;  %879 = vst [vmem:[#allocation2 + $0x240] sm:$0xff] %v783_v26  ;;  %v10253_v27 = vpop.f32.mrf.mxu1  ;;  %8440 = vmatmul.mubr.msk.f32.gmra.mxu0 %vm1053_vm3, %v996_v25  ;;  %v2745_v25 = vld [vmem:[#allocation4 + $0x3c] sm:$0xff] }
 0x1f8   :  { %v8080_v28 = vpop.f32.mrf.mxu0  ;;  %8442 = vmatprep.mubr.msk.f32.mxu0 %vm9435_vm1, %v10160_v30 }
 0x1f9   :  { %v8115_v29 = vpop.f32.mrf.mxu1 }
 0x1fa   :  { %v788_v31 = vpop.f32.mrf.mxu0 }
 0x1fb   :  { %880 = vst [vmem:[#allocation2 + $0x248] sm:$0xff] %v788_v31 }
 0x1fc   :  { %v8083_v32 = vpop.f32.mrf.mxu0 }
 0x1fd   :  { %v1014_v32 = vld [vmem:[#allocation4 + $0x50] sm:$0xff] }
 0x1fe   :  { %v793_v1 = vpop.f32.mrf.mxu0  ;;  %v1049_v34 = vld [vmem:[#allocation4 + $0xa9] sm:$0xff]  ;;  %v1050_v37 = vld [vmem:[#allocation4 + $0xb1] sm:$0x3] }
 0x1ff   :  { %8159 = vmatmul.mubr.msk.f32.gmra.mxu1 %vm1053_vm3, %v1049_v34  ;;  %v2746_v1 = vld [vmem:[#allocation4 + $0x44] sm:$0xff] }
 0x200   :  { %v8086_v52 = vpop.f32.mrf.mxu0  ;;  %8161 = vmatprep.mubr.msk.f32.mxu1 %vm9435_vm1, %v10160_v30 }
 0x202   :  { %v999_v36 = vld [vmem:[#allocation2 + $0x240] ss:$2 sm:$0xff]  ;;  %v798_v35 = vpop.f32.mrf.mxu0 }
 0x203   :  { %v1001_v16 = vadd.f32 %v999_v36, %v10142_v5  ;;  %8162 = vmatmul.mubr.msk.f32.gmra.mxu1 %vm1053_vm3, %v1050_v37  ;;  %v1015_v37 = vld [vmem:[#allocation4 + $0x58] sm:$0xff] }
 0x204   :  { %v8089_v38 = vpop.f32.mrf.mxu0  ;;  %8166 = vmatprep.mubr.msk.f32.mxu1 %vm9435_vm1, %v10160_v30 }
 0x205   :  { %v1002_v19 = vmax.f32 %v1001_v16, 0.0  ;;  %v2747_v16 = vld [vmem:[#allocation4 + $0x4c] sm:$0xff] }
 0x206   :  { %v803_v40 = vpop.f32.mrf.mxu0 }
 0x207   :  { %1003 = vst [vmem:[#allocation4 + $0xb5] sm:$0xff] %v1002_v19  ;;  %8167 = vmatmul.mubr.msk.f32.vlgmr.msra.gmra.mxu1 %vm1053_vm3, %v10160_v30 }
 0x208   :  { %8236 = vmatpush3.msra.mxu1 %v6941_v39  ;;  %v8092_v41 = vpop.f32.mrf.mxu0  ;;  %8169 = vmatprep.mubr.msk.f32.mxu1 %vm9435_vm1, %v10160_v30  ;;  %v2748_v39 = vld [vmem:[#allocation4 + $0x54] sm:$0xff] }
 0x209   :  { %8306 = vmatprep.subr.mxu1 %v10160_v30  ;;  %v2749_v41 = vld [vmem:[#allocation4 + $0x5c] sm:$0xff] }
 0x20a   :  { %v10273_v5 = vpop.f32.mrf.mxu0 }
 0x20b   :  { %v10275_v43 = vpop.f32.mrf.mxu1  ;;  %8170 = vmatmul.mubr.msk.f32.gmra.mxu1 %vm1053_vm3, %v1005_v42 }
 0x20c   :  { %v8097_v44 = vpop.f32.mrf.mxu0  ;;  %8172 = vmatprep.mubr.msk.f32.mxu1 %vm9435_vm1, %v10160_v30 }
 0x20d   :  { %v8118_v45 = vpop.f32.mrf.mxu1  ;;  %v1017_v44 = vld [vmem:[#allocation4 + $0x68] sm:$0xff] }
 0x20e   :  { %v10280_v56 = vpop.f32.mrf.mxu0  ;;  %v2167_v47 = vld [vmem:[#allocation4 + $0xb3] sm:$0xff]  ;;  %v2168_v49 = vld [vmem:[#allocation4 + $0xbb] sm:$0x3] }
 0x20f   :  { %8173 = vmatmul.mubr.msk.f32.gmra.mxu1 %vm1053_vm3, %v1006_v46  ;;  %8443 = vmatmul.mubr.msk.f32.gmra.mxu0 %vm1053_vm3, %v2167_v47  ;;  %v2750_v46 = vld [vmem:[#allocation4 + $0x64] sm:$0xff] }
 0x210   :  { %v8100_v48 = vpop.f32.mrf.mxu0  ;;  %8175 = vmatprep.mubr.msk.f32.mxu1 %vm9435_vm1, %v10160_v30  ;;  %8445 = vmatprep.mubr.msk.f32.mxu0 %vm9435_vm1, %v10160_v30 }
 0x211   :  { %v1018_v48 = vld [vmem:[#allocation4 + $0x70] sm:$0xff] }
 0x212   :  { %v10288_v50 = vpop.f32.mrf.mxu0 }
 0x213   :  { %8176 = vmatmul.mubr.msk.f32.gmra.mxu1 %vm1053_vm3, %v1007_v51  ;;  %8446 = vmatmul.mubr.msk.f32.gmra.mxu0 %vm1053_vm3, %v2168_v49  ;;  %v1019_v51 = vld [vmem:[#allocation4 + $0x78] sm:$0xff] }
 0x214   :  { %v8103_v53 = vpop.f32.mrf.mxu0  ;;  %8178 = vmatprep.mubr.msk.f32.mxu1 %vm9435_vm1, %v10160_v30  ;;  %8521 = vmatprep.mubr.msk.f32.mxu0 %vm9435_vm1, %v10160_v30 }
 0x215   :  { %v2751_v53 = vld [vmem:[#allocation4 + $0x6c] sm:$0xff] }
 0x216   :  { %v10296_v55 = vpop.f32.mrf.mxu0 }
 0x217   :  { %8179 = vmatmul.mubr.msk.f32.gmra.mxu1 %vm1053_vm3, %v1008_v57  ;;  %8522 = vmatmul.mubr.msk.f32.vlgmr.msra.gmra.mxu0 %vm1053_vm3, %v2740_v58 }
 0x218   :  { %v8106_v60 = vpop.f32.mrf.mxu0  ;;  %8181 = vmatprep.mubr.msk.f32.mxu1 %vm9435_vm1, %v10160_v30  ;;  %8524 = vmatprep.mubr.msk.f32.mxu0 %vm9435_vm1, %v10160_v30 }
 0x219   :  { %8662 = vmatpush3.msra.mxu0 %v7085_v59  ;;  %v1020_v59 = vld [vmem:[#allocation4 + $0x80] sm:$0xff]  ;;  %v2752_v60 = vld [vmem:[#allocation4 + $0x74] sm:$0xff] }
 0x21a   :  { %v10307_v61 = vpop.f32.mrf.mxu0  ;;  %8803 = vmatprep.subr.mxu0 %v10160_v30 }
 0x21b   :  { %v10310_v0 = vpop.f32.mrf.mxu1  ;;  %8182 = vmatmul.mubr.msk.f32.gmra.mxu1 %vm1053_vm3, %v1009_v62  ;;  %8525 = vmatmul.mubr.msk.f32.gmra.mxu0 %vm1053_vm3, %v2741_v12 }
 0x21c   :  { %v8381_v63 = vpop.f32.mrf.mxu0  ;;  %8184 = vmatprep.mubr.msk.f32.mxu1 %vm9435_vm1, %v10160_v30  ;;  %8527 = vmatprep.mubr.msk.f32.mxu0 %vm9435_vm1, %v10160_v30 }
 0x21d   :  { %v8121_v2 = vpop.f32.mrf.mxu1  ;;  %v1021_v63 = vld [vmem:[#allocation4 + $0x88] sm:$0xff] }
 0x21e   :  { %v10318_v3 = vpop.f32.mrf.mxu0  ;;  %v2753_v2 = vld [vmem:[#allocation4 + $0x7c] sm:$0xff] }
 0x21f   :  { %v10320_v9 = vpop.f32.mrf.mxu1  ;;  %8185 = vmatmul.mubr.msk.f32.gmra.mxu1 %vm1053_vm3, %v1010_v6  ;;  %8528 = vmatmul.mubr.msk.f32.gmra.mxu0 %vm1053_vm3, %v2742_v7  ;;  %v1022_v6 = vld [vmem:[#allocation4 + $0x90] sm:$0xff]  ;;  %v2754_v7 = vld [vmem:[#allocation4 + $0x84] sm:$0xff] }
 0x220   :  { %v8384_v10 = vpop.f32.mrf.mxu0  ;;  %8187 = vmatprep.mubr.msk.f32.mxu1 %vm9435_vm1, %v10160_v30  ;;  %8530 = vmatprep.mubr.msk.f32.mxu0 %vm9435_vm1, %v10160_v30 }
 0x221   :  { %v8124_v11 = vpop.f32.mrf.mxu1  ;;  %v1023_v10 = vld [vmem:[#allocation4 + $0x98] sm:$0xff] }
 0x222   :  { %v10328_v33 = vpop.f32.mrf.mxu0  ;;  %v2755_v11 = vld [vmem:[#allocation4 + $0x8c] sm:$0xff] }
 0x223   :  { %8188 = vmatmul.mubr.msk.f32.gmra.mxu1 %vm1053_vm3, %v1011_v20  ;;  %8531 = vmatmul.mubr.msk.f32.gmra.mxu0 %vm1053_vm3, %v2743_v13 }
 0x224   :  { %v8387_v8 = vpop.f32.mrf.mxu0  ;;  %8190 = vmatprep.mubr.msk.f32.mxu1 %vm9435_vm1, %v10160_v30  ;;  %8533 = vmatprep.mubr.msk.f32.mxu0 %vm9435_vm1, %v10160_v30 }
 0x226   :  { %v10336_v14 = vpop.f32.mrf.mxu0 }
 0x227   :  { %8191 = vmatmul.mubr.msk.f32.gmra.mxu1 %vm1053_vm3, %v1012_v15  ;;  %8534 = vmatmul.mubr.msk.f32.gmra.mxu0 %vm1053_vm3, %v2744_v17  ;;  %v1239_v18 = vpop.f32.mrf.mxu1  ;;  %v1024_v17 = vld [vmem:[#allocation4 + $0xa0] sm:$0xff] }
 0x228   :  { %v8390_v21 = vpop.f32.mrf.mxu0  ;;  %8193 = vmatprep.mubr.msk.f32.mxu1 %vm9435_vm1, %v10160_v30  ;;  %8536 = vmatprep.mubr.msk.f32.mxu0 %vm9435_vm1, %v10160_v30  ;;  %v10429_v18 = vld [vmem:[#allocation4 + $0x94] sm:$0xff] }
 0x229   :  { %v8127_v22 = vpop.f32.mrf.mxu1 }
 0x22a   :  { %v10344_v23 = vpop.f32.mrf.mxu0 }
 0x22b   :  { %8194 = vmatmul.mubr.msk.f32.gmra.mxu1 %vm1053_vm3, %v1013_v24  ;;  %8537 = vmatmul.mubr.msk.f32.gmra.mxu0 %vm1053_vm3, %v2745_v25  ;;  %v1244_v26 = vpop.f32.mrf.mxu1  ;;  %v1025_v24 = vld [vmem:[#allocation4 + $0xa8] sm:$0xff]  ;;  %v2757_v25 = vld [vmem:[#allocation4 + $0x9c] sm:$0xff] }
 0x22c   :  { %v8393_v28 = vpop.f32.mrf.mxu0  ;;  %8196 = vmatprep.mubr.msk.f32.mxu1 %vm9435_vm1, %v10160_v30  ;;  %8539 = vmatprep.mubr.msk.f32.mxu0 %vm9435_vm1, %v10160_v30 }
 0x22d   :  { %v8130_v29 = vpop.f32.mrf.mxu1 }
 0x22e   :  { %v10352_v31 = vpop.f32.mrf.mxu0  ;;  %v1026_v29 = vld [vmem:[#allocation4 + $0xb0] sm:$0x3] }
 0x22f   :  { %8197 = vmatmul.mubr.msk.f32.gmra.mxu1 %vm1053_vm3, %v1014_v32  ;;  %8540 = vmatmul.mubr.msk.f32.gmra.mxu0 %vm1053_vm3, %v2746_v1  ;;  %v10356_v34 = vpop.f32.mrf.mxu1  ;;  %v2758_v32 = vld [vmem:[#allocation4 + $0xa4] sm:$0xff] }
 0x230   :  { %v8396_v52 = vpop.f32.mrf.mxu0  ;;  %8199 = vmatprep.mubr.msk.f32.mxu1 %vm9435_vm1, %v10160_v30  ;;  %8542 = vmatprep.mubr.msk.f32.mxu0 %vm9435_vm1, %v10160_v30  ;;  %v1552_v1 = vld [vmem:[#allocation4 + $0x2] sm:$0xff] }
 0x231   :  { %v8133_v36 = vpop.f32.mrf.mxu1  ;;  %v6965_v52 = vld [vmem:[%s12521_s2 + $0x18] sm:$0xff] }
 0x232   :  { %v10362_v35 = vpop.f32.mrf.mxu0  ;;  %v10457_v36 = vld [vmem:[#allocation4 + $0xac] sm:$0xff] }
 0x233   :  { %8200 = vmatmul.mubr.msk.f32.gmra.mxu1 %vm1053_vm3, %v1015_v37  ;;  %8543 = vmatmul.mubr.msk.f32.gmra.mxu0 %vm1053_vm3, %v2747_v16  ;;  %v10466_v16 = vld [vmem:[#allocation4 + $0xb4] sm:$0xff] }
 0x234   :  { %v8399_v38 = vpop.f32.mrf.mxu0  ;;  %8202 = vmatprep.mubr.msk.f32.mxu1 %vm9435_vm1, %v10160_v30  ;;  %8545 = vmatprep.mubr.msk.f32.mxu0 %vm9435_vm1, %v10160_v30 }
 0x236   :  { %v10370_v19 = vpop.f32.mrf.mxu0 }
 0x237   :  { %8203 = vmatmul.mubr.msk.f32.gmra.mxu1 %vm1053_vm3, %v10160_v30  ;;  %8546 = vmatmul.mubr.msk.f32.gmra.mxu0 %vm1053_vm3, %v2748_v39  ;;  %v10471_v39 = vld [vmem:[#allocation4 + $0xa] sm:$0xff] }
 0x238   :  { %v8402_v40 = vpop.f32.mrf.mxu0  ;;  %8205 = vmatprep.mubr.msk.f32.mxu1 %vm9435_vm1, %v10160_v30  ;;  %8548 = vmatprep.mubr.msk.f32.mxu0 %vm9435_vm1, %v10160_v30 }
 0x23a   :  { %v10379_v42 = vpop.f32.mrf.mxu0 }
 0x23b   :  { %12531 = vst [vmem:[#allocation9_spill] sm:$0xff] %v10379_v42  ;;  %8206 = vmatmul.mubr.msk.f32.gmra.mxu1 %vm1053_vm3, %v1017_v44  ;;  %8549 = vmatmul.mubr.msk.f32.gmra.mxu0 %vm1053_vm3, %v2749_v41  ;;  %v2761_v41 = vld [vmem:[#allocation4 + $0xbc] sm:$0xff] }
 0x23c   :  { %v8405_v45 = vpop.f32.mrf.mxu0  ;;  %8208 = vmatprep.mubr.msk.f32.mxu1 %vm9435_vm1, %v10160_v30  ;;  %8551 = vmatprep.mubr.msk.f32.mxu0 %vm9435_vm1, %v10160_v30 }
 0x23d   :  { %v10483_v45 = vld [vmem:[#allocation4 + $0x12] sm:$0xff] }
 0x23e   :  { %v10387_v47 = vpop.f32.mrf.mxu0 }
 0x23f   :  { %12532 = vst [vmem:[#allocation10_spill] sm:$0xff] %v10387_v47  ;;  %8209 = vmatmul.mubr.msk.f32.gmra.mxu1 %vm1053_vm3, %v1018_v48  ;;  %8552 = vmatmul.mubr.msk.f32.gmra.mxu0 %vm1053_vm3, %v2750_v46  ;;  %v2762_v46 = vld [vmem:[#allocation4 + $0xc4] sm:$0x3]  ;;  %v10492_v48 = vld [vmem:[#allocation4 + $0x1a] sm:$0xff] }
 0x240   :  { %v8408_v49 = vpop.f32.mrf.mxu0  ;;  %8211 = vmatprep.mubr.msk.f32.mxu1 %vm9435_vm1, %v10160_v30  ;;  %8554 = vmatprep.mubr.msk.f32.mxu0 %vm9435_vm1, %v10160_v30 }
 0x242   :  { %v2356_v57 = vpop.f32.mrf.mxu0 }
 0x243   :  { %8212 = vmatmul.mubr.msk.f32.gmra.mxu1 %vm1053_vm3, %v1019_v51  ;;  %8555 = vmatmul.mubr.msk.f32.gmra.mxu0 %vm1053_vm3, %v2751_v53  ;;  %v10503_v53 = vld [vmem:[#allocation4 + $0x22] sm:$0xff]  ;;  %v3334_v57 = vld [vmem:[#allocation4 + $0x16] sm:$0xff] }
 0x244   :  { %8214 = vmatprep.mubr.msk.f32.mxu1 %vm9435_vm1, %v10160_v30  ;;  %8557 = vmatprep.mubr.msk.f32.mxu0 %vm9435_vm1, %v10160_v30  ;;  %v8411_v58 = vpop.f32.mrf.mxu0 }
 0x245   :  { %v10512_v58 = vld [vmem:[#allocation4 + $0x2a] sm:$0xff] }
 0x246   :  { %v2361_v62 = vpop.f32.mrf.mxu0 }
 0x247   :  { %8215 = vmatmul.mubr.msk.f32.gmra.mxu1 %vm1053_vm3, %v1020_v59  ;;  %8558 = vmatmul.mubr.msk.f32.gmra.mxu0 %vm1053_vm3, %v2752_v60  ;;  %v3335_v59 = vld [vmem:[#allocation4 + $0x1e] sm:$0xff] }
 0x248   :  { %8217 = vmatprep.mubr.msk.f32.mxu1 %vm9435_vm1, %v10160_v30  ;;  %8560 = vmatprep.mubr.msk.f32.mxu0 %vm9435_vm1, %v10160_v30  ;;  %v8414_v12 = vpop.f32.mrf.mxu0 }
 0x249   :  { %v10523_v12 = vld [vmem:[#allocation4 + $0x32] sm:$0xff] }
 0x24b   :  { %8218 = vmatmul.mubr.msk.f32.gmra.mxu1 %vm1053_vm3, %v1021_v63  ;;  %8561 = vmatmul.mubr.msk.f32.gmra.mxu0 %vm1053_vm3, %v2753_v2  ;;  %v3336_v63 = vld [vmem:[#allocation4 + $0x26] sm:$0xff]  ;;  %v10532_v2 = vld [vmem:[#allocation4 + $0x3a] sm:$0xff] }
 0x24c   :  { %8220 = vmatprep.mubr.msk.f32.mxu1 %vm9435_vm1, %v10160_v30  ;;  %8563 = vmatprep.mubr.msk.f32.mxu0 %vm9435_vm1, %v10160_v30 }
 0x24f   :  { %8221 = vmatmul.mubr.msk.f32.gmra.mxu1 %vm1053_vm3, %v1022_v6  ;;  %8564 = vmatmul.mubr.msk.f32.gmra.mxu0 %vm1053_vm3, %v2754_v7  ;;  %v3337_v6 = vld [vmem:[#allocation4 + $0x2e] sm:$0xff]  ;;  %v10541_v7 = vld [vmem:[#allocation4 + $0x42] sm:$0xff] }
 0x250   :  { %8223 = vmatprep.mubr.msk.f32.mxu1 %vm9435_vm1, %v10160_v30  ;;  %8566 = vmatprep.mubr.msk.f32.mxu0 %vm9435_vm1, %v10160_v30 }
 0x253   :  { %v10419_v20 = vpop.f32.mrf.mxu1  ;;  %8224 = vmatmul.mubr.msk.f32.gmra.mxu1 %vm1053_vm3, %v1023_v10  ;;  %8567 = vmatmul.mubr.msk.f32.gmra.mxu0 %vm1053_vm3, %v2755_v11  ;;  %v3338_v10 = vld [vmem:[#allocation4 + $0x36] sm:$0xff]  ;;  %v10550_v11 = vld [vmem:[#allocation4 + $0x4a] sm:$0xff] }
 0x254   :  { %v10422_v13 = vpop.f32.mrf.mxu0  ;;  %8226 = vmatprep.mubr.msk.f32.mxu1 %vm9435_vm1, %v10160_v30  ;;  %8569 = vmatprep.mubr.msk.f32.mxu0 %vm9435_vm1, %v10160_v30 }
 0x255   :  { %12533 = vst [vmem:[#allocation11_spill] sm:$0xff] %v10422_v13  ;;  %v8136_v8 = vpop.f32.mrf.mxu1  ;;  %v2445_v13 = vld [vmem:[#allocation4 + $0x1c] sm:$0xff] }
 0x256   :  { %v8417_v15 = vpop.f32.mrf.mxu0  ;;  %v3339_v8 = vld [vmem:[#allocation4 + $0x3e] sm:$0xff] }
 0x257   :  { %v10431_v21 = vpop.f32.mrf.mxu1  ;;  %8227 = vmatmul.mubr.msk.f32.gmra.mxu1 %vm1053_vm3, %v1024_v17  ;;  %8570 = vmatmul.mubr.msk.f32.gmra.mxu0 %vm1053_vm3, %v10429_v18 }
 0x258   :  { %8229 = vmatprep.mubr.msk.f32.mxu1 %vm9435_vm1, %v10160_v30  ;;  %8572 = vmatprep.mubr.msk.f32.mxu0 %vm9435_vm1, %v10160_v30 }
 0x259   :  { %v8139_v22 = vpop.f32.mrf.mxu1 }
 0x25b   :  { %8230 = vmatmul.mubr.msk.f32.gmra.mxu1 %vm1053_vm3, %v1025_v24  ;;  %8573 = vmatmul.mubr.msk.f32.gmra.mxu0 %vm1053_vm3, %v2757_v25  ;;  %v10442_v26 = vpop.f32.mrf.mxu1  ;;  %v10563_v25 = vld [vmem:[#allocation4 + $0x52] sm:$0xff] }
 0x25c   :  { %8232 = vmatprep.mubr.msk.f32.mxu1 %vm9435_vm1, %v10160_v30  ;;  %8575 = vmatprep.mubr.msk.f32.mxu0 %vm9435_vm1, %v10160_v30 }
 0x25d   :  { %v8142_v28 = vpop.f32.mrf.mxu1 }
 0x25e   :  { %v3340_v28 = vld [vmem:[#allocation4 + $0x46] sm:$0xff] }
 0x25f   :  { %8233 = vmatmul.mubr.msk.f32.gmra.mxu1 %vm1053_vm3, %v1026_v29  ;;  %8576 = vmatmul.mubr.msk.f32.gmra.mxu0 %vm1053_vm3, %v2758_v32  ;;  %v10572_v29 = vld [vmem:[#allocation4 + $0x5a] sm:$0xff]  ;;  %v3341_v32 = vld [vmem:[#allocation4 + $0x4e] sm:$0xff] }
 0x260   :  { %8237 = vmatprep.mubr.msk.f32.mxu1 %vm9435_vm1, %v10160_v30  ;;  %8578 = vmatprep.mubr.msk.f32.mxu0 %vm9435_vm1, %v10160_v30 }
 0x263   :  { %8238 = vmatmul.mubr.msk.f32.vlgmr.msra.gmra.mxu1 %vm1053_vm3, %v1552_v1  ;;  %v10460_v37 = vpop.f32.mrf.mxu0  ;;  %8579 = vmatmul.mubr.msk.f32.gmra.mxu0 %vm1053_vm3, %v10457_v36  ;;  %v10581_v1 = vld [vmem:[#allocation4 + $0x62] sm:$0xff] }
 0x264   :  { %12534 = vst [vmem:[#allocation12_spill] sm:$0xff] %v10460_v37  ;;  %8307 = vmatpush3.msra.mxu1 %v6965_v52  ;;  %8240 = vmatprep.mubr.msk.f32.mxu1 %vm9435_vm1, %v10160_v30  ;;  %v3342_v52 = vld [vmem:[#allocation4 + $0x56] sm:$0xff] }
 0x265   :  { %v8420_v38 = vpop.f32.mrf.mxu0  ;;  %8581 = vmatprep.mubr.msk.f32.mxu0 %vm9435_vm1, %v10160_v30  ;;  %8448 = vmatprep.subr.mxu1 %v10160_v30 }
 0x266   :  { %v10586_v38 = vld [vmem:[#allocation4] sm:$0xff] }
 0x267   :  { %8241 = vmatmul.mubr.msk.f32.gmra.mxu1 %vm1053_vm3, %v10471_v39  ;;  %v10475_v40 = vpop.f32.mrf.mxu0  ;;  %8582 = vmatmul.mubr.msk.f32.gmra.mxu0 %vm1053_vm3, %v10466_v16 }
 0x268   :  { %12535 = vst [vmem:[#allocation13_spill] sm:$0xff] %v10475_v40  ;;  %8243 = vmatprep.mubr.msk.f32.mxu1 %vm9435_vm1, %v10160_v30  ;;  %8584 = vmatprep.mubr.msk.f32.mxu0 %vm9435_vm1, %v10160_v30 }
 0x269   :  { %v8423_v44 = vpop.f32.mrf.mxu0 }
 0x26a   :  { %v10592_v44 = vld [vmem:[#allocation4 + $0x6a] sm:$0xff] }
 0x26b   :  { %8244 = vmatmul.mubr.msk.f32.gmra.mxu1 %vm1053_vm3, %v10483_v45  ;;  %8585 = vmatmul.mubr.msk.f32.gmra.mxu0 %vm1053_vm3, %v2761_v41  ;;  %v3343_v41 = vld [vmem:[#allocation4 + $0x5e] sm:$0xff] }
 0x26c   :  { %8246 = vmatprep.mubr.msk.f32.mxu1 %vm9435_vm1, %v10160_v30  ;;  %8587 = vmatprep.mubr.msk.f32.mxu0 %vm9435_vm1, %v10160_v30 }
 0x26f   :  { %8247 = vmatmul.mubr.msk.f32.gmra.mxu1 %vm1053_vm3, %v10492_v48  ;;  %8588 = vmatmul.mubr.msk.f32.gmra.mxu0 %vm1053_vm3, %v2762_v46  ;;  %v10497_v49 = vpop.f32.mrf.mxu0  ;;  %v10601_v46 = vld [vmem:[#allocation4 + $0x72] sm:$0xff] }
 0x270   :  { %12536 = vst [vmem:[#allocation14_spill] sm:$0xff] %v10497_v49  ;;  %8249 = vmatprep.mubr.msk.f32.mxu1 %vm9435_vm1, %v10160_v30  ;;  %8663 = vmatprep.mubr.msk.f32.mxu0 %vm9435_vm1, %v10160_v30 }
 0x271   :  { %v8426_v51 = vpop.f32.mrf.mxu0 }
 0x273   :  { %8250 = vmatmul.mubr.msk.f32.gmra.mxu1 %vm1053_vm3, %v10503_v53  ;;  %8664 = vmatmul.mubr.msk.f32.vlgmr.msra.gmra.mxu0 %vm1053_vm3, %v3334_v57 }
 0x274   :  { %8252 = vmatprep.mubr.msk.f32.mxu1 %vm9435_vm1, %v10160_v30  ;;  %8666 = vmatprep.mubr.msk.f32.mxu0 %vm9435_vm1, %v10160_v30 }
 0x277   :  { %v10514_v60 = vpop.f32.mrf.mxu1  ;;  %8253 = vmatmul.mubr.msk.f32.gmra.mxu1 %vm1053_vm3, %v10512_v58  ;;  %8667 = vmatmul.mubr.msk.f32.gmra.mxu0 %vm1053_vm3, %v3335_v59 }
 0x278   :  { %8255 = vmatprep.mubr.msk.f32.mxu1 %vm9435_vm1, %v10160_v30  ;;  %8669 = vmatprep.mubr.msk.f32.mxu0 %vm9435_vm1, %v10160_v30 }
 0x279   :  { %v8145_v62 = vpop.f32.mrf.mxu1 }
 0x27b   :  { %8256 = vmatmul.mubr.msk.f32.gmra.mxu1 %vm1053_vm3, %v10523_v12  ;;  %8670 = vmatmul.mubr.msk.f32.gmra.mxu0 %vm1053_vm3, %v3336_v63  ;;  %v10614_v63 = vld [vmem:[#allocation4 + $0x7a] sm:$0xff] }
 0x27c   :  { %8258 = vmatprep.mubr.msk.f32.mxu1 %vm9435_vm1, %v10160_v30  ;;  %8672 = vmatprep.mubr.msk.f32.mxu0 %vm9435_vm1, %v10160_v30 }
 0x27f   :  { %8259 = vmatmul.mubr.msk.f32.gmra.mxu1 %vm1053_vm3, %v10532_v2  ;;  %8673 = vmatmul.mubr.msk.f32.gmra.mxu0 %vm1053_vm3, %v3337_v6  ;;  %v3345_v6 = vld [vmem:[#allocation4 + $0x6e] sm:$0xff] }
 0x280   :  { %8261 = vmatprep.mubr.msk.f32.mxu1 %vm9435_vm1, %v10160_v30  ;;  %8675 = vmatprep.mubr.msk.f32.mxu0 %vm9435_vm1, %v10160_v30 }
 0x283   :  { %8262 = vmatmul.mubr.msk.f32.gmra.mxu1 %vm1053_vm3, %v10541_v7  ;;  %8676 = vmatmul.mubr.msk.f32.gmra.mxu0 %vm1053_vm3, %v3338_v10 }
 0x284   :  { %8264 = vmatprep.mubr.msk.f32.mxu1 %vm9435_vm1, %v10160_v30  ;;  %8678 = vmatprep.mubr.msk.f32.mxu0 %vm9435_vm1, %v10160_v30 }
 0x287   :  { %v10552_v15 = vpop.f32.mrf.mxu1  ;;  %8265 = vmatmul.mubr.msk.f32.gmra.mxu1 %vm1053_vm3, %v10550_v11  ;;  %8679 = vmatmul.mubr.msk.f32.gmra.mxu0 %vm1053_vm3, %v3339_v8 }
 0x288   :  { %v10556_v17 = vpop.f32.mrf.mxu0  ;;  %8267 = vmatprep.mubr.msk.f32.mxu1 %vm9435_vm1, %v10160_v30  ;;  %8681 = vmatprep.mubr.msk.f32.mxu0 %vm9435_vm1, %v10160_v30 }
 0x289   :  { %12537 = vst [vmem:[#allocation15_spill] sm:$0xff] %v10556_v17  ;;  %v8148_v22 = vpop.f32.mrf.mxu1 }
 0x28a   :  { %v8429_v24 = vpop.f32.mrf.mxu0  ;;  %v10625_v22 = vld [vmem:[#allocation4 + $0x82] sm:$0xff] }
 0x28b   :  { %8268 = vmatmul.mubr.msk.f32.gmra.mxu1 %vm1053_vm3, %v10563_v25  ;;  %8682 = vmatmul.mubr.msk.f32.gmra.mxu0 %vm1053_vm3, %v3340_v28  ;;  %v3346_v24 = vld [vmem:[#allocation4 + $0x76] sm:$0xff] }
 0x28c   :  { %8270 = vmatprep.mubr.msk.f32.mxu1 %vm9435_vm1, %v10160_v30  ;;  %8684 = vmatprep.mubr.msk.f32.mxu0 %vm9435_vm1, %v10160_v30 }
 0x28f   :  { %8271 = vmatmul.mubr.msk.f32.gmra.mxu1 %vm1053_vm3, %v10572_v29  ;;  %8685 = vmatmul.mubr.msk.f32.gmra.mxu0 %vm1053_vm3, %v3341_v32 }
 0x290   :  { %8273 = vmatprep.mubr.msk.f32.mxu1 %vm9435_vm1, %v10160_v30  ;;  %8687 = vmatprep.mubr.msk.f32.mxu0 %vm9435_vm1, %v10160_v30  ;;  %v3344_v30 = vld [vmem:[#allocation4 + $0x66] sm:$0xff] }
 0x293   :  { %8274 = vmatmul.mubr.msk.f32.gmra.mxu1 %vm1053_vm3, %v10581_v1  ;;  %8688 = vmatmul.mubr.msk.f32.gmra.mxu0 %vm1053_vm3, %v3342_v52  ;;  %v10636_v52 = vld [vmem:[#allocation4 + $0x8a] sm:$0xff] }
 0x294   :  { %8276 = vmatprep.mubr.msk.f32.mxu1 %vm9435_vm1, %v10586_v38  ;;  %8690 = vmatprep.mubr.msk.f32.mxu0 %vm9435_vm1, %v10586_v38 }
 0x297   :  { %8277 = vmatmul.mubr.msk.f32.gmra.mxu1 %vm1053_vm3, %v10592_v44  ;;  %8691 = vmatmul.mubr.msk.f32.gmra.mxu0 %vm1053_vm3, %v3343_v41  ;;  %v3347_v41 = vld [vmem:[#allocation4 + $0x7e] sm:$0xff] }
 0x298   :  { %8279 = vmatprep.mubr.msk.f32.mxu1 %vm9435_vm1, %v10586_v38  ;;  %8693 = vmatprep.mubr.msk.f32.mxu0 %vm9435_vm1, %v10586_v38 }
 0x29b   :  { %v10603_v51 = vpop.f32.mrf.mxu1  ;;  %8280 = vmatmul.mubr.msk.f32.gmra.mxu1 %vm1053_vm3, %v10601_v46  ;;  %8694 = vmatmul.mubr.msk.f32.gmra.mxu0 %vm1053_vm3, %v3344_v30  ;;  %v10645_v30 = vld [vmem:[#allocation4 + $0x92] sm:$0xff] }
 0x29c   :  { %v10607_v57 = vpop.f32.mrf.mxu0  ;;  %8282 = vmatprep.mubr.msk.f32.mxu1 %vm9435_vm1, %v10586_v38  ;;  %8696 = vmatprep.mubr.msk.f32.mxu0 %vm9435_vm1, %v10586_v38 }
 0x29d   :  { %12538 = vst [vmem:[#allocation16_spill] sm:$0xff] %v10607_v57  ;;  %v8151_v59 = vpop.f32.mrf.mxu1  ;;  %v3352_v57 = vld [vmem:[#allocation4 + $0xa6] sm:$0xff] }
 0x29e   :  { %v8432_v62 = vpop.f32.mrf.mxu0  ;;  %v3348_v59 = vld [vmem:[#allocation4 + $0x86] sm:$0xff] }
 0x29f   :  { %v10616_v10 = vpop.f32.mrf.mxu1  ;;  %8283 = vmatmul.mubr.msk.f32.gmra.mxu1 %vm1053_vm3, %v10614_v63  ;;  %8697 = vmatmul.mubr.msk.f32.gmra.mxu0 %vm1053_vm3, %v3345_v6 }
 0x2a0   :  { %8285 = vmatprep.mubr.msk.f32.mxu1 %vm9435_vm1, %v10586_v38  ;;  %8699 = vmatprep.mubr.msk.f32.mxu0 %vm9435_vm1, %v10586_v38 }
 0x2a1   :  { %v8154_v8 = vpop.f32.mrf.mxu1 }
 0x2a2   :  { %v10656_v8 = vld [vmem:[#allocation4 + $0x9a] sm:$0xff] }
 0x2a3   :  { %8286 = vmatmul.mubr.msk.f32.gmra.mxu1 %vm1053_vm3, %v10625_v22  ;;  %8700 = vmatmul.mubr.msk.f32.gmra.mxu0 %vm1053_vm3, %v3346_v24  ;;  %v10630_v28 = vpop.f32.mrf.mxu1  ;;  %v3349_v24 = vld [vmem:[#allocation4 + $0x8e] sm:$0xff] }
 0x2a4   :  { %8288 = vmatprep.mubr.msk.f32.mxu1 %vm9435_vm1, %v10586_v38  ;;  %8702 = vmatprep.mubr.msk.f32.mxu0 %vm9435_vm1, %v10586_v38 }
 0x2a5   :  { %v8157_v32 = vpop.f32.mrf.mxu1 }
 0x2a7   :  { %8289 = vmatmul.mubr.msk.f32.gmra.mxu1 %vm1053_vm3, %v10636_v52  ;;  %8703 = vmatmul.mubr.msk.f32.gmra.mxu0 %vm1053_vm3, %v3347_v41 }
 0x2a8   :  { %8291 = vmatprep.mubr.msk.f32.mxu1 %vm9435_vm1, %v10586_v38  ;;  %8705 = vmatprep.mubr.msk.f32.mxu0 %vm9435_vm1, %v10586_v38 }
 0x2ab   :  { %8292 = vmatmul.mubr.msk.f32.gmra.mxu1 %vm1053_vm3, %v10645_v30  ;;  %v10649_v62 = vpop.f32.mrf.mxu0  ;;  %8706 = vmatmul.mubr.msk.f32.gmra.mxu0 %vm1053_vm3, %v3348_v59  ;;  %v10667_v59 = vld [vmem:[#allocation4 + $0xa2] sm:$0xff] }
 0x2ac   :  { %12539 = vst [vmem:[#allocation17_spill] sm:$0xff] %v10649_v62  ;;  %8294 = vmatprep.mubr.msk.f32.mxu1 %vm9435_vm1, %v10586_v38  ;;  %8708 = vmatprep.mubr.msk.f32.mxu0 %vm9435_vm1, %v10586_v38  ;;  %v1574_v62 = vld [vmem:[#allocation4 + $0xb2] sm:$0x3] }
 0x2ad   :  { %v8435_v6 = vpop.f32.mrf.mxu0 }
 0x2ae   :  { %v3350_v6 = vld [vmem:[#allocation4 + $0x96] sm:$0xff] }
 0x2af   :  { %8295 = vmatmul.mubr.msk.f32.gmra.mxu1 %vm1053_vm3, %v10656_v8  ;;  %v10660_v32 = vpop.f32.mrf.mxu0  ;;  %8709 = vmatmul.mubr.msk.f32.gmra.mxu0 %vm1053_vm3, %v3349_v24  ;;  %v10676_v24 = vld [vmem:[#allocation4 + $0xaa] sm:$0xff] }
 0x2b0   :  { %12540 = vst [vmem:[#allocation18_spill] sm:$0xff] %v10660_v32  ;;  %8297 = vmatprep.mubr.msk.f32.mxu1 %vm9435_vm1, %v10586_v38  ;;  %8711 = vmatprep.mubr.msk.f32.mxu0 %vm9435_vm1, %v10586_v38  ;;  %v3351_v32 = vld [vmem:[#allocation4 + $0x9e] sm:$0xff] }
 0x2b1   :  { %v8438_v41 = vpop.f32.mrf.mxu0 }
 0x2b3   :  { %8298 = vmatmul.mubr.msk.f32.gmra.mxu1 %vm1053_vm3, %v10667_v59  ;;  %8712 = vmatmul.mubr.msk.f32.gmra.mxu0 %vm1053_vm3, %v3350_v6 }
 0x2b4   :  { %8300 = vmatprep.mubr.msk.f32.mxu1 %vm9435_vm1, %v10586_v38  ;;  %8714 = vmatprep.mubr.msk.f32.mxu0 %vm9435_vm1, %v10586_v38 }
 0x2b7   :  { %8301 = vmatmul.mubr.msk.f32.gmra.mxu1 %vm1053_vm3, %v10676_v24  ;;  %8715 = vmatmul.mubr.msk.f32.gmra.mxu0 %vm1053_vm3, %v3351_v32  ;;  %v10681_v41 = vpop.f32.mrf.mxu0  ;;  %v7013_v32 = vld [vmem:[%s12521_s2 + $0x28] sm:$0xff] }
 0x2b8   :  { %12541 = vst [vmem:[#allocation19_spill] sm:$0xff] %v10681_v41  ;;  %8303 = vmatprep.mubr.msk.f32.mxu1 %vm9435_vm1, %v10586_v38  ;;  %8717 = vmatprep.mubr.msk.f32.mxu0 %vm9435_vm1, %v10586_v38  ;;  %v3353_v41 = vld [vmem:[#allocation4 + $0xae] sm:$0xff] }
 0x2b9   :  { %v8441_v6 = vpop.f32.mrf.mxu0 }
 0x2bb   :  { %8304 = vmatmul.mubr.msk.f32.gmra.mxu1 %vm1053_vm3, %v1574_v62  ;;  %8718 = vmatmul.mubr.msk.f32.gmra.mxu0 %vm1053_vm3, %v3352_v57  ;;  %v3354_v57 = vld [vmem:[#allocation4 + $0xb6] sm:$0xff] }
 0x2bc   :  { %8308 = vmatprep.mubr.msk.f32.mxu1 %vm9435_vm1, %v10586_v38  ;;  %8720 = vmatprep.mubr.msk.f32.mxu0 %vm9435_vm1, %v10586_v38 }
 0x2bf   :  { %v10696_v17 = vpop.f32.mrf.mxu1  ;;  %8309 = vmatmul.mubr.msk.f32.vlgmr.msra.gmra.mxu1 %vm1053_vm3, %v10471_v39  ;;  %8721 = vmatmul.mubr.msk.f32.gmra.mxu0 %vm1053_vm3, %v3353_v41 }
 0x2c0   :  { %8449 = vmatpush3.msra.mxu1 %v7013_v32  ;;  %8311 = vmatprep.mubr.msk.f32.mxu1 %vm9435_vm1, %v10586_v38 }
 0x2c1   :  { %v8160_v62 = vpop.f32.mrf.mxu1  ;;  %8723 = vmatprep.mubr.msk.f32.mxu0 %vm9435_vm1, %v10586_v38  ;;  %8590 = vmatprep.subr.mxu1 %v10586_v38 }
 0x2c3   :  { %v10706_v6 = vpop.f32.mrf.mxu1  ;;  %8312 = vmatmul.mubr.msk.f32.gmra.mxu1 %vm1053_vm3, %v10483_v45  ;;  %8724 = vmatmul.mubr.msk.f32.gmra.mxu0 %vm1053_vm3, %v3354_v57 }
 0x2c4   :  { %8314 = vmatprep.mubr.msk.f32.mxu1 %vm9435_vm1, %v10586_v38  ;;  %8726 = vmatprep.mubr.msk.f32.mxu0 %vm9435_vm1, %v10586_v38 }
 0x2c5   :  { %v8163_v39 = vpop.f32.mrf.mxu1 }
 0x2c7   :  { %v10715_v41 = vpop.f32.mrf.mxu1  ;;  %8315 = vmatmul.mubr.msk.f32.gmra.mxu1 %vm1053_vm3, %v10492_v48 }
 0x2c8   :  { %8317 = vmatprep.mubr.msk.f32.mxu1 %vm9435_vm1, %v10586_v38 }
 0x2c9   :  { %v8168_v32 = vpop.f32.mrf.mxu1 }
 0x2cb   :  { %v10721_v62 = vpop.f32.mrf.mxu1  ;;  %8318 = vmatmul.mubr.msk.f32.gmra.mxu1 %vm1053_vm3, %v10503_v53 }
 0x2cc   :  { %8320 = vmatprep.mubr.msk.f32.mxu1 %vm9435_vm1, %v10586_v38 }
 0x2cd   :  { %v8171_v45 = vpop.f32.mrf.mxu1 }
 0x2cf   :  { %v10727_v57 = vpop.f32.mrf.mxu1  ;;  %8321 = vmatmul.mubr.msk.f32.gmra.mxu1 %vm1053_vm3, %v10512_v58  ;;  %v10731_v39 = vpop.f32.mrf.mxu0 }
 0x2d0   :  { %12542 = vst [vmem:[#allocation20_spill] sm:$0xff] %v10731_v39  ;;  %8323 = vmatprep.mubr.msk.f32.mxu1 %vm9435_vm1, %v10586_v38 }
 0x2d1   :  { %v8174_v48 = vpop.f32.mrf.mxu1  ;;  %v8444_v32 = vpop.f32.mrf.mxu0 }
 0x2d3   :  { %v10735_v49 = vpop.f32.mrf.mxu1  ;;  %8324 = vmatmul.mubr.msk.f32.gmra.mxu1 %vm1053_vm3, %v10523_v12  ;;  %v10739_v53 = vpop.f32.mrf.mxu0 }
 0x2d4   :  { %12543 = vst [vmem:[#allocation21_spill] sm:$0xff] %v10739_v53  ;;  %8326 = vmatprep.mubr.msk.f32.mxu1 %vm9435_vm1, %v10586_v38 }
 0x2d5   :  { %v8177_v45 = vpop.f32.mrf.mxu1  ;;  %v8447_v40 = vpop.f32.mrf.mxu0 }
 0x2d7   :  { %v10743_v58 = vpop.f32.mrf.mxu1  ;;  %8327 = vmatmul.mubr.msk.f32.gmra.mxu1 %vm1053_vm3, %v10532_v2  ;;  %v10747_v39 = vpop.f32.mrf.mxu0 }
 0x2d8   :  { %12544 = vst [vmem:[#allocation22_spill] sm:$0xff] %v10747_v39  ;;  %8329 = vmatprep.mubr.msk.f32.mxu1 %vm9435_vm1, %v10586_v38 }
 0x2d9   :  { %v8180_v48 = vpop.f32.mrf.mxu1  ;;  %v8523_v32 = vpop.f32.mrf.mxu0 }
 0x2db   :  { %v10751_v12 = vpop.f32.mrf.mxu1  ;;  %8330 = vmatmul.mubr.msk.f32.gmra.mxu1 %vm1053_vm3, %v10541_v7  ;;  %v10755_v53 = vpop.f32.mrf.mxu0 }
 0x2dc   :  { %12545 = vst [vmem:[#allocation23_spill] sm:$0xff] %v10755_v53  ;;  %8332 = vmatprep.mubr.msk.f32.mxu1 %vm9435_vm1, %v10586_v38 }
 0x2dd   :  { %v8183_v40 = vpop.f32.mrf.mxu1  ;;  %v8526_v45 = vpop.f32.mrf.mxu0 }
 0x2df   :  { %v10759_v2 = vpop.f32.mrf.mxu1  ;;  %8333 = vmatmul.mubr.msk.f32.gmra.mxu1 %vm1053_vm3, %v10550_v11  ;;  %v10763_v39 = vpop.f32.mrf.mxu0 }
 0x2e0   :  { %12546 = vst [vmem:[#allocation24_spill] sm:$0xff] %v10763_v39  ;;  %8335 = vmatprep.mubr.msk.f32.mxu1 %vm9435_vm1, %v10586_v38 }
 0x2e1   :  { %v8186_v48 = vpop.f32.mrf.mxu1  ;;  %v8529_v32 = vpop.f32.mrf.mxu0 }
 0x2e3   :  { %v10767_v7 = vpop.f32.mrf.mxu1  ;;  %8336 = vmatmul.mubr.msk.f32.gmra.mxu1 %vm1053_vm3, %v10563_v25  ;;  %v10771_v53 = vpop.f32.mrf.mxu0 }
 0x2e4   :  { %12547 = vst [vmem:[#allocation25_spill] sm:$0xff] %v10771_v53  ;;  %8338 = vmatprep.mubr.msk.f32.mxu1 %vm9435_vm1, %v10586_v38 }
 0x2e5   :  { %v8189_v40 = vpop.f32.mrf.mxu1  ;;  %v8532_v45 = vpop.f32.mrf.mxu0 }
 0x2e7   :  { %v10775_v11 = vpop.f32.mrf.mxu1  ;;  %8339 = vmatmul.mubr.msk.f32.gmra.mxu1 %vm1053_vm3, %v10572_v29  ;;  %v10779_v39 = vpop.f32.mrf.mxu0 }
 0x2e8   :  { %12548 = vst [vmem:[#allocation26_spill] sm:$0xff] %v10779_v39  ;;  %8341 = vmatprep.mubr.msk.f32.mxu1 %vm9435_vm1, %v10586_v38 }
 0x2e9   :  { %v8192_v48 = vpop.f32.mrf.mxu1  ;;  %v8535_v32 = vpop.f32.mrf.mxu0 }
 0x2eb   :  { %v10783_v25 = vpop.f32.mrf.mxu1  ;;  %8342 = vmatmul.mubr.msk.f32.gmra.mxu1 %vm1053_vm3, %v10581_v1  ;;  %v10787_v53 = vpop.f32.mrf.mxu0 }
 0x2ec   :  { %12549 = vst [vmem:[#allocation27_spill] sm:$0xff] %v10787_v53  ;;  %8344 = vmatprep.mubr.msk.f32.mxu1 %vm9435_vm1, %v10586_v38 }
 0x2ed   :  { %v8195_v40 = vpop.f32.mrf.mxu1  ;;  %v8538_v45 = vpop.f32.mrf.mxu0 }
 0x2ef   :  { %v1488_v29 = vpop.f32.mrf.mxu1  ;;  %8345 = vmatmul.mubr.msk.f32.gmra.mxu1 %vm1053_vm3, %v10592_v44  ;;  %v10793_v39 = vpop.f32.mrf.mxu0 }
 0x2f0   :  { %12550 = vst [vmem:[#allocation28_spill] sm:$0xff] %v10793_v39  ;;  %8347 = vmatprep.mubr.msk.f32.mxu1 %vm9435_vm1, %v10586_v38 }
 0x2f1   :  { %v8198_v48 = vpop.f32.mrf.mxu1  ;;  %v8541_v32 = vpop.f32.mrf.mxu0 }
 0x2f3   :  { %v1493_v37 = vpop.f32.mrf.mxu1  ;;  %8348 = vmatmul.mubr.msk.f32.gmra.mxu1 %vm1053_vm3, %v10601_v46  ;;  %v10799_v1 = vpop.f32.mrf.mxu0 }
 0x2f4   :  { %12551 = vst [vmem:[#allocation29_spill] sm:$0xff] %v10799_v1  ;;  %8350 = vmatprep.mubr.msk.f32.mxu1 %vm9435_vm1, %v10586_v38 }
 0x2f5   :  { %v8201_v40 = vpop.f32.mrf.mxu1  ;;  %v8544_v45 = vpop.f32.mrf.mxu0 }
 0x2f7   :  { %v10803_v29 = vpop.f32.mrf.mxu1  ;;  %8351 = vmatmul.mubr.msk.f32.gmra.mxu1 %vm1053_vm3, %v10614_v63  ;;  %v10807_v44 = vpop.f32.mrf.mxu0 }
 0x2f8   :  { %12552 = vst [vmem:[#allocation30_spill] sm:$0xff] %v10807_v44  ;;  %8353 = vmatprep.mubr.msk.f32.mxu1 %vm9435_vm1, %v10586_v38 }
 0x2f9   :  { %v8204_v37 = vpop.f32.mrf.mxu1  ;;  %v8547_v48 = vpop.f32.mrf.mxu0 }
 0x2fb   :  { %v10811_v46 = vpop.f32.mrf.mxu1  ;;  %8354 = vmatmul.mubr.msk.f32.gmra.mxu1 %vm1053_vm3, %v10625_v22  ;;  %v10815_v32 = vpop.f32.mrf.mxu0 }
 0x2fc   :  { %12553 = vst [vmem:[#allocation31_spill] sm:$0xff] %v10815_v32  ;;  %8356 = vmatprep.mubr.msk.f32.mxu1 %vm9435_vm1, %v10586_v38 }
 0x2fd   :  { %v8207_v40 = vpop.f32.mrf.mxu1  ;;  %v8550_v45 = vpop.f32.mrf.mxu0 }
 0x2ff   :  { %v10819_v63 = vpop.f32.mrf.mxu1  ;;  %8357 = vmatmul.mubr.msk.f32.gmra.mxu1 %vm1053_vm3, %v10636_v52  ;;  %v2950_v44 = vpop.f32.mrf.mxu0 }
 0x300   :  { %8359 = vmatprep.mubr.msk.f32.mxu1 %vm9435_vm1, %v10586_v38 }
 0x301   :  { %v8210_v37 = vpop.f32.mrf.mxu1  ;;  %v8553_v48 = vpop.f32.mrf.mxu0 }
 0x303   :  { %v10825_v1 = vpop.f32.mrf.mxu1  ;;  %8360 = vmatmul.mubr.msk.f32.gmra.mxu1 %vm1053_vm3, %v10645_v30  ;;  %v2955_v22 = vpop.f32.mrf.mxu0 }
 0x304   :  { %8362 = vmatprep.mubr.msk.f32.mxu1 %vm9435_vm1, %v10586_v38 }
 0x305   :  { %v8213_v40 = vpop.f32.mrf.mxu1  ;;  %v8556_v45 = vpop.f32.mrf.mxu0 }
 0x307   :  { %v10831_v32 = vpop.f32.mrf.mxu1  ;;  %8363 = vmatmul.mubr.msk.f32.gmra.mxu1 %vm1053_vm3, %v10656_v8  ;;  %v10835_v52 = vpop.f32.mrf.mxu0 }
 0x308   :  { %12554 = vst [vmem:[#allocation32_spill] sm:$0xff] %v10835_v52  ;;  %8365 = vmatprep.mubr.msk.f32.mxu1 %vm9435_vm1, %v10586_v38 }
 0x309   :  { %v8216_v44 = vpop.f32.mrf.mxu1  ;;  %v8559_v37 = vpop.f32.mrf.mxu0 }
 0x30b   :  { %v10839_v48 = vpop.f32.mrf.mxu1  ;;  %8366 = vmatmul.mubr.msk.f32.gmra.mxu1 %vm1053_vm3, %v10667_v59  ;;  %v10843_v30 = vpop.f32.mrf.mxu0  ;;  %v1870_v59 = vld [vmem:[#allocation4 + $0xb2] sm:$0xff] }
 0x30c   :  { %12555 = vst [vmem:[#allocation33_spill] sm:$0xff] %v10843_v30  ;;  %8368 = vmatprep.mubr.msk.f32.mxu1 %vm9435_vm1, %v10586_v38 }
 0x30d   :  { %v8219_v22 = vpop.f32.mrf.mxu1  ;;  %v8562_v40 = vpop.f32.mrf.mxu0 }
 0x30f   :  { %v10847_v8 = vpop.f32.mrf.mxu1  ;;  %8369 = vmatmul.mubr.msk.f32.gmra.mxu1 %vm1053_vm3, %v10676_v24  ;;  %v10851_v45 = vpop.f32.mrf.mxu0  ;;  %v1871_v24 = vld [vmem:[#allocation4 + $0xba] sm:$0x3] }
 0x310   :  { %12556 = vst [vmem:[#allocation34_spill] sm:$0xff] %v10851_v45  ;;  %8371 = vmatprep.mubr.msk.f32.mxu1 %vm9435_vm1, %v10586_v38 }
 0x311   :  { %v8222_v44 = vpop.f32.mrf.mxu1  ;;  %v8565_v37 = vpop.f32.mrf.mxu0 }
 0x313   :  { %v10855_v52 = vpop.f32.mrf.mxu1  ;;  %8372 = vmatmul.mubr.msk.f32.gmra.mxu1 %vm1053_vm3, %v1870_v59  ;;  %v10858_v30 = vpop.f32.mrf.mxu0  ;;  %v7061_v59 = vld [vmem:[%s12521_s2 + $0x38] sm:$0xff] }
 0x314   :  { %12557 = vst [vmem:[#allocation35_spill] sm:$0xff] %v10858_v30  ;;  %8374 = vmatprep.mubr.msk.f32.mxu1 %vm9435_vm1, %v10586_v38  ;;  %v2443_v30 = vld [vmem:[#allocation4 + $0xc] sm:$0xff] }
 0x315   :  { %v8225_v22 = vpop.f32.mrf.mxu1  ;;  %v8568_v40 = vpop.f32.mrf.mxu0 }
 0x317   :  { %v10862_v39 = vpop.f32.mrf.mxu1  ;;  %8375 = vmatmul.mubr.msk.f32.gmra.mxu1 %vm1053_vm3, %v1871_v24  ;;  %v10865_v45 = vpop.f32.mrf.mxu0 }
 0x318   :  { %12558 = vst [vmem:[#allocation36_spill] sm:$0xff] %v10865_v45  ;;  %8450 = vmatprep.mubr.msk.f32.mxu1 %vm9435_vm1, %v10586_v38 }
 0x319   :  { %v8228_v44 = vpop.f32.mrf.mxu1  ;;  %v8571_v37 = vpop.f32.mrf.mxu0 }
 0x31a   :  { %v2444_v44 = vld [vmem:[#allocation4 + $0x14] sm:$0xff] }
 0x31b   :  { %v10872_v53 = vpop.f32.mrf.mxu1  ;;  %8451 = vmatmul.mubr.msk.f32.vlgmr.msra.gmra.mxu1 %vm1053_vm3, %v2443_v30  ;;  %v10875_v22 = vpop.f32.mrf.mxu0 }
 0x31c   :  { %12559 = vst [vmem:[#allocation37_spill] sm:$0xff] %v10875_v22  ;;  %8591 = vmatpush3.msra.mxu1 %v7061_v59  ;;  %8453 = vmatprep.mubr.msk.f32.mxu1 %vm9435_vm1, %v10586_v38  ;;  %v1439_v59 = vadd.f32 %v10715_v41, %v10273_v5 }
 0x31d   :  { %v8231_v40 = vpop.f32.mrf.mxu1  ;;  %v8574_v24 = vpop.f32.mrf.mxu0  ;;  %8732 = vmatprep.subr.mxu1 %v10586_v38 }
 0x31f   :  { %v10880_v37 = vpop.f32.mrf.mxu1  ;;  %8454 = vmatmul.mubr.msk.f32.gmra.mxu1 %vm1053_vm3, %v2444_v44  ;;  %v10883_v45 = vpop.f32.mrf.mxu0 }
 0x320   :  { %12560 = vst [vmem:[#allocation38_spill] sm:$0xff] %v10883_v45  ;;  %8456 = vmatprep.mubr.msk.f32.mxu1 %vm9435_vm1, %v10586_v38 }
 0x321   :  { %v8234_v30 = vpop.f32.mrf.mxu1  ;;  %v8577_v22 = vpop.f32.mrf.mxu0 }
 0x322   :  { %v1444_v30 = vadd.f32 %v10721_v62, %v10280_v56  ;;  %v2446_v22 = vld [vmem:[#allocation4 + $0x24] sm:$0xff] }
 0x323   :  { %v1712_v40 = vpop.f32.mrf.mxu1  ;;  %8457 = vmatmul.mubr.msk.f32.gmra.mxu1 %vm1053_vm3, %v2445_v13  ;;  %v10890_v24 = vpop.f32.mrf.mxu0 }
 0x324   :  { %v10892_v47 = vadd.f32 %v1712_v40, %v1439_v59  ;;  %8459 = vmatprep.mubr.msk.f32.mxu1 %vm9435_vm1, %v10586_v38  ;;  %v1449_v40 = vadd.f32 %v10727_v57, %v10288_v50 }
 0x325   :  { %v8239_v44 = vpop.f32.mrf.mxu1  ;;  %v8580_v45 = vpop.f32.mrf.mxu0 }
 0x326   :  { %v2447_v45 = vld [vmem:[#allocation4 + $0x2c] sm:$0xff] }
 0x327   :  { %v1717_v42 = vpop.f32.mrf.mxu1  ;;  %8460 = vmatmul.mubr.msk.f32.gmra.mxu1 %vm1053_vm3, %v2446_v22  ;;  %v10899_v5 = vpop.f32.mrf.mxu0  ;;  %v1454_v22 = vadd.f32 %v10735_v49, %v10296_v55 }
 0x328   :  { %v10901_v41 = vadd.f32 %v1717_v42, %v1444_v30  ;;  %8462 = vmatprep.mubr.msk.f32.mxu1 %vm9435_vm1, %v10586_v38 }
 0x329   :  { %v8242_v13 = vpop.f32.mrf.mxu1  ;;  %v8583_v59 = vpop.f32.mrf.mxu0 }
 0x32a   :  { %v2448_v13 = vld [vmem:[#allocation4 + $0x34] sm:$0xff] }
 0x32b   :  { %v1722_v44 = vpop.f32.mrf.mxu1  ;;  %8463 = vmatmul.mubr.msk.f32.gmra.mxu1 %vm1053_vm3, %v2447_v45  ;;  %v10908_v56 = vpop.f32.mrf.mxu0 }
 0x32c   :  { %12561 = vst [vmem:[#allocation39_spill] sm:$0xff] %v10908_v56  ;;  %v10910_v62 = vadd.f32 %v1722_v44, %v1449_v40  ;;  %8465 = vmatprep.mubr.msk.f32.mxu1 %vm9435_vm1, %v10586_v38  ;;  %v1459_v44 = vadd.f32 %v10743_v58, %v10229_v54 }
 0x32d   :  { %v8245_v42 = vpop.f32.mrf.mxu1  ;;  %v8586_v30 = vpop.f32.mrf.mxu0 }
 0x32e   :  { %v2449_v42 = vld [vmem:[#allocation4 + $0x3c] sm:$0xff] }
 0x32f   :  { %v1727_v59 = vpop.f32.mrf.mxu1  ;;  %8466 = vmatmul.mubr.msk.f32.gmra.mxu1 %vm1053_vm3, %v2448_v13  ;;  %v10917_v50 = vpop.f32.mrf.mxu0 }
 0x330   :  { %12562 = vst [vmem:[#allocation40_spill] sm:$0xff] %v10917_v50  ;;  %v10919_v57 = vadd.f32 %v1727_v59, %v1454_v22  ;;  %8468 = vmatprep.mubr.msk.f32.mxu1 %vm9435_vm1, %v10586_v38  ;;  %v1464_v59 = vadd.f32 %v10751_v12, %v10239_v4 }
 0x331   :  { %v8248_v40 = vpop.f32.mrf.mxu1  ;;  %v8589_v45 = vpop.f32.mrf.mxu0 }
 0x332   :  { %v2450_v40 = vld [vmem:[#allocation4 + $0x44] sm:$0xff] }
 0x333   :  { %v1732_v30 = vpop.f32.mrf.mxu1  ;;  %8469 = vmatmul.mubr.msk.f32.gmra.mxu1 %vm1053_vm3, %v2449_v42  ;;  %v10926_v55 = vpop.f32.mrf.mxu0 }
 0x334   :  { %v10928_v49 = vadd.f32 %v1732_v30, %v1459_v44  ;;  %8471 = vmatprep.mubr.msk.f32.mxu1 %vm9435_vm1, %v10586_v38  ;;  %v1469_v30 = vadd.f32 %v10759_v2, %v10253_v27 }
 0x335   :  { %v8251_v22 = vpop.f32.mrf.mxu1  ;;  %v8665_v13 = vpop.f32.mrf.mxu0 }
 0x336   :  { %v2451_v22 = vld [vmem:[#allocation4 + $0x4c] sm:$0xff] }
 0x337   :  { %v1737_v45 = vpop.f32.mrf.mxu1  ;;  %8472 = vmatmul.mubr.msk.f32.gmra.mxu1 %vm1053_vm3, %v2450_v40  ;;  %v10935_v54 = vpop.f32.mrf.mxu0 }
 0x338   :  { %v10937_v58 = vadd.f32 %v1737_v45, %v1464_v59  ;;  %8474 = vmatprep.mubr.msk.f32.mxu1 %vm9435_vm1, %v10586_v38  ;;  %v1474_v45 = vadd.f32 %v10767_v7, %v10275_v43 }
 0x339   :  { %v8254_v44 = vpop.f32.mrf.mxu1  ;;  %v8668_v42 = vpop.f32.mrf.mxu0 }
 0x33a   :  { %v2452_v44 = vld [vmem:[#allocation4 + $0x54] sm:$0xff] }
 0x33b   :  { %v1742_v13 = vpop.f32.mrf.mxu1  ;;  %8475 = vmatmul.mubr.msk.f32.gmra.mxu1 %vm1053_vm3, %v2451_v22  ;;  %v10944_v4 = vpop.f32.mrf.mxu0 }
 0x33c   :  { %v10946_v12 = vadd.f32 %v1742_v13, %v1469_v30  ;;  %8477 = vmatprep.mubr.msk.f32.mxu1 %vm9435_vm1, %v10586_v38  ;;  %v2453_v30 = vld [vmem:[#allocation4 + $0x5c] sm:$0xff] }
 0x33d   :  { %v8257_v59 = vpop.f32.mrf.mxu1  ;;  %v8671_v40 = vpop.f32.mrf.mxu0 }
 0x33e   :  { %v1479_v59 = vadd.f32 %v10775_v11, %v10310_v0 }
 0x33f   :  { %v1747_v42 = vpop.f32.mrf.mxu1  ;;  %8478 = vmatmul.mubr.msk.f32.gmra.mxu1 %vm1053_vm3, %v2452_v44  ;;  %v10953_v27 = vpop.f32.mrf.mxu0 }
 0x340   :  { %v10955_v2 = vadd.f32 %v1747_v42, %v1474_v45  ;;  %8480 = vmatprep.mubr.msk.f32.mxu1 %vm9435_vm1, %v10586_v38  ;;  %v2454_v45 = vld [vmem:[#allocation4 + $0x64] sm:$0xff] }
 0x341   :  { %v8260_v22 = vpop.f32.mrf.mxu1  ;;  %v8674_v13 = vpop.f32.mrf.mxu0 }
 0x342   :  { %v1484_v22 = vadd.f32 %v10783_v25, %v10320_v9 }
 0x343   :  { %v1752_v40 = vpop.f32.mrf.mxu1  ;;  %8481 = vmatmul.mubr.msk.f32.gmra.mxu1 %vm1053_vm3, %v2453_v30  ;;  %v10962_v43 = vpop.f32.mrf.mxu0 }
 0x344   :  { %v10964_v7 = vadd.f32 %v1752_v40, %v1479_v59  ;;  %8483 = vmatprep.mubr.msk.f32.mxu1 %vm9435_vm1, %v10586_v38  ;;  %v2455_v40 = vld [vmem:[#allocation4 + $0x6c] sm:$0xff] }
 0x345   :  { %v8263_v44 = vpop.f32.mrf.mxu1  ;;  %v8677_v42 = vpop.f32.mrf.mxu0 }
 0x346   :  { %v2456_v42 = vld [vmem:[#allocation4 + $0x74] sm:$0xff] }
 0x347   :  { %v1757_v13 = vpop.f32.mrf.mxu1  ;;  %8484 = vmatmul.mubr.msk.f32.gmra.mxu1 %vm1053_vm3, %v2454_v45  ;;  %v10971_v0 = vpop.f32.mrf.mxu0  ;;  %v3355_v45 = vld [vmem:[#allocation4 + $0xbe] sm:$0xff] }
 0x348   :  { %v10973_v11 = vadd.f32 %v1757_v13, %v1484_v22  ;;  %8486 = vmatprep.mubr.msk.f32.mxu1 %vm9435_vm1, %v10586_v38  ;;  %8727 = vmatmul.mubr.msk.f32.gmra.mxu0 %vm1053_vm3, %v3355_v45 }
 0x349   :  { %v8266_v30 = vpop.f32.mrf.mxu1  ;;  %v8680_v59 = vpop.f32.mrf.mxu0  ;;  %8729 = vmatprep.mubr.msk.f32.mxu0 %vm9435_vm1, %v10586_v38 }
 0x34a   :  { %v3356_v59 = vld [vmem:[#allocation4 + $0xc6] sm:$0x3] }
 0x34b   :  { %v1762_v50 = vpop.f32.mrf.mxu1  ;;  %8487 = vmatmul.mubr.msk.f32.gmra.mxu1 %vm1053_vm3, %v2455_v40  ;;  %v10978_v44 = vpop.f32.mrf.mxu0  ;;  %v1499_v40 = vadd.f32 %v10803_v29, %v10356_v34  ;;  %v1504_v34 = vadd.f32 %v10811_v46, %v10419_v20  ;;  %v2458_v29 = vld [vmem:[#allocation4 + $0x84] sm:$0xff] }
 0x34c   :  { %8489 = vmatprep.mubr.msk.f32.mxu1 %vm9435_vm1, %v10586_v38  ;;  %8730 = vmatmul.mubr.msk.f32.gmra.mxu0 %vm1053_vm3, %v3356_v59 }
 0x34d   :  { %v8269_v9 = vpop.f32.mrf.mxu1  ;;  %v8683_v25 = vpop.f32.mrf.mxu0  ;;  %8805 = vmatprep.mubr.msk.f32.mxu0 %vm9435_vm1, %v10586_v38 }
 0x34e   :  { %v2457_v9 = vld [vmem:[#allocation4 + $0x7c] sm:$0xff] }
 0x34f   :  { %v1767_v22 = vpop.f32.mrf.mxu1  ;;  %8490 = vmatmul.mubr.msk.f32.gmra.mxu1 %vm1053_vm3, %v2456_v42  ;;  %v10984_v13 = vpop.f32.mrf.mxu0 }
 0x350   :  { %8492 = vmatprep.mubr.msk.f32.mxu1 %vm9435_vm1, %v10586_v38 }
 0x351   :  { %v8272_v50 = vpop.f32.mrf.mxu1  ;;  %v8686_v30 = vpop.f32.mrf.mxu0 }
 0x353   :  { %v1772_v25 = vpop.f32.mrf.mxu1  ;;  %8493 = vmatmul.mubr.msk.f32.gmra.mxu1 %vm1053_vm3, %v2457_v9  ;;  %v10994_v45 = vpop.f32.mrf.mxu0 }
 0x354   :  { %v10998_v42 = vadd.f32 %v1772_v25, %v1499_v40  ;;  %8495 = vmatprep.mubr.msk.f32.mxu1 %vm9435_vm1, %v10586_v38 }
 0x355   :  { %v8275_v22 = vpop.f32.mrf.mxu1  ;;  %v8689_v50 = vpop.f32.mrf.mxu0 }
 0x356   :  { %v1509_v22 = vadd.f32 %v10819_v63, %v10431_v21  ;;  %v2459_v50 = vld [vmem:[#allocation4 + $0x8c] sm:$0xff] }
 0x357   :  { %v1777_v30 = vpop.f32.mrf.mxu1  ;;  %8496 = vmatmul.mubr.msk.f32.gmra.mxu1 %vm1053_vm3, %v2458_v29  ;;  %v11005_v59 = vpop.f32.mrf.mxu0 }
 0x358   :  { %v11007_v9 = vadd.f32 %v1777_v30, %v1504_v34  ;;  %8498 = vmatprep.mubr.msk.f32.mxu1 %vm9435_vm1, %v10586_v38  ;;  %v1514_v30 = vadd.f32 %v10825_v1, %v10442_v26 }
 0x359   :  { %v8278_v40 = vpop.f32.mrf.mxu1  ;;  %v8692_v25 = vpop.f32.mrf.mxu0 }
 0x35b   :  { %v1782_v56 = vpop.f32.mrf.mxu1  ;;  %8499 = vmatmul.mubr.msk.f32.gmra.mxu1 %vm1053_vm3, %v2459_v50  ;;  %v3544_v20 = vpop.f32.mrf.mxu0  ;;  %v2461_v50 = vld [vmem:[#allocation4 + $0x9c] sm:$0xff] }
 0x35c   :  { %v11014_v46 = vadd.f32 %v1782_v56, %v1509_v22  ;;  %8501 = vmatprep.mubr.msk.f32.mxu1 %vm9435_vm1, %v10586_v38  ;;  %v1519_v22 = vadd.f32 %v10831_v32, %v10514_v60 }
 0x35d   :  { %v8281_v34 = vpop.f32.mrf.mxu1  ;;  %v8695_v29 = vpop.f32.mrf.mxu0 }
 0x35e   :  { %v1524_v29 = vadd.f32 %v10839_v48, %v10552_v15 }
 0x35f   :  { %v1787_v40 = vpop.f32.mrf.mxu1  ;;  %8502 = vmatmul.mubr.msk.f32.gmra.mxu1 %vm1053_vm3, %v10429_v18  ;;  %v3549_v21 = vpop.f32.mrf.mxu0 }
 0x360   :  { %v11022_v63 = vadd.f32 %v1787_v40, %v1514_v30  ;;  %8504 = vmatprep.mubr.msk.f32.mxu1 %vm9435_vm1, %v10586_v38  ;;  %v2462_v30 = vld [vmem:[#allocation4 + $0xa4] sm:$0xff] }
 0x361   :  { %v8284_v56 = vpop.f32.mrf.mxu1  ;;  %v8698_v25 = vpop.f32.mrf.mxu0 }
 0x362   :  { %v1529_v25 = vadd.f32 %v10847_v8, %v10603_v51 }
 0x363   :  { %v1792_v20 = vpop.f32.mrf.mxu1  ;;  %8505 = vmatmul.mubr.msk.f32.gmra.mxu1 %vm1053_vm3, %v2461_v50  ;;  %v11029_v26 = vpop.f32.mrf.mxu0 }
 0x364   :  { %v11031_v1 = vadd.f32 %v1792_v20, %v1519_v22  ;;  %8507 = vmatprep.mubr.msk.f32.mxu1 %vm9435_vm1, %v10586_v38 }
 0x365   :  { %v8287_v18 = vpop.f32.mrf.mxu1  ;;  %v8701_v34 = vpop.f32.mrf.mxu0 }
 0x366   :  { %v1534_v18 = vadd.f32 %v10855_v52, %v10616_v10 }
 0x367   :  { %v1797_v40 = vpop.f32.mrf.mxu1  ;;  %8508 = vmatmul.mubr.msk.f32.gmra.mxu1 %vm1053_vm3, %v2462_v30  ;;  %v11038_v60 = vpop.f32.mrf.mxu0  ;;  %v1539_v30 = vadd.f32 %v10862_v39, %v10630_v28  ;;  %v1544_v28 = vadd.f32 %v10872_v53, %v10696_v17  ;;  %v3037_v39 = vld [vmem:[#allocation4 + $0x15] sm:$0xff]  ;;  %v3038_v17 = vld [vmem:[#allocation4 + $0x1d] sm:$0xff] }
 0x368   :  { %v11040_v32 = vadd.f32 %v1797_v40, %v1524_v29  ;;  %8510 = vmatprep.mubr.msk.f32.mxu1 %vm9435_vm1, %v10586_v38  ;;  %v2465_v40 = vld [vmem:[#allocation4 + $0xbc] sm:$0x3] }
 0x369   :  { %v8290_v21 = vpop.f32.mrf.mxu1  ;;  %v8704_v56 = vpop.f32.mrf.mxu0 }
 0x36b   :  { %v1802_v22 = vpop.f32.mrf.mxu1  ;;  %8511 = vmatmul.mubr.msk.f32.gmra.mxu1 %vm1053_vm3, %v10457_v36  ;;  %v11048_v15 = vpop.f32.mrf.mxu0 }
 0x36c   :  { %v11050_v48 = vadd.f32 %v1802_v22, %v1529_v25  ;;  %8513 = vmatprep.mubr.msk.f32.mxu1 %vm9435_vm1, %v10586_v38  ;;  %v7109_v25 = vld [vmem:[%s12522_s3 + $0x8] sm:$0xff] }
 0x36d   :  { %v8293_v50 = vpop.f32.mrf.mxu1  ;;  %v8707_v20 = vpop.f32.mrf.mxu0 }
 0x36f   :  { %v1807_v34 = vpop.f32.mrf.mxu1  ;;  %8514 = vmatmul.mubr.msk.f32.gmra.mxu1 %vm1053_vm3, %v10466_v16  ;;  %v11058_v51 = vpop.f32.mrf.mxu0 }
 0x370   :  { %v11060_v8 = vadd.f32 %v1807_v34, %v1534_v18  ;;  %8516 = vmatprep.mubr.msk.f32.mxu1 %vm9435_vm1, %v10586_v38 }
 0x371   :  { %v8296_v36 = vpop.f32.mrf.mxu1  ;;  %v8710_v29 = vpop.f32.mrf.mxu0 }
 0x372   :  { %v1549_v36 = vadd.f32 %v10880_v37, %v10706_v6 }
 0x373   :  { %v1812_v21 = vpop.f32.mrf.mxu1  ;;  %8517 = vmatmul.mubr.msk.f32.gmra.mxu1 %vm1053_vm3, %v2465_v40  ;;  %v11067_v10 = vpop.f32.mrf.mxu0 }
 0x374   :  { %v11069_v52 = vadd.f32 %v1812_v21, %v1539_v30  ;;  %8592 = vmatprep.mubr.msk.f32.mxu1 %vm9435_vm1, %v10586_v38 }
 0x375   :  { %v8299_v16 = vpop.f32.mrf.mxu1  ;;  %v8713_v56 = vpop.f32.mrf.mxu0 }
 0x376   :  { %v3039_v16 = vld [vmem:[#allocation4 + $0x25] sm:$0xff] }
 0x377   :  { %v1817_v22 = vpop.f32.mrf.mxu1  ;;  %8593 = vmatmul.mubr.msk.f32.vlgmr.msra.gmra.mxu1 %vm1053_vm3, %v3037_v39  ;;  %v11079_v50 = vpop.f32.mrf.mxu0  ;;  %v3040_v39 = vld [vmem:[#allocation4 + $0x2d] sm:$0xff] }
 0x378   :  { %v11081_v20 = vadd.f32 %v1817_v22, %v1544_v28  ;;  %8595 = vmatprep.mubr.msk.f32.mxu1 %vm9435_vm1, %v10586_v38  ;;  %8733 = vmatpush3.msra.mxu1 %v7109_v25 }
 0x379   :  { %v8302_v18 = vpop.f32.mrf.mxu1  ;;  %v8716_v34 = vpop.f32.mrf.mxu0  ;;  %8874 = vmatprep.subr.mxu1 %v10586_v38 }
 0x37b   :  { %v1822_v53 = vpop.f32.mrf.mxu1  ;;  %8596 = vmatmul.mubr.msk.f32.gmra.mxu1 %vm1053_vm3, %v3038_v17  ;;  %v11089_v29 = vpop.f32.mrf.mxu0  ;;  %v3041_v17 = vld [vmem:[#allocation4 + $0x35] sm:$0xff] }
 0x37c   :  { %v11091_v30 = vadd.f32 %v1822_v53, %v1549_v36  ;;  %8598 = vmatprep.mubr.msk.f32.mxu1 %vm9435_vm1, %v10586_v38 }
 0x37d   :  { %v8305_v40 = vpop.f32.mrf.mxu1  ;;  %v8719_v21 = vpop.f32.mrf.mxu0 }
 0x37f   :  { %v2009_v56 = vpop.f32.mrf.mxu1  ;;  %8599 = vmatmul.mubr.msk.f32.gmra.mxu1 %vm1053_vm3, %v3039_v16  ;;  %v11096_v25 = vpop.f32.mrf.mxu0  ;;  %v3042_v16 = vld [vmem:[#allocation4 + $0x3d] sm:$0xff] }
 0x380   :  { %v11099_v6 = vadd.f32 %v2009_v56, %v10892_v47  ;;  %8601 = vmatprep.mubr.msk.f32.mxu1 %vm9435_vm1, %v10586_v38 }
 0x381   :  { %v8310_v37 = vpop.f32.mrf.mxu1  ;;  %v8722_v28 = vpop.f32.mrf.mxu0 }
 0x382   :  { %v3043_v28 = vld [vmem:[#allocation4 + $0x45] sm:$0xff] }
 0x383   :  { %v2014_v22 = vpop.f32.mrf.mxu1  ;;  %8602 = vmatmul.mubr.msk.f32.gmra.mxu1 %vm1053_vm3, %v3040_v39  ;;  %v11104_v18 = vpop.f32.mrf.mxu0 }
 0x384   :  { %v11107_v34 = vadd.f32 %v2014_v22, %v10901_v41  ;;  %8604 = vmatprep.mubr.msk.f32.mxu1 %vm9435_vm1, %v10586_v38 }
 0x385   :  { %v8313_v36 = vpop.f32.mrf.mxu1  ;;  %v8725_v47 = vpop.f32.mrf.mxu0 }
 0x386   :  { %v3044_v36 = vld [vmem:[#allocation4 + $0x4d] sm:$0xff] }
 0x387   :  { %v2019_v53 = vpop.f32.mrf.mxu1  ;;  %8605 = vmatmul.mubr.msk.f32.gmra.mxu1 %vm1053_vm3, %v3041_v17 }
 0x388   :  { %v11113_v40 = vadd.f32 %v2019_v53, %v10910_v62  ;;  %8607 = vmatprep.mubr.msk.f32.mxu1 %vm9435_vm1, %v10586_v38  ;;  %v3045_v53 = vld [vmem:[#allocation4 + $0x55] sm:$0xff] }
 0x389   :  { %v8316_v21 = vpop.f32.mrf.mxu1 }
 0x38b   :  { %v2024_v56 = vpop.f32.mrf.mxu1  ;;  %8608 = vmatmul.mubr.msk.f32.gmra.mxu1 %vm1053_vm3, %v3042_v16  ;;  %v3046_v16 = vld [vmem:[#allocation4 + $0x5d] sm:$0xff] }
 0x38c   :  { %v11119_v41 = vadd.f32 %v2024_v56, %v10919_v57  ;;  %8610 = vmatprep.mubr.msk.f32.mxu1 %vm9435_vm1, %v10586_v38 }
 0x38d   :  { %v8319_v37 = vpop.f32.mrf.mxu1 }
 0x38f   :  { %v2029_v39 = vpop.f32.mrf.mxu1  ;;  %8611 = vmatmul.mubr.msk.f32.gmra.mxu1 %vm1053_vm3, %v3043_v28  ;;  %v3047_v28 = vld [vmem:[#allocation4 + $0x65] sm:$0xff] }
 0x390   :  { %v11125_v62 = vadd.f32 %v2029_v39, %v10928_v49  ;;  %8613 = vmatprep.mubr.msk.f32.mxu1 %vm9435_vm1, %v10586_v38 }
 0x391   :  { %v8322_v22 = vpop.f32.mrf.mxu1 }
 0x393   :  { %v2034_v47 = vpop.f32.mrf.mxu1  ;;  %8614 = vmatmul.mubr.msk.f32.gmra.mxu1 %vm1053_vm3, %v3044_v36 }
 0x394   :  { %v11131_v57 = vadd.f32 %v2034_v47, %v10937_v58  ;;  %8616 = vmatprep.mubr.msk.f32.mxu1 %vm9435_vm1, %v10586_v38  ;;  %v3048_v47 = vld [vmem:[#allocation4 + $0x6d] sm:$0xff] }
 0x395   :  { %v8325_v17 = vpop.f32.mrf.mxu1 }
 0x397   :  { %v2039_v21 = vpop.f32.mrf.mxu1  ;;  %8617 = vmatmul.mubr.msk.f32.gmra.mxu1 %vm1053_vm3, %v3045_v53 }
 0x398   :  { %v11137_v49 = vadd.f32 %v2039_v21, %v10946_v12  ;;  %8619 = vmatprep.mubr.msk.f32.mxu1 %vm9435_vm1, %v10586_v38  ;;  %v3049_v21 = vld [vmem:[#allocation4 + $0x75] sm:$0xff] }
 0x399   :  { %v8328_v56 = vpop.f32.mrf.mxu1 }
 0x39a   :  { %v3050_v56 = vld [vmem:[#allocation4 + $0x7d] sm:$0xff] }
 0x39b   :  { %v2044_v37 = vpop.f32.mrf.mxu1  ;;  %8620 = vmatmul.mubr.msk.f32.gmra.mxu1 %vm1053_vm3, %v3046_v16 }
 0x39c   :  { %v11143_v58 = vadd.f32 %v2044_v37, %v10955_v2  ;;  %8622 = vmatprep.mubr.msk.f32.mxu1 %vm9435_vm1, %v10586_v38 }
 0x39d   :  { %v8331_v39 = vpop.f32.mrf.mxu1 }
 0x39e   :  { %v3051_v39 = vld [vmem:[#allocation4 + $0x85] sm:$0xff] }
 0x39f   :  { %v2049_v22 = vpop.f32.mrf.mxu1  ;;  %8623 = vmatmul.mubr.msk.f32.gmra.mxu1 %vm1053_vm3, %v3047_v28  ;;  %v11163_v28 = vld [vmem:[#allocation4] sm:$0xff] }
 0x3a0   :  { %v11149_v12 = vadd.f32 %v2049_v22, %v10964_v7  ;;  %8625 = vmatprep.mubr.msk.f32.mxu1 %vm9435_vm1, %v10586_v38 }
 0x3a1   :  { %v8334_v36 = vpop.f32.mrf.mxu1 }
 0x3a3   :  { %v2054_v17 = vpop.f32.mrf.mxu1  ;;  %8626 = vmatmul.mubr.msk.f32.gmra.mxu1 %vm1053_vm3, %v3048_v47  ;;  %v3052_v47 = vld [vmem:[#allocation4 + $0x8d] sm:$0xff] }
 0x3a4   :  { %v11155_v2 = vadd.f32 %v2054_v17, %v10973_v11  ;;  %8628 = vmatprep.mubr.msk.f32.mxu1 %vm9435_vm1, %v10586_v38 }
 0x3a5   :  { %v8337_v53 = vpop.f32.mrf.mxu1 }
 0x3a7   :  { %v2059_v16 = vpop.f32.mrf.mxu1  ;;  %8629 = vmatmul.mubr.msk.f32.gmra.mxu1 %vm1053_vm3, %v3049_v21 }
 0x3a8   :  { %8631 = vmatprep.mubr.msk.f32.mxu1 %vm9435_vm1, %v10586_v38  ;;  %v3053_v16 = vld [vmem:[#allocation4 + $0x95] sm:$0xff] }
 0x3a9   :  { %v8340_v7 = vpop.f32.mrf.mxu1 }
 0x3ab   :  { %v2064_v37 = vpop.f32.mrf.mxu1  ;;  %8632 = vmatmul.mubr.msk.f32.gmra.mxu1 %vm1053_vm3, %v3050_v56 }
 0x3ac   :  { %8634 = vmatprep.mubr.msk.f32.mxu1 %vm9435_vm1, %v11163_v28  ;;  %v3054_v37 = vld [vmem:[#allocation4 + $0x9d] sm:$0xff] }
 0x3ad   :  { %v8343_v11 = vpop.f32.mrf.mxu1 }
 0x3af   :  { %v2069_v22 = vpop.f32.mrf.mxu1  ;;  %8635 = vmatmul.mubr.msk.f32.gmra.mxu1 %vm1053_vm3, %v3051_v39 }
 0x3b0   :  { %v11169_v36 = vadd.f32 %v2069_v22, %v10998_v42  ;;  %8637 = vmatprep.mubr.msk.f32.mxu1 %vm9435_vm1, %v11163_v28  ;;  %v3055_v22 = vld [vmem:[#allocation4 + $0xa5] sm:$0xff] }
 0x3b1   :  { %v8346_v38 = vpop.f32.mrf.mxu1 }
 0x3b3   :  { %v2074_v17 = vpop.f32.mrf.mxu1  ;;  %8638 = vmatmul.mubr.msk.f32.gmra.mxu1 %vm1053_vm3, %v3052_v47 }
 0x3b4   :  { %v11175_v53 = vadd.f32 %v2074_v17, %v11007_v9  ;;  %8640 = vmatprep.mubr.msk.f32.mxu1 %vm9435_vm1, %v11163_v28  ;;  %v3056_v17 = vld [vmem:[#allocation4 + $0xad] sm:$0xff] }
 0x3b5   :  { %v8349_v21 = vpop.f32.mrf.mxu1 }
 0x3b7   :  { %v2079_v7 = vpop.f32.mrf.mxu1  ;;  %8641 = vmatmul.mubr.msk.f32.gmra.mxu1 %vm1053_vm3, %v3053_v16 }
 0x3b8   :  { %v11181_v42 = vadd.f32 %v2079_v7, %v11014_v46  ;;  %8643 = vmatprep.mubr.msk.f32.mxu1 %vm9435_vm1, %v11163_v28  ;;  %v3057_v7 = vld [vmem:[#allocation4 + $0xb5] sm:$0xff] }
 0x3b9   :  { %v8352_v56 = vpop.f32.mrf.mxu1 }
 0x3bb   :  { %v2084_v11 = vpop.f32.mrf.mxu1  ;;  %8644 = vmatmul.mubr.msk.f32.gmra.mxu1 %vm1053_vm3, %v3054_v37 }
 0x3bc   :  { %v11187_v9 = vadd.f32 %v2084_v11, %v11022_v63  ;;  %8646 = vmatprep.mubr.msk.f32.mxu1 %vm9435_vm1, %v11163_v28 }
 0x3bd   :  { %v8355_v39 = vpop.f32.mrf.mxu1 }
 0x3bf   :  { %v2089_v38 = vpop.f32.mrf.mxu1  ;;  %8647 = vmatmul.mubr.msk.f32.gmra.mxu1 %vm1053_vm3, %v3055_v22 }
 0x3c0   :  { %v11193_v46 = vadd.f32 %v2089_v38, %v11031_v1  ;;  %8649 = vmatprep.mubr.msk.f32.mxu1 %vm9435_vm1, %v11163_v28  ;;  %v3782_v1 = vld [vmem:[%s12522_s3] sm:$0xff] }
 0x3c1   :  { %v8358_v47 = vpop.f32.mrf.mxu1  ;;  %8804 = vmatpush3.msra.mxu0 %v3782_v1 }
 0x3c2   :  { %8806 = vmatmul.mubr.msk.f32.vlgmr.msra.gmra.mxu0 %vm1053_vm3, %v11163_v28  ;;  %8945 = vmatprep.subr.mxu0 %v11163_v28 }
 0x3c3   :  { %v2094_v21 = vpop.f32.mrf.mxu1  ;;  %8650 = vmatmul.mubr.msk.f32.gmra.mxu1 %vm1053_vm3, %v3056_v17  ;;  %8808 = vmatprep.mubr.msk.f32.mxu0 %vm9435_vm1, %v11163_v28 }
 0x3c4   :  { %v11199_v63 = vadd.f32 %v2094_v21, %v11040_v32  ;;  %8652 = vmatprep.mubr.msk.f32.mxu1 %vm9435_vm1, %v11163_v28  ;;  %v3058_v32 = vld [vmem:[#allocation4 + $0xbd] sm:$0xff]  ;;  %v3783_v21 = vld [vmem:[#allocation5 + $0x1] sm:$0xff] }
 0x3c5   :  { %v8361_v16 = vpop.f32.mrf.mxu1 }
 0x3c7   :  { %v2099_v56 = vpop.f32.mrf.mxu1  ;;  %8653 = vmatmul.mubr.msk.f32.gmra.mxu1 %vm1053_vm3, %v3057_v7 }
 0x3c8   :  { %v11208_v37 = vadd.f32 %v2099_v56, %v11050_v48  ;;  %8655 = vmatprep.mubr.msk.f32.mxu1 %vm9435_vm1, %v11163_v28  ;;  %v3059_v48 = vld [vmem:[#allocation4 + $0xc5] sm:$0x3] }
 0x3c9   :  { %v8364_v11 = vpop.f32.mrf.mxu1 }
 0x3cb   :  { %v2104_v39 = vpop.f32.mrf.mxu1  ;;  %8656 = vmatmul.mubr.msk.f32.gmra.mxu1 %vm1053_vm3, %v3058_v32 }
 0x3cc   :  { %v11219_v22 = vadd.f32 %v2104_v39, %v11060_v8  ;;  %8658 = vmatprep.mubr.msk.f32.mxu1 %vm9435_vm1, %v11163_v28  ;;  %v2420_v39 = vadd.f32 %v10307_v61, %v11099_v6  ;;  %v2423_v6 = vadd.f32 %v10336_v14, %v11119_v41  ;;  %v2426_v14 = vadd.f32 %v10362_v35, %v11137_v49  ;;  %v12564_v35 = vld [vmem:[#allocation10_spill] sm:$0xff] }
 0x3cd   :  { %v8367_v38 = vpop.f32.mrf.mxu1  ;;  %v2429_v49 = vadd.f32 %v12564_v35, %v11155_v2 }
 0x3cf   :  { %v2109_v47 = vpop.f32.mrf.mxu1  ;;  %8659 = vmatmul.mubr.msk.f32.gmra.mxu1 %vm1053_vm3, %v3059_v48 }
 0x3d0   :  { %v11225_v17 = vadd.f32 %v2109_v47, %v11069_v52  ;;  %8734 = vmatprep.mubr.msk.f32.mxu1 %vm9435_vm1, %v11163_v28  ;;  %v7156_v52 = vld [vmem:[%s12522_s3 + $0x10] sm:$0xff]  ;;  %v2421_v47 = vadd.f32 %v10318_v3, %v11107_v34  ;;  %v2424_v3 = vadd.f32 %v10344_v23, %v11125_v62  ;;  %v2427_v23 = vadd.f32 %v10370_v19, %v11143_v58 }
 0x3d1   :  { %v8370_v16 = vpop.f32.mrf.mxu1 }
 0x3d3   :  { %v2114_v7 = vpop.f32.mrf.mxu1  ;;  %8735 = vmatmul.mubr.msk.f32.vlgmr.msra.gmra.mxu1 %vm1053_vm3, %v3783_v21 }
 0x3d4   :  { %v11231_v8 = vadd.f32 %v2114_v7, %v11081_v20  ;;  %8737 = vmatprep.mubr.msk.f32.mxu1 %vm9435_vm1, %v11163_v28  ;;  %8875 = vmatpush3.msra.mxu1 %v7156_v52  ;;  %v2422_v7 = vadd.f32 %v10328_v33, %v11113_v40  ;;  %v2425_v33 = vadd.f32 %v10352_v31, %v11131_v57  ;;  %v12563_v31 = vld [vmem:[#allocation9_spill] sm:$0xff] }
 0x3d5   :  { %v8373_v1 = vpop.f32.mrf.mxu1  ;;  %9016 = vmatprep.subr.mxu1 %v11163_v28  ;;  %v2428_v57 = vadd.f32 %v12563_v31, %v11149_v12 }
 0x3d7   :  { %v2119_v56 = vpop.f32.mrf.mxu1 }
 0x3d8   :  { %v11236_v32 = vadd.f32 %v2119_v56, %v11091_v30 }
 0x3d9   :  { %v8376_v11 = vpop.f32.mrf.mxu1 }
 0x3db   :  { %v2603_v20 = vpop.f32.mrf.mxu1 }
 0x3dc   :  { %v11244_v48 = vadd.f32 %v2603_v20, %v2420_v39 }
 0x3dd   :  { %v8452_v38 = vpop.f32.mrf.mxu1 }
 0x3df   :  { %v2608_v30 = vpop.f32.mrf.mxu1 }
 0x3e0   :  { %v11248_v21 = vadd.f32 %v2608_v30, %v2421_v47 }
 0x3e1   :  { %v8455_v16 = vpop.f32.mrf.mxu1 }
 0x3e3   :  { %v2613_v1 = vpop.f32.mrf.mxu1 }
 0x3e4   :  { %v11252_v56 = vadd.f32 %v2613_v1, %v2422_v7 }
 0x3e5   :  { %v8458_v61 = vpop.f32.mrf.mxu1 }
 0x3e7   :  { %v2618_v52 = vpop.f32.mrf.mxu1 }
 0x3e8   :  { %v11256_v11 = vadd.f32 %v2618_v52, %v2423_v6 }
 0x3e9   :  { %v8461_v39 = vpop.f32.mrf.mxu1 }
 0x3eb   :  { %v2623_v34 = vpop.f32.mrf.mxu1 }
 0x3ec   :  { %v11260_v20 = vadd.f32 %v2623_v34, %v2424_v3 }
 0x3ed   :  { %v8464_v38 = vpop.f32.mrf.mxu1 }
 0x3ef   :  { %v2628_v40 = vpop.f32.mrf.mxu1 }
 0x3f0   :  { %v11264_v47 = vadd.f32 %v2628_v40, %v2425_v33 }
 0x3f1   :  { %v8467_v30 = vpop.f32.mrf.mxu1 }
 0x3f2   :  { %v12565_v30 = vld [vmem:[#allocation11_spill] sm:$0xff] }
 0x3f3   :  { %v2633_v41 = vpop.f32.mrf.mxu1 }
 0x3f4   :  { %v11268_v16 = vadd.f32 %v2633_v41, %v2426_v14  ;;  %v2432_v14 = vadd.f32 %v12565_v30, %v11169_v36 }
 0x3f5   :  { %v8470_v7 = vpop.f32.mrf.mxu1 }
 0x3f7   :  { %v2638_v62 = vpop.f32.mrf.mxu1 }
 0x3f8   :  { %v11272_v1 = vadd.f32 %v2638_v62, %v2427_v23  ;;  %v12566_v23 = vld [vmem:[#allocation12_spill] sm:$0xff] }
 0x3f9   :  { %v8473_v61 = vpop.f32.mrf.mxu1  ;;  %v2433_v62 = vadd.f32 %v12566_v23, %v11175_v53 }
 0x3fb   :  { %v2643_v6 = vpop.f32.mrf.mxu1 }
 0x3fc   :  { %v11276_v52 = vadd.f32 %v2643_v6, %v2428_v57  ;;  %v12567_v6 = vld [vmem:[#allocation13_spill] sm:$0xff] }
 0x3fd   :  { %v8476_v39 = vpop.f32.mrf.mxu1 }
 0x3fe   :  { %v2434_v39 = vadd.f32 %v12567_v6, %v11181_v42 }
 0x3ff   :  { %v2648_v3 = vpop.f32.mrf.mxu1 }
 0x400   :  { %v11280_v34 = vadd.f32 %v2648_v3, %v2429_v49 }
 0x401   :  { %v8479_v38 = vpop.f32.mrf.mxu1 }
 0x403   :  { %v2653_v33 = vpop.f32.mrf.mxu1 }
 0x404   :  { %v12568_v33 = vld [vmem:[#allocation14_spill] sm:$0xff] }
 0x405   :  { %v8482_v19 = vpop.f32.mrf.mxu1 }
 0x406   :  { %v2435_v19 = vadd.f32 %v12568_v33, %v11187_v9  ;;  %v12571_v9 = vld [vmem:[#allocation17_spill] sm:$0xff] }
 0x407   :  { %v2658_v58 = vpop.f32.mrf.mxu1 }
 0x408   :  { %v11290_v57 = vpop.f32.mrf.mxu0 }
 0x409   :  { %v8485_v40 = vpop.f32.mrf.mxu1 }
 0x40a   :  { %v8728_v49 = vpop.f32.mrf.mxu0 }
 0x40b   :  { %v2663_v41 = vpop.f32.mrf.mxu1 }
 0x40c   :  { %v11284_v12 = vadd.f32 %v2663_v41, %v2432_v14  ;;  %v11296_v38 = vpop.f32.mrf.mxu0  ;;  %v12569_v14 = vld [vmem:[#allocation15_spill] sm:$0xff] }
 0x40d   :  { %v8488_v7 = vpop.f32.mrf.mxu1  ;;  %v2436_v41 = vadd.f32 %v12569_v14, %v11193_v46  ;;  %v12572_v46 = vld [vmem:[#allocation18_spill] sm:$0xff]  ;;  %v12573_v14 = vld [vmem:[#allocation19_spill] sm:$0xff] }
 0x40e   :  { %v8731_v58 = vpop.f32.mrf.mxu0 }
 0x40f   :  { %v2668_v61 = vpop.f32.mrf.mxu1 }
 0x410   :  { %v11288_v2 = vadd.f32 %v2668_v61, %v2433_v62  ;;  %v12570_v62 = vld [vmem:[#allocation16_spill] sm:$0xff] }
 0x411   :  { %v8491_v31 = vpop.f32.mrf.mxu1  ;;  %v2437_v61 = vadd.f32 %v12570_v62, %v11199_v63  ;;  %v7180_v63 = vld [vmem:[%s12522_s3 + $0x18] sm:$0xff] }
 0x412   :  { %8946 = vmatpush3.msra.mxu0 %v7180_v63 }
 0x413   :  { %v2673_v35 = vpop.f32.mrf.mxu1  ;;  %9087 = vmatprep.subr.mxu0 %v11163_v28 }
 0x414   :  { %v11294_v3 = vadd.f32 %v2673_v35, %v2434_v39  ;;  %v2438_v35 = vadd.f32 %v12571_v9, %v11208_v37  ;;  %v12575_v9 = vld [vmem:[#allocation21_spill] sm:$0xff] }
 0x415   :  { %v8494_v36 = vpop.f32.mrf.mxu1 }
 0x417   :  { %v2678_v53 = vpop.f32.mrf.mxu1 }
 0x418   :  { %v11300_v40 = vadd.f32 %v2678_v53, %v2435_v19  ;;  %v2439_v19 = vadd.f32 %v12572_v46, %v11219_v22  ;;  %v12574_v22 = vld [vmem:[#allocation20_spill] sm:$0xff]  ;;  %v12576_v46 = vld [vmem:[#allocation22_spill] sm:$0xff] }
 0x419   :  { %v8497_v30 = vpop.f32.mrf.mxu1  ;;  %v2441_v62 = vadd.f32 %v12574_v22, %v11231_v8  ;;  %v11339_v8 = vld [vmem:[%s12524_s5 + $0xb] sm:$0xff] }
 0x41b   :  { %v2683_v7 = vpop.f32.mrf.mxu1 }
 0x41c   :  { %v11304_v42 = vadd.f32 %v2683_v7, %v2436_v41  ;;  %v2440_v41 = vadd.f32 %v12573_v14, %v11225_v17 }
 0x41d   :  { %v8500_v23 = vpop.f32.mrf.mxu1 }
 0x41f   :  { %v2688_v31 = vpop.f32.mrf.mxu1 }
 0x420   :  { %v11308_v6 = vadd.f32 %v2688_v31, %v2437_v61 }
 0x421   :  { %v8503_v39 = vpop.f32.mrf.mxu1 }
 0x423   :  { %v2693_v49 = vpop.f32.mrf.mxu1 }
 0x424   :  { %v11312_v36 = vadd.f32 %v2693_v49, %v2438_v35  ;;  %v2442_v35 = vadd.f32 %v12575_v9, %v11236_v32 }
 0x425   :  { %v8506_v33 = vpop.f32.mrf.mxu1 }
 0x427   :  { %v2698_v53 = vpop.f32.mrf.mxu1 }
 0x428   :  { %v11316_v58 = vadd.f32 %v2698_v53, %v2439_v19  ;;  %v3014_v19 = vadd.f32 %v12576_v46, %v11244_v48 }
 0x429   :  { %v8509_v30 = vpop.f32.mrf.mxu1 }
 0x42b   :  { %v2703_v37 = vpop.f32.mrf.mxu1 }
 0x42c   :  { %v11324_v7 = vadd.f32 %v2703_v37, %v2440_v41  ;;  %v12577_v41 = vld [vmem:[#allocation23_spill] sm:$0xff] }
 0x42d   :  { %v8512_v23 = vpop.f32.mrf.mxu1  ;;  %v3015_v32 = vadd.f32 %v12577_v41, %v11248_v21 }
 0x42f   :  { %v2708_v61 = vpop.f32.mrf.mxu1 }
 0x430   :  { %v11328_v31 = vadd.f32 %v2708_v61, %v2441_v62 }
 0x431   :  { %v8515_v39 = vpop.f32.mrf.mxu1 }
 0x432   :  { %v12578_v39 = vld [vmem:[#allocation24_spill] sm:$0xff] }
 0x433   :  { %v2713_v49 = vpop.f32.mrf.mxu1  ;;  %v3016_v9 = vadd.f32 %v12578_v39, %v11252_v56  ;;  %v12580_v56 = vld [vmem:[#allocation26_spill] sm:$0xff] }
 0x434   :  { %v11332_v33 = vadd.f32 %v2713_v49, %v2442_v35 }
 0x435   :  { %v8518_v17 = vpop.f32.mrf.mxu1 }
 0x436   :  { %v12579_v17 = vld [vmem:[#allocation25_spill] sm:$0xff] }
 0x437   :  { %v3197_v53 = vpop.f32.mrf.mxu1  ;;  %v3017_v46 = vadd.f32 %v12579_v17, %v11256_v11 }
 0x438   :  { %v3311_v63 = vadd.f32 %v3197_v53, %v3014_v19 }
 0x439   :  { %v8594_v30 = vpop.f32.mrf.mxu1 }
 0x43a   :  { %v3608_v14 = vadd.f32 %v10926_v55, %v3311_v63  ;;  %v3018_v30 = vadd.f32 %v12580_v56, %v11260_v20  ;;  %v12581_v20 = vld [vmem:[#allocation27_spill] sm:$0xff]  ;;  %v11394_v56 = vld [vmem:[%s12524_s5 + $0x29] sm:$0xff] }
 0x43b   :  { %v3202_v37 = vpop.f32.mrf.mxu1 }
 0x43c   :  { %v11345_v23 = vadd.f32 %v11339_v8, %v3608_v14  ;;  %v3312_v22 = vadd.f32 %v3202_v37, %v3015_v32 }
 0x43d   :  { %v8597_v62 = vpop.f32.mrf.mxu1 }
 0x43e   :  { %v3682_v48 = vmax.f32 %v11345_v23, 0.0  ;;  %v3609_v61 = vadd.f32 %v10935_v54, %v3312_v22  ;;  %v3019_v22 = vadd.f32 %v12581_v20, %v11264_v47 }
 0x43f   :  { %v3207_v35 = vpop.f32.mrf.mxu1 }
 0x440   :  { %3683 = vst [vmem:[#allocation5 + $0xb] sm:$0xff] %v3682_v48  ;;  %3632 = vst [vmem:[#allocation3 + $0x8] sm:$0xff] %v3609_v61  ;;  %v3313_v55 = vadd.f32 %v3207_v35, %v3016_v9  ;;  %v11377_v35 = vld [vmem:[%s12524_s5 + $0x1f] sm:$0xff] }
 0x441   :  { %v8600_v21 = vpop.f32.mrf.mxu1 }
 0x442   :  { %v3610_v49 = vadd.f32 %v10944_v4, %v3313_v55  ;;  %v11364_v4 = vld [vmem:[%s12524_s5 + $0x15] sm:$0xff] }
 0x443   :  { %v3212_v19 = vpop.f32.mrf.mxu1  ;;  %v11382_v55 = vld [vmem:[%s12524_s5 + $0x33] sm:$0xff] }
 0x444   :  { %3633 = vst [vmem:[#allocation3 + $0x10] sm:$0xff] %v3610_v49  ;;  %v3314_v53 = vadd.f32 %v3212_v19, %v3017_v46  ;;  %v12582_v49 = vld [vmem:[#allocation28_spill] sm:$0xff] }
 0x445   :  { %v8603_v63 = vpop.f32.mrf.mxu1  ;;  %v3020_v17 = vadd.f32 %v12582_v49, %v11268_v16 }
 0x446   :  { %v3611_v54 = vadd.f32 %v10953_v27, %v3314_v53 }
 0x447   :  { %v3217_v14 = vpop.f32.mrf.mxu1  ;;  %v3784_v41 = vld [vmem:[#allocation5 + $0x9] sm:$0xff] }
 0x448   :  { %v3760_v32 = vld [vmem:[#allocation5 + $0x8] sm:$0xff]  ;;  %3634 = vst [vmem:[#allocation3 + $0x18] sm:$0xff] %v3611_v54  ;;  %v3315_v37 = vadd.f32 %v3217_v14, %v3018_v30  ;;  %8738 = vmatmul.mubr.msk.f32.gmra.mxu1 %vm1053_vm3, %v3784_v41 }
 0x449   :  { %8809 = vmatmul.mubr.msk.f32.gmra.mxu0 %vm1053_vm3, %v3760_v32  ;;  %v8606_v11 = vpop.f32.mrf.mxu1  ;;  %8740 = vmatprep.mubr.msk.f32.mxu1 %vm9435_vm1, %v11163_v28  ;;  %v12583_v41 = vld [vmem:[#allocation29_spill] sm:$0xff] }
 0x44a   :  { %8811 = vmatprep.mubr.msk.f32.mxu0 %vm9435_vm1, %v11163_v28  ;;  %v3612_v27 = vadd.f32 %v10962_v43, %v3315_v37  ;;  %v3021_v32 = vadd.f32 %v12583_v41, %v11272_v1 }
 0x44b   :  { %v3684_v62 = vld [vmem:[#allocation3 + $0xa] sm:$0xff]  ;;  %v3222_v61 = vpop.f32.mrf.mxu1 }
 0x44c   :  { %v3686_v39 = vadd.f32 %v11364_v4, %v3684_v62  ;;  %3635 = vst [vmem:[#allocation3 + $0x20] sm:$0xff] %v3612_v27  ;;  %v3316_v9 = vadd.f32 %v3222_v61, %v3019_v22 }
 0x44d   :  { %v8609_v43 = vpop.f32.mrf.mxu1 }
 0x44e   :  { %v3687_v21 = vmax.f32 %v3686_v39, 0.0  ;;  %v3613_v47 = vadd.f32 %v10971_v0, %v3316_v9  ;;  %v12584_v39 = vld [vmem:[#allocation30_spill] sm:$0xff] }
 0x44f   :  { %v3689_v46 = vld [vmem:[#allocation3 + $0x14] sm:$0xff]  ;;  %v3227_v19 = vpop.f32.mrf.mxu1 }
 0x450   :  { %3688 = vst [vmem:[#allocation5 + $0x15] sm:$0xff] %v3687_v21  ;;  %v3691_v53 = vadd.f32 %v11377_v35, %v3689_v46  ;;  %v11389_v63 = vadd.f32 %v11382_v55, %v3613_v47  ;;  %v3317_v54 = vadd.f32 %v3227_v19, %v3020_v17 }
 0x451   :  { %v8612_v30 = vpop.f32.mrf.mxu1 }
 0x452   :  { %v3692_v14 = vmax.f32 %v3691_v53, 0.0  ;;  %v3702_v0 = vmax.f32 %v11389_v63, 0.0  ;;  %v3614_v16 = vadd.f32 %v10978_v44, %v3317_v54  ;;  %v3022_v44 = vadd.f32 %v12584_v39, %v11276_v52  ;;  %v12585_v52 = vld [vmem:[#allocation31_spill] sm:$0xff]  ;;  %v11445_v39 = vld [vmem:[%s12524_s5 + $0x51] sm:$0xff] }
 0x453   :  { %v3694_v37 = vld [vmem:[#allocation3 + $0x1e] sm:$0xff]  ;;  %v3232_v11 = vpop.f32.mrf.mxu1  ;;  %v3023_v49 = vadd.f32 %v12585_v52, %v11280_v34  ;;  %v11420_v54 = vld [vmem:[%s12524_s5 + $0x3d] sm:$0xff] }
 0x454   :  { %3693 = vst [vmem:[#allocation5 + $0x1f] sm:$0xff] %v3692_v14  ;;  %v3696_v27 = vadd.f32 %v11394_v56, %v3694_v37  ;;  %3703 = vst [vmem:[#allocation5 + $0x33] sm:$0xff] %v3702_v0  ;;  %v3318_v20 = vadd.f32 %v3232_v11, %v3021_v32  ;;  %v11433_v37 = vld [vmem:[%s12524_s5 + $0x47] sm:$0xff] }
 0x455   :  { %3637 = vst [vmem:[#allocation3 + $0x30] sm:$0xff] %v3614_v16  ;;  %v8615_v22 = vpop.f32.mrf.mxu1 }
 0x456   :  { %v3697_v62 = vmax.f32 %v3696_v27, 0.0  ;;  %v3615_v61 = vadd.f32 %v10984_v13, %v3318_v20 }
 0x457   :  { %v3237_v9 = vpop.f32.mrf.mxu1  ;;  %v3785_v43 = vld [vmem:[#allocation5 + $0x11] sm:$0xff] }
 0x458   :  { %v3761_v1 = vld [vmem:[#allocation5 + $0x10] sm:$0xff]  ;;  %3698 = vst [vmem:[#allocation5 + $0x29] sm:$0xff] %v3697_v62  ;;  %3638 = vst [vmem:[#allocation3 + $0x38] sm:$0xff] %v3615_v61  ;;  %v3319_v21 = vadd.f32 %v3237_v9, %v3022_v44  ;;  %8741 = vmatmul.mubr.msk.f32.gmra.mxu1 %vm1053_vm3, %v3785_v43  ;;  %v12586_v43 = vld [vmem:[#allocation32_spill] sm:$0xff] }
 0x459   :  { %8812 = vmatmul.mubr.msk.f32.gmra.mxu0 %vm1053_vm3, %v3761_v1  ;;  %v8618_v47 = vpop.f32.mrf.mxu1  ;;  %8743 = vmatprep.mubr.msk.f32.mxu1 %vm9435_vm1, %v11163_v28  ;;  %v3026_v1 = vadd.f32 %v12586_v43, %v11284_v12  ;;  %v11772_v23 = vld [vmem:[#allocation5 + $0x14] sm:$0xff] }
 0x45a   :  { %8814 = vmatprep.mubr.msk.f32.mxu0 %vm9435_vm1, %v11163_v28  ;;  %v3616_v13 = vadd.f32 %v10994_v45, %v3319_v21 }
 0x45b   :  { %v3242_v17 = vpop.f32.mrf.mxu1  ;;  %v3786_v46 = vld [vmem:[#allocation5 + $0x19] sm:$0xff]  ;;  %v3787_v16 = vld [vmem:[#allocation5 + $0x21] sm:$0xff]  ;;  %v3789_v47 = vld [vmem:[#allocation5 + $0x31] sm:$0xff] }
 0x45c   :  { %v3762_v19 = vld [vmem:[#allocation5 + $0x18] sm:$0xff]  ;;  %3639 = vst [vmem:[#allocation3 + $0x40] sm:$0xff] %v3616_v13  ;;  %v3320_v53 = vadd.f32 %v3242_v17, %v3023_v49  ;;  %8744 = vmatmul.mubr.msk.f32.gmra.mxu1 %vm1053_vm3, %v3786_v46  ;;  %v3763_v41 = vld [vmem:[#allocation5 + $0x20] sm:$0xff] }
 0x45d   :  { %8815 = vmatmul.mubr.msk.f32.gmra.mxu0 %vm1053_vm3, %v3762_v19  ;;  %v8621_v30 = vpop.f32.mrf.mxu1  ;;  %8746 = vmatprep.mubr.msk.f32.mxu1 %vm9435_vm1, %v11163_v28  ;;  %v12587_v19 = vld [vmem:[#allocation33_spill] sm:$0xff] }
 0x45e   :  { %8817 = vmatprep.mubr.msk.f32.mxu0 %vm9435_vm1, %v11163_v28  ;;  %v3617_v45 = vadd.f32 %v11005_v59, %v3320_v53  ;;  %v3027_v53 = vadd.f32 %v12587_v19, %v11288_v2  ;;  %v12588_v2 = vld [vmem:[#allocation34_spill] sm:$0xff] }
 0x45f   :  { %v3704_v34 = vld [vmem:[#allocation3 + $0x32] sm:$0xff]  ;;  %v3247_v14 = vpop.f32.mrf.mxu1  ;;  %v3764_v22 = vld [vmem:[#allocation5 + $0x28] sm:$0xff] }
 0x460   :  { %v3706_v32 = vadd.f32 %v11420_v54, %v3704_v34  ;;  %3640 = vst [vmem:[#allocation3 + $0x48] sm:$0xff] %v3617_v45  ;;  %8747 = vmatmul.mubr.msk.f32.gmra.mxu1 %vm1053_vm3, %v3787_v16  ;;  %v3765_v13 = vld [vmem:[#allocation5 + $0x30] sm:$0xff] }
 0x461   :  { %8818 = vmatmul.mubr.msk.f32.gmra.mxu0 %vm1053_vm3, %v3763_v41  ;;  %v8624_v11 = vpop.f32.mrf.mxu1  ;;  %8749 = vmatprep.mubr.msk.f32.mxu1 %vm9435_vm1, %v11163_v28  ;;  %v3028_v41 = vadd.f32 %v12588_v2, %v11294_v3  ;;  %v12589_v3 = vld [vmem:[#allocation35_spill] sm:$0xff] }
 0x462   :  { %8820 = vmatprep.mubr.msk.f32.mxu0 %vm9435_vm1, %v11163_v28  ;;  %v3707_v59 = vmax.f32 %v3706_v32, 0.0 }
 0x463   :  { %v3709_v27 = vld [vmem:[#allocation3 + $0x3c] sm:$0xff]  ;;  %v3252_v20 = vpop.f32.mrf.mxu1 }
 0x464   :  { %3708 = vst [vmem:[#allocation5 + $0x3d] sm:$0xff] %v3707_v59  ;;  %v3711_v61 = vadd.f32 %v11433_v37, %v3709_v27  ;;  %8750 = vmatmul.mubr.msk.f32.gmra.mxu1 %vm1053_vm3, %v3697_v62 }
 0x465   :  { %8821 = vmatmul.mubr.msk.f32.gmra.mxu0 %vm1053_vm3, %v3764_v22  ;;  %v8627_v44 = vpop.f32.mrf.mxu1  ;;  %8752 = vmatprep.mubr.msk.f32.mxu1 %vm9435_vm1, %v11163_v28  ;;  %v3029_v22 = vadd.f32 %v12589_v3, %v11300_v40  ;;  %v12590_v40 = vld [vmem:[#allocation36_spill] sm:$0xff] }
 0x466   :  { %8823 = vmatprep.mubr.msk.f32.mxu0 %vm9435_vm1, %v11163_v28  ;;  %v3712_v9 = vmax.f32 %v3711_v61, 0.0 }
 0x467   :  { %v3714_v21 = vld [vmem:[#allocation3 + $0x46] sm:$0xff]  ;;  %v3257_v62 = vpop.f32.mrf.mxu1 }
 0x468   :  { %3713 = vst [vmem:[#allocation5 + $0x47] sm:$0xff] %v3712_v9  ;;  %v3716_v52 = vadd.f32 %v11445_v39, %v3714_v21  ;;  %v3323_v49 = vadd.f32 %v3257_v62, %v3026_v1  ;;  %8753 = vmatmul.mubr.msk.f32.gmra.mxu1 %vm1053_vm3, %v3789_v47  ;;  %v3030_v21 = vadd.f32 %v12590_v40, %v11304_v42 }
 0x469   :  { %8824 = vmatmul.mubr.msk.f32.gmra.mxu0 %vm1053_vm3, %v3765_v13  ;;  %v8630_v17 = vpop.f32.mrf.mxu1  ;;  %8755 = vmatprep.mubr.msk.f32.mxu1 %vm9435_vm1, %v11163_v28 }
 0x46a   :  { %8826 = vmatprep.mubr.msk.f32.mxu0 %vm9435_vm1, %v11163_v28  ;;  %v3717_v12 = vmax.f32 %v3716_v52, 0.0  ;;  %v3620_v46 = vadd.f32 %v11029_v26, %v3323_v49 }
 0x46b   :  { %v3262_v30 = vpop.f32.mrf.mxu1  ;;  %v3790_v45 = vld [vmem:[#allocation5 + $0x39] sm:$0xff] }
 0x46c   :  { %v3766_v34 = vld [vmem:[#allocation5 + $0x38] sm:$0xff]  ;;  %3718 = vst [vmem:[#allocation5 + $0x51] sm:$0xff] %v3717_v12  ;;  %3643 = vst [vmem:[#allocation3 + $0x60] sm:$0xff] %v3620_v46  ;;  %v3324_v14 = vadd.f32 %v3262_v30, %v3027_v53  ;;  %8756 = vmatmul.mubr.msk.f32.gmra.mxu1 %vm1053_vm3, %v3790_v45 }
 0x46d   :  { %8827 = vmatmul.mubr.msk.f32.gmra.mxu0 %vm1053_vm3, %v3766_v34  ;;  %v8633_v16 = vpop.f32.mrf.mxu1  ;;  %8758 = vmatprep.mubr.msk.f32.mxu1 %vm9435_vm1, %v11163_v28 }
 0x46e   :  { %8829 = vmatprep.mubr.msk.f32.mxu0 %vm9435_vm1, %v11163_v28  ;;  %v3621_v26 = vadd.f32 %v11038_v60, %v3324_v14 }
 0x46f   :  { %v3267_v32 = vpop.f32.mrf.mxu1  ;;  %v3791_v11 = vld [vmem:[#allocation5 + $0x41] sm:$0xff]  ;;  %v3792_v44 = vld [vmem:[#allocation5 + $0x49] sm:$0xff] }
 0x470   :  { %v3767_v59 = vld [vmem:[#allocation5 + $0x40] sm:$0xff]  ;;  %3644 = vst [vmem:[#allocation3 + $0x68] sm:$0xff] %v3621_v26  ;;  %v3325_v27 = vadd.f32 %v3267_v32, %v3028_v41  ;;  %8759 = vmatmul.mubr.msk.f32.gmra.mxu1 %vm1053_vm3, %v3791_v11  ;;  %v3768_v9 = vld [vmem:[#allocation5 + $0x48] sm:$0xff]  ;;  %v12592_v26 = vld [vmem:[#allocation38_spill] sm:$0xff] }
 0x471   :  { %8830 = vmatmul.mubr.msk.f32.gmra.mxu0 %vm1053_vm3, %v3767_v59  ;;  %v8636_v20 = vpop.f32.mrf.mxu1  ;;  %8761 = vmatprep.mubr.msk.f32.mxu1 %vm9435_vm1, %v11163_v28  ;;  %v3032_v2 = vadd.f32 %v12592_v26, %v11312_v36  ;;  %v3033_v36 = vadd.f32 %v10890_v24, %v11316_v58  ;;  %v3034_v24 = vadd.f32 %v10899_v5, %v11324_v7  ;;  %v12593_v7 = vld [vmem:[#allocation39_spill] sm:$0xff] }
 0x472   :  { %8832 = vmatprep.mubr.msk.f32.mxu0 %vm9435_vm1, %v11163_v28  ;;  %v3622_v60 = vadd.f32 %v11048_v15, %v3325_v27 }
 0x473   :  { %v3272_v61 = vpop.f32.mrf.mxu1  ;;  %v3769_v13 = vld [vmem:[#allocation5 + $0x50] sm:$0xff]  ;;  %v3770_v45 = vld [vmem:[#allocation5 + $0x58] sm:$0xff] }
 0x474   :  { %3645 = vst [vmem:[#allocation3 + $0x70] sm:$0xff] %v3622_v60  ;;  %v3326_v43 = vadd.f32 %v3272_v61, %v3029_v22  ;;  %8762 = vmatmul.mubr.msk.f32.gmra.mxu1 %vm1053_vm3, %v3792_v44 }
 0x475   :  { %8833 = vmatmul.mubr.msk.f32.gmra.mxu0 %vm1053_vm3, %v3768_v9  ;;  %v8639_v1 = vpop.f32.mrf.mxu1  ;;  %8764 = vmatprep.mubr.msk.f32.mxu1 %vm9435_vm1, %v11163_v28 }
 0x476   :  { %8835 = vmatprep.mubr.msk.f32.mxu0 %vm9435_vm1, %v11163_v28  ;;  %v3623_v15 = vadd.f32 %v11058_v51, %v3326_v43  ;;  %v3794_v51 = vld [vmem:[#allocation5 + $0x59] sm:$0xff] }
 0x477   :  { %v3719_v62 = vld [vmem:[#allocation3 + $0x64] sm:$0xff]  ;;  %v3277_v47 = vpop.f32.mrf.mxu1 }
 0x478   :  { %v3721_v52 = vadd.f32 %v3719_v62, %v11339_v8  ;;  %v11492_v49 = vadd.f32 %v11377_v35, %v3623_v15  ;;  %v3327_v17 = vadd.f32 %v3277_v47, %v3030_v21  ;;  %8765 = vmatmul.mubr.msk.f32.gmra.mxu1 %vm1053_vm3, %v3717_v12  ;;  %v12591_v35 = vld [vmem:[#allocation37_spill] sm:$0xff] }
 0x479   :  { %8836 = vmatmul.mubr.msk.f32.gmra.mxu0 %vm1053_vm3, %v3769_v13  ;;  %v8642_v46 = vpop.f32.mrf.mxu1  ;;  %8767 = vmatprep.mubr.msk.f32.mxu1 %vm9435_vm1, %v11163_v28  ;;  %v3031_v53 = vadd.f32 %v12591_v35, %v11308_v6 }
 0x47a   :  { %8838 = vmatprep.mubr.msk.f32.mxu0 %vm9435_vm1, %v11163_v28  ;;  %v3722_v42 = vmax.f32 %v3721_v52, 0.0  ;;  %v3732_v19 = vmax.f32 %v11492_v49, 0.0  ;;  %v3624_v8 = vadd.f32 %v11067_v10, %v3327_v17  ;;  %v3795_v10 = vld [vmem:[#allocation5 + $0x61] sm:$0xff] }
 0x47b   :  { %v3724_v30 = vld [vmem:[#allocation3 + $0x6e] sm:$0xff]  ;;  %v3282_v12 = vpop.f32.mrf.mxu1 }
 0x47c   :  { %3723 = vst [vmem:[#allocation5 + $0x6f] sm:$0xff] %v3722_v42  ;;  %v3726_v34 = vadd.f32 %v3724_v30, %v11364_v4  ;;  %3733 = vst [vmem:[#allocation5 + $0x83] sm:$0xff] %v3732_v19  ;;  %v3328_v14 = vadd.f32 %v3282_v12, %v3031_v53  ;;  %8768 = vmatmul.mubr.msk.f32.gmra.mxu1 %vm1053_vm3, %v3794_v51 }
 0x47d   :  { %3647 = vst [vmem:[#allocation3 + $0x80] sm:$0xff] %v3624_v8  ;;  %8839 = vmatmul.mubr.msk.f32.gmra.mxu0 %vm1053_vm3, %v3770_v45  ;;  %v8645_v16 = vpop.f32.mrf.mxu1  ;;  %8770 = vmatprep.mubr.msk.f32.mxu1 %vm9435_vm1, %v11163_v28 }
 0x47e   :  { %8841 = vmatprep.mubr.msk.f32.mxu0 %vm9435_vm1, %v11163_v28  ;;  %v3727_v6 = vmax.f32 %v3726_v34, 0.0  ;;  %v3625_v4 = vadd.f32 %v11079_v50, %v3328_v14 }
 0x47f   :  { %v3287_v41 = vpop.f32.mrf.mxu1 }
 0x480   :  { %3728 = vst [vmem:[#allocation5 + $0x79] sm:$0xff] %v3727_v6  ;;  %3648 = vst [vmem:[#allocation3 + $0x88] sm:$0xff] %v3625_v4  ;;  %v3329_v32 = vadd.f32 %v3287_v41, %v3032_v2  ;;  %8771 = vmatmul.mubr.msk.f32.gmra.mxu1 %vm1053_vm3, %v3795_v10 }
 0x481   :  { %8842 = vmatmul.mubr.msk.f32.gmra.mxu0 %vm1053_vm3, %v11163_v28  ;;  %v8648_v11 = vpop.f32.mrf.mxu1  ;;  %8773 = vmatprep.mubr.msk.f32.mxu1 %vm9435_vm1, %v11163_v28 }
 0x482   :  { %8844 = vmatprep.mubr.msk.f32.mxu0 %vm9435_vm1, %v11163_v28  ;;  %v3626_v50 = vadd.f32 %v11089_v29, %v3329_v32  ;;  %v4192_v1 = vpop.f32.mrf.mxu0 }
 0x483   :  { %v3292_v59 = vpop.f32.mrf.mxu1  ;;  %v3796_v27 = vld [vmem:[#allocation5 + $0x69] sm:$0xff]  ;;  %v3797_v61 = vld [vmem:[#allocation5 + $0x71] sm:$0xff]  ;;  %v3799_v35 = vld [vmem:[#allocation5 + $0x81] sm:$0xff] }
 0x484   :  { %v3772_v20 = vld [vmem:[#allocation5 + $0x68] sm:$0xff]  ;;  %3649 = vst [vmem:[#allocation3 + $0x90] sm:$0xff] %v3626_v50  ;;  %v3330_v60 = vadd.f32 %v3292_v59, %v3033_v36  ;;  %8774 = vmatmul.mubr.msk.f32.gmra.mxu1 %vm1053_vm3, %v3796_v27  ;;  %v3773_v44 = vld [vmem:[#allocation5 + $0x70] sm:$0xff]  ;;  %v8807_v40 = vpop.f32.mrf.mxu0 }
 0x485   :  { %8845 = vmatmul.mubr.msk.f32.gmra.mxu0 %vm1053_vm3, %v3772_v20  ;;  %v8651_v3 = vpop.f32.mrf.mxu1  ;;  %8776 = vmatprep.mubr.msk.f32.mxu1 %vm9435_vm1, %v11163_v28  ;;  %v4306_v27 = vld [vmem:[#allocation5 + $0x2] sm:$0xff]  ;;  %v7204_v20 = vld [vmem:[%s12522_s3 + $0x20] sm:$0xff] }
 0x486   :  { %8847 = vmatprep.mubr.msk.f32.mxu0 %vm9435_vm1, %v11163_v28  ;;  %v3627_v29 = vadd.f32 %v11096_v25, %v3330_v60  ;;  %v4603_v60 = vld [vmem:[#allocation5 + $0xa] sm:$0xff]  ;;  %v7228_v3 = vld [vmem:[%s12522_s3 + $0x28] sm:$0xff] }
 0x487   :  { %v3734_v58 = vld [vmem:[#allocation3 + $0x82] sm:$0xff]  ;;  %v3297_v22 = vpop.f32.mrf.mxu1  ;;  %v3774_v47 = vld [vmem:[#allocation5 + $0x78] sm:$0xff] }
 0x488   :  { %v3736_v9 = vadd.f32 %v3734_v58, %v11394_v56  ;;  %3650 = vst [vmem:[#allocation3 + $0x98] sm:$0xff] %v3627_v29  ;;  %v3331_v43 = vadd.f32 %v3297_v22, %v3034_v24  ;;  %8777 = vmatmul.mubr.msk.f32.gmra.mxu1 %vm1053_vm3, %v3797_v61  ;;  %v3035_v56 = vadd.f32 %v12593_v7, %v11328_v31  ;;  %v3775_v53 = vld [vmem:[#allocation5 + $0x80] sm:$0xff]  ;;  %v4604_v29 = vld [vmem:[#allocation5 + $0x12] sm:$0xff] }
 0x489   :  { %8848 = vmatmul.mubr.msk.f32.gmra.mxu0 %vm1053_vm3, %v3773_v44  ;;  %v8654_v15 = vpop.f32.mrf.mxu1  ;;  %8779 = vmatprep.mubr.msk.f32.mxu1 %vm9435_vm1, %v11163_v28  ;;  %v4605_v24 = vld [vmem:[#allocation5 + $0x1a] sm:$0xff]  ;;  %v4606_v22 = vld [vmem:[#allocation5 + $0x22] sm:$0xff]  ;;  %v4608_v61 = vld [vmem:[#allocation5 + $0x32] sm:$0xff] }
 0x48a   :  { %8850 = vmatprep.mubr.msk.f32.mxu0 %vm9435_vm1, %v11163_v28  ;;  %v3737_v5 = vmax.f32 %v3736_v9, 0.0  ;;  %v3628_v25 = vadd.f32 %v11104_v18, %v3331_v43  ;;  %v11630_v58 = vld [vmem:[#allocation4] sm:$0xff]  ;;  %v4610_v9 = vld [vmem:[#allocation5 + $0x42] sm:$0xff]  ;;  %v4611_v43 = vld [vmem:[#allocation5 + $0x4a] sm:$0xff] }
 0x48b   :  { %v3739_v21 = vld [vmem:[#allocation3 + $0x8c] sm:$0xff]  ;;  %v3302_v62 = vpop.f32.mrf.mxu1  ;;  %v4609_v44 = vld [vmem:[#allocation5 + $0x3a] sm:$0xff]  ;;  %v4618_v40 = vld [vmem:[#allocation5 + $0x82] sm:$0xff] }
 0x48c   :  { %3738 = vst [vmem:[#allocation5 + $0x8d] sm:$0xff] %v3737_v5  ;;  %v3741_v13 = vadd.f32 %v3739_v21, %v11382_v55  ;;  %v11547_v52 = vadd.f32 %v11433_v37, %v3628_v25  ;;  %v3332_v17 = vadd.f32 %v3302_v62, %v3035_v56  ;;  %8780 = vmatmul.mubr.msk.f32.gmra.mxu1 %vm1053_vm3, %v3727_v6  ;;  %v12594_v37 = vld [vmem:[#allocation40_spill] sm:$0xff]  ;;  %v4615_v25 = vld [vmem:[#allocation5 + $0x6a] sm:$0xff]  ;;  %v4616_v7 = vld [vmem:[#allocation5 + $0x72] sm:$0xff] }
 0x48d   :  { %8851 = vmatmul.mubr.msk.f32.gmra.mxu0 %vm1053_vm3, %v3774_v47  ;;  %v8657_v46 = vpop.f32.mrf.mxu1  ;;  %8782 = vmatprep.mubr.msk.f32.mxu1 %vm9435_vm1, %v11163_v28  ;;  %v3036_v51 = vadd.f32 %v12594_v37, %v11332_v33  ;;  %v4613_v15 = vld [vmem:[#allocation5 + $0x5a] sm:$0xff]  ;;  %v4614_v5 = vld [vmem:[#allocation5 + $0x62] sm:$0xff] }
 0x48e   :  { %8853 = vmatprep.mubr.msk.f32.mxu0 %vm9435_vm1, %v11163_v28  ;;  %v3742_v18 = vmax.f32 %v3741_v13, 0.0  ;;  %v3752_v31 = vmax.f32 %v11547_v52, 0.0  ;;  %v3629_v55 = vadd.f32 %v11290_v57, %v3332_v17  ;;  %v4617_v56 = vld [vmem:[#allocation5 + $0x7a] sm:$0xff]  ;;  %v7252_v37 = vld [vmem:[%s12522_s3 + $0x30] sm:$0xff] }
 0x48f   :  { %v3744_v42 = vld [vmem:[#allocation3 + $0x96] sm:$0xff]  ;;  %v3307_v8 = vpop.f32.mrf.mxu1 }
 0x490   :  { %3743 = vst [vmem:[#allocation5 + $0x97] sm:$0xff] %v3742_v18  ;;  %v3746_v30 = vadd.f32 %v3744_v42, %v11420_v54  ;;  %3753 = vst [vmem:[#allocation5 + $0xab] sm:$0xff] %v3752_v31  ;;  %v3333_v12 = vadd.f32 %v3307_v8, %v3036_v51  ;;  %8783 = vmatmul.mubr.msk.f32.gmra.mxu1 %vm1053_vm3, %v3799_v35  ;;  %v5197_v51 = vld [vmem:[#allocation5 + $0xc] sm:$0xff] }
 0x491   :  { %3652 = vst [vmem:[#allocation3 + $0xa8] sm:$0xff] %v3629_v55  ;;  %8854 = vmatmul.mubr.msk.f32.gmra.mxu0 %vm1053_vm3, %v3775_v53  ;;  %8785 = vmatprep.mubr.msk.f32.mxu1 %vm9435_vm1, %v11163_v28  ;;  %v8660_v57 = vpop.f32.mrf.mxu1  ;;  %v7276_v42 = vld [vmem:[%s12522_s3 + $0x38] sm:$0xff] }
 0x492   :  { %8856 = vmatprep.mubr.msk.f32.mxu0 %vm9435_vm1, %v11163_v28  ;;  %v3747_v33 = vmax.f32 %v3746_v30, 0.0  ;;  %v3630_v45 = vadd.f32 %v11296_v38, %v3333_v12  ;;  %v4901_v57 = vld [vmem:[#allocation5 + $0x13] sm:$0xff] }
 0x493   :  { %v3800_v54 = vld [vmem:[#allocation5 + $0x89] sm:$0xff]  ;;  %v3943_v14 = vpop.f32.mrf.mxu1 }
 0x494   :  { %v3776_v34 = vld [vmem:[#allocation5 + $0x88] sm:$0xff]  ;;  %3748 = vst [vmem:[#allocation5 + $0xa1] sm:$0xff] %v3747_v33  ;;  %3653 = vst [vmem:[#allocation3 + $0xb0] sm:$0x3] %v3630_v45  ;;  %8786 = vmatmul.mubr.msk.f32.gmra.mxu1 %vm1053_vm3, %v3800_v54  ;;  %v11571_v16 = vadd.f32 %v4192_v1, %v3943_v14  ;;  %v4612_v1 = vld [vmem:[#allocation5 + $0x52] sm:$0xff] }
 0x495   :  { %8857 = vmatmul.mubr.msk.f32.gmra.mxu0 %vm1053_vm3, %v3776_v34  ;;  %8788 = vmatprep.mubr.msk.f32.mxu1 %vm9435_vm1, %v11163_v28  ;;  %v8736_v10 = vpop.f32.mrf.mxu1  ;;  %v4619_v21 = vld [vmem:[#allocation5 + $0x8a] sm:$0xff] }
 0x496   :  { %8859 = vmatprep.mubr.msk.f32.mxu0 %vm9435_vm1, %v11163_v28  ;;  %v4903_v45 = vld [vmem:[#allocation5 + $0x23] sm:$0xff]  ;;  %v4904_v34 = vld [vmem:[#allocation5 + $0x2b] sm:$0xff] }
 0x497   :  { %v3801_v6 = vld [vmem:[#allocation5 + $0x91] sm:$0xff]  ;;  %v3802_v26 = vld [vmem:[#allocation5 + $0x99] sm:$0xff]  ;;  %v11792_v54 = vld [vmem:[#allocation5 + $0x24] sm:$0xff] }
 0x498   :  { %v3777_v38 = vld [vmem:[#allocation5 + $0x90] sm:$0xff]  ;;  %8789 = vmatmul.mubr.msk.f32.gmra.mxu1 %vm1053_vm3, %v3801_v6  ;;  %v3778_v2 = vld [vmem:[#allocation5 + $0x98] sm:$0xff] }
 0x499   :  { %8860 = vmatmul.mubr.msk.f32.gmra.mxu0 %vm1053_vm3, %v3777_v38  ;;  %8791 = vmatprep.mubr.msk.f32.mxu1 %vm9435_vm1, %v11163_v28  ;;  %v3805_v36 = vld [vmem:[#allocation5 + $0xb1] sm:$0x3] }
 0x49a   :  { %8862 = vmatprep.mubr.msk.f32.mxu0 %vm9435_vm1, %v11163_v28  ;;  %v3781_v59 = vld [vmem:[#allocation5 + $0xb0] sm:$0x3]  ;;  %v4620_v62 = vld [vmem:[#allocation5 + $0x92] sm:$0xff] }
 0x49b   :  { %v3754_v4 = vld [vmem:[#allocation3 + $0xaa] sm:$0xff]  ;;  %v3779_v11 = vld [vmem:[#allocation5 + $0xa0] sm:$0xff]  ;;  %v4328_v18 = vld [vmem:[#allocation5 + $0xb2] sm:$0x3] }
 0x49c   :  { %v3756_v41 = vadd.f32 %v3754_v4, %v11445_v39  ;;  %8792 = vmatmul.mubr.msk.f32.gmra.mxu1 %vm1053_vm3, %v3802_v26  ;;  %v3804_v39 = vld [vmem:[#allocation5 + $0xa9] sm:$0xff]  ;;  %v4621_v47 = vld [vmem:[#allocation5 + $0x9a] sm:$0xff] }
 0x49d   :  { %8863 = vmatmul.mubr.msk.f32.gmra.mxu0 %vm1053_vm3, %v3778_v2  ;;  %8794 = vmatprep.mubr.msk.f32.mxu1 %vm9435_vm1, %v11163_v28  ;;  %v3780_v50 = vld [vmem:[#allocation5 + $0xa8] sm:$0xff]  ;;  %v11812_v2 = vld [vmem:[#allocation5 + $0x34] sm:$0xff] }
 0x49e   :  { %8865 = vmatprep.mubr.msk.f32.mxu0 %vm9435_vm1, %v11163_v28  ;;  %v3757_v32 = vmax.f32 %v3756_v41, 0.0  ;;  %v4622_v13 = vld [vmem:[#allocation5 + $0xa2] sm:$0xff]  ;;  %v4623_v17 = vld [vmem:[#allocation5 + $0xaa] sm:$0xff] }
 0x49f   :  { %v11801_v14 = vld [vmem:[#allocation5 + $0x2c] sm:$0xff] }
 0x4a0   :  { %3758 = vst [vmem:[#allocation5 + $0xb5] sm:$0xff] %v3757_v32  ;;  %8795 = vmatmul.mubr.msk.f32.gmra.mxu1 %vm1053_vm3, %v3747_v33  ;;  %v11783_v33 = vld [vmem:[#allocation5 + $0x1c] sm:$0xff] }
 0x4a1   :  { %8866 = vmatmul.mubr.msk.f32.gmra.mxu0 %vm1053_vm3, %v3779_v11  ;;  %8797 = vmatprep.mubr.msk.f32.mxu1 %vm9435_vm1, %v11163_v28 }
 0x4a2   :  { %8868 = vmatprep.mubr.msk.f32.mxu0 %vm9435_vm1, %v11163_v28 }
 0x4a4   :  { %8798 = vmatmul.mubr.msk.f32.gmra.mxu1 %vm1053_vm3, %v3804_v39 }
 0x4a5   :  { %8869 = vmatmul.mubr.msk.f32.gmra.mxu0 %vm1053_vm3, %v3780_v50  ;;  %8800 = vmatprep.mubr.msk.f32.mxu1 %vm9435_vm1, %v11163_v28 }
 0x4a6   :  { %8871 = vmatprep.mubr.msk.f32.mxu0 %vm9435_vm1, %v11163_v28 }
 0x4a7   :  { %v4624_v46 = vld [vmem:[#allocation5 + $0xb2] sm:$0xff]  ;;  %v4625_v55 = vld [vmem:[#allocation5 + $0xba] sm:$0x3] }
 0x4a8   :  { %8801 = vmatmul.mubr.msk.f32.gmra.mxu1 %vm1053_vm3, %v3805_v36  ;;  %v4906_v36 = vld [vmem:[#allocation5 + $0x3b] sm:$0xff] }
 0x4a9   :  { %8872 = vmatmul.mubr.msk.f32.gmra.mxu0 %vm1053_vm3, %v3781_v59  ;;  %8876 = vmatprep.mubr.msk.f32.mxu1 %vm9435_vm1, %v11163_v28  ;;  %v11825_v59 = vld [vmem:[#allocation5 + $0x3c] sm:$0xff] }
 0x4aa   :  { %8947 = vmatprep.mubr.msk.f32.mxu0 %vm9435_vm1, %v11163_v28 }
 0x4ac   :  { %8877 = vmatmul.mubr.msk.f32.vlgmr.msra.gmra.mxu1 %vm1053_vm3, %v4306_v27 }
 0x4ad   :  { %8948 = vmatmul.mubr.msk.f32.vlgmr.msra.gmra.mxu0 %vm1053_vm3, %v4603_v60  ;;  %9017 = vmatpush3.msra.mxu1 %v7204_v20 }
 0x4ae   :  { %8879 = vmatprep.mubr.msk.f32.mxu1 %vm9435_vm1, %v11163_v28  ;;  %8950 = vmatprep.mubr.msk.f32.mxu0 %vm9435_vm1, %v11163_v28 }
 0x4af   :  { %9088 = vmatpush3.msra.mxu0 %v7228_v3  ;;  %9158 = vmatprep.subr.mxu1 %v11163_v28  ;;  %v4907_v3 = vld [vmem:[#allocation5 + $0x43] sm:$0xff] }
 0x4b0   :  { %9229 = vmatprep.subr.mxu0 %v11163_v28  ;;  %8880 = vmatmul.mubr.msk.f32.gmra.mxu1 %vm1053_vm3, %v4603_v60 }
 0x4b1   :  { %8951 = vmatmul.mubr.msk.f32.gmra.mxu0 %vm1053_vm3, %v4604_v29  ;;  %8882 = vmatprep.mubr.msk.f32.mxu1 %vm9435_vm1, %v11163_v28 }
 0x4b2   :  { %8953 = vmatprep.mubr.msk.f32.mxu0 %vm9435_vm1, %v11163_v28  ;;  %v4607_v28 = vld [vmem:[#allocation5 + $0x2a] sm:$0xff] }
 0x4b4   :  { %8883 = vmatmul.mubr.msk.f32.gmra.mxu1 %vm1053_vm3, %v4604_v29  ;;  %v11836_v29 = vld [vmem:[#allocation5 + $0x44] sm:$0xff] }
 0x4b5   :  { %8954 = vmatmul.mubr.msk.f32.gmra.mxu0 %vm1053_vm3, %v4605_v24  ;;  %8885 = vmatprep.mubr.msk.f32.mxu1 %vm9435_vm1, %v11630_v58 }
 0x4b6   :  { %8956 = vmatprep.mubr.msk.f32.mxu0 %vm9435_vm1, %v11630_v58 }
 0x4b8   :  { %8886 = vmatmul.mubr.msk.f32.gmra.mxu1 %vm1053_vm3, %v4605_v24 }
 0x4b9   :  { %8957 = vmatmul.mubr.msk.f32.gmra.mxu0 %vm1053_vm3, %v4606_v22  ;;  %8888 = vmatprep.mubr.msk.f32.mxu1 %vm9435_vm1, %v11630_v58 }
 0x4ba   :  { %8959 = vmatprep.mubr.msk.f32.mxu0 %vm9435_vm1, %v11630_v58 }
 0x4bc   :  { %8889 = vmatmul.mubr.msk.f32.gmra.mxu1 %vm1053_vm3, %v4606_v22 }
 0x4bd   :  { %8960 = vmatmul.mubr.msk.f32.gmra.mxu0 %vm1053_vm3, %v4607_v28  ;;  %8891 = vmatprep.mubr.msk.f32.mxu1 %vm9435_vm1, %v11630_v58 }
 0x4be   :  { %8962 = vmatprep.mubr.msk.f32.mxu0 %vm9435_vm1, %v11630_v58 }
 0x4c0   :  { %8892 = vmatmul.mubr.msk.f32.gmra.mxu1 %vm1053_vm3, %v4607_v28 }
 0x4c1   :  { %8963 = vmatmul.mubr.msk.f32.gmra.mxu0 %vm1053_vm3, %v4608_v61  ;;  %8894 = vmatprep.mubr.msk.f32.mxu1 %vm9435_vm1, %v11630_v58 }
 0x4c2   :  { %8965 = vmatprep.mubr.msk.f32.mxu0 %vm9435_vm1, %v11630_v58 }
 0x4c4   :  { %8895 = vmatmul.mubr.msk.f32.gmra.mxu1 %vm1053_vm3, %v4608_v61 }
 0x4c5   :  { %8966 = vmatmul.mubr.msk.f32.gmra.mxu0 %vm1053_vm3, %v4609_v44  ;;  %8897 = vmatprep.mubr.msk.f32.mxu1 %vm9435_vm1, %v11630_v58 }
 0x4c6   :  { %8968 = vmatprep.mubr.msk.f32.mxu0 %vm9435_vm1, %v11630_v58 }
 0x4c8   :  { %8898 = vmatmul.mubr.msk.f32.gmra.mxu1 %vm1053_vm3, %v4609_v44 }
 0x4c9   :  { %8969 = vmatmul.mubr.msk.f32.gmra.mxu0 %vm1053_vm3, %v4610_v9  ;;  %8900 = vmatprep.mubr.msk.f32.mxu1 %vm9435_vm1, %v11630_v58 }
 0x4ca   :  { %8971 = vmatprep.mubr.msk.f32.mxu0 %vm9435_vm1, %v11630_v58 }
 0x4cc   :  { %8901 = vmatmul.mubr.msk.f32.gmra.mxu1 %vm1053_vm3, %v4610_v9  ;;  %v4908_v9 = vld [vmem:[#allocation5 + $0x4b] sm:$0xff] }
 0x4cd   :  { %8972 = vmatmul.mubr.msk.f32.gmra.mxu0 %vm1053_vm3, %v4611_v43  ;;  %8903 = vmatprep.mubr.msk.f32.mxu1 %vm9435_vm1, %v11630_v58 }
 0x4ce   :  { %8974 = vmatprep.mubr.msk.f32.mxu0 %vm9435_vm1, %v11630_v58 }
 0x4d0   :  { %8904 = vmatmul.mubr.msk.f32.gmra.mxu1 %vm1053_vm3, %v4611_v43  ;;  %v11847_v43 = vld [vmem:[#allocation5 + $0x4c] sm:$0xff] }
 0x4d1   :  { %8975 = vmatmul.mubr.msk.f32.gmra.mxu0 %vm1053_vm3, %v4612_v1  ;;  %8906 = vmatprep.mubr.msk.f32.mxu1 %vm9435_vm1, %v11630_v58 }
 0x4d2   :  { %8977 = vmatprep.mubr.msk.f32.mxu0 %vm9435_vm1, %v11630_v58 }
 0x4d4   :  { %8907 = vmatmul.mubr.msk.f32.gmra.mxu1 %vm1053_vm3, %v4612_v1 }
 0x4d5   :  { %8978 = vmatmul.mubr.msk.f32.gmra.mxu0 %vm1053_vm3, %v4613_v15  ;;  %8909 = vmatprep.mubr.msk.f32.mxu1 %vm9435_vm1, %v11630_v58 }
 0x4d6   :  { %8980 = vmatprep.mubr.msk.f32.mxu0 %vm9435_vm1, %v11630_v58 }
 0x4d8   :  { %8910 = vmatmul.mubr.msk.f32.gmra.mxu1 %vm1053_vm3, %v4613_v15 }
 0x4d9   :  { %8981 = vmatmul.mubr.msk.f32.gmra.mxu0 %vm1053_vm3, %v4614_v5  ;;  %8912 = vmatprep.mubr.msk.f32.mxu1 %vm9435_vm1, %v11630_v58 }
 0x4da   :  { %8983 = vmatprep.mubr.msk.f32.mxu0 %vm9435_vm1, %v11630_v58 }
 0x4dc   :  { %8913 = vmatmul.mubr.msk.f32.gmra.mxu1 %vm1053_vm3, %v4614_v5 }
 0x4dd   :  { %8984 = vmatmul.mubr.msk.f32.gmra.mxu0 %vm1053_vm3, %v4615_v25  ;;  %8915 = vmatprep.mubr.msk.f32.mxu1 %vm9435_vm1, %v11630_v58 }
 0x4de   :  { %8986 = vmatprep.mubr.msk.f32.mxu0 %vm9435_vm1, %v11630_v58 }
 0x4e0   :  { %8916 = vmatmul.mubr.msk.f32.gmra.mxu1 %vm1053_vm3, %v4615_v25 }
 0x4e1   :  { %8987 = vmatmul.mubr.msk.f32.gmra.mxu0 %vm1053_vm3, %v4616_v7  ;;  %8918 = vmatprep.mubr.msk.f32.mxu1 %vm9435_vm1, %v11630_v58 }
 0x4e2   :  { %8989 = vmatprep.mubr.msk.f32.mxu0 %vm9435_vm1, %v11630_v58 }
 0x4e4   :  { %8919 = vmatmul.mubr.msk.f32.gmra.mxu1 %vm1053_vm3, %v4616_v7 }
 0x4e5   :  { %8990 = vmatmul.mubr.msk.f32.gmra.mxu0 %vm1053_vm3, %v4617_v56  ;;  %8921 = vmatprep.mubr.msk.f32.mxu1 %vm9435_vm1, %v11630_v58 }
 0x4e6   :  { %8992 = vmatprep.mubr.msk.f32.mxu0 %vm9435_vm1, %v11630_v58 }
 0x4e8   :  { %8922 = vmatmul.mubr.msk.f32.gmra.mxu1 %vm1053_vm3, %v4617_v56  ;;  %v4909_v56 = vld [vmem:[#allocation5 + $0x53] sm:$0xff] }
 0x4e9   :  { %8993 = vmatmul.mubr.msk.f32.gmra.mxu0 %vm1053_vm3, %v4618_v40  ;;  %8924 = vmatprep.mubr.msk.f32.mxu1 %vm9435_vm1, %v11630_v58 }
 0x4ea   :  { %8995 = vmatprep.mubr.msk.f32.mxu0 %vm9435_vm1, %v11630_v58 }
 0x4ec   :  { %8925 = vmatmul.mubr.msk.f32.gmra.mxu1 %vm1053_vm3, %v4618_v40  ;;  %v11858_v40 = vld [vmem:[#allocation5 + $0x54] sm:$0xff] }
 0x4ed   :  { %8996 = vmatmul.mubr.msk.f32.gmra.mxu0 %vm1053_vm3, %v4619_v21  ;;  %8927 = vmatprep.mubr.msk.f32.mxu1 %vm9435_vm1, %v11630_v58 }
 0x4ee   :  { %8998 = vmatprep.mubr.msk.f32.mxu0 %vm9435_vm1, %v11630_v58 }
 0x4f0   :  { %8928 = vmatmul.mubr.msk.f32.gmra.mxu1 %vm1053_vm3, %v4619_v21 }
 0x4f1   :  { %8999 = vmatmul.mubr.msk.f32.gmra.mxu0 %vm1053_vm3, %v4620_v62  ;;  %8930 = vmatprep.mubr.msk.f32.mxu1 %vm9435_vm1, %v11630_v58 }
 0x4f2   :  { %9001 = vmatprep.mubr.msk.f32.mxu0 %vm9435_vm1, %v11630_v58 }
 0x4f4   :  { %8931 = vmatmul.mubr.msk.f32.gmra.mxu1 %vm1053_vm3, %v4620_v62 }
 0x4f5   :  { %9002 = vmatmul.mubr.msk.f32.gmra.mxu0 %vm1053_vm3, %v4621_v47  ;;  %8933 = vmatprep.mubr.msk.f32.mxu1 %vm9435_vm1, %v11630_v58 }
 0x4f6   :  { %9004 = vmatprep.mubr.msk.f32.mxu0 %vm9435_vm1, %v11630_v58 }
 0x4f8   :  { %8934 = vmatmul.mubr.msk.f32.gmra.mxu1 %vm1053_vm3, %v4621_v47 }
 0x4f9   :  { %9005 = vmatmul.mubr.msk.f32.gmra.mxu0 %vm1053_vm3, %v4622_v13  ;;  %8936 = vmatprep.mubr.msk.f32.mxu1 %vm9435_vm1, %v11630_v58 }
 0x4fa   :  { %9007 = vmatprep.mubr.msk.f32.mxu0 %vm9435_vm1, %v11630_v58 }
 0x4fc   :  { %8937 = vmatmul.mubr.msk.f32.gmra.mxu1 %vm1053_vm3, %v4622_v13  ;;  %v4910_v13 = vld [vmem:[#allocation5 + $0x5b] sm:$0xff] }
 0x4fd   :  { %9008 = vmatmul.mubr.msk.f32.gmra.mxu0 %vm1053_vm3, %v4623_v17  ;;  %8939 = vmatprep.mubr.msk.f32.mxu1 %vm9435_vm1, %v11630_v58 }
 0x4fe   :  { %9010 = vmatprep.mubr.msk.f32.mxu0 %vm9435_vm1, %v11630_v58 }
 0x500   :  { %8940 = vmatmul.mubr.msk.f32.gmra.mxu1 %vm1053_vm3, %v4623_v17  ;;  %v11869_v17 = vld [vmem:[#allocation5 + $0x5c] sm:$0xff] }
 0x501   :  { %9011 = vmatmul.mubr.msk.f32.gmra.mxu0 %vm1053_vm3, %v4624_v46  ;;  %8942 = vmatprep.mubr.msk.f32.mxu1 %vm9435_vm1, %v11630_v58 }
 0x502   :  { %9013 = vmatprep.mubr.msk.f32.mxu0 %vm9435_vm1, %v11630_v58 }
 0x504   :  { %8943 = vmatmul.mubr.msk.f32.gmra.mxu1 %vm1053_vm3, %v4328_v18 }
 0x505   :  { %9014 = vmatmul.mubr.msk.f32.gmra.mxu0 %vm1053_vm3, %v4625_v55  ;;  %9018 = vmatprep.mubr.msk.f32.mxu1 %vm9435_vm1, %v11630_v58 }
 0x506   :  { %9089 = vmatprep.mubr.msk.f32.mxu0 %vm9435_vm1, %v11630_v58 }
 0x508   :  { %9019 = vmatmul.mubr.msk.f32.vlgmr.msra.gmra.mxu1 %vm1053_vm3, %v3682_v48  ;;  %v3948_v8 = vpop.f32.mrf.mxu1  ;;  %v4902_v48 = vld [vmem:[#allocation5 + $0x1b] sm:$0xff] }
 0x509   :  { %9090 = vmatmul.mubr.msk.f32.vlgmr.msra.gmra.mxu0 %vm1053_vm3, %v5197_v51  ;;  %v4197_v35 = vpop.f32.mrf.mxu0  ;;  %9159 = vmatpush3.msra.mxu1 %v7252_v37 }
 0x50a   :  { %9021 = vmatprep.mubr.msk.f32.mxu1 %vm9435_vm1, %v11630_v58  ;;  %v11768_v53 = vadd.f32 %v4197_v35, %v3948_v8  ;;  %9092 = vmatprep.mubr.msk.f32.mxu0 %vm9435_vm1, %v11630_v58  ;;  %v8739_v30 = vpop.f32.mrf.mxu1  ;;  %v11880_v8 = vld [vmem:[#allocation5 + $0x64] sm:$0xff] }
 0x50b   :  { %v8810_v12 = vpop.f32.mrf.mxu0  ;;  %9230 = vmatpush3.msra.mxu0 %v7276_v42  ;;  %9300 = vmatprep.subr.mxu1 %v11630_v58  ;;  %v4911_v42 = vld [vmem:[#allocation5 + $0x63] sm:$0xff] }
 0x50c   :  { %9371 = vmatprep.subr.mxu0 %v11630_v58  ;;  %9022 = vmatmul.mubr.msk.f32.gmra.mxu1 %vm1053_vm3, %v4901_v57 }
 0x50d   :  { %9093 = vmatmul.mubr.msk.f32.gmra.mxu0 %vm1053_vm3, %v11772_v23  ;;  %9024 = vmatprep.mubr.msk.f32.mxu1 %vm9435_vm1, %v11630_v58 }
 0x50e   :  { %9095 = vmatprep.mubr.msk.f32.mxu0 %vm9435_vm1, %v11630_v58 }
 0x510   :  { %9025 = vmatmul.mubr.msk.f32.gmra.mxu1 %vm1053_vm3, %v4902_v48 }
 0x511   :  { %9096 = vmatmul.mubr.msk.f32.gmra.mxu0 %vm1053_vm3, %v11783_v33  ;;  %9027 = vmatprep.mubr.msk.f32.mxu1 %vm9435_vm1, %v11630_v58 }
 0x512   :  { %9098 = vmatprep.mubr.msk.f32.mxu0 %vm9435_vm1, %v11630_v58 }
 0x514   :  { %9028 = vmatmul.mubr.msk.f32.gmra.mxu1 %vm1053_vm3, %v4903_v45 }
 0x515   :  { %9099 = vmatmul.mubr.msk.f32.gmra.mxu0 %vm1053_vm3, %v11792_v54  ;;  %9030 = vmatprep.mubr.msk.f32.mxu1 %vm9435_vm1, %v11630_v58 }
 0x516   :  { %9101 = vmatprep.mubr.msk.f32.mxu0 %vm9435_vm1, %v11630_v58 }
 0x518   :  { %v3953_v10 = vpop.f32.mrf.mxu1  ;;  %9031 = vmatmul.mubr.msk.f32.gmra.mxu1 %vm1053_vm3, %v4904_v34 }
 0x519   :  { %v4202_v6 = vpop.f32.mrf.mxu0  ;;  %9102 = vmatmul.mubr.msk.f32.gmra.mxu0 %vm1053_vm3, %v11801_v14  ;;  %9033 = vmatprep.mubr.msk.f32.mxu1 %vm9435_vm1, %v11630_v58 }
 0x51a   :  { %v11806_v38 = vadd.f32 %v4202_v6, %v3953_v10  ;;  %9104 = vmatprep.mubr.msk.f32.mxu0 %vm9435_vm1, %v11630_v58  ;;  %v8742_v4 = vpop.f32.mrf.mxu1  ;;  %v4912_v10 = vld [vmem:[#allocation5 + $0x6b] sm:$0xff] }
 0x51b   :  { %v8813_v26 = vpop.f32.mrf.mxu0  ;;  %v11891_v6 = vld [vmem:[#allocation5 + $0x6c] sm:$0xff] }
 0x51c   :  { %v3958_v41 = vpop.f32.mrf.mxu1  ;;  %9034 = vmatmul.mubr.msk.f32.gmra.mxu1 %vm1053_vm3, %v3702_v0 }
 0x51d   :  { %v4207_v32 = vpop.f32.mrf.mxu0  ;;  %9105 = vmatmul.mubr.msk.f32.gmra.mxu0 %vm1053_vm3, %v11812_v2  ;;  %9036 = vmatprep.mubr.msk.f32.mxu1 %vm9435_vm1, %v11630_v58 }
 0x51e   :  { %v11819_v11 = vadd.f32 %v4207_v32, %v3958_v41  ;;  %9107 = vmatprep.mubr.msk.f32.mxu0 %vm9435_vm1, %v11630_v58  ;;  %v8745_v39 = vpop.f32.mrf.mxu1 }
 0x51f   :  { %v8816_v50 = vpop.f32.mrf.mxu0  ;;  %v4913_v39 = vld [vmem:[#allocation5 + $0x73] sm:$0xff] }
 0x520   :  { %v3963_v27 = vpop.f32.mrf.mxu1  ;;  %9037 = vmatmul.mubr.msk.f32.gmra.mxu1 %vm1053_vm3, %v4906_v36  ;;  %v11900_v50 = vld [vmem:[#allocation5 + $0x74] sm:$0xff] }
 0x521   :  { %v4212_v63 = vpop.f32.mrf.mxu0  ;;  %9108 = vmatmul.mubr.msk.f32.gmra.mxu0 %vm1053_vm3, %v11825_v59  ;;  %9039 = vmatprep.mubr.msk.f32.mxu1 %vm9435_vm1, %v11630_v58 }
 0x522   :  { %v11830_v0 = vadd.f32 %v4212_v63, %v3963_v27  ;;  %9110 = vmatprep.mubr.msk.f32.mxu0 %vm9435_vm1, %v11630_v58  ;;  %v8748_v20 = vpop.f32.mrf.mxu1 }
 0x523   :  { %v8819_v60 = vpop.f32.mrf.mxu0 }
 0x524   :  { %v3968_v24 = vpop.f32.mrf.mxu1  ;;  %9040 = vmatmul.mubr.msk.f32.gmra.mxu1 %vm1053_vm3, %v4907_v3  ;;  %v4914_v60 = vld [vmem:[#allocation5 + $0x7b] sm:$0xff] }
 0x525   :  { %v4217_v22 = vpop.f32.mrf.mxu0  ;;  %9111 = vmatmul.mubr.msk.f32.gmra.mxu0 %vm1053_vm3, %v11836_v29  ;;  %9042 = vmatprep.mubr.msk.f32.mxu1 %vm9435_vm1, %v11630_v58  ;;  %v11909_v3 = vld [vmem:[#allocation5 + $0x7c] sm:$0xff] }
 0x526   :  { %v11841_v28 = vadd.f32 %v4217_v22, %v3968_v24  ;;  %9113 = vmatprep.mubr.msk.f32.mxu0 %vm9435_vm1, %v11630_v58  ;;  %v8751_v61 = vpop.f32.mrf.mxu1 }
 0x527   :  { %v8822_v44 = vpop.f32.mrf.mxu0 }
 0x528   :  { %v3973_v1 = vpop.f32.mrf.mxu1  ;;  %9043 = vmatmul.mubr.msk.f32.gmra.mxu1 %vm1053_vm3, %v4908_v9 }
 0x529   :  { %v4222_v15 = vpop.f32.mrf.mxu0  ;;  %9114 = vmatmul.mubr.msk.f32.gmra.mxu0 %vm1053_vm3, %v11847_v43  ;;  %9045 = vmatprep.mubr.msk.f32.mxu1 %vm9435_vm1, %v11630_v58 }
 0x52a   :  { %v11852_v5 = vadd.f32 %v4222_v15, %v3973_v1  ;;  %9116 = vmatprep.mubr.msk.f32.mxu0 %vm9435_vm1, %v11630_v58  ;;  %v8754_v25 = vpop.f32.mrf.mxu1  ;;  %v11920_v1 = vld [vmem:[#allocation5 + $0x84] sm:$0xff] }
 0x52b   :  { %v8825_v7 = vpop.f32.mrf.mxu0 }
 0x52c   :  { %v3978_v21 = vpop.f32.mrf.mxu1  ;;  %9046 = vmatmul.mubr.msk.f32.gmra.mxu1 %vm1053_vm3, %v4909_v56 }
 0x52d   :  { %v4227_v62 = vpop.f32.mrf.mxu0  ;;  %9117 = vmatmul.mubr.msk.f32.gmra.mxu0 %vm1053_vm3, %v11858_v40  ;;  %9048 = vmatprep.mubr.msk.f32.mxu1 %vm9435_vm1, %v11630_v58 }
 0x52e   :  { %v11863_v47 = vadd.f32 %v4227_v62, %v3978_v21  ;;  %9119 = vmatprep.mubr.msk.f32.mxu0 %vm9435_vm1, %v11630_v58  ;;  %v8757_v46 = vpop.f32.mrf.mxu1  ;;  %v4916_v62 = vld [vmem:[#allocation5 + $0x8b] sm:$0xff] }
 0x52f   :  { %v8828_v18 = vpop.f32.mrf.mxu0 }
 0x530   :  { %v3983_v55 = vpop.f32.mrf.mxu1  ;;  %9049 = vmatmul.mubr.msk.f32.gmra.mxu1 %vm1053_vm3, %v4910_v13  ;;  %v11933_v13 = vld [vmem:[#allocation5 + $0x8c] sm:$0xff] }
 0x531   :  { %v4232_v37 = vpop.f32.mrf.mxu0  ;;  %9120 = vmatmul.mubr.msk.f32.gmra.mxu0 %vm1053_vm3, %v11869_v17  ;;  %9051 = vmatprep.mubr.msk.f32.mxu1 %vm9435_vm1, %v11630_v58 }
 0x532   :  { %v11874_v51 = vadd.f32 %v4232_v37, %v3983_v55  ;;  %9122 = vmatprep.mubr.msk.f32.mxu0 %vm9435_vm1, %v11630_v58  ;;  %v8760_v35 = vpop.f32.mrf.mxu1  ;;  %v4917_v37 = vld [vmem:[#allocation5 + $0x93] sm:$0xff] }
 0x533   :  { %v8831_v30 = vpop.f32.mrf.mxu0 }
 0x534   :  { %v3988_v12 = vpop.f32.mrf.mxu1  ;;  %9052 = vmatmul.mubr.msk.f32.gmra.mxu1 %vm1053_vm3, %v4911_v42  ;;  %v11944_v42 = vld [vmem:[#allocation5 + $0x94] sm:$0xff] }
 0x535   :  { %v4237_v57 = vpop.f32.mrf.mxu0  ;;  %9123 = vmatmul.mubr.msk.f32.gmra.mxu0 %vm1053_vm3, %v11880_v8  ;;  %9054 = vmatprep.mubr.msk.f32.mxu1 %vm9435_vm1, %v11630_v58 }
 0x536   :  { %v11885_v48 = vadd.f32 %v4237_v57, %v3988_v12  ;;  %9125 = vmatprep.mubr.msk.f32.mxu0 %vm9435_vm1, %v11630_v58  ;;  %v8763_v45 = vpop.f32.mrf.mxu1 }
 0x537   :  { %v8834_v34 = vpop.f32.mrf.mxu0 }
 0x538   :  { %v3993_v4 = vpop.f32.mrf.mxu1  ;;  %9055 = vmatmul.mubr.msk.f32.gmra.mxu1 %vm1053_vm3, %v4912_v10  ;;  %v4918_v34 = vld [vmem:[#allocation5 + $0x9b] sm:$0xff] }
 0x539   :  { %v4242_v26 = vpop.f32.mrf.mxu0  ;;  %9126 = vmatmul.mubr.msk.f32.gmra.mxu0 %vm1053_vm3, %v11891_v6  ;;  %9057 = vmatprep.mubr.msk.f32.mxu1 %vm9435_vm1, %v11630_v58  ;;  %v11955_v10 = vld [vmem:[#allocation5 + $0x9c] sm:$0xff] }
 0x53a   :  { %9128 = vmatprep.mubr.msk.f32.mxu0 %vm9435_vm1, %v11630_v58  ;;  %v8766_v41 = vpop.f32.mrf.mxu1 }
 0x53b   :  { %v8837_v32 = vpop.f32.mrf.mxu0 }
 0x53c   :  { %v3998_v36 = vpop.f32.mrf.mxu1  ;;  %9058 = vmatmul.mubr.msk.f32.gmra.mxu1 %vm1053_vm3, %v4913_v39 }
 0x53d   :  { %v4247_v27 = vpop.f32.mrf.mxu0  ;;  %9129 = vmatmul.mubr.msk.f32.gmra.mxu0 %vm1053_vm3, %v11900_v50  ;;  %9060 = vmatprep.mubr.msk.f32.mxu1 %vm9435_vm1, %v11630_v58  ;;  %v4919_v36 = vld [vmem:[#allocation5 + $0xa3] sm:$0xff] }
 0x53e   :  { %9131 = vmatprep.mubr.msk.f32.mxu0 %vm9435_vm1, %v11630_v58  ;;  %v8769_v63 = vpop.f32.mrf.mxu1  ;;  %v11966_v27 = vld [vmem:[#allocation5 + $0xa4] sm:$0xff] }
 0x53f   :  { %v8840_v20 = vpop.f32.mrf.mxu0 }
 0x540   :  { %v4003_v24 = vpop.f32.mrf.mxu1  ;;  %9061 = vmatmul.mubr.msk.f32.gmra.mxu1 %vm1053_vm3, %v4914_v60 }
 0x541   :  { %v4252_v22 = vpop.f32.mrf.mxu0  ;;  %9132 = vmatmul.mubr.msk.f32.gmra.mxu0 %vm1053_vm3, %v11909_v3  ;;  %9063 = vmatprep.mubr.msk.f32.mxu1 %vm9435_vm1, %v11630_v58 }
 0x542   :  { %v11914_v61 = vadd.f32 %v4252_v22, %v4003_v24  ;;  %9134 = vmatprep.mubr.msk.f32.mxu0 %vm9435_vm1, %v11630_v58  ;;  %v8772_v44 = vpop.f32.mrf.mxu1 }
 0x543   :  { %v8843_v9 = vpop.f32.mrf.mxu0  ;;  %v11977_v44 = vld [vmem:[#allocation5 + $0xac] sm:$0xff] }
 0x544   :  { %v4008_v15 = vpop.f32.mrf.mxu1  ;;  %9064 = vmatmul.mubr.msk.f32.gmra.mxu1 %vm1053_vm3, %v3732_v19 }
 0x545   :  { %v4257_v25 = vpop.f32.mrf.mxu0  ;;  %9135 = vmatmul.mubr.msk.f32.gmra.mxu0 %vm1053_vm3, %v11920_v1  ;;  %9066 = vmatprep.mubr.msk.f32.mxu1 %vm9435_vm1, %v11630_v58 }
 0x546   :  { %v11927_v7 = vadd.f32 %v4257_v25, %v4008_v15  ;;  %9137 = vmatprep.mubr.msk.f32.mxu0 %vm9435_vm1, %v11630_v58  ;;  %v8775_v56 = vpop.f32.mrf.mxu1 }
 0x547   :  { %v8846_v21 = vpop.f32.mrf.mxu0 }
 0x548   :  { %v4013_v46 = vpop.f32.mrf.mxu1  ;;  %9067 = vmatmul.mubr.msk.f32.gmra.mxu1 %vm1053_vm3, %v4916_v62  ;;  %v4921_v62 = vld [vmem:[#allocation5 + $0xb3] sm:$0xff] }
 0x549   :  { %v4262_v49 = vpop.f32.mrf.mxu0  ;;  %9138 = vmatmul.mubr.msk.f32.gmra.mxu0 %vm1053_vm3, %v11933_v13  ;;  %9069 = vmatprep.mubr.msk.f32.mxu1 %vm9435_vm1, %v11630_v58 }
 0x54a   :  { %v11938_v19 = vadd.f32 %v4262_v49, %v4013_v46  ;;  %9140 = vmatprep.mubr.msk.f32.mxu0 %vm9435_vm1, %v11630_v58  ;;  %v8778_v18 = vpop.f32.mrf.mxu1  ;;  %v11990_v46 = vld [vmem:[#allocation5 + $0xb4] sm:$0xff] }
 0x54b   :  { %v8849_v55 = vpop.f32.mrf.mxu0 }
 0x54c   :  { %v4018_v35 = vpop.f32.mrf.mxu1  ;;  %9070 = vmatmul.mubr.msk.f32.gmra.mxu1 %vm1053_vm3, %v4917_v37  ;;  %v4922_v37 = vld [vmem:[#allocation5 + $0xbb] sm:$0x3] }
 0x54d   :  { %v4267_v30 = vpop.f32.mrf.mxu0  ;;  %9141 = vmatmul.mubr.msk.f32.gmra.mxu0 %vm1053_vm3, %v11944_v42  ;;  %9072 = vmatprep.mubr.msk.f32.mxu1 %vm9435_vm1, %v11630_v58 }
 0x54e   :  { %v11949_v12 = vadd.f32 %v4267_v30, %v4018_v35  ;;  %9143 = vmatprep.mubr.msk.f32.mxu0 %vm9435_vm1, %v11630_v58  ;;  %v8781_v57 = vpop.f32.mrf.mxu1  ;;  %v5219_v35 = vld [vmem:[#allocation5 + $0xbc] sm:$0x3] }
 0x54f   :  { %v8852_v45 = vpop.f32.mrf.mxu0 }
 0x550   :  { %v4023_v4 = vpop.f32.mrf.mxu1  ;;  %9073 = vmatmul.mubr.msk.f32.gmra.mxu1 %vm1053_vm3, %v4918_v34 }
 0x551   :  { %v4272_v26 = vpop.f32.mrf.mxu0  ;;  %9144 = vmatmul.mubr.msk.f32.gmra.mxu0 %vm1053_vm3, %v11955_v10  ;;  %9075 = vmatprep.mubr.msk.f32.mxu1 %vm9435_vm1, %v11630_v58 }
 0x552   :  { %v11960_v41 = vadd.f32 %v4272_v26, %v4023_v4  ;;  %9146 = vmatprep.mubr.msk.f32.mxu0 %vm9435_vm1, %v11630_v58  ;;  %v8784_v32 = vpop.f32.mrf.mxu1  ;;  %v7300_v26 = vld [vmem:[%s12522_s3 + $0x40] sm:$0xff]  ;;  %s6805_s3 = sshll.u32 %s9436_s20, 4  ;;  %s6806_s3 = int_to_ptr.vmem [resolvable:$true] %s6805_s3 }
 0x553   :  { %v8855_v39 = vpop.f32.mrf.mxu0  ;;  %v5791_v32 = vld [vmem:[#allocation5 + $0x15] sm:$0xff]  ;;  %s9412_s21 = scalar_lea.vmem %s6806_s3, 512  ;;  %p9417_p1 = scmp.lt.s32.totalorder %s6806_s3, %s6806_s3 }
 0x554   :  { %v4028_v63 = vpop.f32.mrf.mxu1  ;;  %9076 = vmatmul.mubr.msk.f32.gmra.mxu1 %vm1053_vm3, %v4919_v36  ;;  %p9413_p0 = scmp.ne.s32.totalorder %s6806_s3, %s9412_s21  ;;  %p9418_p2 = scmp.lt.s32.totalorder %s9412_s21, %s9412_s21 }
 0x555   :  { %v4277_v20 = vpop.f32.mrf.mxu0  ;;  %9147 = vmatmul.mubr.msk.f32.gmra.mxu0 %vm1053_vm3, %v11966_v27  ;;  %9078 = vmatprep.mubr.msk.f32.mxu1 %vm9435_vm1, %v11630_v58 }
 0x556   :  { %v11971_v60 = vadd.f32 %v4277_v20, %v4028_v63  ;;  %9149 = vmatprep.mubr.msk.f32.mxu0 %vm9435_vm1, %v11630_v58  ;;  %v8787_v24 = vpop.f32.mrf.mxu1  ;;  %p9419_p3 = por %p9418_p2, %p9417_p1 }
 0x557   :  { %v8858_v22 = vpop.f32.mrf.mxu0 }
 0x558   :  { %v4033_v9 = vpop.f32.mrf.mxu1  ;;  %9079 = vmatmul.mubr.msk.f32.gmra.mxu1 %vm1053_vm3, %v3752_v31  ;;  %v5792_v22 = vld [vmem:[#allocation5 + $0x1d] sm:$0xff]  ;;  %p9420_p4 = pnand %p9419_p3, %p9413_p0 }
 0x559   :  { %v4282_v15 = vpop.f32.mrf.mxu0  ;;  %9150 = vmatmul.mubr.msk.f32.gmra.mxu0 %vm1053_vm3, %v11977_v44  ;;  %9081 = vmatprep.mubr.msk.f32.mxu1 %vm9435_vm1, %v11630_v58 }
 0x55a   :  { %v11984_v25 = vadd.f32 %v4282_v15, %v4033_v9  ;;  %9152 = vmatprep.mubr.msk.f32.mxu0 %vm9435_vm1, %v11630_v58  ;;  %v8790_v56 = vpop.f32.mrf.mxu1 }
 0x55b   :  { %v8861_v21 = vpop.f32.mrf.mxu0 }
 0x55c   :  { %v4038_v49 = vpop.f32.mrf.mxu1  ;;  %9082 = vmatmul.mubr.msk.f32.gmra.mxu1 %vm1053_vm3, %v4921_v62  ;;  %v5793_v62 = vld [vmem:[#allocation5 + $0x25] sm:$0xff] }
 0x55d   :  { %v4287_v52 = vpop.f32.mrf.mxu0  ;;  %9153 = vmatmul.mubr.msk.f32.gmra.mxu0 %vm1053_vm3, %v11990_v46  ;;  %9084 = vmatprep.mubr.msk.f32.mxu1 %vm9435_vm1, %v11630_v58 }
 0x55e   :  { %v11995_v31 = vadd.f32 %v4287_v52, %v4038_v49  ;;  %9155 = vmatprep.mubr.msk.f32.mxu0 %vm9435_vm1, %v11630_v58  ;;  %v8793_v18 = vpop.f32.mrf.mxu1 }
 0x55f   :  { %v8864_v55 = vpop.f32.mrf.mxu0 }
 0x560   :  { %v4043_v30 = vpop.f32.mrf.mxu1  ;;  %9085 = vmatmul.mubr.msk.f32.gmra.mxu1 %vm1053_vm3, %v4922_v37 }
 0x561   :  { %v4292_v57 = vpop.f32.mrf.mxu0  ;;  %9156 = vmatmul.mubr.msk.f32.gmra.mxu0 %vm1053_vm3, %v5219_v35  ;;  %9160 = vmatprep.mubr.msk.f32.mxu1 %vm9435_vm1, %v11630_v58  ;;  %v5794_v35 = vld [vmem:[#allocation5 + $0x2d] sm:$0xff] }
 0x562   :  { %v12003_v45 = vadd.f32 %v4292_v57, %v4043_v30  ;;  %9231 = vmatprep.mubr.msk.f32.mxu0 %vm9435_vm1, %v11630_v58  ;;  %v8796_v34 = vpop.f32.mrf.mxu1 }
 0x563   :  { %v8867_v4 = vpop.f32.mrf.mxu0 }
 0x564   :  { %v4048_v39 = vpop.f32.mrf.mxu1  ;;  %9161 = vmatmul.mubr.msk.f32.vlgmr.msra.gmra.mxu1 %vm1053_vm3, %v11772_v23 }
 0x565   :  { %v4297_v36 = vpop.f32.mrf.mxu0  ;;  %9232 = vmatmul.mubr.msk.f32.vlgmr.msra.gmra.mxu0 %vm1053_vm3, %v5791_v32  ;;  %9301 = vmatpush3.msra.mxu1 %v7300_v26  ;;  %v5795_v26 = vld [vmem:[#allocation5 + $0x35] sm:$0xff] }
 0x566   :  { %v12015_v63 = vadd.f32 %v4297_v36, %v4048_v39  ;;  %9163 = vmatprep.mubr.msk.f32.mxu1 %vm9435_vm1, %v11630_v58  ;;  %v8799_v20 = vpop.f32.mrf.mxu1  ;;  %9234 = vmatprep.mubr.msk.f32.mxu0 %vm9435_vm1, %v11630_v58 }
 0x567   :  { %v8870_v24 = vpop.f32.mrf.mxu0 }
 0x568   :  { %v4053_v9 = vpop.f32.mrf.mxu1  ;;  %9164 = vmatmul.mubr.msk.f32.gmra.mxu1 %vm1053_vm3, %v11783_v33  ;;  %v5796_v24 = vld [vmem:[#allocation5 + $0x3d] sm:$0xff] }
 0x569   :  { %v4302_v15 = vpop.f32.mrf.mxu0  ;;  %9235 = vmatmul.mubr.msk.f32.gmra.mxu0 %vm1053_vm3, %v5792_v22  ;;  %9166 = vmatprep.mubr.msk.f32.mxu1 %vm9435_vm1, %v11630_v58 }
 0x56a   :  { %v12024_v23 = vadd.f32 %v4302_v15, %v4053_v9  ;;  %9237 = vmatprep.mubr.msk.f32.mxu0 %vm9435_vm1, %v11630_v58  ;;  %v8802_v56 = vpop.f32.mrf.mxu1 }
 0x56b   :  { %v8873_v21 = vpop.f32.mrf.mxu0 }
 0x56c   :  { %v4466_v49 = vpop.f32.mrf.mxu1  ;;  %9167 = vmatmul.mubr.msk.f32.gmra.mxu1 %vm1053_vm3, %v11792_v54  ;;  %v5797_v21 = vld [vmem:[#allocation5 + $0x45] sm:$0xff] }
 0x56d   :  { %v4763_v52 = vpop.f32.mrf.mxu0  ;;  %9238 = vmatmul.mubr.msk.f32.gmra.mxu0 %vm1053_vm3, %v5793_v62  ;;  %v4580_v33 = vadd.f32 %v4466_v49, %v11571_v16  ;;  %9169 = vmatprep.mubr.msk.f32.mxu1 %vm9435_vm1, %v11630_v58 }
 0x56e   :  { %9240 = vmatprep.mubr.msk.f32.mxu0 %vm9435_vm1, %v11630_v58  ;;  %v8878_v18 = vpop.f32.mrf.mxu1 }
 0x56f   :  { %v8949_v55 = vpop.f32.mrf.mxu0  ;;  %v12038_v37 = vadd.f32 %v4763_v52, %v4580_v33  ;;  %v5798_v18 = vld [vmem:[#allocation5 + $0x4d] sm:$0xff] }
 0x570   :  { %v4471_v30 = vpop.f32.mrf.mxu1  ;;  %9170 = vmatmul.mubr.msk.f32.gmra.mxu1 %vm1053_vm3, %v11801_v14 }
 0x571   :  { %v4768_v57 = vpop.f32.mrf.mxu0  ;;  %9241 = vmatmul.mubr.msk.f32.gmra.mxu0 %vm1053_vm3, %v5794_v35  ;;  %v4581_v16 = vadd.f32 %v4471_v30, %v11768_v53  ;;  %9172 = vmatprep.mubr.msk.f32.mxu1 %vm9435_vm1, %v11630_v58 }
 0x572   :  { %9243 = vmatprep.mubr.msk.f32.mxu0 %vm9435_vm1, %v11630_v58  ;;  %v8881_v54 = vpop.f32.mrf.mxu1 }
 0x573   :  { %v8952_v34 = vpop.f32.mrf.mxu0  ;;  %v12048_v4 = vadd.f32 %v4768_v57, %v4581_v16  ;;  %v5799_v16 = vld [vmem:[#allocation5 + $0x55] sm:$0xff] }
 0x574   :  { %v4476_v32 = vpop.f32.mrf.mxu1  ;;  %9173 = vmatmul.mubr.msk.f32.gmra.mxu1 %vm1053_vm3, %v11812_v2 }
 0x575   :  { %v4773_v39 = vpop.f32.mrf.mxu0  ;;  %9244 = vmatmul.mubr.msk.f32.gmra.mxu0 %vm1053_vm3, %v5795_v26  ;;  %v4582_v53 = vadd.f32 %v4476_v32, %v11806_v38  ;;  %9175 = vmatprep.mubr.msk.f32.mxu1 %vm9435_vm1, %v11630_v58 }
 0x576   :  { %9246 = vmatprep.mubr.msk.f32.mxu0 %vm9435_vm1, %v11630_v58  ;;  %v8884_v14 = vpop.f32.mrf.mxu1 }
 0x577   :  { %v8955_v36 = vpop.f32.mrf.mxu0  ;;  %v12058_v20 = vadd.f32 %v4773_v39, %v4582_v53 }
 0x578   :  { %v4481_v22 = vpop.f32.mrf.mxu1  ;;  %9176 = vmatmul.mubr.msk.f32.gmra.mxu1 %vm1053_vm3, %v11825_v59 }
 0x579   :  { %v4778_v9 = vpop.f32.mrf.mxu0  ;;  %9247 = vmatmul.mubr.msk.f32.gmra.mxu0 %vm1053_vm3, %v5796_v24  ;;  %v4583_v38 = vadd.f32 %v4481_v22, %v11819_v11  ;;  %9178 = vmatprep.mubr.msk.f32.mxu1 %vm9435_vm1, %v11630_v58 }
 0x57a   :  { %9249 = vmatprep.mubr.msk.f32.mxu0 %vm9435_vm1, %v11630_v58  ;;  %v8887_v2 = vpop.f32.mrf.mxu1 }
 0x57b   :  { %v8958_v15 = vpop.f32.mrf.mxu0  ;;  %v12068_v56 = vadd.f32 %v4778_v9, %v4583_v38 }
 0x57c   :  { %v4486_v62 = vpop.f32.mrf.mxu1  ;;  %9179 = vmatmul.mubr.msk.f32.gmra.mxu1 %vm1053_vm3, %v11836_v29 }
 0x57d   :  { %v4783_v49 = vpop.f32.mrf.mxu0  ;;  %9250 = vmatmul.mubr.msk.f32.gmra.mxu0 %vm1053_vm3, %v5797_v21  ;;  %v4584_v11 = vadd.f32 %v4486_v62, %v11830_v0  ;;  %9181 = vmatprep.mubr.msk.f32.mxu1 %vm9435_vm1, %v11630_v58  ;;  %v5802_v21 = vld [vmem:[#allocation5 + $0x6d] sm:$0xff] }
 0x57e   :  { %9252 = vmatprep.mubr.msk.f32.mxu0 %vm9435_vm1, %v11630_v58  ;;  %v8890_v59 = vpop.f32.mrf.mxu1 }
 0x57f   :  { %v8961_v52 = vpop.f32.mrf.mxu0  ;;  %v12078_v33 = vadd.f32 %v4783_v49, %v4584_v11 }
 0x580   :  { %v4491_v55 = vpop.f32.mrf.mxu1  ;;  %9182 = vmatmul.mubr.msk.f32.gmra.mxu1 %vm1053_vm3, %v11847_v43  ;;  %v5800_v43 = vld [vmem:[#allocation5 + $0x5d] sm:$0xff]  ;;  %v5803_v52 = vld [vmem:[#allocation5 + $0x75] sm:$0xff] }
 0x581   :  { %v4788_v35 = vpop.f32.mrf.mxu0  ;;  %9253 = vmatmul.mubr.msk.f32.gmra.mxu0 %vm1053_vm3, %v5798_v18  ;;  %v4585_v0 = vadd.f32 %v4491_v55, %v11841_v28  ;;  %9184 = vmatprep.mubr.msk.f32.mxu1 %vm9435_vm1, %v11630_v58 }
 0x582   :  { %9255 = vmatprep.mubr.msk.f32.mxu0 %vm9435_vm1, %v11630_v58  ;;  %v8893_v29 = vpop.f32.mrf.mxu1 }
 0x583   :  { %v8964_v30 = vpop.f32.mrf.mxu0  ;;  %v12088_v57 = vadd.f32 %v4788_v35, %v4585_v0  ;;  %v5804_v35 = vld [vmem:[#allocation5 + $0x7d] sm:$0xff] }
 0x584   :  { %v4496_v54 = vpop.f32.mrf.mxu1  ;;  %9185 = vmatmul.mubr.msk.f32.gmra.mxu1 %vm1053_vm3, %v11858_v40  ;;  %v5801_v40 = vld [vmem:[#allocation5 + $0x65] sm:$0xff] }
 0x585   :  { %v4793_v34 = vpop.f32.mrf.mxu0  ;;  %9256 = vmatmul.mubr.msk.f32.gmra.mxu0 %vm1053_vm3, %v5799_v16  ;;  %v4586_v28 = vadd.f32 %v4496_v54, %v11852_v5  ;;  %9187 = vmatprep.mubr.msk.f32.mxu1 %vm9435_vm1, %v11630_v58  ;;  %v5805_v16 = vld [vmem:[#allocation5 + $0x85] sm:$0xff] }
 0x586   :  { %9258 = vmatprep.mubr.msk.f32.mxu0 %vm9435_vm1, %v11630_v58  ;;  %v8896_v26 = vpop.f32.mrf.mxu1 }
 0x587   :  { %v8967_v32 = vpop.f32.mrf.mxu0  ;;  %v12098_v39 = vadd.f32 %v4793_v34, %v4586_v28 }
 0x588   :  { %v4501_v53 = vpop.f32.mrf.mxu1  ;;  %9188 = vmatmul.mubr.msk.f32.gmra.mxu1 %vm1053_vm3, %v11869_v17  ;;  %v5806_v32 = vld [vmem:[#allocation5 + $0x8d] sm:$0xff] }
 0x589   :  { %v4798_v14 = vpop.f32.mrf.mxu0  ;;  %9259 = vmatmul.mubr.msk.f32.gmra.mxu0 %vm1053_vm3, %v5800_v43  ;;  %v4587_v5 = vadd.f32 %v4501_v53, %v11863_v47  ;;  %9190 = vmatprep.mubr.msk.f32.mxu1 %vm9435_vm1, %v11630_v58 }
 0x58a   :  { %9261 = vmatprep.mubr.msk.f32.mxu0 %vm9435_vm1, %v11630_v58  ;;  %v8899_v36 = vpop.f32.mrf.mxu1 }
 0x58b   :  { %v8970_v24 = vpop.f32.mrf.mxu0  ;;  %v12108_v22 = vadd.f32 %v4798_v14, %v4587_v5  ;;  %v5807_v36 = vld [vmem:[#allocation5 + $0x95] sm:$0xff] }
 0x58c   :  { %v4506_v9 = vpop.f32.mrf.mxu1  ;;  %9191 = vmatmul.mubr.msk.f32.gmra.mxu1 %vm1053_vm3, %v11880_v8 }
 0x58d   :  { %v4803_v38 = vpop.f32.mrf.mxu0  ;;  %9262 = vmatmul.mubr.msk.f32.gmra.mxu0 %vm1053_vm3, %v5801_v40  ;;  %v4588_v47 = vadd.f32 %v4506_v9, %v11874_v51  ;;  %9193 = vmatprep.mubr.msk.f32.mxu1 %vm9435_vm1, %v11630_v58 }
 0x58e   :  { %9264 = vmatprep.mubr.msk.f32.mxu0 %vm9435_vm1, %v11630_v58  ;;  %v8902_v17 = vpop.f32.mrf.mxu1 }
 0x58f   :  { %v8973_v2 = vpop.f32.mrf.mxu0  ;;  %v12118_v15 = vadd.f32 %v4803_v38, %v4588_v47  ;;  %v5808_v17 = vld [vmem:[#allocation5 + $0x9d] sm:$0xff] }
 0x590   :  { %v4511_v62 = vpop.f32.mrf.mxu1  ;;  %9194 = vmatmul.mubr.msk.f32.gmra.mxu1 %vm1053_vm3, %v11891_v6 }
 0x591   :  { %v4808_v49 = vpop.f32.mrf.mxu0  ;;  %9265 = vmatmul.mubr.msk.f32.gmra.mxu0 %vm1053_vm3, %v5802_v21  ;;  %v4589_v51 = vadd.f32 %v4511_v62, %v11885_v48  ;;  %9196 = vmatprep.mubr.msk.f32.mxu1 %vm9435_vm1, %v11630_v58 }
 0x592   :  { %9267 = vmatprep.mubr.msk.f32.mxu0 %vm9435_vm1, %v11630_v58  ;;  %v8905_v8 = vpop.f32.mrf.mxu1 }
 0x593   :  { %v8976_v11 = vpop.f32.mrf.mxu0  ;;  %v12128_v59 = vadd.f32 %v4808_v49, %v4589_v51  ;;  %v5809_v51 = vld [vmem:[#allocation5 + $0xa5] sm:$0xff] }
 0x594   :  { %v4516_v18 = vpop.f32.mrf.mxu1  ;;  %9197 = vmatmul.mubr.msk.f32.gmra.mxu1 %vm1053_vm3, %v11900_v50 }
 0x595   :  { %v4813_v55 = vpop.f32.mrf.mxu0  ;;  %9268 = vmatmul.mubr.msk.f32.gmra.mxu0 %vm1053_vm3, %v5803_v52  ;;  %9199 = vmatprep.mubr.msk.f32.mxu1 %vm9435_vm1, %v11630_v58 }
 0x596   :  { %9270 = vmatprep.mubr.msk.f32.mxu0 %vm9435_vm1, %v11630_v58  ;;  %v8908_v48 = vpop.f32.mrf.mxu1  ;;  %v5810_v55 = vld [vmem:[#allocation5 + $0xad] sm:$0xff] }
 0x597   :  { %v8979_v6 = vpop.f32.mrf.mxu0 }
 0x598   :  { %v4521_v0 = vpop.f32.mrf.mxu1  ;;  %9200 = vmatmul.mubr.msk.f32.gmra.mxu1 %vm1053_vm3, %v11909_v3 }
 0x599   :  { %v4818_v29 = vpop.f32.mrf.mxu0  ;;  %9271 = vmatmul.mubr.msk.f32.gmra.mxu0 %vm1053_vm3, %v5804_v35  ;;  %9202 = vmatprep.mubr.msk.f32.mxu1 %vm9435_vm1, %v11630_v58 }
 0x59a   :  { %9273 = vmatprep.mubr.msk.f32.mxu0 %vm9435_vm1, %v11630_v58  ;;  %v8911_v50 = vpop.f32.mrf.mxu1  ;;  %v5811_v29 = vld [vmem:[#allocation5 + $0xb5] sm:$0xff] }
 0x59b   :  { %v8982_v30 = vpop.f32.mrf.mxu0 }
 0x59c   :  { %v4526_v54 = vpop.f32.mrf.mxu1  ;;  %9203 = vmatmul.mubr.msk.f32.gmra.mxu1 %vm1053_vm3, %v11920_v1  ;;  %v12158_v1 = vld [vmem:[#allocation4] sm:$0xff] }
 0x59d   :  { %v4823_v34 = vpop.f32.mrf.mxu0  ;;  %9274 = vmatmul.mubr.msk.f32.gmra.mxu0 %vm1053_vm3, %v5805_v16  ;;  %v4592_v3 = vadd.f32 %v4526_v54, %v11914_v61  ;;  %9205 = vmatprep.mubr.msk.f32.mxu1 %vm9435_vm1, %v11630_v58 }
 0x59e   :  { %9276 = vmatprep.mubr.msk.f32.mxu0 %vm9435_vm1, %v11630_v58  ;;  %v8914_v28 = vpop.f32.mrf.mxu1 }
 0x59f   :  { %v8985_v43 = vpop.f32.mrf.mxu0  ;;  %v12152_v26 = vadd.f32 %v4823_v34, %v4592_v3  ;;  %v5515_v3 = vld [vmem:[#allocation5 + $0xbc] sm:$0xff] }
 0x5a0   :  { %v4531_v53 = vpop.f32.mrf.mxu1  ;;  %9206 = vmatmul.mubr.msk.f32.gmra.mxu1 %vm1053_vm3, %v11933_v13 }
 0x5a1   :  { %v4828_v14 = vpop.f32.mrf.mxu0  ;;  %9277 = vmatmul.mubr.msk.f32.gmra.mxu0 %vm1053_vm3, %v5806_v32  ;;  %v4593_v61 = vadd.f32 %v4531_v53, %v11927_v7  ;;  %9208 = vmatprep.mubr.msk.f32.mxu1 %vm9435_vm1, %v12158_v1  ;;  %v5813_v32 = vld [vmem:[#allocation5 + $0xc5] sm:$0x3] }
 0x5a2   :  { %9279 = vmatprep.mubr.msk.f32.mxu0 %vm9435_vm1, %v12158_v1  ;;  %v8917_v58 = vpop.f32.mrf.mxu1 }
 0x5a3   :  { %v8988_v5 = vpop.f32.mrf.mxu0  ;;  %v12164_v40 = vadd.f32 %v4828_v14, %v4593_v61 }
 0x5a4   :  { %v4536_v24 = vpop.f32.mrf.mxu1  ;;  %9209 = vmatmul.mubr.msk.f32.gmra.mxu1 %vm1053_vm3, %v11944_v42 }
 0x5a5   :  { %v4833_v9 = vpop.f32.mrf.mxu0  ;;  %9280 = vmatmul.mubr.msk.f32.gmra.mxu0 %vm1053_vm3, %v5807_v36  ;;  %v4594_v7 = vadd.f32 %v4536_v24, %v11938_v19  ;;  %9211 = vmatprep.mubr.msk.f32.mxu1 %vm9435_vm1, %v12158_v1 }
 0x5a6   :  { %9282 = vmatprep.mubr.msk.f32.mxu0 %vm9435_vm1, %v12158_v1  ;;  %v8920_v13 = vpop.f32.mrf.mxu1 }
 0x5a7   :  { %v8991_v38 = vpop.f32.mrf.mxu0  ;;  %v12174_v47 = vadd.f32 %v4833_v9, %v4594_v7  ;;  %v6088_v7 = vld [vmem:[#allocation5 + $0x16] sm:$0xff] }
 0x5a8   :  { %v4541_v2 = vpop.f32.mrf.mxu1  ;;  %9212 = vmatmul.mubr.msk.f32.gmra.mxu1 %vm1053_vm3, %v11955_v10 }
 0x5a9   :  { %v4838_v21 = vpop.f32.mrf.mxu0  ;;  %9283 = vmatmul.mubr.msk.f32.gmra.mxu0 %vm1053_vm3, %v5808_v17  ;;  %v4595_v19 = vadd.f32 %v4541_v2, %v11949_v12  ;;  %9214 = vmatprep.mubr.msk.f32.mxu1 %vm9435_vm1, %v12158_v1 }
 0x5aa   :  { %9285 = vmatprep.mubr.msk.f32.mxu0 %vm9435_vm1, %v12158_v1  ;;  %v8923_v42 = vpop.f32.mrf.mxu1 }
 0x5ab   :  { %v8994_v62 = vpop.f32.mrf.mxu0  ;;  %v12184_v49 = vadd.f32 %v4838_v21, %v4595_v19  ;;  %v6089_v19 = vld [vmem:[#allocation5 + $0x1e] sm:$0xff] }
 0x5ac   :  { %v4546_v8 = vpop.f32.mrf.mxu1  ;;  %9215 = vmatmul.mubr.msk.f32.gmra.mxu1 %vm1053_vm3, %v11966_v27 }
 0x5ad   :  { %v4843_v11 = vpop.f32.mrf.mxu0  ;;  %9286 = vmatmul.mubr.msk.f32.gmra.mxu0 %vm1053_vm3, %v5809_v51  ;;  %v4596_v12 = vadd.f32 %v4546_v8, %v11960_v41  ;;  %9217 = vmatprep.mubr.msk.f32.mxu1 %vm9435_vm1, %v12158_v1 }
 0x5ae   :  { %9288 = vmatprep.mubr.msk.f32.mxu0 %vm9435_vm1, %v12158_v1  ;;  %v8926_v10 = vpop.f32.mrf.mxu1 }
 0x5af   :  { %v8997_v52 = vpop.f32.mrf.mxu0  ;;  %v12194_v18 = vadd.f32 %v4843_v11, %v4596_v12  ;;  %v6090_v12 = vld [vmem:[#allocation5 + $0x26] sm:$0xff] }
 0x5b0   :  { %v4551_v48 = vpop.f32.mrf.mxu1  ;;  %9218 = vmatmul.mubr.msk.f32.gmra.mxu1 %vm1053_vm3, %v11977_v44  ;;  %v5812_v44 = vld [vmem:[#allocation5 + $0xbd] sm:$0xff] }
 0x5b1   :  { %v4848_v6 = vpop.f32.mrf.mxu0  ;;  %9289 = vmatmul.mubr.msk.f32.gmra.mxu0 %vm1053_vm3, %v5810_v55  ;;  %v4597_v41 = vadd.f32 %v4551_v48, %v11971_v60  ;;  %9220 = vmatprep.mubr.msk.f32.mxu1 %vm9435_vm1, %v12158_v1 }
 0x5b2   :  { %9291 = vmatprep.mubr.msk.f32.mxu0 %vm9435_vm1, %v12158_v1  ;;  %v8929_v27 = vpop.f32.mrf.mxu1 }
 0x5b3   :  { %v9000_v35 = vpop.f32.mrf.mxu0  ;;  %v12204_v0 = vadd.f32 %v4848_v6, %v4597_v41  ;;  %v6091_v41 = vld [vmem:[#allocation5 + $0x2e] sm:$0xff] }
 0x5b4   :  { %v4556_v50 = vpop.f32.mrf.mxu1  ;;  %9221 = vmatmul.mubr.msk.f32.gmra.mxu1 %vm1053_vm3, %v11990_v46  ;;  %v5516_v46 = vld [vmem:[#allocation5 + $0xc4] sm:$0x3] }
 0x5b5   :  { %v4853_v30 = vpop.f32.mrf.mxu0  ;;  %9292 = vmatmul.mubr.msk.f32.gmra.mxu0 %vm1053_vm3, %v5811_v29  ;;  %v4598_v60 = vadd.f32 %v4556_v50, %v11984_v25  ;;  %9223 = vmatprep.mubr.msk.f32.mxu1 %vm9435_vm1, %v12158_v1 }
 0x5b6   :  { %9294 = vmatprep.mubr.msk.f32.mxu0 %vm9435_vm1, %v12158_v1  ;;  %v8932_v16 = vpop.f32.mrf.mxu1 }
 0x5b7   :  { %v9003_v54 = vpop.f32.mrf.mxu0  ;;  %v12214_v34 = vadd.f32 %v4853_v30, %v4598_v60  ;;  %v6092_v60 = vld [vmem:[#allocation5 + $0x36] sm:$0xff] }
 0x5b8   :  { %v4561_v28 = vpop.f32.mrf.mxu1  ;;  %9224 = vmatmul.mubr.msk.f32.gmra.mxu1 %vm1053_vm3, %v5515_v3 }
 0x5b9   :  { %v4858_v43 = vpop.f32.mrf.mxu0  ;;  %9295 = vmatmul.mubr.msk.f32.gmra.mxu0 %vm1053_vm3, %v5812_v44  ;;  %v4599_v25 = vadd.f32 %v4561_v28, %v11995_v31  ;;  %9226 = vmatprep.mubr.msk.f32.mxu1 %vm9435_vm1, %v12158_v1 }
 0x5ba   :  { %9297 = vmatprep.mubr.msk.f32.mxu0 %vm9435_vm1, %v12158_v1  ;;  %v8935_v53 = vpop.f32.mrf.mxu1 }
 0x5bb   :  { %v9006_v14 = vpop.f32.mrf.mxu0  ;;  %v12223_v61 = vadd.f32 %v4858_v43, %v4599_v25  ;;  %v6093_v43 = vld [vmem:[#allocation5 + $0x3e] sm:$0xff] }
 0x5bc   :  { %v4566_v58 = vpop.f32.mrf.mxu1  ;;  %9227 = vmatmul.mubr.msk.f32.gmra.mxu1 %vm1053_vm3, %v5516_v46 }
 0x5bd   :  { %v4863_v5 = vpop.f32.mrf.mxu0  ;;  %9298 = vmatmul.mubr.msk.f32.gmra.mxu0 %vm1053_vm3, %v5813_v32  ;;  %v4600_v31 = vadd.f32 %v4566_v58, %v12003_v45  ;;  %9302 = vmatprep.mubr.msk.f32.mxu1 %vm9435_vm1, %v12158_v1  ;;  %v6094_v58 = vld [vmem:[#allocation5 + $0x46] sm:$0xff] }
 0x5be   :  { %9373 = vmatprep.mubr.msk.f32.mxu0 %vm9435_vm1, %v12158_v1  ;;  %v8938_v36 = vpop.f32.mrf.mxu1 }
 0x5bf   :  { %v9009_v24 = vpop.f32.mrf.mxu0  ;;  %v12232_v9 = vadd.f32 %v4863_v5, %v4600_v31 }
 0x5c0   :  { %v4571_v13 = vpop.f32.mrf.mxu1  ;;  %9303 = vmatmul.mubr.msk.f32.vlgmr.msra.gmra.mxu1 %vm1053_vm3, %v6088_v7 }
 0x5c1   :  { %v4868_v38 = vpop.f32.mrf.mxu0  ;;  %v4601_v17 = vadd.f32 %v4571_v13, %v12015_v63  ;;  %9305 = vmatprep.mubr.msk.f32.mxu1 %vm9435_vm1, %v12158_v1  ;;  %v6095_v13 = vld [vmem:[#allocation5 + $0x4e] sm:$0xff] }
 0x5c2   :  { %v8941_v45 = vpop.f32.mrf.mxu1 }
 0x5c3   :  { %v9012_v2 = vpop.f32.mrf.mxu0  ;;  %v12238_v21 = vadd.f32 %v4868_v38, %v4601_v17 }
 0x5c4   :  { %v4576_v42 = vpop.f32.mrf.mxu1  ;;  %9306 = vmatmul.mubr.msk.f32.gmra.mxu1 %vm1053_vm3, %v6089_v19 }
 0x5c5   :  { %v4873_v62 = vpop.f32.mrf.mxu0  ;;  %v4602_v51 = vadd.f32 %v4576_v42, %v12024_v23  ;;  %9308 = vmatprep.mubr.msk.f32.mxu1 %vm9435_vm1, %v12158_v1  ;;  %v6096_v42 = vld [vmem:[#allocation5 + $0x56] sm:$0xff] }
 0x5c6   :  { %v8944_v8 = vpop.f32.mrf.mxu1 }
 0x5c7   :  { %v9015_v11 = vpop.f32.mrf.mxu0  ;;  %v12244_v63 = vadd.f32 %v4873_v62, %v4602_v51 }
 0x5c8   :  { %v5060_v10 = vpop.f32.mrf.mxu1  ;;  %9309 = vmatmul.mubr.msk.f32.gmra.mxu1 %vm1053_vm3, %v6090_v12  ;;  %v6097_v11 = vld [vmem:[#allocation5 + $0x5e] sm:$0xff] }
 0x5c9   :  { %v5357_v52 = vpop.f32.mrf.mxu0  ;;  %v5174_v55 = vadd.f32 %v5060_v10, %v12038_v37  ;;  %9311 = vmatprep.mubr.msk.f32.mxu1 %vm9435_vm1, %v12158_v1 }
 0x5ca   :  { %v9020_v48 = vpop.f32.mrf.mxu1 }
 0x5cb   :  { %v9091_v6 = vpop.f32.mrf.mxu0  ;;  %v12250_v23 = vadd.f32 %v5357_v52, %v5174_v55 }
 0x5cc   :  { %v5065_v27 = vpop.f32.mrf.mxu1  ;;  %9312 = vmatmul.mubr.msk.f32.gmra.mxu1 %vm1053_vm3, %v6091_v41  ;;  %v6098_v6 = vld [vmem:[#allocation5 + $0x66] sm:$0xff] }
 0x5cd   :  { %v5362_v35 = vpop.f32.mrf.mxu0  ;;  %v5175_v29 = vadd.f32 %v5065_v27, %v12048_v4  ;;  %9314 = vmatprep.mubr.msk.f32.mxu1 %vm9435_vm1, %v12158_v1 }
 0x5ce   :  { %v9023_v50 = vpop.f32.mrf.mxu1 }
 0x5cf   :  { %v9094_v30 = vpop.f32.mrf.mxu0  ;;  %v12256_v37 = vadd.f32 %v5362_v35, %v5175_v29 }
 0x5d0   :  { %v5070_v44 = vpop.f32.mrf.mxu1  ;;  %9315 = vmatmul.mubr.msk.f32.gmra.mxu1 %vm1053_vm3, %v6092_v60 }
 0x5d1   :  { %v5367_v16 = vpop.f32.mrf.mxu0  ;;  %v5176_v54 = vadd.f32 %v5070_v44, %v12058_v20  ;;  %9317 = vmatprep.mubr.msk.f32.mxu1 %vm9435_vm1, %v12158_v1  ;;  %v6099_v44 = vld [vmem:[#allocation5 + $0x6e] sm:$0xff] }
 0x5d2   :  { %v9026_v3 = vpop.f32.mrf.mxu1 }
 0x5d3   :  { %v9097_v28 = vpop.f32.mrf.mxu0  ;;  %v12262_v4 = vadd.f32 %v5367_v16, %v5176_v54  ;;  %v12303_v16 = vld [vmem:[%s12526_s7] sm:$0xff] }
 0x5d4   :  { %v5075_v25 = vpop.f32.mrf.mxu1  ;;  %9318 = vmatmul.mubr.msk.f32.gmra.mxu1 %vm1053_vm3, %v6093_v43  ;;  %9372 = vmatpush3.msra.mxu0 %v12303_v16 }
 0x5d5   :  { %v5372_v46 = vpop.f32.mrf.mxu0  ;;  %v5177_v32 = vadd.f32 %v5075_v25, %v12068_v56  ;;  %9320 = vmatprep.mubr.msk.f32.mxu1 %vm9435_vm1, %v12158_v1  ;;  %9376 = vmatprep.subr.mxu0 %v12158_v1 }
 0x5d6   :  { %v9029_v53 = vpop.f32.mrf.mxu1 }
 0x5d7   :  { %v9100_v14 = vpop.f32.mrf.mxu0  ;;  %v12268_v20 = vadd.f32 %v5372_v46, %v5177_v32  ;;  %v6100_v46 = vld [vmem:[#allocation5 + $0x76] sm:$0xff] }
 0x5d8   :  { %v5080_v5 = vpop.f32.mrf.mxu1  ;;  %9321 = vmatmul.mubr.msk.f32.gmra.mxu1 %vm1053_vm3, %v6094_v58 }
 0x5d9   :  { %v5377_v31 = vpop.f32.mrf.mxu0  ;;  %v5178_v36 = vadd.f32 %v5080_v5, %v12078_v33  ;;  %9323 = vmatprep.mubr.msk.f32.mxu1 %vm9435_vm1, %v12158_v1 }
 0x5da   :  { %v9032_v24 = vpop.f32.mrf.mxu1 }
 0x5db   :  { %v9103_v7 = vpop.f32.mrf.mxu0  ;;  %v12274_v56 = vadd.f32 %v5377_v31, %v5178_v36 }
 0x5dc   :  { %v5085_v38 = vpop.f32.mrf.mxu1  ;;  %9324 = vmatmul.mubr.msk.f32.gmra.mxu1 %vm1053_vm3, %v6095_v13  ;;  %v6102_v7 = vld [vmem:[#allocation5 + $0x86] sm:$0xff] }
 0x5dd   :  { %v5382_v17 = vpop.f32.mrf.mxu0  ;;  %v5179_v45 = vadd.f32 %v5085_v38, %v12088_v57  ;;  %9326 = vmatprep.mubr.msk.f32.mxu1 %vm9435_vm1, %v12158_v1 }
 0x5de   :  { %v9035_v2 = vpop.f32.mrf.mxu1 }
 0x5df   :  { %v9106_v19 = vpop.f32.mrf.mxu0  ;;  %v12280_v33 = vadd.f32 %v5382_v17, %v5179_v45 }
 0x5e0   :  { %v5090_v62 = vpop.f32.mrf.mxu1  ;;  %9327 = vmatmul.mubr.msk.f32.gmra.mxu1 %vm1053_vm3, %v6096_v42  ;;  %v6103_v42 = vld [vmem:[#allocation5 + $0x8e] sm:$0xff] }
 0x5e1   :  { %v5387_v51 = vpop.f32.mrf.mxu0  ;;  %v5180_v8 = vadd.f32 %v5090_v62, %v12098_v39  ;;  %9329 = vmatprep.mubr.msk.f32.mxu1 %vm9435_vm1, %v12158_v1 }
 0x5e2   :  { %v9038_v12 = vpop.f32.mrf.mxu1 }
 0x5e3   :  { %v9109_v57 = vpop.f32.mrf.mxu0  ;;  %v12286_v10 = vadd.f32 %v5387_v51, %v5180_v8 }
 0x5e4   :  { %v5095_v52 = vpop.f32.mrf.mxu1  ;;  %9330 = vmatmul.mubr.msk.f32.gmra.mxu1 %vm1053_vm3, %v6097_v11  ;;  %v6104_v57 = vld [vmem:[#allocation5 + $0x96] sm:$0xff] }
 0x5e5   :  { %v5392_v55 = vpop.f32.mrf.mxu0  ;;  %v5181_v48 = vadd.f32 %v5095_v52, %v12108_v22  ;;  %9332 = vmatprep.mubr.msk.f32.mxu1 %vm9435_vm1, %v12158_v1 }
 0x5e6   :  { %v9041_v41 = vpop.f32.mrf.mxu1 }
 0x5e7   :  { %v9112_v39 = vpop.f32.mrf.mxu0  ;;  %v12292_v27 = vadd.f32 %v5392_v55, %v5181_v48 }
 0x5e8   :  { %v5100_v35 = vpop.f32.mrf.mxu1  ;;  %9333 = vmatmul.mubr.msk.f32.gmra.mxu1 %vm1053_vm3, %v6098_v6  ;;  %v6105_v39 = vld [vmem:[#allocation5 + $0x9e] sm:$0xff] }
 0x5e9   :  { %v5397_v29 = vpop.f32.mrf.mxu0  ;;  %v5182_v50 = vadd.f32 %v5100_v35, %v12118_v15  ;;  %9335 = vmatprep.mubr.msk.f32.mxu1 %vm9435_vm1, %v12158_v1 }
 0x5ea   :  { %v9044_v30 = vpop.f32.mrf.mxu1 }
 0x5eb   :  { %v9115_v60 = vpop.f32.mrf.mxu0  ;;  %v12298_v22 = vadd.f32 %v5397_v29, %v5182_v50 }
 0x5ec   :  { %v5105_v54 = vpop.f32.mrf.mxu1  ;;  %9336 = vmatmul.mubr.msk.f32.gmra.mxu1 %vm1053_vm3, %v6099_v44  ;;  %v6106_v44 = vld [vmem:[#allocation5 + $0xa6] sm:$0xff] }
 0x5ed   :  { %v5402_v3 = vpop.f32.mrf.mxu0  ;;  %v5183_v15 = vadd.f32 %v5105_v54, %v12128_v59  ;;  %9338 = vmatprep.mubr.msk.f32.mxu1 %vm9435_vm1, %v12158_v1  ;;  %v6101_v59 = vld [vmem:[#allocation5 + $0x7e] sm:$0xff] }
 0x5ee   :  { %v9047_v28 = vpop.f32.mrf.mxu1 }
 0x5ef   :  { %v9118_v43 = vpop.f32.mrf.mxu0  ;;  %v12311_v25 = vadd.f32 %v5402_v3, %v5183_v15 }
 0x5f0   :  { %v5110_v32 = vpop.f32.mrf.mxu1  ;;  %9339 = vmatmul.mubr.msk.f32.gmra.mxu1 %vm1053_vm3, %v6100_v46  ;;  %v6107_v46 = vld [vmem:[#allocation5 + $0xae] sm:$0xff] }
 0x5f1   :  { %v5407_v53 = vpop.f32.mrf.mxu0  ;;  %9341 = vmatprep.mubr.msk.f32.mxu1 %vm9435_vm1, %v12158_v1 }
 0x5f2   :  { %v9050_v14 = vpop.f32.mrf.mxu1 }
 0x5f3   :  { %v9121_v58 = vpop.f32.mrf.mxu0 }
 0x5f4   :  { %v5115_v5 = vpop.f32.mrf.mxu1  ;;  %9342 = vmatmul.mubr.msk.f32.gmra.mxu1 %vm1053_vm3, %v6101_v59 }
 0x5f5   :  { %v5412_v31 = vpop.f32.mrf.mxu0  ;;  %9344 = vmatprep.mubr.msk.f32.mxu1 %vm9435_vm1, %v12158_v1  ;;  %v6108_v5 = vld [vmem:[#allocation5 + $0xb6] sm:$0xff] }
 0x5f6   :  { %v9053_v36 = vpop.f32.mrf.mxu1 }
 0x5f7   :  { %v9124_v24 = vpop.f32.mrf.mxu0 }
 0x5f8   :  { %v5120_v13 = vpop.f32.mrf.mxu1  ;;  %9345 = vmatmul.mubr.msk.f32.gmra.mxu1 %vm1053_vm3, %v6102_v7  ;;  %v6109_v7 = vld [vmem:[#allocation5 + $0xbe] sm:$0xff] }
 0x5f9   :  { %v5417_v38 = vpop.f32.mrf.mxu0  ;;  %v5186_v17 = vadd.f32 %v5120_v13, %v12152_v26  ;;  %9347 = vmatprep.mubr.msk.f32.mxu1 %vm9435_vm1, %v12158_v1 }
 0x5fa   :  { %v9056_v45 = vpop.f32.mrf.mxu1 }
 0x5fb   :  { %v9127_v2 = vpop.f32.mrf.mxu0  ;;  %v12323_v19 = vadd.f32 %v5417_v38, %v5186_v17 }
 0x5fc   :  { %v5125_v62 = vpop.f32.mrf.mxu1  ;;  %9348 = vmatmul.mubr.msk.f32.gmra.mxu1 %vm1053_vm3, %v6103_v42  ;;  %v6110_v42 = vld [vmem:[#allocation5 + $0xc6] sm:$0x3] }
 0x5fd   :  { %v5422_v51 = vpop.f32.mrf.mxu0  ;;  %v5187_v8 = vadd.f32 %v5125_v62, %v12164_v40  ;;  %9350 = vmatprep.mubr.msk.f32.mxu1 %vm9435_vm1, %v12158_v1 }
 0x5fe   :  { %v9059_v11 = vpop.f32.mrf.mxu1 }
 0x5ff   :  { %v9130_v12 = vpop.f32.mrf.mxu0  ;;  %v12329_v26 = vadd.f32 %v5422_v51, %v5187_v8 }
 0x600   :  { %v5130_v52 = vpop.f32.mrf.mxu1  ;;  %9351 = vmatmul.mubr.msk.f32.gmra.mxu1 %vm1053_vm3, %v6104_v57 }
 0x601   :  { %v5427_v55 = vpop.f32.mrf.mxu0  ;;  %v5188_v48 = vadd.f32 %v5130_v52, %v12174_v47  ;;  %9353 = vmatprep.mubr.msk.f32.mxu1 %vm9435_vm1, %v12158_v1 }
 0x602   :  { %v9062_v6 = vpop.f32.mrf.mxu1 }
 0x603   :  { %v9133_v41 = vpop.f32.mrf.mxu0  ;;  %v12335_v40 = vadd.f32 %v5427_v55, %v5188_v48 }
 0x604   :  { %v5135_v35 = vpop.f32.mrf.mxu1  ;;  %9354 = vmatmul.mubr.msk.f32.gmra.mxu1 %vm1053_vm3, %v6105_v39 }
 0x605   :  { %v5432_v29 = vpop.f32.mrf.mxu0  ;;  %v5189_v50 = vadd.f32 %v5135_v35, %v12184_v49  ;;  %9356 = vmatprep.mubr.msk.f32.mxu1 %vm9435_vm1, %v12158_v1 }
 0x606   :  { %v9065_v30 = vpop.f32.mrf.mxu1 }
 0x607   :  { %v9136_v60 = vpop.f32.mrf.mxu0  ;;  %v12341_v47 = vadd.f32 %v5432_v29, %v5189_v50 }
 0x608   :  { %v5140_v54 = vpop.f32.mrf.mxu1  ;;  %9357 = vmatmul.mubr.msk.f32.gmra.mxu1 %vm1053_vm3, %v6106_v44 }
 0x609   :  { %v5437_v3 = vpop.f32.mrf.mxu0  ;;  %v5190_v15 = vadd.f32 %v5140_v54, %v12194_v18  ;;  %9359 = vmatprep.mubr.msk.f32.mxu1 %vm9435_vm1, %v12158_v1 }
 0x60a   :  { %v9068_v28 = vpop.f32.mrf.mxu1 }
 0x60b   :  { %v9139_v43 = vpop.f32.mrf.mxu0  ;;  %v12347_v49 = vadd.f32 %v5437_v3, %v5190_v15 }
 0x60c   :  { %v5145_v32 = vpop.f32.mrf.mxu1  ;;  %9360 = vmatmul.mubr.msk.f32.gmra.mxu1 %vm1053_vm3, %v6107_v46 }
 0x60d   :  { %v5442_v53 = vpop.f32.mrf.mxu0  ;;  %v5191_v14 = vadd.f32 %v5145_v32, %v12204_v0  ;;  %9362 = vmatprep.mubr.msk.f32.mxu1 %vm9435_vm1, %v12158_v1 }
 0x60e   :  { %v9071_v58 = vpop.f32.mrf.mxu1 }
 0x60f   :  { %v9142_v59 = vpop.f32.mrf.mxu0  ;;  %v12353_v18 = vadd.f32 %v5442_v53, %v5191_v14 }
 0x610   :  { %v5150_v31 = vpop.f32.mrf.mxu1  ;;  %9363 = vmatmul.mubr.msk.f32.gmra.mxu1 %vm1053_vm3, %v6108_v5 }
 0x611   :  { %v5447_v36 = vpop.f32.mrf.mxu0  ;;  %v5192_v24 = vadd.f32 %v5150_v31, %v12214_v34  ;;  %9365 = vmatprep.mubr.msk.f32.mxu1 %vm9435_vm1, %v12158_v1 }
 0x612   :  { %v9074_v13 = vpop.f32.mrf.mxu1 }
 0x613   :  { %v9145_v0 = vpop.f32.mrf.mxu0  ;;  %v12359_v38 = vadd.f32 %v5447_v36, %v5192_v24 }
 0x614   :  { %v5155_v17 = vpop.f32.mrf.mxu1  ;;  %9366 = vmatmul.mubr.msk.f32.gmra.mxu1 %vm1053_vm3, %v6109_v7 }
 0x615   :  { %v5452_v45 = vpop.f32.mrf.mxu0  ;;  %v5193_v2 = vadd.f32 %v5155_v17, %v12223_v61  ;;  %9368 = vmatprep.mubr.msk.f32.mxu1 %vm9435_vm1, %v12158_v1 }
 0x616   :  { %v9077_v62 = vpop.f32.mrf.mxu1 }
 0x617   :  { %v9148_v34 = vpop.f32.mrf.mxu0  ;;  %v12365_v51 = vadd.f32 %v5452_v45, %v5193_v2 }
 0x618   :  { %v5160_v8 = vpop.f32.mrf.mxu1  ;;  %9369 = vmatmul.mubr.msk.f32.gmra.mxu1 %vm1053_vm3, %v6110_v42 }
 0x619   :  { %v5457_v11 = vpop.f32.mrf.mxu0  ;;  %v5194_v12 = vadd.f32 %v5160_v8, %v12232_v9 }
 0x61a   :  { %v9080_v57 = vpop.f32.mrf.mxu1 }
 0x61b   :  { %v9151_v52 = vpop.f32.mrf.mxu0  ;;  %v12369_v55 = vadd.f32 %v5457_v11, %v5194_v12 }
 0x61c   :  { %v5165_v48 = vpop.f32.mrf.mxu1 }
 0x61d   :  { %v5462_v61 = vpop.f32.mrf.mxu0  ;;  %v5195_v6 = vadd.f32 %v5165_v48, %v12238_v21 }
 0x61e   :  { %v9083_v1 = vpop.f32.mrf.mxu1 }
 0x61f   :  { %v9154_v41 = vpop.f32.mrf.mxu0  ;;  %v12372_v39 = vadd.f32 %v5462_v61, %v5195_v6 }
 0x620   :  { %v5170_v35 = vpop.f32.mrf.mxu1 }
 0x621   :  { %v5467_v29 = vpop.f32.mrf.mxu0  ;;  %v5196_v50 = vadd.f32 %v5170_v35, %v12244_v63 }
 0x622   :  { %v9086_v30 = vpop.f32.mrf.mxu1 }
 0x623   :  { %v9157_v60 = vpop.f32.mrf.mxu0  ;;  %v12375_v44 = vadd.f32 %v5467_v29, %v5196_v50 }
 0x624   :  { %v5654_v9 = vpop.f32.mrf.mxu1 }
 0x625   :  { %v5951_v54 = vpop.f32.mrf.mxu0  ;;  %v5768_v3 = vadd.f32 %v5654_v9, %v12250_v23 }
 0x626   :  { %v9162_v15 = vpop.f32.mrf.mxu1 }
 0x627   :  { %v9233_v28 = vpop.f32.mrf.mxu0  ;;  %v12378_v43 = vadd.f32 %v5951_v54, %v5768_v3 }
 0x628   :  { %v5659_v21 = vpop.f32.mrf.mxu1 }
 0x629   :  { %v5956_v46 = vpop.f32.mrf.mxu0  ;;  %v5769_v32 = vadd.f32 %v5659_v21, %v12256_v37 }
 0x62a   :  { %v9165_v53 = vpop.f32.mrf.mxu1 }
 0x62b   :  { %v9236_v14 = vpop.f32.mrf.mxu0  ;;  %v12381_v58 = vadd.f32 %v5956_v46, %v5769_v32 }
 0x62c   :  { %v5664_v63 = vpop.f32.mrf.mxu1 }
 0x62d   :  { %v5961_v59 = vpop.f32.mrf.mxu0  ;;  %v5770_v5 = vadd.f32 %v5664_v63, %v12262_v4 }
 0x62e   :  { %v9168_v31 = vpop.f32.mrf.mxu1 }
 0x62f   :  { %v9239_v36 = vpop.f32.mrf.mxu0  ;;  %v12384_v24 = vadd.f32 %v5961_v59, %v5770_v5 }
 0x630   :  { %v5669_v23 = vpop.f32.mrf.mxu1 }
 0x631   :  { %v5966_v7 = vpop.f32.mrf.mxu0  ;;  %v5771_v13 = vadd.f32 %v5669_v23, %v12268_v20 }
 0x632   :  { %v9171_v0 = vpop.f32.mrf.mxu1 }
 0x633   :  { %v9242_v17 = vpop.f32.mrf.mxu0  ;;  %v12387_v45 = vadd.f32 %v5966_v7, %v5771_v13 }
 0x634   :  { %v5674_v37 = vpop.f32.mrf.mxu1 }
 0x635   :  { %v5971_v2 = vpop.f32.mrf.mxu0  ;;  %v5772_v42 = vadd.f32 %v5674_v37, %v12274_v56 }
 0x636   :  { %v9174_v62 = vpop.f32.mrf.mxu1 }
 0x637   :  { %v9245_v34 = vpop.f32.mrf.mxu0  ;;  %v12390_v8 = vadd.f32 %v5971_v2, %v5772_v42 }
 0x638   :  { %v5679_v4 = vpop.f32.mrf.mxu1 }
 0x639   :  { %v5976_v11 = vpop.f32.mrf.mxu0  ;;  %v5773_v12 = vadd.f32 %v5679_v4, %v12280_v33 }
 0x63a   :  { %v9177_v57 = vpop.f32.mrf.mxu1 }
 0x63b   :  { %v9248_v52 = vpop.f32.mrf.mxu0  ;;  %v12393_v48 = vadd.f32 %v5976_v11, %v5773_v12 }
 0x63c   :  { %v5684_v20 = vpop.f32.mrf.mxu1 }
 0x63d   :  { %v5981_v61 = vpop.f32.mrf.mxu0  ;;  %v5774_v6 = vadd.f32 %v5684_v20, %v12286_v10 }
 0x63e   :  { %v9180_v1 = vpop.f32.mrf.mxu1 }
 0x63f   :  { %v9251_v41 = vpop.f32.mrf.mxu0  ;;  %v12396_v35 = vadd.f32 %v5981_v61, %v5774_v6 }
 0x640   :  { %v5689_v56 = vpop.f32.mrf.mxu1 }
 0x641   :  { %v5986_v29 = vpop.f32.mrf.mxu0  ;;  %v5775_v50 = vadd.f32 %v5689_v56, %v12292_v27 }
 0x642   :  { %v9183_v30 = vpop.f32.mrf.mxu1 }
 0x643   :  { %v9254_v60 = vpop.f32.mrf.mxu0  ;;  %v12399_v9 = vadd.f32 %v5986_v29, %v5775_v50 }
 0x644   :  { %v5694_v33 = vpop.f32.mrf.mxu1 }
 0x645   :  { %v5991_v54 = vpop.f32.mrf.mxu0  ;;  %v5776_v3 = vadd.f32 %v5694_v33, %v12298_v22 }
 0x646   :  { %v9186_v15 = vpop.f32.mrf.mxu1 }
 0x647   :  { %v9257_v28 = vpop.f32.mrf.mxu0  ;;  %v12402_v21 = vadd.f32 %v5991_v54, %v5776_v3 }
 0x648   :  { %v5699_v10 = vpop.f32.mrf.mxu1 }
 0x649   :  { %v5996_v46 = vpop.f32.mrf.mxu0  ;;  %v5777_v32 = vadd.f32 %v5699_v10, %v12311_v25 }
 0x64a   :  { %v9189_v53 = vpop.f32.mrf.mxu1 }
 0x64b   :  { %v9260_v14 = vpop.f32.mrf.mxu0  ;;  %v12405_v63 = vadd.f32 %v5996_v46, %v5777_v32 }
 0x64c   :  { %v5704_v27 = vpop.f32.mrf.mxu1 }
 0x64d   :  { %v6001_v59 = vpop.f32.mrf.mxu0 }
 0x64e   :  { %v9192_v5 = vpop.f32.mrf.mxu1 }
 0x64f   :  { %v9263_v31 = vpop.f32.mrf.mxu0 }
 0x650   :  { %v5709_v36 = vpop.f32.mrf.mxu1 }
 0x651   :  { %v6006_v23 = vpop.f32.mrf.mxu0 }
 0x652   :  { %v9195_v7 = vpop.f32.mrf.mxu1 }
 0x653   :  { %v9266_v22 = vpop.f32.mrf.mxu0 }
 0x654   :  { %v5714_v13 = vpop.f32.mrf.mxu1 }
 0x655   :  { %v6011_v0 = vpop.f32.mrf.mxu0  ;;  %v5780_v17 = vadd.f32 %v5714_v13, %v12323_v19 }
 0x656   :  { %v9198_v37 = vpop.f32.mrf.mxu1 }
 0x657   :  { %v9269_v2 = vpop.f32.mrf.mxu0  ;;  %v12408_v42 = vadd.f32 %v6011_v0, %v5780_v17 }
 0x658   :  { %v5719_v25 = vpop.f32.mrf.mxu1 }
 0x659   :  { %v6016_v62 = vpop.f32.mrf.mxu0  ;;  %v5781_v34 = vadd.f32 %v5719_v25, %v12329_v26 }
 0x65a   :  { %v9201_v4 = vpop.f32.mrf.mxu1 }
 0x65b   :  { %v9272_v11 = vpop.f32.mrf.mxu0  ;;  %v12411_v12 = vadd.f32 %v6016_v62, %v5781_v34 }
 0x65c   :  { %v5724_v57 = vpop.f32.mrf.mxu1 }
 0x65d   :  { %v6021_v52 = vpop.f32.mrf.mxu0  ;;  %v5782_v20 = vadd.f32 %v5724_v57, %v12335_v40 }
 0x65e   :  { %v9204_v61 = vpop.f32.mrf.mxu1 }
 0x65f   :  { %v9275_v6 = vpop.f32.mrf.mxu0  ;;  %v12414_v1 = vadd.f32 %v6021_v52, %v5782_v20 }
 0x660   :  { %v5729_v19 = vpop.f32.mrf.mxu1 }
 0x661   :  { %v6026_v41 = vpop.f32.mrf.mxu0  ;;  %v5783_v56 = vadd.f32 %v5729_v19, %v12341_v47 }
 0x662   :  { %v9207_v29 = vpop.f32.mrf.mxu1 }
 0x663   :  { %v9278_v50 = vpop.f32.mrf.mxu0  ;;  %v12417_v30 = vadd.f32 %v6026_v41, %v5783_v56 }
 0x664   :  { %v5734_v26 = vpop.f32.mrf.mxu1 }
 0x665   :  { %v6031_v60 = vpop.f32.mrf.mxu0  ;;  %v5784_v33 = vadd.f32 %v5734_v26, %v12347_v49  ;;  %v6409_v26 = vld [vmem:[%s12525_s6] sm:$0xf] }
 0x666   :  { %v9210_v54 = vpop.f32.mrf.mxu1 }
 0x667   :  { %v9281_v3 = vpop.f32.mrf.mxu0  ;;  %v12420_v15 = vadd.f32 %v6031_v60, %v5784_v33 }
 0x668   :  { %v5739_v40 = vpop.f32.mrf.mxu1 }
 0x669   :  { %v6036_v28 = vpop.f32.mrf.mxu0  ;;  %v5785_v10 = vadd.f32 %v5739_v40, %v12353_v18 }
 0x66a   :  { %v9213_v46 = vpop.f32.mrf.mxu1 }
 0x66b   :  { %v9284_v32 = vpop.f32.mrf.mxu0  ;;  %v12423_v53 = vadd.f32 %v6036_v28, %v5785_v10 }
 0x66c   :  { %v5744_v47 = vpop.f32.mrf.mxu1  ;;  %v6414_v32 = vld [vmem:[%s12525_s6 + $0x4] sm:$0xf] }
 0x66d   :  { %v6041_v14 = vpop.f32.mrf.mxu0  ;;  %v5786_v27 = vadd.f32 %v5744_v47, %v12359_v38 }
 0x66e   :  { %v9216_v59 = vpop.f32.mrf.mxu1 }
 0x66f   :  { %v9287_v5 = vpop.f32.mrf.mxu0  ;;  %v12426_v31 = vadd.f32 %v6041_v14, %v5786_v27 }
 0x670   :  { %v5749_v49 = vpop.f32.mrf.mxu1 }
 0x671   :  { %v6046_v36 = vpop.f32.mrf.mxu0  ;;  %v5787_v23 = vadd.f32 %v5749_v49, %v12365_v51 }
 0x672   :  { %v9219_v7 = vpop.f32.mrf.mxu1 }
 0x673   :  { %v9290_v22 = vpop.f32.mrf.mxu0  ;;  %v12429_v13 = vadd.f32 %v6046_v36, %v5787_v23 }
 0x674   :  { %v5754_v18 = vpop.f32.mrf.mxu1 }
 0x675   :  { %v6051_v0 = vpop.f32.mrf.mxu0  ;;  %v5788_v17 = vadd.f32 %v5754_v18, %v12369_v55 }
 0x676   :  { %v9222_v37 = vpop.f32.mrf.mxu1 }
 0x677   :  { %v9293_v2 = vpop.f32.mrf.mxu0  ;;  %v12432_v25 = vadd.f32 %v6051_v0, %v5788_v17 }
 0x678   :  { %v5759_v38 = vpop.f32.mrf.mxu1 }
 0x679   :  { %v6056_v62 = vpop.f32.mrf.mxu0  ;;  %v5789_v34 = vadd.f32 %v5759_v38, %v12372_v39  ;;  %v6424_v38 = vld [vmem:[%s12525_s6 + $0xc] sm:$0xf] }
 0x67a   :  { %v9225_v4 = vpop.f32.mrf.mxu1 }
 0x67b   :  { %v9296_v11 = vpop.f32.mrf.mxu0  ;;  %v12435_v57 = vadd.f32 %v6056_v62, %v5789_v34 }
 0x67c   :  { %v5764_v51 = vpop.f32.mrf.mxu1 }
 0x67d   :  { %v6061_v52 = vpop.f32.mrf.mxu0  ;;  %v5790_v20 = vadd.f32 %v5764_v51, %v12375_v44 }
 0x67e   :  { %v9228_v61 = vpop.f32.mrf.mxu1 }
 0x67f   :  { %v9299_v6 = vpop.f32.mrf.mxu0  ;;  %v12438_v19 = vadd.f32 %v6061_v52, %v5790_v20 }
 0x680   :  { %v6248_v55 = vpop.f32.mrf.mxu1 }
 0x681   :  { %v6362_v41 = vadd.f32 %v6248_v55, %v12378_v43 }
 0x682   :  { %v9304_v56 = vpop.f32.mrf.mxu1 }
 0x683   :  { %6385 = vst [vmem:[#allocation3] sm:$0xff] %v6362_v41 }
 0x684   :  { %v6253_v29 = vpop.f32.mrf.mxu1 }
 0x685   :  { %v6363_v39 = vadd.f32 %v6253_v29, %v12381_v58 }
 0x686   :  { %v9307_v50 = vpop.f32.mrf.mxu1 }
 0x687   :  { %6386 = vst [vmem:[#allocation3 + $0x8] sm:$0xff] %v6363_v39 }
 0x688   :  { %v6258_v60 = vpop.f32.mrf.mxu1 }
 0x689   :  { %v6364_v44 = vadd.f32 %v6258_v60, %v12384_v24 }
 0x68a   :  { %v6408_v33 = vld [vmem:[#allocation3] ss:$2 sm:$0xf]  ;;  %v9310_v54 = vpop.f32.mrf.mxu1 }
 0x68b   :  { %v6410_v3 = vadd.f32 %v6409_v26, %v6408_v33  ;;  %6387 = vst [vmem:[#allocation3 + $0x10] sm:$0xff] %v6364_v44  ;;  %v6429_v44 = vld [vmem:[%s12525_s6] sm:$0xf] }
 0x68c   :  { %v6263_v40 = vpop.f32.mrf.mxu1 }
 0x68d   :  { %6411 = vst [vmem:[#allocation6] sm:$0xf] %v6410_v3  ;;  %v6365_v43 = vadd.f32 %v6263_v40, %v12387_v45 }
 0x68e   :  { %v9313_v28 = vpop.f32.mrf.mxu1 }
 0x68f   :  { %6388 = vst [vmem:[#allocation3 + $0x18] sm:$0xff] %v6365_v43 }
 0x690   :  { %v6268_v58 = vpop.f32.mrf.mxu1 }
 0x691   :  { %v6366_v10 = vadd.f32 %v6268_v58, %v12390_v8  ;;  %v6419_v8 = vld [vmem:[%s12525_s6 + $0x8] sm:$0xf] }
 0x692   :  { %v9316_v46 = vpop.f32.mrf.mxu1 }
 0x693   :  { %6389 = vst [vmem:[#allocation3 + $0x20] sm:$0xff] %v6366_v10 }
 0x694   :  { %v6273_v24 = vpop.f32.mrf.mxu1 }
 0x695   :  { %v6367_v47 = vadd.f32 %v6273_v24, %v12393_v48  ;;  %v6434_v24 = vld [vmem:[%s12525_s6 + $0x4] sm:$0xf] }
 0x696   :  { %v6413_v14 = vld [vmem:[#allocation3 + $0x14] ss:$2 sm:$0xf]  ;;  %v9319_v27 = vpop.f32.mrf.mxu1 }
 0x697   :  { %v6415_v59 = vadd.f32 %v6414_v32, %v6413_v14  ;;  %6390 = vst [vmem:[#allocation3 + $0x28] sm:$0xff] %v6367_v47 }
 0x698   :  { %v6278_v5 = vpop.f32.mrf.mxu1 }
 0x699   :  { %6416 = vst [vmem:[#allocation6 + $0x4] sm:$0xf] %v6415_v59  ;;  %v6368_v45 = vadd.f32 %v6278_v5, %v12396_v35  ;;  %v9411_v59 = vld [vmem:[#allocation4] sm:$0xff] }
 0x69a   :  { %v9322_v49 = vpop.f32.mrf.mxu1 }
 0x69b   :  { %6391 = vst [vmem:[#allocation3 + $0x30] sm:$0xff] %v6368_v45 }
 0x69c   :  { %v6283_v36 = vpop.f32.mrf.mxu1 }
 0x69d   :  { %v6369_v23 = vadd.f32 %v6283_v36, %v12399_v9 }
 0x69e   :  { %v6418_v7 = vld [vmem:[#allocation3 + $0x28] ss:$2 sm:$0xf]  ;;  %v9325_v22 = vpop.f32.mrf.mxu1 }
 0x69f   :  { %v6420_v48 = vadd.f32 %v6419_v8, %v6418_v7  ;;  %6392 = vst [vmem:[#allocation3 + $0x38] sm:$0xff] %v6369_v23 }
 0x6a0   :  { %v6288_v18 = vpop.f32.mrf.mxu1 }
 0x6a1   :  { %6421 = vst [vmem:[#allocation6 + $0x8] sm:$0xf] %v6420_v48  ;;  %v6370_v0 = vadd.f32 %v6288_v18, %v12402_v21 }
 0x6a2   :  { %v9328_v17 = vpop.f32.mrf.mxu1 }
 0x6a3   :  { %6393 = vst [vmem:[#allocation3 + $0x40] sm:$0xff] %v6370_v0 }
 0x6a4   :  { %v6293_v35 = vpop.f32.mrf.mxu1 }
 0x6a5   :  { %v6371_v37 = vadd.f32 %v6293_v35, %v12405_v63  ;;  %v12463_v63 = vld [vmem:[#allocation6] sm:$0xff] }
 0x6a6   :  { %v9331_v2 = vpop.f32.mrf.mxu1 }
 0x6a7   :  { %6394 = vst [vmem:[#allocation3 + $0x48] sm:$0xff] %v6371_v37 }
 0x6a8   :  { %v6298_v9 = vpop.f32.mrf.mxu1 }
 0x6aa   :  { %v6423_v62 = vld [vmem:[#allocation3 + $0x3c] ss:$2 sm:$0xf]  ;;  %v9334_v34 = vpop.f32.mrf.mxu1 }
 0x6ab   :  { %v6425_v4 = vadd.f32 %v6424_v38, %v6423_v62  ;;  %v6534_v62 = vld [vmem:[%s12528_s9] sm:$0xff] }
 0x6ac   :  { %v6303_v11 = vpop.f32.mrf.mxu1 }
 0x6ad   :  { %6426 = vst [vmem:[#allocation6 + $0xc] sm:$0xf] %v6425_v4 }
 0x6ae   :  { %v9337_v51 = vpop.f32.mrf.mxu1 }
 0x6b0   :  { %v6308_v52 = vpop.f32.mrf.mxu1 }
 0x6b1   :  { %v6374_v21 = vadd.f32 %v6308_v52, %v12408_v42 }
 0x6b2   :  { %v9340_v20 = vpop.f32.mrf.mxu1 }
 0x6b3   :  { %6397 = vst [vmem:[#allocation3 + $0x60] sm:$0xff] %v6374_v21 }
 0x6b4   :  { %v6313_v61 = vpop.f32.mrf.mxu1  ;;  %v12465_v6 = vld [vmem:[#allocation6 + $0x8] sm:$0xff] }
 0x6b5   :  { %v6375_v55 = vadd.f32 %v6313_v61, %v12411_v12  ;;  %v6449_v41 = vadd.f32 %v12465_v6, %v12463_v63 }
 0x6b6   :  { %v9343_v56 = vpop.f32.mrf.mxu1 }
 0x6b7   :  { %6398 = vst [vmem:[#allocation3 + $0x68] sm:$0xff] %v6375_v55  ;;  %v6450_v29 = vrot.slane %v6449_v41, 4 }
 0x6b8   :  { %v6318_v39 = vpop.f32.mrf.mxu1 }
 0x6b9   :  { %v6376_v50 = vadd.f32 %v6318_v39, %v12414_v1  ;;  %v6451_v26 = vadd.f32 %v6450_v29, %v6449_v41 }
 0x6ba   :  { %v9346_v42 = vpop.f32.mrf.mxu1 }
 0x6bb   :  { %6399 = vst [vmem:[#allocation3 + $0x70] sm:$0xff] %v6376_v50  ;;  %v6452_v60 = vrot.slane %v6451_v26, 2  ;;  %v6535_v50 = vld [vmem:[%s12529_s10] sm:$0x1] }
 0x6bc   :  { %v6323_v33 = vpop.f32.mrf.mxu1 }
 0x6bd   :  { %v6377_v12 = vadd.f32 %v6323_v33, %v12417_v30  ;;  %v6453_v54 = vadd.f32 %v6452_v60, %v6451_v26 }
 0x6be   :  { %v6428_v3 = vld [vmem:[#allocation3 + $0x64] ss:$2 sm:$0xf]  ;;  %v9349_v40 = vpop.f32.mrf.mxu1 }
 0x6bf   :  { %v6430_v43 = vadd.f32 %v6429_v44, %v6428_v3  ;;  %6400 = vst [vmem:[#allocation3 + $0x78] sm:$0xff] %v6377_v12  ;;  %v6454_v28 = vrot.slane %v6453_v54, 1 }
 0x6c0   :  { %v6328_v58 = vpop.f32.mrf.mxu1 }
 0x6c1   :  { %6431 = vst [vmem:[#allocation6 + $0x10] sm:$0xf] %v6430_v43  ;;  %v6378_v1 = vadd.f32 %v6328_v58, %v12420_v15  ;;  %v6455_v10 = vadd.f32 %v6454_v28, %v6453_v54  ;;  %v6616_v28 = vlaneseq }
 0x6c2   :  { %v9352_v46 = vpop.f32.mrf.mxu1 }
 0x6c3   :  { %6401 = vst [vmem:[#allocation3 + $0x80] sm:$0xff] %v6378_v1  ;;  %v6457_v32 = vmul.f32 0.0625, %v6455_v10  ;;  %v6617_v58 = vshrl.u32 %v6616_v28, 7 }
 0x6c4   :  { %v6333_v47 = vpop.f32.mrf.mxu1 }
 0x6c5   :  { %v6379_v30 = vadd.f32 %v6333_v47, %v12423_v53  ;;  %9374 = vmatmul.mubr.msk.f32.vlgmr.msra.gmra.mxu0 %vm1053_vm3, %v6457_v32  ;;  %v6439_v53 = vld [vmem:[%s12525_s6 + $0x8] sm:$0xf]  ;;  %v6618_v1 = vsub.s32 0, %v6617_v58 }
 0x6c6   :  { %v6433_v14 = vld [vmem:[#allocation3 + $0x78] ss:$2 sm:$0xf]  ;;  %v9355_v27 = vpop.f32.mrf.mxu1  ;;  %9378 = vmatprep.mubr.msk.f32.mxu0 %vm9435_vm1, %v9411_v59  ;;  %9377 = vmatpush3.msra.mxu0 %v6534_v62 }
 0x6c7   :  { %v6435_v5 = vadd.f32 %v6434_v24, %v6433_v14  ;;  %6402 = vst [vmem:[#allocation3 + $0x88] sm:$0xff] %v6379_v30  ;;  %9381 = vmatprep.subr.mxu0 %v9411_v59  ;;  %v6711_v30 = vld [vmem:[%s12529_s10] sm:$0x1] }
 0x6c8   :  { %v6338_v15 = vpop.f32.mrf.mxu1 }
 0x6c9   :  { %6436 = vst [vmem:[#allocation6 + $0x14] sm:$0xf] %v6435_v5  ;;  %v6380_v45 = vadd.f32 %v6338_v15, %v12426_v31 }
 0x6ca   :  { %v9358_v49 = vpop.f32.mrf.mxu1 }
 0x6cb   :  { %6403 = vst [vmem:[#allocation3 + $0x90] sm:$0xff] %v6380_v45 }
 0x6cc   :  { %v6343_v8 = vpop.f32.mrf.mxu1 }
 0x6cd   :  { %v6381_v36 = vadd.f32 %v6343_v8, %v12429_v13  ;;  %v6444_v13 = vld [vmem:[%s12525_s6 + $0xc] sm:$0xf] }
 0x6ce   :  { %v9361_v23 = vpop.f32.mrf.mxu1 }
 0x6cf   :  { %6404 = vst [vmem:[#allocation3 + $0x98] sm:$0xff] %v6381_v36 }
 0x6d0   :  { %v6348_v7 = vpop.f32.mrf.mxu1  ;;  %v6624_v34 = vld [vmem:[#allocation6 + $0x10] sm:$0xff] }
 0x6d1   :  { %v6382_v22 = vadd.f32 %v6348_v7, %v12432_v25 }
 0x6d2   :  { %v6438_v48 = vld [vmem:[#allocation3 + $0x8c] ss:$2 sm:$0xf]  ;;  %v9364_v18 = vpop.f32.mrf.mxu1 }
 0x6d3   :  { %v6440_v0 = vadd.f32 %v6439_v53, %v6438_v48  ;;  %6405 = vst [vmem:[#allocation3 + $0xa0] sm:$0xff] %v6382_v22 }
 0x6d4   :  { %v6353_v17 = vpop.f32.mrf.mxu1 }
 0x6d5   :  { %6441 = vst [vmem:[#allocation6 + $0x18] sm:$0xf] %v6440_v0  ;;  %v6383_v31 = vadd.f32 %v6353_v17, %v12435_v57 }
 0x6d6   :  { %v9367_v35 = vpop.f32.mrf.mxu1 }
 0x6d7   :  { %6406 = vst [vmem:[#allocation3 + $0xa8] sm:$0xff] %v6383_v31 }
 0x6d8   :  { %v6358_v37 = vpop.f32.mrf.mxu1 }
 0x6d9   :  { %v6384_v2 = vadd.f32 %v6358_v37, %v12438_v19  ;;  %v6459_v19 = vld [vmem:[%s12527_s8] sm:$0x1] }
 0x6da   :  { %v6443_v38 = vld [vmem:[#allocation3 + $0xa0] ss:$2 sm:$0xf]  ;;  %v9370_v9 = vpop.f32.mrf.mxu1 }
 0x6db   :  { %v6445_v25 = vadd.f32 %v6444_v13, %v6443_v38  ;;  %6407 = vst [vmem:[#allocation3 + $0xb0] sm:$0x3] %v6384_v2 }
 0x6dd   :  { %6446 = vst [vmem:[#allocation6 + $0x1c] sm:$0xf] %v6445_v25 }
 0x6e4   :  { %v6625_v57 = vld [vmem:[#allocation6 + $0x18] sm:$0xff] }
 0x6e5   :  { %v6626_v4 = vadd.f32 %v6625_v57, %v6624_v34 }
 0x6e7   :  { %v6627_v11 = vrot.slane %v6626_v4, 4 }
 0x6e9   :  { %v6628_v51 = vadd.f32 %v6627_v11, %v6626_v4 }
 0x6eb   :  { %v6629_v52 = vrot.slane %v6628_v51, 2 }
 0x6ed   :  { %v6630_v21 = vadd.f32 %v6629_v52, %v6628_v51 }
 0x6ef   :  { %v6631_v20 = vrot.slane %v6630_v21, 1 }
 0x6f1   :  { %v6632_v29 = vadd.f32 %v6631_v20, %v6630_v21 }
 0x6f3   :  { %v6633_v39 = vmul.f32 0.0625, %v6632_v29 }
 0x785   :  { %v6529_v61 = vpop.f32.mrf.mxu0 }
 0x786   :  { %v6530_v55 = vadd.f32 %v6529_v61, %v6459_v19 }
 0x787   :  { %v9375_v41 = vpop.f32.mrf.mxu0 }
 0x788   :  { %v6533_v56 = vmax.f32 %v6530_v55, 0.0 }
 0x78a   :  { %9379 = vmatmul.mubr.msk.f32.vlgmr.msra.gmra.mxu0 %vm1053_vm3, %v6533_v56 }
 0x78b   :  { %9382 = vmatpush3.msra.mxu0 %v12303_v16  ;;  %9383 = vmatprep.mubr.msk.f32.mxu0 %vm9435_vm1, %v9411_v59  ;;  %v6635_v16 = vld [vmem:[%s12527_s8] sm:$0x1] }
 0x78c   :  { %9386 = vmatprep.subr.mxu0 %v9411_v59 }
 0x78e   :  { %9384 = vmatmul.mubr.msk.f32.vlgmr.msra.gmra.mxu0 %vm1053_vm3, %v6633_v39 }
 0x78f   :  { %9387 = vmatpush3.msra.mxu0 %v6534_v62  ;;  %9388 = vmatprep.mubr.msk.f32.mxu0 %vm9435_vm1, %v9411_v59 }
 0x84a   :  { %v6605_v26 = vpop.f32.mrf.mxu0 }
 0x84b   :  { %v6606_v42 = vadd.f32 %v6605_v26, %v6535_v50 }
 0x84c   :  { %v9380_v60 = vpop.f32.mrf.mxu0 }
 0x84d   :  { %v7326_v44 = vmul.f32 -1.442695, %v6606_v42 }
 0x84e   :  { %v6705_v33 = vpop.f32.mrf.mxu0 }
 0x84f   :  { %9398 = vpow2.f32 %v7326_v44  ;;  %v6706_v12 = vadd.f32 %v6705_v33, %v6635_v16 }
 0x850   :  { %v9385_v54 = vpop.f32.mrf.mxu0 }
 0x851   :  { %v6709_v3 = vmax.f32 %v6706_v12, 0.0 }
 0x853   :  { %9389 = vmatmul.mubr.msk.f32.vlgmr.msra.gmra.mxu0 %vm1053_vm3, %v6709_v3 }
 0x85c   :  { %v9399_v40 = vpop.eup %9398 }
 0x85d   :  { %v6612_v43 = vadd.f32 1.0, %v9399_v40 }
 0x85f   :  { %9400 = vrcp.f32 %v6612_v43 }
 0x86c   :  { %v9401_v10 = vpop.eup %9400 }
 0x86d   :  { %v6615_v46 = vadd.f32 1.0, %v9401_v10 }
 0x86f   :  { %v6619_v32 = vrot.slane %v6615_v46, %v6618_v1 }
 0x871   :  { %v6620_v24 = vmul.f32 %v6619_v32, %v12463_v63  ;;  %v6621_v47 = vmul.f32 %v6619_v32, %v12465_v6 }
 0x873   :  { %6622 = vst [vmem:[#allocation6] sm:$0xff] %v6620_v24  ;;  %6623 = vst [vmem:[#allocation6 + $0x8] sm:$0xff] %v6621_v47 }
 0x913   :  { %v6781_v14 = vpop.f32.mrf.mxu0 }
 0x914   :  { %v6782_v27 = vadd.f32 %v6781_v14, %v6711_v30 }
 0x915   :  { %v9390_v59 = vpop.f32.mrf.mxu0 }
 0x916   :  { %v7329_v5 = vmul.f32 -1.442695, %v6782_v27 }
 0x918   :  { %9402 = vpow2.f32 %v7329_v5 }
 0x925   :  { %v9403_v15 = vpop.eup %9402 }
 0x926   :  { %v6788_v45 = vadd.f32 1.0, %v9403_v15 }
 0x928   :  { %9404 = vrcp.f32 %v6788_v45 }
 0x935   :  { %v9405_v49 = vpop.eup %9404 }
 0x936   :  { %v6791_v8 = vadd.f32 1.0, %v9405_v49 }
 0x938   :  { %v6795_v63 = vrot.slane %v6791_v8, %v6618_v1 }
 0x93a   :  { %v6796_v6 = vmul.f32 %v6795_v63, %v6624_v34  ;;  %v6797_v36 = vmul.f32 %v6795_v63, %v6625_v57 }
 0x93c   :  { %6798 = vst [vmem:[#allocation6 + $0x10] sm:$0xff] %v6796_v6  ;;  %6799 = vst [vmem:[#allocation6 + $0x18] sm:$0xff] %v6797_v36 }
 0x93d   :  { %9423 = shalt.err (!%p9420_p4)
}
 0x93e   :  { %s9437_s10 = smov 128   ;;  %s9438_s7 = smov 8  }
 0x93f   :  { %6811 = dma.vmem_to_hbm [thread:$0]  %s6806_s3, 512, %s12530_s11, [#allocation7], %s9437_s10, %s9437_s10, %s9438_s7  }
 0x940   :  { %9432 = dma.done.wait [#allocation7], 512  }
 0x941   :  { %9433 = vsyncadd [#allocation7], 4294966784 }
 0x942   :  { %6815 = vsyncpa [#allocation7], 1 }

</bundles_post_ra>
